<compile_context>
chip_gen: v7x
topology: tpu7x:2x2x1
jax: 0.10.0
libtpu: 0.0.40
codegen_flags: <defaults>
</compile_context>

<pallas_src>
import functools

import numpy as np
import jax
import jax.numpy as jnp
from jax.experimental import pallas as pl
from jax.experimental.pallas import tpu as pltpu

FM = 64          # fm in the PyTorch script
D_IN = 600       # d in Net.__init__
EPS = 1e-5       # BatchNorm2d default eps

# Non-zero taps of the 3x3 causal masks (kernel row, kernel col).
TAPS = {
    "A": ((0, 0), (0, 1), (0, 2), (1, 0)),
    "B": ((0, 0), (0, 1), (0, 2), (1, 0), (1, 1)),
}


# ----------------------------------------------------------------------------
# Fused Pallas kernel: conv1..conv4 (masked 3x3 + folded BN + ReLU) + conv9 1x1
# ----------------------------------------------------------------------------
def _fused_net_kernel(xpad_ref, w1_ref, t1_ref, w2_ref, t2_ref, w3_ref, t3_ref,
                      w4_ref, t4_ref, w9_ref, b9_ref, o_ref, apad_ref,
                      *, B, H, W):
    """Whole batch in one invocation.  All intermediates stay in VMEM.

    xpad_ref: (B, H+1, W+2, D_IN) bf16  pre-padded conv1 input (halo already 0)
    wN_ref:   (n_taps*Cin, FM)    bf16  masked-conv weights, BN scale folded in,
                                        taps flattened into K (im2col layout)
    tN_ref:   (1, FM)             f32   folded BN shift (acts as bias)
    w9_ref:   (FM, n_class) bf16;       b9_ref: (1, n_class) f32
    o_ref:    (B*H*W, n_class)    f32   output (lane-friendly 2-D block)
    apad_ref: (B, H+1, W+2, FM)   bf16  zero-padded activation scratch (conv2-4)
    """
    M = B * H * W

    def masked_layer(src_ref, w_ref, t_ref, taps):
        cin = src_ref.shape[-1]
        # im2col over the non-zero taps -> single wide-K bf16 MXU matmul.
        cols = [src_ref[:, dy:dy + H, dx:dx + W, :].reshape(M, cin)
                for (dy, dx) in taps]
        patch = jnp.concatenate(cols, axis=-1)           # (M, n_taps*cin) bf16
        acc = jnp.dot(patch, w_ref[...], preferred_element_type=jnp.float32)
        # folded eval-mode BatchNorm shift + ReLU (kept in f32)
        return jnp.maximum(acc + t_ref[...], 0.0)        # (M, FM) f32

    # Zero the small bf16 activation pad scratch once (~23 KB here); the halo
    # border stays zero afterwards, only the interior is rewritten per layer.
    # (The big 600-channel conv1 pad arrives pre-zeroed from the wrapper.)
    apad_ref[...] = jnp.zeros_like(apad_ref)

    # --- conv1: mask 'A', 600 -> 64 ------------------------------------------
    act = masked_layer(xpad_ref, w1_ref, t1_ref, TAPS["A"])

    # --- conv2..conv4: mask 'B', 64 -> 64 (activations never leave VMEM) -----
    # NOTE: the padded-scratch round trip could be replaced by pltpu.roll-based
    #       shifts on an aligned (M, FM) tile; kept simple here.
    for w_ref, t_ref in ((w2_ref, t2_ref), (w3_ref, t3_ref), (w4_ref, t4_ref)):
        apad_ref[:, 1:H + 1, 1:W + 1, :] = (
            act.reshape(B, H, W, FM).astype(jnp.bfloat16))
        act = masked_layer(apad_ref, w_ref, t_ref, TAPS["B"])

    # --- conv9: 1x1 conv with bias == per-pixel matmul over channels ---------
    o_ref[...] = (jnp.dot(act.astype(jnp.bfloat16), w9_ref[...],
                          preferred_element_type=jnp.float32) + b9_ref[...])


# ----------------------------------------------------------------------------
# Pallas wrapper
# ----------------------------------------------------------------------------
def net_forward_pallas(params, x_nchw):
    # NCHW -> NHWC, cast to bf16 once, and zero-pad the conv1 halo (top row,
    # left/right cols; the causal masks never read a bottom pad row).  These
    # fuse into a single XLA layout op; the kernel then reads a pre-padded
    # VMEM block directly -- no in-kernel relayout copy or big-scratch zeroing.
    x = jnp.transpose(x_nchw, (0, 2, 3, 1)).astype(jnp.bfloat16)
    B, H, W, Cin = x.shape
    xpad = jnp.pad(x, ((0, 0), (1, 0), (1, 1), (0, 0)))      # (B, H+1, W+2, Cin)
    n_class = params["w9"].shape[-1]
    kernel = functools.partial(_fused_net_kernel, B=B, H=H, W=W)

    vmem = pl.BlockSpec(memory_space=pltpu.MemorySpace.VMEM)
    out = pl.pallas_call(
        kernel,
        out_shape=jax.ShapeDtypeStruct((B * H * W, n_class), jnp.float32),
        in_specs=[vmem] * 11,
        out_specs=vmem,
        scratch_shapes=[
            pltpu.VMEM((B, H + 1, W + 2, FM), jnp.bfloat16),  # conv2-4 pad buf
        ],
    )(xpad, params["w1"], params["t1"], params["w2"], params["t2"],
      params["w3"], params["t3"], params["w4"], params["t4"],
      params["w9"], params["b9"])

    out = out.reshape(B, H, W, n_class)
    return jnp.transpose(out, (0, 3, 1, 2))                   # NHWC -> NCHW


# ----------------------------------------------------------------------------
# Parameter construction (deterministic, synthetic; BN folded into weights)
# ----------------------------------------------------------------------------
def _make_bn_fold(key, c):
    k1, k2, k3, k4 = jax.random.split(key, 4)
    gamma = 1.0 + 0.1 * jax.random.normal(k1, (c,), jnp.float32)
    beta = 0.1 * jax.random.normal(k2, (c,), jnp.float32)
    mean = 0.1 * jax.random.normal(k3, (c,), jnp.float32)
    var = 1.0 + 0.1 * jax.random.uniform(k4, (c,), jnp.float32)
    scale = gamma / jnp.sqrt(var + EPS)
    shift = beta - mean * scale
    return scale, shift


def init_params(key, n_class):
    keys = jax.random.split(key, 10)
    params = {}
    layer_cfg = (("1", D_IN, "A"), ("2", FM, "B"), ("3", FM, "B"), ("4", FM, "B"))
    for i, (name, cin, mtype) in enumerate(layer_cfg):
        n_taps = len(TAPS[mtype])
        # Only the non-zero (unmasked) taps are generated / stored.
        w = jax.random.normal(keys[2 * i], (n_taps, cin, FM), jnp.float32)
        w = w * (1.0 / np.sqrt(9.0 * cin))
        scale, shift = _make_bn_fold(keys[2 * i + 1], FM)
        # Fold eval-mode BatchNorm (y = conv(x)*scale + shift) and flatten the
        # taps into the matmul K dimension: (n_taps*cin, FM), tap-major.
        w = (w * scale[None, None, :]).reshape(n_taps * cin, FM)
        params["w" + name] = w.astype(jnp.bfloat16)
        params["t" + name] = shift.reshape(1, FM)             # stays f32
    params["w9"] = (jax.random.normal(keys[8], (FM, n_class), jnp.float32)
                    / np.sqrt(FM)).astype(jnp.bfloat16)
    params["b9"] = 0.1 * jax.random.normal(keys[9], (1, n_class), jnp.float32)
    return params


# ----------------------------------------------------------------------------
# Pure-JAX reference of the same fused math (for a loose sanity check)
# ----------------------------------------------------------------------------
def net_forward_reference(params, x_nchw):
    x = jnp.transpose(x_nchw, (0, 2, 3, 1))
    x = x.astype(jnp.bfloat16).astype(jnp.float32)   # mirror kernel's input cast

    def layer(x, w_flat, shift, taps):
        B, H, W, C = x.shape
        w = w_flat.astype(jnp.float32).reshape(len(taps), C, -1)
        xp = jnp.pad(x, ((0, 0), (1, 1), (1, 1), (0, 0)))
        acc = 0.0
        for t, (dy, dx) in enumerate(taps):
            acc = acc + jnp.einsum("bhwc,co->bhwo",
                                   xp[:, dy:dy + H, dx:dx + W, :], w[t])
        return jax.nn.relu(acc + shift.reshape(1, 1, 1, -1))

    x = layer(x, params["w1"], params["t1"], TAPS["A"])
    x = layer(x, params["w2"], params["t2"], TAPS["B"])
    x = layer(x, params["w3"], params["t3"], TAPS["B"])
    x = layer(x, params["w4"], params["t4"], TAPS["B"])
    x = (jnp.einsum("bhwc,co->bhwo", x, params["w9"].astype(jnp.float32))
         + params["b9"].reshape(1, 1, 1, -1))
    return jnp.transpose(x, (0, 3, 1, 2))


if __name__ == "__main__":
    B, H, W = 2, 8, 8
    n_class = 16

    key = jax.random.PRNGKey(0)
    k_params, k_x = jax.random.split(key)
    params = init_params(k_params, n_class)
    x = jax.random.normal(k_x, (B, D_IN, H, W), jnp.float32)   # PyTorch NCHW input

    fwd = jax.jit(net_forward_pallas)
    out = jax.block_until_ready(fwd(params, x))

    assert out.shape == (B, n_class, H, W), out.shape
    assert bool(jnp.all(jnp.isfinite(out)))

    # Loose agreement with a pure-JAX reference (kernel uses bf16 MXU operands
    # and bf16 inter-layer activations with f32 accumulation, so only coarse
    # agreement is expected).
    ref = net_forward_reference(params, x)
    max_err = float(jnp.max(jnp.abs(out - ref)))
    assert max_err < 0.3, max_err

    print("KERNEL_OK")
</pallas_src>

<mosaic_0001>
module attributes {stable_mosaic.version = 11 : i64} {
  func.func @_fused_net_kernel(%arg0: memref<2x9x10x600xbf16, #tpu.memory_space<vmem>>, %arg1: memref<2400x64xbf16, #tpu.memory_space<vmem>>, %arg2: memref<1x64xf32, #tpu.memory_space<vmem>>, %arg3: memref<320x64xbf16, #tpu.memory_space<vmem>>, %arg4: memref<1x64xf32, #tpu.memory_space<vmem>>, %arg5: memref<320x64xbf16, #tpu.memory_space<vmem>>, %arg6: memref<1x64xf32, #tpu.memory_space<vmem>>, %arg7: memref<320x64xbf16, #tpu.memory_space<vmem>>, %arg8: memref<1x64xf32, #tpu.memory_space<vmem>>, %arg9: memref<64x16xbf16, #tpu.memory_space<vmem>>, %arg10: memref<1x16xf32, #tpu.memory_space<vmem>>, %arg11: memref<128x16xf32, #tpu.memory_space<vmem>>, %arg12: memref<2x9x10x64xbf16, #tpu.memory_space<vmem>>) attributes {dimension_semantics = [], scalar_prefetch = 0 : i64, scratch_operands = 1 : i64, tpu.core_type = #tpu.core_type<tc>} {
    %cst = arith.constant 0.000000e+00 : bf16
    %0 = vector.broadcast %cst : bf16 to vector<2x9x10x64xbf16>
    %c0 = arith.constant 0 : index
    %c0_0 = arith.constant 0 : index
    %c0_1 = arith.constant 0 : index
    %c0_2 = arith.constant 0 : index
    %1 = vector.load %arg12[%c0, %c0_0, %c0_1, %c0_2] : memref<2x9x10x64xbf16, #tpu.memory_space<vmem>>, vector<2x9x10x64xbf16>
    tpu.vector_store %arg12[%c0, %c0_0, %c0_1, %c0_2], %0 {strides = array<i32>} : memref<2x9x10x64xbf16, #tpu.memory_space<vmem>>, vector<2x9x10x64xbf16>,
    %c0_3 = arith.constant 0 : index
    %c0_4 = arith.constant 0 : index
    %c0_5 = arith.constant 0 : index
    %c0_6 = arith.constant 0 : index
    %2 = vector.load %arg0[%c0_3, %c0_4, %c0_5, %c0_6] : memref<2x9x10x600xbf16, #tpu.memory_space<vmem>>, vector<2x8x8x600xbf16>
    %3 = vector.shape_cast %2 : vector<2x8x8x600xbf16> to vector<128x600xbf16>
    %c0_7 = arith.constant 0 : index
    %c0_8 = arith.constant 0 : index
    %c1 = arith.constant 1 : index
    %c0_9 = arith.constant 0 : index
    %4 = vector.load %arg0[%c0_7, %c0_8, %c1, %c0_9] : memref<2x9x10x600xbf16, #tpu.memory_space<vmem>>, vector<2x8x8x600xbf16>
    %5 = vector.shape_cast %4 : vector<2x8x8x600xbf16> to vector<128x600xbf16>
    %c0_10 = arith.constant 0 : index
    %c0_11 = arith.constant 0 : index
    %c2 = arith.constant 2 : index
    %c0_12 = arith.constant 0 : index
    %6 = vector.load %arg0[%c0_10, %c0_11, %c2, %c0_12] : memref<2x9x10x600xbf16, #tpu.memory_space<vmem>>, vector<2x8x8x600xbf16>
    %7 = vector.shape_cast %6 : vector<2x8x8x600xbf16> to vector<128x600xbf16>
    %c0_13 = arith.constant 0 : index
    %c1_14 = arith.constant 1 : index
    %c0_15 = arith.constant 0 : index
    %c0_16 = arith.constant 0 : index
    %8 = vector.load %arg0[%c0_13, %c1_14, %c0_15, %c0_16] : memref<2x9x10x600xbf16, #tpu.memory_space<vmem>>, vector<2x8x8x600xbf16>
    %9 = vector.shape_cast %8 : vector<2x8x8x600xbf16> to vector<128x600xbf16>
    %10 = tpu.concatenate %3, %5, %7, %9 in 1 : vector<128x600xbf16>, vector<128x600xbf16>, vector<128x600xbf16>, vector<128x600xbf16> -> vector<128x2400xbf16>
    %c0_17 = arith.constant 0 : index
    %c0_18 = arith.constant 0 : index
    %11 = vector.load %arg1[%c0_17, %c0_18] : memref<2400x64xbf16, #tpu.memory_space<vmem>>, vector<2400x64xbf16>
    %cst_19 = arith.constant dense<0.000000e+00> : vector<128x64xf32>
    %12 = tpu.matmul %10, %11, %cst_19 {dimension_numbers = #tpu.dot_dimension_numbers<[1], [0], [0], [1], [0, 0, 1, 1], [], []>} : vector<128x2400xbf16>, vector<2400x64xbf16>, vector<128x64xf32> -> vector<128x64xf32>
    %c0_20 = arith.constant 0 : index
    %c0_21 = arith.constant 0 : index
    %13 = vector.load %arg2[%c0_20, %c0_21] : memref<1x64xf32, #tpu.memory_space<vmem>>, vector<1x64xf32>
    %14 = vector.broadcast %13 : vector<1x64xf32> to vector<128x64xf32>
    %15 = arith.addf %12, %14 : vector<128x64xf32>
    %cst_22 = arith.constant 0.000000e+00 : f32
    %16 = vector.broadcast %cst_22 : f32 to vector<128x64xf32>
    %17 = arith.maximumf %15, %16 : vector<128x64xf32>
    %18 = vector.shape_cast %17 : vector<128x64xf32> to vector<2x8x8x64xf32>
    %19 = arith.truncf %18 : vector<2x8x8x64xf32> to vector<2x8x8x64xbf16>
    %c0_23 = arith.constant 0 : index
    %c1_24 = arith.constant 1 : index
    %c1_25 = arith.constant 1 : index
    %c0_26 = arith.constant 0 : index
    %20 = vector.load %arg12[%c0_23, %c1_24, %c1_25, %c0_26] : memref<2x9x10x64xbf16, #tpu.memory_space<vmem>>, vector<2x8x8x64xbf16>
    tpu.vector_store %arg12[%c0_23, %c1_24, %c1_25, %c0_26], %19 {strides = array<i32>} : memref<2x9x10x64xbf16, #tpu.memory_space<vmem>>, vector<2x8x8x64xbf16>,
    %c0_27 = arith.constant 0 : index
    %c0_28 = arith.constant 0 : index
    %c0_29 = arith.constant 0 : index
    %c0_30 = arith.constant 0 : index
    %21 = vector.load %arg12[%c0_27, %c0_28, %c0_29, %c0_30] : memref<2x9x10x64xbf16, #tpu.memory_space<vmem>>, vector<2x8x8x64xbf16>
    %22 = vector.shape_cast %21 : vector<2x8x8x64xbf16> to vector<128x64xbf16>
    %c0_31 = arith.constant 0 : index
    %c0_32 = arith.constant 0 : index
    %c1_33 = arith.constant 1 : index
    %c0_34 = arith.constant 0 : index
    %23 = vector.load %arg12[%c0_31, %c0_32, %c1_33, %c0_34] : memref<2x9x10x64xbf16, #tpu.memory_space<vmem>>, vector<2x8x8x64xbf16>
    %24 = vector.shape_cast %23 : vector<2x8x8x64xbf16> to vector<128x64xbf16>
    %c0_35 = arith.constant 0 : index
    %c0_36 = arith.constant 0 : index
    %c2_37 = arith.constant 2 : index
    %c0_38 = arith.constant 0 : index
    %25 = vector.load %arg12[%c0_35, %c0_36, %c2_37, %c0_38] : memref<2x9x10x64xbf16, #tpu.memory_space<vmem>>, vector<2x8x8x64xbf16>
    %26 = vector.shape_cast %25 : vector<2x8x8x64xbf16> to vector<128x64xbf16>
    %c0_39 = arith.constant 0 : index
    %c1_40 = arith.constant 1 : index
    %c0_41 = arith.constant 0 : index
    %c0_42 = arith.constant 0 : index
    %27 = vector.load %arg12[%c0_39, %c1_40, %c0_41, %c0_42] : memref<2x9x10x64xbf16, #tpu.memory_space<vmem>>, vector<2x8x8x64xbf16>
    %28 = vector.shape_cast %27 : vector<2x8x8x64xbf16> to vector<128x64xbf16>
    %c0_43 = arith.constant 0 : index
    %c1_44 = arith.constant 1 : index
    %c1_45 = arith.constant 1 : index
    %c0_46 = arith.constant 0 : index
    %29 = vector.load %arg12[%c0_43, %c1_44, %c1_45, %c0_46] : memref<2x9x10x64xbf16, #tpu.memory_space<vmem>>, vector<2x8x8x64xbf16>
    %30 = vector.shape_cast %29 : vector<2x8x8x64xbf16> to vector<128x64xbf16>
    %31 = tpu.concatenate %22, %24, %26, %28, %30 in 1 : vector<128x64xbf16>, vector<128x64xbf16>, vector<128x64xbf16>, vector<128x64xbf16>, vector<128x64xbf16> -> vector<128x320xbf16>
    %c0_47 = arith.constant 0 : index
    %c0_48 = arith.constant 0 : index
    %32 = vector.load %arg3[%c0_47, %c0_48] : memref<320x64xbf16, #tpu.memory_space<vmem>>, vector<320x64xbf16>
    %cst_49 = arith.constant dense<0.000000e+00> : vector<128x64xf32>
    %33 = tpu.matmul %31, %32, %cst_49 {dimension_numbers = #tpu.dot_dimension_numbers<[1], [0], [0], [1], [0, 0, 1, 1], [], []>} : vector<128x320xbf16>, vector<320x64xbf16>, vector<128x64xf32> -> vector<128x64xf32>
    %c0_50 = arith.constant 0 : index
    %c0_51 = arith.constant 0 : index
    %34 = vector.load %arg4[%c0_50, %c0_51] : memref<1x64xf32, #tpu.memory_space<vmem>>, vector<1x64xf32>
    %35 = vector.broadcast %34 : vector<1x64xf32> to vector<128x64xf32>
    %36 = arith.addf %33, %35 : vector<128x64xf32>
    %cst_52 = arith.constant 0.000000e+00 : f32
    %37 = vector.broadcast %cst_52 : f32 to vector<128x64xf32>
    %38 = arith.maximumf %36, %37 : vector<128x64xf32>
    %39 = vector.shape_cast %38 : vector<128x64xf32> to vector<2x8x8x64xf32>
    %40 = arith.truncf %39 : vector<2x8x8x64xf32> to vector<2x8x8x64xbf16>
    %c0_53 = arith.constant 0 : index
    %c1_54 = arith.constant 1 : index
    %c1_55 = arith.constant 1 : index
    %c0_56 = arith.constant 0 : index
    %41 = vector.load %arg12[%c0_53, %c1_54, %c1_55, %c0_56] : memref<2x9x10x64xbf16, #tpu.memory_space<vmem>>, vector<2x8x8x64xbf16>
    tpu.vector_store %arg12[%c0_53, %c1_54, %c1_55, %c0_56], %40 {strides = array<i32>} : memref<2x9x10x64xbf16, #tpu.memory_space<vmem>>, vector<2x8x8x64xbf16>,
    %c0_57 = arith.constant 0 : index
    %c0_58 = arith.constant 0 : index
    %c0_59 = arith.constant 0 : index
    %c0_60 = arith.constant 0 : index
    %42 = vector.load %arg12[%c0_57, %c0_58, %c0_59, %c0_60] : memref<2x9x10x64xbf16, #tpu.memory_space<vmem>>, vector<2x8x8x64xbf16>
    %43 = vector.shape_cast %42 : vector<2x8x8x64xbf16> to vector<128x64xbf16>
    %c0_61 = arith.constant 0 : index
    %c0_62 = arith.constant 0 : index
    %c1_63 = arith.constant 1 : index
    %c0_64 = arith.constant 0 : index
    %44 = vector.load %arg12[%c0_61, %c0_62, %c1_63, %c0_64] : memref<2x9x10x64xbf16, #tpu.memory_space<vmem>>, vector<2x8x8x64xbf16>
    %45 = vector.shape_cast %44 : vector<2x8x8x64xbf16> to vector<128x64xbf16>
    %c0_65 = arith.constant 0 : index
    %c0_66 = arith.constant 0 : index
    %c2_67 = arith.constant 2 : index
    %c0_68 = arith.constant 0 : index
    %46 = vector.load %arg12[%c0_65, %c0_66, %c2_67, %c0_68] : memref<2x9x10x64xbf16, #tpu.memory_space<vmem>>, vector<2x8x8x64xbf16>
    %47 = vector.shape_cast %46 : vector<2x8x8x64xbf16> to vector<128x64xbf16>
    %c0_69 = arith.constant 0 : index
    %c1_70 = arith.constant 1 : index
    %c0_71 = arith.constant 0 : index
    %c0_72 = arith.constant 0 : index
    %48 = vector.load %arg12[%c0_69, %c1_70, %c0_71, %c0_72] : memref<2x9x10x64xbf16, #tpu.memory_space<vmem>>, vector<2x8x8x64xbf16>
    %49 = vector.shape_cast %48 : vector<2x8x8x64xbf16> to vector<128x64xbf16>
    %c0_73 = arith.constant 0 : index
    %c1_74 = arith.constant 1 : index
    %c1_75 = arith.constant 1 : index
    %c0_76 = arith.constant 0 : index
    %50 = vector.load %arg12[%c0_73, %c1_74, %c1_75, %c0_76] : memref<2x9x10x64xbf16, #tpu.memory_space<vmem>>, vector<2x8x8x64xbf16>
    %51 = vector.shape_cast %50 : vector<2x8x8x64xbf16> to vector<128x64xbf16>
    %52 = tpu.concatenate %43, %45, %47, %49, %51 in 1 : vector<128x64xbf16>, vector<128x64xbf16>, vector<128x64xbf16>, vector<128x64xbf16>, vector<128x64xbf16> -> vector<128x320xbf16>
    %c0_77 = arith.constant 0 : index
    %c0_78 = arith.constant 0 : index
    %53 = vector.load %arg5[%c0_77, %c0_78] : memref<320x64xbf16, #tpu.memory_space<vmem>>, vector<320x64xbf16>
    %cst_79 = arith.constant dense<0.000000e+00> : vector<128x64xf32>
    %54 = tpu.matmul %52, %53, %cst_79 {dimension_numbers = #tpu.dot_dimension_numbers<[1], [0], [0], [1], [0, 0, 1, 1], [], []>} : vector<128x320xbf16>, vector<320x64xbf16>, vector<128x64xf32> -> vector<128x64xf32>
    %c0_80 = arith.constant 0 : index
    %c0_81 = arith.constant 0 : index
    %55 = vector.load %arg6[%c0_80, %c0_81] : memref<1x64xf32, #tpu.memory_space<vmem>>, vector<1x64xf32>
    %56 = vector.broadcast %55 : vector<1x64xf32> to vector<128x64xf32>
    %57 = arith.addf %54, %56 : vector<128x64xf32>
    %cst_82 = arith.constant 0.000000e+00 : f32
    %58 = vector.broadcast %cst_82 : f32 to vector<128x64xf32>
    %59 = arith.maximumf %57, %58 : vector<128x64xf32>
    %60 = vector.shape_cast %59 : vector<128x64xf32> to vector<2x8x8x64xf32>
    %61 = arith.truncf %60 : vector<2x8x8x64xf32> to vector<2x8x8x64xbf16>
    %c0_83 = arith.constant 0 : index
    %c1_84 = arith.constant 1 : index
    %c1_85 = arith.constant 1 : index
    %c0_86 = arith.constant 0 : index
    %62 = vector.load %arg12[%c0_83, %c1_84, %c1_85, %c0_86] : memref<2x9x10x64xbf16, #tpu.memory_space<vmem>>, vector<2x8x8x64xbf16>
    tpu.vector_store %arg12[%c0_83, %c1_84, %c1_85, %c0_86], %61 {strides = array<i32>} : memref<2x9x10x64xbf16, #tpu.memory_space<vmem>>, vector<2x8x8x64xbf16>,
    %c0_87 = arith.constant 0 : index
    %c0_88 = arith.constant 0 : index
    %c0_89 = arith.constant 0 : index
    %c0_90 = arith.constant 0 : index
    %63 = vector.load %arg12[%c0_87, %c0_88, %c0_89, %c0_90] : memref<2x9x10x64xbf16, #tpu.memory_space<vmem>>, vector<2x8x8x64xbf16>
    %64 = vector.shape_cast %63 : vector<2x8x8x64xbf16> to vector<128x64xbf16>
    %c0_91 = arith.constant 0 : index
    %c0_92 = arith.constant 0 : index
    %c1_93 = arith.constant 1 : index
    %c0_94 = arith.constant 0 : index
    %65 = vector.load %arg12[%c0_91, %c0_92, %c1_93, %c0_94] : memref<2x9x10x64xbf16, #tpu.memory_space<vmem>>, vector<2x8x8x64xbf16>
    %66 = vector.shape_cast %65 : vector<2x8x8x64xbf16> to vector<128x64xbf16>
    %c0_95 = arith.constant 0 : index
    %c0_96 = arith.constant 0 : index
    %c2_97 = arith.constant 2 : index
    %c0_98 = arith.constant 0 : index
    %67 = vector.load %arg12[%c0_95, %c0_96, %c2_97, %c0_98] : memref<2x9x10x64xbf16, #tpu.memory_space<vmem>>, vector<2x8x8x64xbf16>
    %68 = vector.shape_cast %67 : vector<2x8x8x64xbf16> to vector<128x64xbf16>
    %c0_99 = arith.constant 0 : index
    %c1_100 = arith.constant 1 : index
    %c0_101 = arith.constant 0 : index
    %c0_102 = arith.constant 0 : index
    %69 = vector.load %arg12[%c0_99, %c1_100, %c0_101, %c0_102] : memref<2x9x10x64xbf16, #tpu.memory_space<vmem>>, vector<2x8x8x64xbf16>
    %70 = vector.shape_cast %69 : vector<2x8x8x64xbf16> to vector<128x64xbf16>
    %c0_103 = arith.constant 0 : index
    %c1_104 = arith.constant 1 : index
    %c1_105 = arith.constant 1 : index
    %c0_106 = arith.constant 0 : index
    %71 = vector.load %arg12[%c0_103, %c1_104, %c1_105, %c0_106] : memref<2x9x10x64xbf16, #tpu.memory_space<vmem>>, vector<2x8x8x64xbf16>
    %72 = vector.shape_cast %71 : vector<2x8x8x64xbf16> to vector<128x64xbf16>
    %73 = tpu.concatenate %64, %66, %68, %70, %72 in 1 : vector<128x64xbf16>, vector<128x64xbf16>, vector<128x64xbf16>, vector<128x64xbf16>, vector<128x64xbf16> -> vector<128x320xbf16>
    %c0_107 = arith.constant 0 : index
    %c0_108 = arith.constant 0 : index
    %74 = vector.load %arg7[%c0_107, %c0_108] : memref<320x64xbf16, #tpu.memory_space<vmem>>, vector<320x64xbf16>
    %cst_109 = arith.constant dense<0.000000e+00> : vector<128x64xf32>
    %75 = tpu.matmul %73, %74, %cst_109 {dimension_numbers = #tpu.dot_dimension_numbers<[1], [0], [0], [1], [0, 0, 1, 1], [], []>} : vector<128x320xbf16>, vector<320x64xbf16>, vector<128x64xf32> -> vector<128x64xf32>
    %c0_110 = arith.constant 0 : index
    %c0_111 = arith.constant 0 : index
    %76 = vector.load %arg8[%c0_110, %c0_111] : memref<1x64xf32, #tpu.memory_space<vmem>>, vector<1x64xf32>
    %77 = vector.broadcast %76 : vector<1x64xf32> to vector<128x64xf32>
    %78 = arith.addf %75, %77 : vector<128x64xf32>
    %cst_112 = arith.constant 0.000000e+00 : f32
    %79 = vector.broadcast %cst_112 : f32 to vector<128x64xf32>
    %80 = arith.maximumf %78, %79 : vector<128x64xf32>
    %81 = arith.truncf %80 : vector<128x64xf32> to vector<128x64xbf16>
    %c0_113 = arith.constant 0 : index
    %c0_114 = arith.constant 0 : index
    %82 = vector.load %arg9[%c0_113, %c0_114] : memref<64x16xbf16, #tpu.memory_space<vmem>>, vector<64x16xbf16>
    %cst_115 = arith.constant dense<0.000000e+00> : vector<128x16xf32>
    %83 = tpu.matmul %81, %82, %cst_115 {dimension_numbers = #tpu.dot_dimension_numbers<[1], [0], [0], [1], [0, 0, 1, 1], [], []>} : vector<128x64xbf16>, vector<64x16xbf16>, vector<128x16xf32> -> vector<128x16xf32>
    %c0_116 = arith.constant 0 : index
    %c0_117 = arith.constant 0 : index
    %84 = vector.load %arg10[%c0_116, %c0_117] : memref<1x16xf32, #tpu.memory_space<vmem>>, vector<1x16xf32>
    %85 = vector.broadcast %84 : vector<1x16xf32> to vector<128x16xf32>
    %86 = arith.addf %83, %85 : vector<128x16xf32>
    %c0_118 = arith.constant 0 : index
    %c0_119 = arith.constant 0 : index
    %87 = vector.load %arg11[%c0_118, %c0_119] : memref<128x16xf32, #tpu.memory_space<vmem>>, vector<128x16xf32>
    tpu.vector_store %arg11[%c0_118, %c0_119], %86 {strides = array<i32>} : memref<128x16xf32, #tpu.memory_space<vmem>>, vector<128x16xf32>,
    return
  }
}

</mosaic_0001>

<bundles_post_ra>
// kernel: net_forward_pallas.1
= control target key start
LH: loop header
LB: loop body
LE: loop exit
PB: predicated region body
PF: predicated region fallthrough
CT: control target
= control target key end

     0   :  { %vm174_vm0 = vsmask.f32 3328  ;;  %vm175_vm1 = vsmask.f32 7440  ;;  %s11749_s30 = smov 88   ;;  %vm993_vm3 = vcmask 1042432   ;;  %s16322_s0 = inlined_call_operand.vmem [shape: bf16[2,9,10,600], index: 0, kind: input, shape index: {}]   ;;  %s16323_s1 = inlined_call_operand.vmem [shape: bf16[2400,64], index: 1, kind: input, shape index: {}]   ;;  %s16324_s2 = inlined_call_operand.vmem [shape: f32[1,64], index: 2, kind: input, shape index: {}]   ;;  %s16325_s3 = inlined_call_operand.vmem [shape: bf16[320,64], index: 3, kind: input, shape index: {}]   ;;  %s16326_s4 = inlined_call_operand.vmem [shape: f32[1,64], index: 4, kind: input, shape index: {}]   ;;  %s16327_s5 = inlined_call_operand.vmem [shape: bf16[320,64], index: 5, kind: input, shape index: {}]   ;;  %s16328_s6 = inlined_call_operand.vmem [shape: f32[1,64], index: 6, kind: input, shape index: {}]   ;;  %s16329_s7 = inlined_call_operand.vmem [shape: bf16[320,64], index: 7, kind: input, shape index: {}]   ;;  %s16330_s8 = inlined_call_operand.vmem [shape: f32[1,64], index: 8, kind: input, shape index: {}]   ;;  %s16331_s9 = inlined_call_operand.vmem [shape: bf16[64,16], index: 9, kind: input, shape index: {}]   ;;  %s16332_s10 = inlined_call_operand.vmem [shape: f32[1,16], index: 10, kind: input, shape index: {}]   ;;  %s16333_s11 = inlined_call_operand.hbm [shape: f32[128,16], index: 11, kind: output, shape index: {}]  }
   0x1   :  { %v11819_v0 = vld [vmem:[%s16322_s0 + $0x8] sm:$0xff]  ;;  %v11824_v1 = vld [vmem:[%s16322_s0 + $0x30] sm:$0xff]  ;;  %v11829_v2 = vld [vmem:[%s16322_s0 + $0x1c] sm:$0x11]  ;;  %vm994_vm4 = vcmask 1046532   ;;  %s11750_s28 = smov 48  }
   0x2   :  { %v11834_v3 = vld [vmem:[%s16322_s0 + $0x44] sm:$0x11]  ;;  %v192_v4 = vshrl.u32 %v11819_v0, 16  ;;  %v195_v5 = vshll.u32 %v11819_v0, 16  ;;  %v9674_v6 = vcombine.high %v11819_v0, %v11824_v1  ;;  %v201_v7 = vshll.u32 %v11829_v2, 16  ;;  %v11872_v27 = vld [vmem:[%s16322_s0 + $0x50] sm:$0xff]  ;;  %vm11876_vm2 = vmor %vm174_vm0, %vm175_vm1 }
   0x3   :  { %v234_v8 = vshrl.u32 %v11824_v1, 16  ;;  %v237_v9 = vshll.u32 %v11824_v1, 16  ;;  %v243_v10 = vshll.u32 %v11834_v3, 16  ;;  %v11847_v11 = vld [vmem:[%s16322_s0] sm:$0xff]  ;;  %v11852_v14 = vld [vmem:[%s16322_s0 + $0x28] sm:$0xff]  ;;  %v9673_v17 = vcombine.low %v11819_v0, %v11824_v1  ;;  %v11886_v33 = vld [vmem:[%s16322_s0 + $0x78] sm:$0xff] }
   0x4   :  { %v194_v12 = vrot.slane %v192_v4, 4  ;;  %v197_v13 = vrot.slane %v195_v5, 5  ;;  %v11857_v15 = vld [vmem:[%s16322_s0 + $0x14] sm:$0x11]  ;;  %v178_v16 = vshrl.u32 %v11847_v11, 16  ;;  %3732 = vmatprep.mubr.bf16.mxu1 %v9674_v6  ;;  %v203_v18 = vrot.slane %v201_v7, 5  ;;  %vm12431_vm5 = vmor %vm993_vm3, %vm994_vm4 }
   0x5   :  { %v236_v19 = vrot.slane %v234_v8, 4  ;;  %v239_v20 = vrot.slane %v237_v9, 5  ;;  %v245_v21 = vrot.slane %v243_v10, 5  ;;  %v11865_v22 = vld [vmem:[%s16322_s0 + $0x3c] sm:$0x11]  ;;  %v181_v25 = vshll.u32 %v11847_v11, 16 }
   0x6   :  { %v198_v23 = vor.u32 %v197_v13, %v194_v12  ;;  %v180_v24 = vrot.slane %v178_v16, 4  ;;  %v187_v26 = vshll.u32 %v11857_v15, 16  ;;  %v220_v30 = vshrl.u32 %v11852_v14, 16  ;;  %v11891_v37 = vld [vmem:[%s16322_s0 + $0x64] sm:$0x11]  ;;  %v11909_v52 = vld [vmem:[%s16322_s0 + $0x58] sm:$0xff] }
   0x7   :  { %v240_v29 = vor.u32 %v239_v20, %v236_v19  ;;  %v223_v31 = vshll.u32 %v11852_v14, 16  ;;  %v229_v32 = vshll.u32 %v11865_v22, 16  ;;  %v183_v35 = vrot.slane %v181_v25, 5  ;;  %v11902_v49 = vld [vmem:[%s16322_s0 + $0x8c] sm:$0x11]  ;;  %v11920_v62 = vld [vmem:[%s16322_s0 + $0x80] sm:$0xff] }
   0x8   :  { %v199_v34 = vrot.slane %v198_v23, 4  ;;  %v189_v36 = vrot.slane %v187_v26, 5  ;;  %v262_v38 = vshrl.u32 %v11872_v27, 16  ;;  %v222_v40 = vrot.slane %v220_v30, 4  ;;  %v11914_v57 = vld [vmem:[%s16322_s0 + $0x6c] sm:$0x11] }
   0x9   :  { %v241_v39 = vrot.slane %v240_v29, 4  ;;  %v225_v41 = vrot.slane %v223_v31, 5  ;;  %v231_v42 = vrot.slane %v229_v32, 5  ;;  %v184_v44 = vor.u32 %v183_v35, %v180_v24  ;;  %v11925_v63 = vld [vmem:[%s16322_s0 + $0x94] sm:$0x11]  ;;  %v11935_v8 = vld [vmem:[%s16322_s0 + $0xa0] sm:$0xff] }
   0xa   :  { %v204_v43 = vsel %vm11876_vm2, %v199_v34, %v203_v18  ;;  %v264_v45 = vrot.slane %v262_v38, 4  ;;  %v265_v46 = vshll.u32 %v11872_v27, 16  ;;  %v271_v50 = vshll.u32 %v11891_v37, 16  ;;  %v11944_v16 = vld [vmem:[%s16322_s0 + $0xb4] sm:$0x11]  ;;  %v11331_v18 = vld [vmem:[%s16323_s1 + $0x40] sm:$0xff]  }
   0xb   :  { %v246_v47 = vsel %vm11876_vm2, %v241_v39, %v245_v21  ;;  %v226_v48 = vor.u32 %v225_v41, %v222_v40  ;;  %v304_v51 = vshrl.u32 %v11886_v33, 16  ;;  %v185_v55 = vrot.slane %v184_v44, 4  ;;  %v11332_v24 = vld [vmem:[%s16323_s1] sm:$0xff]   ;;  %10354 = vmatprep.subr.bf16.mxu0 %v11331_v18  ;;  %v11965_v40 = vld [vmem:[%s16322_s0 + $0xc8] sm:$0xff]  ;;  %s11751_s20 = smov 8  }
   0xc   :  { %v9713_v53 = vcombine.low %v204_v43, %v246_v47  ;;  %v9714_v54 = vcombine.high %v204_v43, %v246_v47  ;;  %v267_v56 = vrot.slane %v265_v46, 5  ;;  %v273_v59 = vrot.slane %v271_v50, 5  ;;  %v11333_v25 = vld [vmem:[%s16323_s1 + $0xc0] sm:$0xff]   ;;  %v11977_v44 = vld [vmem:[%s16322_s0 + $0xa8] sm:$0xff]  ;;  %10355 = vmatpush3.bf16.msra.mxu0 %v11332_v24 }
   0xd   :  { %v227_v58 = vrot.slane %v226_v48, 4  ;;  %v306_v60 = vrot.slane %v304_v51, 4  ;;  %v307_v61 = vshll.u32 %v11886_v33, 16  ;;  %v190_v4 = vsel %vm11876_vm2, %v185_v55, %v189_v36  ;;  %v11970_v41 = vld [vmem:[%s16322_s0 + $0xdc] sm:$0x11]  ;;  %10418 = vmatprep.subr.bf16.mxu1 %v11333_v25 }
   0xe   :  { %1561 = vrot.lane.b32.xlu1 %v9713_v53, %s11749_s30  ;;  %v268_v5 = vor.u32 %v267_v56, %v264_v45  ;;  %v313_v6 = vshll.u32 %v11902_v49, 16  ;;  %v276_v7 = vshrl.u32 %v11909_v52, 16  ;;  %v279_v12 = vshll.u32 %v11909_v52, 16  ;;  %v11334_v45 = vld [vmem:[%s16323_s1 + $0x80] sm:$0xff]  }
   0xf   :  { %v232_v9 = vsel %vm11876_vm2, %v227_v58, %v231_v42  ;;  %v309_v10 = vrot.slane %v307_v61, 5  ;;  %v285_v13 = vshll.u32 %v11914_v57, 16  ;;  %v318_v34 = vshrl.u32 %v11920_v62, 16  ;;  %v11986_v51 = vld [vmem:[%s16322_s0 + $0xbc] sm:$0x11]  ;;  %10419 = vmatpush3.bf16.msra.mxu1 %v11334_v45  ;;  %v11335_v58 = vld [vmem:[%s16323_s1 + $0x48] sm:$0xff]  }
  0x10   :  { %v9711_v19 = vcombine.low %v190_v4, %v232_v9  ;;  %v9712_v20 = vcombine.high %v190_v4, %v232_v9  ;;  %v269_v21 = vrot.slane %v268_v5, 4  ;;  %v315_v23 = vrot.slane %v313_v6, 5  ;;  %v11336_v5 = vld [vmem:[%s16323_s1 + $0x8] sm:$0xff]   ;;  %10356 = vmatprep.subr.bf16.mxu0 %v11335_v58  ;;  %v11369_v0 = vld [vmem:[%s16323_s1 + $0x1c0] sm:$0xff]  }
  0x11   :  { %v310_v26 = vor.u32 %v309_v10, %v306_v60  ;;  %v278_v29 = vrot.slane %v276_v7, 4  ;;  %v281_v30 = vrot.slane %v279_v12, 5  ;;  %v287_v31 = vrot.slane %v285_v13, 5  ;;  %v12004_v12 = vld [vmem:[%s16322_s0 + $0xd0] sm:$0xff]  ;;  %10357 = vmatpush3.bf16.msra.mxu0 %v11336_v5 }
  0x12   :  { %1557 = vrot.lane.b32.xlu0 %v9711_v19, %s11749_s30  ;;  %1563 = vrot.lane.b32.xlu1 %v9714_v54, %s11749_s30  ;;  %v274_v32 = vsel %vm11876_vm2, %v269_v21, %v273_v59  ;;  %v321_v35 = vshll.u32 %v11920_v62, 16  ;;  %v327_v36 = vshll.u32 %v11925_v63, 16  ;;  %v346_v42 = vshrl.u32 %v11935_v8, 16  ;;  %v12011_v19 = vld [vmem:[%s16322_s0 + $0xe4] sm:$0x11] }
  0x13   :  { %v311_v38 = vrot.slane %v310_v26, 4  ;;  %v282_v39 = vor.u32 %v281_v30, %v278_v29  ;;  %v349_v43 = vshll.u32 %v11935_v8, 16  ;;  %v320_v46 = vrot.slane %v318_v34, 4 }
  0x14   :  { %v323_v47 = vrot.slane %v321_v35, 5  ;;  %v329_v48 = vrot.slane %v327_v36, 5  ;;  %v355_v50 = vshll.u32 %v11944_v16, 16  ;;  %v348_v55 = vrot.slane %v346_v42, 4  ;;  %v11337_v35 = vld [vmem:[%s16323_s1 + $0xc8] sm:$0xff]  }
  0x15   :  { %v316_v53 = vsel %vm11876_vm2, %v311_v38, %v315_v23  ;;  %v283_v54 = vrot.slane %v282_v39, 4  ;;  %v351_v56 = vrot.slane %v349_v43, 5  ;;  %v388_v9 = vshrl.u32 %v11965_v40, 16  ;;  %v12018_v23 = vld [vmem:[%s16322_s0 + $0xf0] sm:$0xff]  ;;  %v144_v43 = vld [vmem:[%s16322_s0 + $0x104] sm:$0x11]  ;;  %10420 = vmatprep.subr.bf16.mxu1 %v11337_v35 }
  0x16   :  { %1559 = vrot.lane.b32.xlu0 %v9712_v20, %s11749_s30  ;;  %v9717_v59 = vcombine.high %v274_v32, %v316_v53  ;;  %v9716_v60 = vcombine.low %v274_v32, %v316_v53  ;;  %v324_v61 = vor.u32 %v323_v47, %v320_v46  ;;  %v357_v4 = vrot.slane %v355_v50, 5  ;;  %v12037_v50 = vld [vmem:[%s16322_s0 + $0x118] sm:$0xff]  ;;  %v11338_v53 = vld [vmem:[%s16323_s1 + $0x88] sm:$0xff]  }
  0x17   :  { %v288_v6 = vsel %vm11876_vm2, %v283_v54, %v287_v31  ;;  %v352_v7 = vor.u32 %v351_v56, %v348_v55  ;;  %v391_v10 = vshll.u32 %v11965_v40, 16  ;;  %v397_v18 = vshll.u32 %v11970_v41, 16  ;;  %v147_v56 = vld [vmem:[%s16322_s0 + $0x12c] sm:$0x11]  ;;  %10421 = vmatpush3.bf16.msra.mxu1 %v11338_v53 }
  0x18   :  { %1569 = vrot.lane.b32.xlu1 %v9717_v59, %s11749_s30  ;;  %v325_v13 = vrot.slane %v324_v61, 4  ;;  %v360_v20 = vshrl.u32 %v11977_v44, 16  ;;  %v363_v21 = vshll.u32 %v11977_v44, 16  ;;  %v390_v25 = vrot.slane %v388_v9, 4 }
  0x19   :  { %v353_v24 = vrot.slane %v352_v7, 4  ;;  %v393_v26 = vrot.slane %v391_v10, 5  ;;  %v369_v29 = vshll.u32 %v11986_v51, 16  ;;  %v399_v31 = vrot.slane %v397_v18, 5  ;;  %v145_v7 = vld [vmem:[%s16322_s0 + $0x10c] sm:$0x11] }
  0x1a   :  { %1567 = vrot.lane.b32.xlu0 %v9716_v60, %s11749_s30  ;;  %v330_v30 = vsel %vm11876_vm2, %v325_v13, %v329_v48  ;;  %v362_v32 = vrot.slane %v360_v20, 4  ;;  %v365_v34 = vrot.slane %v363_v21, 5  ;;  %v402_v47 = vshrl.u32 %v12004_v12, 16  ;;  %v12052_v60 = vld [vmem:[%s16322_s0 + $0xf8] sm:$0xff]  ;;  %v11339_v20 = vld [vmem:[%s16323_s1 + $0x50] sm:$0xff]  }
  0x1b   :  { %v9719_v36 = vcombine.high %v288_v6, %v330_v30  ;;  %v9718_v38 = vcombine.low %v288_v6, %v330_v30  ;;  %v358_v39 = vsel %vm11876_vm2, %v353_v24, %v357_v4  ;;  %v394_v42 = vor.u32 %v393_v26, %v390_v25  ;;  %10358 = vmatprep.subr.bf16.mxu0 %v11339_v20  ;;  %v12102_v20 = vld [vmem:[%s16322_s0 + $0x190] sm:$0xff] }
  0x1c   :  { %v366_v45 = vor.u32 %v365_v34, %v362_v32  ;;  %v371_v46 = vrot.slane %v369_v29, 5  ;;  %v405_v48 = vshll.u32 %v12004_v12, 16  ;;  %v411_v55 = vshll.u32 %v12011_v19, 16 }
  0x1d   :  { %1573 = vrot.lane.b32.xlu1 %v9719_v36, %s11749_s30  ;;  %v395_v54 = vrot.slane %v394_v42, 4  ;;  %v430_v58 = vshrl.u32 %v12018_v23, 16  ;;  %v433_v59 = vshll.u32 %v12018_v23, 16  ;;  %v404_v4 = vrot.slane %v402_v47, 4 }
  0x1e   :  { %1571 = vrot.lane.b32.xlu0 %v9718_v38, %s11749_s30  ;;  %v367_v61 = vrot.slane %v366_v45, 4  ;;  %v407_v5 = vrot.slane %v405_v48, 5  ;;  %v439_v6 = vshll.u32 %v144_v43, 16  ;;  %v413_v10 = vrot.slane %v411_v55, 5  ;;  %v11341_v48 = vld [vmem:[%s16323_s1 + $0xd0] sm:$0xff]  }
  0x1f   :  { %v400_v9 = vsel %vm11876_vm2, %v395_v54, %v399_v31  ;;  %v432_v13 = vrot.slane %v430_v58, 4  ;;  %v435_v18 = vrot.slane %v433_v59, 5  ;;  %v472_v32 = vshrl.u32 %v12037_v50, 16  ;;  %v11340_v31 = vld [vmem:[%s16323_s1 + $0x10] sm:$0xff]   ;;  %v12090_v59 = vld [vmem:[%s16322_s0 + $0x168] sm:$0xff]  ;;  %10422 = vmatprep.subr.bf16.mxu1 %v11341_v48 }
  0x20   :  { %v9722_v21 = vcombine.high %v358_v39, %v400_v9  ;;  %v9721_v24 = vcombine.low %v358_v39, %v400_v9  ;;  %v372_v25 = vsel %vm11876_vm2, %v367_v61, %v371_v46  ;;  %v408_v26 = vor.u32 %v407_v5, %v404_v4  ;;  %v12077_v46 = vld [vmem:[%s16322_s0 + $0x120] sm:$0xff]  ;;  %10359 = vmatpush3.bf16.msra.mxu0 %v11340_v31  ;;  %v148_v55 = vld [vmem:[%s16322_s0 + $0x134] sm:$0x11] }
  0x21   :  { %v436_v29 = vor.u32 %v435_v18, %v432_v13  ;;  %v441_v30 = vrot.slane %v439_v6, 5  ;;  %v475_v34 = vshll.u32 %v12037_v50, 16  ;;  %v481_v36 = vshll.u32 %v147_v56, 16 }
  0x22   :  { %1579 = vrot.lane.b32.xlu1 %v9722_v21, %s11749_s30  ;;  %1577 = vrot.lane.b32.xlu0 %v9721_v24, %s11749_s30  ;;  %v409_v35 = vrot.slane %v408_v26, 4  ;;  %v444_v38 = vshrl.u32 %v12052_v60, 16  ;;  %v447_v39 = vshll.u32 %v12052_v60, 16  ;;  %v474_v43 = vrot.slane %v472_v32, 4  ;;  %v11342_v21 = vld [vmem:[%s16323_s1 + $0x90] sm:$0xff]  }
  0x23   :  { %v437_v42 = vrot.slane %v436_v29, 4  ;;  %v477_v45 = vrot.slane %v475_v34, 5  ;;  %v453_v47 = vshll.u32 %v145_v7, 16  ;;  %v483_v54 = vrot.slane %v481_v36, 5  ;;  %v150_v7 = vld [vmem:[%s16322_s0 + $0x17c] sm:$0x11]  ;;  %10423 = vmatpush3.bf16.msra.mxu1 %v11342_v21 }
  0x24   :  { %v414_v53 = vsel %vm11876_vm2, %v409_v35, %v413_v10  ;;  %v446_v56 = vrot.slane %v444_v38, 4  ;;  %v449_v58 = vrot.slane %v447_v39, 5  ;;  %v486_v13 = vshrl.u32 %v12077_v46, 16  ;;  %v153_v26 = vld [vmem:[%s16322_s0 + $0x1a4] sm:$0x11]  ;;  %v11343_v36 = vld [vmem:[%s16323_s1 + $0x58] sm:$0xff]  }
  0x25   :  { %v9724_v61 = vcombine.high %v372_v25, %v414_v53  ;;  %v9723_v4 = vcombine.low %v372_v25, %v414_v53  ;;  %v442_v5 = vsel %vm11876_vm2, %v437_v42, %v441_v30  ;;  %v478_v6 = vor.u32 %v477_v45, %v474_v43  ;;  %v11344_v38 = vld [vmem:[%s16323_s1 + $0x18] sm:$0xff]   ;;  %10360 = vmatprep.subr.bf16.mxu0 %v11343_v36  ;;  %v11347_v36 = vld [vmem:[%s16323_s1 + $0x60] sm:$0xff]  }
  0x26   :  { %v450_v9 = vor.u32 %v449_v58, %v446_v56  ;;  %v455_v10 = vrot.slane %v453_v47, 5  ;;  %v489_v18 = vshll.u32 %v12077_v46, 16  ;;  %v495_v25 = vshll.u32 %v148_v55, 16  ;;  %v11345_v47 = vld [vmem:[%s16323_s1 + $0xd8] sm:$0xff]   ;;  %10361 = vmatpush3.bf16.msra.mxu0 %v11344_v38 }
  0x27   :  { %1583 = vrot.lane.b32.xlu1 %v9724_v61, %s11749_s30  ;;  %1581 = vrot.lane.b32.xlu0 %v9723_v4, %s11749_s30  ;;  %v479_v24 = vrot.slane %v478_v6, 4  ;;  %v514_v29 = vshrl.u32 %v12090_v59, 16  ;;  %v517_v30 = vshll.u32 %v12090_v59, 16  ;;  %v488_v34 = vrot.slane %v486_v13, 4  ;;  %v12132_v6 = vld [vmem:[%s16322_s0 + $0x170] sm:$0xff] }
  0x28   :  { %v451_v32 = vrot.slane %v450_v9, 4  ;;  %v491_v31 = vrot.slane %v489_v18, 5  ;;  %v523_v35 = vshll.u32 %v150_v7, 16  ;;  %v497_v42 = vrot.slane %v495_v25, 5  ;;  %10424 = vmatprep.subr.bf16.mxu1 %v11345_v47  ;;  %v11346_v7 = vld [vmem:[%s16323_s1 + $0x98] sm:$0xff]   ;;  %10362 = vmatprep.subr.bf16.mxu0 %v11347_v36 }
  0x29   :  { %v484_v39 = vsel %vm11876_vm2, %v479_v24, %v483_v54  ;;  %v516_v43 = vrot.slane %v514_v29, 4  ;;  %v519_v45 = vrot.slane %v517_v30, 5  ;;  %v556_v4 = vshrl.u32 %v12102_v20, 16  ;;  %v151_v13 = vld [vmem:[%s16322_s0 + $0x184] sm:$0x11]  ;;  %10425 = vmatpush3.bf16.msra.mxu1 %v11346_v7 }
  0x2a   :  { %v9727_v48 = vcombine.high %v442_v5, %v484_v39  ;;  %v9726_v53 = vcombine.low %v442_v5, %v484_v39  ;;  %v456_v55 = vsel %vm11876_vm2, %v451_v32, %v455_v10  ;;  %v492_v56 = vor.u32 %v491_v31, %v488_v34  ;;  %v12137_v5 = vld [vmem:[%s16322_s0 + $0x198] sm:$0xff]  ;;  %v154_v18 = vld [vmem:[%s16322_s0 + $0x1ac] sm:$0x11] }
  0x2b   :  { %v520_v58 = vor.u32 %v519_v45, %v516_v43  ;;  %v525_v61 = vrot.slane %v523_v35, 5  ;;  %v559_v54 = vshll.u32 %v12102_v20, 16  ;;  %v565_v10 = vshll.u32 %v153_v26, 16 }
  0x2c   :  { %1589 = vrot.lane.b32.xlu1 %v9727_v48, %s11749_s30  ;;  %1587 = vrot.lane.b32.xlu0 %v9726_v53, %s11749_s30  ;;  %v493_v9 = vrot.slane %v492_v56, 4  ;;  %v9672_v21 = vcombine.high %v11847_v11, %v11852_v14  ;;  %v9671_v24 = vcombine.low %v11847_v11, %v11852_v14  ;;  %v558_v29 = vrot.slane %v556_v4, 4  ;;  %v12356_v11 = vld [vmem:[%s16322_s0 + $0x258] sm:$0xff]  ;;  %v12361_v14 = vld [vmem:[%s16322_s0 + $0x280] sm:$0xff] }
  0x2d   :  { %v521_v25 = vrot.slane %v520_v58, 4  ;;  %v561_v30 = vrot.slane %v559_v54, 5  ;;  %v528_v32 = vshrl.u32 %v12132_v6, 16  ;;  %v567_v34 = vrot.slane %v565_v10, 5  ;;  %v12176_v10 = vld [vmem:[%s16322_s0 + $0x1b8] sm:$0xff] }
  0x2e   :  { %v498_v26 = vsel %vm11876_vm2, %v493_v9, %v497_v42  ;;  %v531_v31 = vshll.u32 %v12132_v6, 16  ;;  %v537_v35 = vshll.u32 %v151_v13, 16  ;;  %3635 = vmatprep.mubr.bf16.mxu0 %v9672_v21  ;;  %v570_v48 = vshrl.u32 %v12137_v5, 16  ;;  %v11349_v9 = vld [vmem:[%s16323_s1 + $0xe0] sm:$0xff]  }
  0x2f   :  { %v9729_v38 = vcombine.high %v456_v55, %v498_v26  ;;  %v9728_v39 = vcombine.low %v456_v55, %v498_v26  ;;  %v562_v43 = vor.u32 %v561_v30, %v558_v29  ;;  %v530_v45 = vrot.slane %v528_v32, 4  ;;  %v11348_v55 = vld [vmem:[%s16323_s1 + $0x20] sm:$0xff]   ;;  %v156_v29 = vld [vmem:[%s16322_s0 + $0x1cc] sm:$0x11]  ;;  %10426 = vmatprep.subr.bf16.mxu1 %v11349_v9 }
  0x30   :  { %v533_v47 = vrot.slane %v531_v31, 5  ;;  %v526_v42 = vsel %vm11876_vm2, %v521_v25, %v525_v61  ;;  %v573_v56 = vshll.u32 %v12137_v5, 16  ;;  %v579_v58 = vshll.u32 %v154_v18, 16  ;;  %10363 = vmatpush3.bf16.msra.mxu0 %v11348_v55  ;;  %v12185_v25 = vld [vmem:[%s16322_s0 + $0x1e0] sm:$0xff] }
  0x31   :  { %1593 = vrot.lane.b32.xlu1 %v9729_v38, %s11749_s30  ;;  %1591 = vrot.lane.b32.xlu0 %v9728_v39, %s11749_s30  ;;  %v563_v53 = vrot.slane %v562_v43, 4  ;;  %v539_v54 = vrot.slane %v537_v35, 5  ;;  %v572_v7 = vrot.slane %v570_v48, 4  ;;  %v598_v30 = vshrl.u32 %v12176_v10, 16 }
  0x32   :  { %v534_v4 = vor.u32 %v533_v47, %v530_v45  ;;  %v575_v18 = vrot.slane %v573_v56, 5  ;;  %v581_v21 = vrot.slane %v579_v58, 5  ;;  %v601_v35 = vshll.u32 %v12176_v10, 16  ;;  %v11350_v45 = vld [vmem:[%s16323_s1 + $0xa0] sm:$0xff]  }
  0x33   :  { %v568_v13 = vsel %vm11876_vm2, %v563_v53, %v567_v34  ;;  %v159_v34 = vld [vmem:[%s16322_s0 + $0x1f4] sm:$0x11]  ;;  %v600_v38 = vrot.slane %v598_v30, 4  ;;  %v607_v39 = vshll.u32 %v156_v29, 16  ;;  %v640_v43 = vshrl.u32 %v12185_v25, 16  ;;  %v11351_v53 = vld [vmem:[%s16323_s1 + $0x68] sm:$0xff]   ;;  %10427 = vmatpush3.bf16.msra.mxu1 %v11350_v45 }
  0x34   :  { %v9732_v32 = vcombine.high %v526_v42, %v568_v13  ;;  %v9731_v26 = vcombine.low %v526_v42, %v568_v13  ;;  %v535_v31 = vrot.slane %v534_v4, 4  ;;  %v576_v36 = vor.u32 %v575_v18, %v572_v7  ;;  %v11352_v4 = vld [vmem:[%s16323_s1 + $0x28] sm:$0xff]   ;;  %10364 = vmatprep.subr.bf16.mxu0 %v11351_v53 }
  0x35   :  { %v603_v47 = vrot.slane %v601_v35, 5  ;;  %v643_v48 = vshll.u32 %v12185_v25, 16  ;;  %v649_v42 = vshll.u32 %v159_v34, 16  ;;  %v642_v55 = vrot.slane %v640_v43, 4  ;;  %10365 = vmatpush3.bf16.msra.mxu0 %v11352_v4 }
  0x36   :  { %1599 = vrot.lane.b32.xlu1 %v9732_v32, %s11749_s30  ;;  %1597 = vrot.lane.b32.xlu0 %v9731_v26, %s11749_s30  ;;  %v540_v56 = vsel %vm11876_vm2, %v535_v31, %v539_v54  ;;  %v577_v58 = vrot.slane %v576_v36, 4  ;;  %v609_v13 = vrot.slane %v607_v39, 5  ;;  %v11353_v54 = vld [vmem:[%s16323_s1 + $0xe8] sm:$0xff]   ;;  %v12222_v36 = vld [vmem:[%s16322_s0 + $0x1c0] sm:$0xff]  ;;  %vm1637_vm6 = vcmask 719872  }
  0x37   :  { %v604_v9 = vor.u32 %v603_v47, %v600_v38  ;;  %v645_v18 = vrot.slane %v643_v48, 5  ;;  %v651_v30 = vrot.slane %v649_v42, 5  ;;  %v157_v38 = vld [vmem:[%s16322_s0 + $0x1d4] sm:$0x11]  ;;  %10428 = vmatprep.subr.bf16.mxu1 %v11353_v54  ;;  %v160_v39 = vld [vmem:[%s16322_s0 + $0x1fc] sm:$0x11] }
  0x38   :  { %v582_v29 = vsel %vm11876_vm2, %v577_v58, %v581_v21  ;;  %v12227_v21 = vld [vmem:[%s16322_s0 + $0x1e8] sm:$0xff]  ;;  %v612_v43 = vshrl.u32 %v12222_v36, 16  ;;  %v615_v45 = vshll.u32 %v12222_v36, 16  ;;  %v621_v47 = vshll.u32 %v157_v38, 16 }
  0x39   :  { %v9734_v26 = vcombine.high %v540_v56, %v582_v29  ;;  %v9733_v31 = vcombine.low %v540_v56, %v582_v29  ;;  %v605_v34 = vrot.slane %v604_v9, 4  ;;  %v646_v35 = vor.u32 %v645_v18, %v642_v55  ;;  %v11354_v55 = vld [vmem:[%s16323_s1 + $0xa8] sm:$0xff]  }
  0x3a   :  { %v654_v48 = vshrl.u32 %v12227_v21, 16  ;;  %v657_v56 = vshll.u32 %v12227_v21, 16  ;;  %v663_v58 = vshll.u32 %v160_v39, 16  ;;  %v614_v4 = vrot.slane %v612_v43, 4  ;;  %10429 = vmatpush3.bf16.msra.mxu1 %v11354_v55  ;;  %v11355_v39 = vld [vmem:[%s16323_s1 + $0x70] sm:$0xff]  }
  0x3b   :  { %1603 = vrot.lane.b32.xlu1 %v9734_v26, %s11749_s30  ;;  %1601 = vrot.lane.b32.xlu0 %v9733_v31, %s11749_s30  ;;  %v610_v42 = vsel %vm11876_vm2, %v605_v34, %v609_v13  ;;  %v647_v53 = vrot.slane %v646_v35, 4  ;;  %v617_v9 = vrot.slane %v615_v45, 5  ;;  %v623_v54 = vrot.slane %v621_v47, 5  ;;  %v11356_v45 = vld [vmem:[%s16323_s1 + $0x30] sm:$0xff]  }
  0x3c   :  { %v656_v18 = vrot.slane %v654_v48, 4  ;;  %v659_v26 = vrot.slane %v657_v56, 5  ;;  %v665_v38 = vrot.slane %v663_v58, 5  ;;  %10366 = vmatprep.subr.bf16.mxu0 %v11355_v39  ;;  %vm1902_vm7 = vcmask 392192  }
  0x3d   :  { %v652_v29 = vsel %vm11876_vm2, %v647_v53, %v651_v30  ;;  %v618_v35 = vor.u32 %v617_v9, %v614_v4  ;;  %v12267_v53 = vld [vmem:[%s16322_s0 + $0x208] sm:$0xff]  ;;  %v12275_v9 = vld [vmem:[%s16322_s0 + $0x230] sm:$0xff]  ;;  %10367 = vmatpush3.bf16.msra.mxu0 %v11356_v45  ;;  %vm2215_vm8 = vcmask 64512  }
  0x3e   :  { %v9737_v31 = vcombine.high %v610_v42, %v652_v29  ;;  %v9736_v34 = vcombine.low %v610_v42, %v652_v29  ;;  %v660_v43 = vor.u32 %v659_v26, %v656_v18  ;;  %v11357_v42 = vld [vmem:[%s16323_s1 + $0xf0] sm:$0xff]   ;;  %v162_v18 = vld [vmem:[%s16322_s0 + $0x21c] sm:$0x11]  ;;  %v165_v29 = vld [vmem:[%s16322_s0 + $0x244] sm:$0x11]  ;;  %v724_v55 = vshrl.u32 %v12275_v9, 16 }
  0x3f   :  { %v619_v48 = vrot.slane %v618_v35, 4  ;;  %10430 = vmatprep.subr.bf16.mxu1 %v11357_v42  ;;  %v685_v35 = vshll.u32 %v12267_v53, 16  ;;  %v691_v39 = vshll.u32 %v162_v18, 16  ;;  %v727_v26 = vshll.u32 %v12275_v9, 16 }
  0x40   :  { %1609 = vrot.lane.b32.xlu1 %v9737_v31, %s11749_s30  ;;  %1607 = vrot.lane.b32.xlu0 %v9736_v34, %s11749_s30  ;;  %v661_v4 = vrot.slane %v660_v43, 4  ;;  %v682_v34 = vshrl.u32 %v12267_v53, 16  ;;  %v11358_v43 = vld [vmem:[%s16323_s1 + $0xb0] sm:$0xff]   ;;  %v733_v58 = vshll.u32 %v165_v29, 16  ;;  %v726_v32 = vrot.slane %v724_v55, 4 }
  0x41   :  { %v624_v31 = vsel %vm11876_vm2, %v619_v48, %v623_v54  ;;  %v11359_v54 = vld [vmem:[%s16323_s1 + $0x78] sm:$0xff]   ;;  %v687_v18 = vrot.slane %v685_v35, 5  ;;  %10431 = vmatpush3.bf16.msra.mxu1 %v11358_v43  ;;  %v693_v13 = vrot.slane %v691_v39, 5  ;;  %v729_v56 = vrot.slane %v727_v26, 5  ;;  %v12318_v43 = vld [vmem:[%s16322_s0 + $0x210] sm:$0xff] }
  0x42   :  { %v666_v47 = vsel %vm11876_vm2, %v661_v4, %v665_v38  ;;  %v684_v42 = vrot.slane %v682_v34, 4  ;;  %v735_v30 = vrot.slane %v733_v58, 5  ;;  %10368 = vmatprep.subr.bf16.mxu0 %v11359_v54  ;;  %v11360_v4 = vld [vmem:[%s16323_s1 + $0x38] sm:$0xff]   ;;  %v9677_v55 = vcombine.high %v11872_v27, %v11886_v33 }
  0x43   :  { %v9739_v45 = vcombine.high %v624_v31, %v666_v47  ;;  %v9738_v48 = vcombine.low %v624_v31, %v666_v47  ;;  %v730_v34 = vor.u32 %v729_v56, %v726_v32  ;;  %v11361_v58 = vld [vmem:[%s16323_s1 + $0xf8] sm:$0xff]   ;;  %v9679_v26 = vcombine.high %v11909_v52, %v11920_v62  ;;  %10369 = vmatpush3.bf16.msra.mxu0 %v11360_v4  ;;  %v163_v56 = vld [vmem:[%s16322_s0 + $0x224] sm:$0x11] }
  0x44   :  { %v688_v38 = vor.u32 %v687_v18, %v684_v42  ;;  %v12323_v32 = vld [vmem:[%s16322_s0 + $0x238] sm:$0xff]  ;;  %10432 = vmatprep.subr.bf16.mxu1 %v11361_v58  ;;  %v166_v18 = vld [vmem:[%s16322_s0 + $0x24c] sm:$0x11]  ;;  %v699_v4 = vshll.u32 %v12318_v43, 16  ;;  %v705_v35 = vshll.u32 %v163_v56, 16 }
  0x45   :  { %1613 = vrot.lane.b32.xlu1 %v9739_v45, %s11749_s30  ;;  %1611 = vrot.lane.b32.xlu0 %v9738_v48, %s11749_s30  ;;  %v731_v42 = vrot.slane %v730_v34, 4  ;;  %v738_v47 = vshrl.u32 %v12323_v32, 16  ;;  %v741_v29 = vshll.u32 %v12323_v32, 16  ;;  %v747_v45 = vshll.u32 %v166_v18, 16  ;;  %v11363_v34 = vld [vmem:[%s16323_s1 + $0xb8] sm:$0xff]  }
  0x46   :  { %v689_v39 = vrot.slane %v688_v38, 4  ;;  %v696_v38 = vshrl.u32 %v12318_v43, 16  ;;  %v701_v7 = vrot.slane %v699_v4, 5  ;;  %v707_v54 = vrot.slane %v705_v35, 5  ;;  %3636 = vmatmul.mubr.bf16.vlgmr.msra.gmra.mrb[0].mxu0 %v9671_v24  ;;  %10433 = vmatpush3.bf16.msra.mxu1 %v11363_v34  ;;  %v168_v24 = vld [vmem:[%s16322_s0 + $0x26c] sm:$0x11] }
  0x47   :  { %v736_v58 = vsel %vm11876_vm2, %v731_v42, %v735_v30  ;;  %v740_v18 = vrot.slane %v738_v47, 4  ;;  %v743_v61 = vrot.slane %v741_v29, 5  ;;  %3643 = vmatprep.mubr.bf16.mxu0 %v9677_v55  ;;  %v749_v42 = vrot.slane %v747_v45, 5  ;;  %10546 = vmatprep.subr.bf16.mxu1 %v11369_v0 }
  0x48   :  { %v694_v31 = vsel %vm11876_vm2, %v689_v39, %v693_v13  ;;  %v698_v48 = vrot.slane %v696_v38, 4  ;;  %v11367_v13 = vld [vmem:[%s16323_s1 + $0x140] sm:$0xff]   ;;  %v9687_v29 = vcombine.high %v12018_v23, %v12037_v50  ;;  %v766_v55 = vshrl.u32 %v12356_v11, 16 }
  0x49   :  { %v9742_v39 = vcombine.high %v694_v31, %v736_v58  ;;  %v9741_v56 = vcombine.low %v694_v31, %v736_v58  ;;  %10482 = vmatprep.subr.bf16.mxu0 %v11367_v13  ;;  %v744_v47 = vor.u32 %v743_v61, %v740_v18  ;;  %v171_v31 = vld [vmem:[%s16322_s0 + $0x294] sm:$0x11]  ;;  %v769_v35 = vshll.u32 %v12356_v11, 16  ;;  %3733 = vmatmul.mubr.bf16.vlgmr.msra.gmra.mrb[0].mxu1 %v9673_v17 }
  0x4a   :  { %v702_v30 = vor.u32 %v701_v7, %v698_v48  ;;  %v775_v45 = vshll.u32 %v168_v24, 16  ;;  %v11368_v48 = vld [vmem:[%s16323_s1 + $0x100] sm:$0xff]   ;;  %v808_v61 = vshrl.u32 %v12361_v14, 16  ;;  %v811_v4 = vshll.u32 %v12361_v14, 16  ;;  %3740 = vmatprep.mubr.bf16.mxu1 %v9679_v26  ;;  %v12399_v26 = vld [vmem:[%s16322_s0 + $0x288] sm:$0xff] }
  0x4b   :  { %1619 = vrot.lane.b32.xlu1 %v9742_v39, %s11749_s30  ;;  %1617 = vrot.lane.b32.xlu0 %v9741_v56, %s11749_s30  ;;  %v817_v34 = vshll.u32 %v171_v31, 16  ;;  %v745_v58 = vrot.slane %v744_v47, 4  ;;  %v768_v13 = vrot.slane %v766_v55, 4  ;;  %v771_v39 = vrot.slane %v769_v35, 5  ;;  %v12394_v47 = vld [vmem:[%s16322_s0 + $0x260] sm:$0xff] }
  0x4c   :  { %v703_v38 = vrot.slane %v702_v30, 4  ;;  %v777_v56 = vrot.slane %v775_v45, 5  ;;  %10483 = vmatpush3.bf16.msra.mxu0 %v11368_v48  ;;  %v810_v24 = vrot.slane %v808_v61, 4  ;;  %v813_v30 = vrot.slane %v811_v4, 5  ;;  %v172_v48 = vld [vmem:[%s16322_s0 + $0x29c] sm:$0x11] }
  0x4d   :  { %v819_v7 = vrot.slane %v817_v34, 5  ;;  %v750_v1 = vsel %vm11876_vm2, %v745_v58, %v749_v42  ;;  %v772_v17 = vor.u32 %v771_v39, %v768_v13  ;;  %v169_v42 = vld [vmem:[%s16322_s0 + $0x274] sm:$0x11]  ;;  %v11371_v61 = vld [vmem:[%s16323_s1 + $0x180] sm:$0xff]   ;;  %v16363_v4 = vcombine.low %v11872_v27, %v11886_v33 }
  0x4e   :  { %v708_v18 = vsel %vm11876_vm2, %v703_v38, %v707_v54  ;;  %v1050_v54 = vrot.slane %v11986_v51, 5  ;;  %v814_v45 = vor.u32 %v813_v30, %v810_v24  ;;  %v780_v38 = vshrl.u32 %v12394_v47, 16  ;;  %10547 = vmatpush3.bf16.msra.mxu1 %v11371_v61  ;;  %v852_v61 = vld [vmem:[%s16322_s0 + $0x28] sm:$0xee] }
  0x4f   :  { %v9744_v55 = vcombine.high %v708_v18, %v750_v1  ;;  %v9743_v35 = vcombine.low %v708_v18, %v750_v1  ;;  %3644 = vmatmul.mubr.bf16.gmra.mrb[4].mxu0 %v16363_v4  ;;  %v773_v34 = vrot.slane %v772_v17, 4  ;;  %v783_v58 = vshll.u32 %v12394_v47, 16  ;;  %v849_v4 = vld [vmem:[%s16322_s0] sm:$0xee] }
  0x50   :  { %v789_v13 = vshll.u32 %v169_v42, 16  ;;  %v822_v39 = vshrl.u32 %v12399_v26, 16  ;;  %v16364_v18 = vcombine.high %v11935_v8, %v11965_v40  ;;  %v815_v24 = vrot.slane %v814_v45, 4 }
  0x51   :  { %1623 = vrot.lane.b32.xlu1 %v9744_v55, %s11749_s30  ;;  %1621 = vrot.lane.b32.xlu0 %v9743_v35, %s11749_s30  ;;  %v782_v30 = vrot.slane %v780_v38, 4  ;;  %v825_v0 = vshll.u32 %v12399_v26, 16  ;;  %v831_v27 = vshll.u32 %v172_v48, 16  ;;  %v778_v33 = vsel %vm11876_vm2, %v773_v34, %v777_v56  ;;  %v11375_v35 = vld [vmem:[%s16323_s1 + $0x148] sm:$0xff]  }
  0x52   :  { %3651 = vmatprep.mubr.bf16.mxu0 %v16364_v18  ;;  %v785_v1 = vrot.slane %v783_v58, 5  ;;  %v791_v17 = vrot.slane %v789_v13, 5  ;;  %v824_v42 = vrot.slane %v822_v39, 4  ;;  %v820_v56 = vsel %vm11876_vm2, %v815_v24, %v819_v7  ;;  %v11376_v58 = vld [vmem:[%s16323_s1 + $0x108] sm:$0xff]   ;;  %10484 = vmatprep.subr.bf16.mxu0 %v11375_v35 }
  0x53   :  { %v827_v45 = vrot.slane %v825_v0, 5  ;;  %v833_v48 = vrot.slane %v831_v27, 5  ;;  %v16367_v38 = vcombine.low %v11909_v52, %v11920_v62  ;;  %v9575_v34 = vrot.slane %v849_v4, 9  ;;  %v11377_v7 = vld [vmem:[%s16323_s1 + $0x1c8] sm:$0xff]   ;;  %v12469_v27 = vld [vmem:[%s16322_s0 + $0x38] sm:$0xf]  ;;  %10485 = vmatpush3.bf16.msra.mxu0 %v11376_v58 }
  0x54   :  { %v9747_v13 = vcombine.high %v778_v33, %v820_v56  ;;  %v9746_v39 = vcombine.low %v778_v33, %v820_v56  ;;  %v786_v18 = vor.u32 %v785_v1, %v782_v30  ;;  %v9578_v31 = vrot.slane %v852_v61, 9  ;;  %v12464_v30 = vld [vmem:[%s16322_s0 + $0x10] sm:$0xf]  ;;  %v128_v33 = vld [vmem:[%s16322_s0 + $0x24] sm:$0x1]  ;;  %v11379_v61 = vld [vmem:[%s16323_s1 + $0x188] sm:$0xff]   ;;  %10548 = vmatprep.subr.bf16.mxu1 %v11377_v7 }
  0x55   :  { %3741 = vmatmul.mubr.bf16.gmra.mrb[4].mxu1 %v16367_v38  ;;  %v16368_v52 = vcombine.high %v11977_v44, %v12004_v12  ;;  %v828_v62 = vor.u32 %v827_v45, %v824_v42  ;;  %v16369_v24 = vrot.slane %v11857_v15, 5  ;;  %v9689_v15 = vcombine.high %v12052_v60, %v12077_v46  ;;  %v131_v56 = vld [vmem:[%s16322_s0 + $0x4c] sm:$0x1]  ;;  %v11384_v7 = vld [vmem:[%s16323_s1 + $0x110] sm:$0xff]  }
  0x56   :  { %v9692_v1 = vcombine.high %v12090_v59, %v12102_v20  ;;  %1629 = vrot.lane.b32.xlu1 %v9747_v13, %s11749_s30  ;;  %1627 = vrot.lane.b32.xlu0 %v9746_v39, %s11749_s30  ;;  %v787_v42 = vrot.slane %v786_v18, 4  ;;  %v16370_v4 = vrot.slane %v11865_v22, 5  ;;  %v206_v45 = vshrl.u32 %v12464_v30, 16  ;;  %v11383_v39 = vld [vmem:[%s16323_s1 + $0x150] sm:$0xff]  }
  0x57   :  { %3748 = vmatprep.mubr.bf16.mxu1 %v16368_v52  ;;  %v12459_v0 = vsel %vm12431_vm5, %v9575_v34, %v16369_v24  ;;  %v209_v38 = vshll.u32 %v12464_v30, 16  ;;  %v829_v34 = vrot.slane %v828_v62, 4  ;;  %v215_v58 = vshll.u32 %v128_v33, 16  ;;  %10549 = vmatpush3.bf16.msra.mxu1 %v11379_v61 }
  0x58   :  { %v12484_v35 = vsel %vm12431_vm5, %v9578_v31, %v16370_v4  ;;  %v248_v31 = vshrl.u32 %v12469_v27, 16  ;;  %v16371_v13 = vcombine.low %v11935_v8, %v11965_v40  ;;  %v792_v18 = vsel %vm11876_vm2, %v787_v42, %v791_v17  ;;  %10486 = vmatprep.subr.bf16.mxu0 %v11383_v39  ;;  %v11385_v17 = vld [vmem:[%s16323_s1 + $0x1d0] sm:$0xff]  }
  0x59   :  { %v9751_v22 = vcombine.low %v12459_v0, %v12484_v35  ;;  %v208_v52 = vrot.slane %v206_v45, 4  ;;  %v211_v62 = vrot.slane %v209_v38, 5  ;;  %v251_v24 = vshll.u32 %v12469_v27, 16  ;;  %10487 = vmatpush3.bf16.msra.mxu0 %v11384_v7  ;;  %10550 = vmatprep.subr.bf16.mxu1 %v11385_v17 }
  0x5a   :  { %3652 = vmatmul.mubr.bf16.gmra.mrb[8].mxu0 %v16371_v13  ;;  %v834_v8 = vsel %vm11876_vm2, %v829_v34, %v833_v48  ;;  %v217_v40 = vrot.slane %v215_v58, 5  ;;  %v250_v33 = vrot.slane %v248_v31, 4  ;;  %v257_v4 = vshll.u32 %v131_v56, 16  ;;  %v850_v13 = vld [vmem:[%s16322_s0 + $0x8] sm:$0xee] }
  0x5b   :  { %3659 = vmatprep.mubr.bf16.mxu0 %v9687_v29  ;;  %v9749_v42 = vcombine.high %v792_v18, %v834_v8  ;;  %v9748_v45 = vcombine.low %v792_v18, %v834_v8  ;;  %v212_v38 = vor.u32 %v211_v62, %v208_v52  ;;  %v253_v61 = vrot.slane %v251_v24, 5  ;;  %v11387_v29 = vld [vmem:[%s16323_s1 + $0x190] sm:$0xff]   ;;  %v858_v8 = vld [vmem:[%s16322_s0 + $0x78] sm:$0xee] }
  0x5c   :  { %v259_v48 = vrot.slane %v257_v4, 5  ;;  %v853_v56 = vld [vmem:[%s16322_s0 + $0x30] sm:$0xee]  ;;  %v9576_v34 = vrot.slane %v850_v13, 9  ;;  %v9752_v58 = vcombine.high %v12459_v0, %v12484_v35  ;;  %v16372_v31 = vcombine.low %v11977_v44, %v12004_v12  ;;  %10551 = vmatpush3.bf16.msra.mxu1 %v11387_v29  ;;  %v12567_v13 = vld [vmem:[%s16322_s0 + $0x60] sm:$0xf] }
  0x5d   :  { %v9691_v39 = vcombine.low %v12090_v59, %v12102_v20  ;;  %1633 = vrot.lane.b32.xlu1 %v9749_v42, %s11749_s30  ;;  %1631 = vrot.lane.b32.xlu0 %v9748_v45, %s11749_s30  ;;  %v213_v18 = vrot.slane %v212_v38, 4  ;;  %v254_v52 = vor.u32 %v253_v61, %v250_v33  ;;  %v9579_v62 = vrot.slane %v853_v56, 9  ;;  %v855_v24 = vld [vmem:[%s16322_s0 + $0x50] sm:$0xee]  ;;  %v11391_v33 = vld [vmem:[%s16323_s1 + $0x158] sm:$0xff]  }
  0x5e   :  { %3749 = vmatmul.mubr.bf16.gmra.mrb[8].mxu1 %v16372_v31  ;;  %v9694_v7 = vcombine.high %v12132_v6, %v12137_v5  ;;  %v16373_v44 = vrot.slane %v11829_v2, 5  ;;  %v9581_v4 = vrot.slane %v855_v24, 9  ;;  %v9693_v17 = vcombine.low %v12132_v6, %v12137_v5  ;;  %v12590_v31 = vld [vmem:[%s16322_s0 + $0x9c] sm:$0x1]  ;;  %10488 = vmatprep.subr.bf16.mxu0 %v11391_v33  ;;  %v12698_v59 = vld [vmem:[%s16322_s0 + $0xc4] sm:$0x1] }
  0x5f   :  { %3756 = vmatprep.mubr.bf16.mxu1 %v9689_v15  ;;  %v9697_v2 = vcombine.high %v12176_v10, %v12185_v25  ;;  %v218_v42 = vsel %vm11876_vm2, %v213_v18, %v217_v40  ;;  %v255_v45 = vrot.slane %v254_v52, 4  ;;  %v16374_v38 = vrot.slane %v11834_v3, 5  ;;  %v12580_v3 = vld [vmem:[%s16322_s0 + $0x88] sm:$0xf]  ;;  %v12703_v20 = vld [vmem:[%s16322_s0 + $0xec] sm:$0x1] }
  0x60   :  { %v12544_v12 = vsel %vm12431_vm5, %v9576_v34, %v16373_v44  ;;  %v9584_v15 = vrot.slane %v858_v8, 9  ;;  %v16375_v56 = vrot.slane %v11891_v37, 5  ;;  %v12585_v34 = vld [vmem:[%s16322_s0 + $0x74] sm:$0x1]  ;;  %v16376_v37 = vcombine.low %v12018_v23, %v12037_v50  ;;  %v11700_v35 = vld [vmem:[%s16322_s0 + $0x1fc] sm:$0x11] }
  0x61   :  { %v12562_v61 = vsel %vm12431_vm5, %v9579_v62, %v16374_v38  ;;  %v9696_v18 = vcombine.low %v12176_v10, %v12185_v25  ;;  %1822 = vrot.lane.b32.xlu1 %v9751_v22, %s11750_s28  ;;  %v260_v52 = vsel %vm11876_vm2, %v255_v45, %v259_v48  ;;  %v16377_v62 = vrot.slane %v11902_v49, 5  ;;  %v856_v38 = vld [vmem:[%s16322_s0 + $0x58] sm:$0xee]  ;;  %v11401_v10 = vld [vmem:[%s16323_s1 + $0x1e0] sm:$0xff]  }
  0x62   :  { %v9753_v29 = vcombine.low %v12544_v12, %v12562_v61  ;;  %v12575_v40 = vsel %vm12431_vm5, %v9581_v4, %v16375_v56  ;;  %3660 = vmatmul.mubr.bf16.gmra.mrb[12].mxu0 %v16376_v37  ;;  %v290_v44 = vshrl.u32 %v12567_v13, 16  ;;  %v293_v23 = vshll.u32 %v12567_v13, 16 }
  0x63   :  { %v12604_v24 = vsel %vm12431_vm5, %v9584_v15, %v16377_v62  ;;  %3667 = vmatprep.mubr.bf16.mxu0 %v9692_v1  ;;  %v9715_v50 = vcombine.low %v218_v42, %v260_v52  ;;  %v299_v48 = vshll.u32 %v12585_v34, 16  ;;  %v332_v49 = vshrl.u32 %v12580_v3, 16  ;;  %v859_v15 = vld [vmem:[%s16322_s0 + $0x80] sm:$0xee]  ;;  %v11392_v62 = vld [vmem:[%s16323_s1 + $0x118] sm:$0xff]  }
  0x64   :  { %v9756_v22 = vcombine.low %v12575_v40, %v12604_v24  ;;  %v292_v8 = vrot.slane %v290_v44, 4  ;;  %v295_v4 = vrot.slane %v293_v23, 5  ;;  %v335_v33 = vshll.u32 %v12580_v3, 16  ;;  %10489 = vmatpush3.bf16.msra.mxu0 %v11392_v62 }
  0x65   :  { %v341_v45 = vshll.u32 %v12590_v31, 16  ;;  %1565 = vrot.lane.b32.xlu0 %v9715_v50, %s11749_s30  ;;  %v301_v1 = vrot.slane %v299_v48, 5  ;;  %v334_v42 = vrot.slane %v332_v49, 4  ;;  %v9582_v56 = vrot.slane %v856_v38, 9  ;;  %1826 = vrot.lane.b32.xlu1 %v9753_v29, %s11750_s28  ;;  %v11393_v49 = vld [vmem:[%s16323_s1 + $0x1d8] sm:$0xff]  }
  0x66   :  { %v9757_v37 = vcombine.high %v12575_v40, %v12604_v24  ;;  %v16378_v52 = vcombine.low %v12052_v60, %v12077_v46  ;;  %v296_v44 = vor.u32 %v295_v4, %v292_v8  ;;  %v337_v23 = vrot.slane %v335_v33, 5  ;;  %v861_v46 = vld [vmem:[%s16322_s0 + $0xa0] sm:$0xee]  ;;  %v864_v29 = vld [vmem:[%s16322_s0 + $0xc8] sm:$0xee]  ;;  %10552 = vmatprep.subr.bf16.mxu1 %v11393_v49 }
  0x67   :  { %v343_v50 = vrot.slane %v341_v45, 5  ;;  %v9585_v48 = vrot.slane %v859_v15, 9  ;;  %v16379_v38 = vrot.slane %v11914_v57, 5  ;;  %v9699_v8 = vcombine.high %v12222_v36, %v12227_v21  ;;  %v12813_v40 = vld [vmem:[%s16322_s0 + $0x13c] sm:$0x1] }
  0x68   :  { %3757 = vmatmul.mubr.bf16.gmra.mrb[12].mxu1 %v16378_v52  ;;  %v9702_v57 = vcombine.high %v12267_v53, %v12275_v9  ;;  %v297_v4 = vrot.slane %v296_v44, 4  ;;  %v338_v33 = vor.u32 %v337_v23, %v334_v42  ;;  %v16380_v45 = vrot.slane %v11925_v63, 5  ;;  %v12669_v42 = vld [vmem:[%s16322_s0 + $0xb0] sm:$0xf]  ;;  %v12674_v63 = vld [vmem:[%s16322_s0 + $0xd8] sm:$0xf] }
  0x69   :  { %3764 = vmatprep.mubr.bf16.mxu1 %v9694_v7  ;;  %v12640_v60 = vsel %vm12431_vm5, %v9582_v56, %v16379_v38  ;;  %v9698_v7 = vcombine.low %v12222_v36, %v12227_v21  ;;  %v9587_v56 = vrot.slane %v861_v46, 9  ;;  %1824 = vrot.lane.b32.xlu0 %v9752_v58, %s11750_s28  ;;  %v9590_v62 = vrot.slane %v864_v29, 9  ;;  %v11395_v44 = vld [vmem:[%s16323_s1 + $0x198] sm:$0xff]   ;;  %v11399_v29 = vld [vmem:[%s16323_s1 + $0x160] sm:$0xff]  }
  0x6a   :  { %v12658_v15 = vsel %vm12431_vm5, %v9585_v48, %v16380_v45  ;;  %3668 = vmatmul.mubr.bf16.gmra.mrb[16].mxu0 %v9691_v39  ;;  %v9701_v0 = vcombine.low %v12267_v53, %v12275_v9  ;;  %1832 = vrot.lane.b32.xlu1 %v9756_v22, %s11750_s28  ;;  %v302_v58 = vsel %vm11876_vm2, %v297_v4, %v301_v1  ;;  %v339_v23 = vrot.slane %v338_v33, 4  ;;  %v871_v36 = vld [vmem:[%s16322_s0 + $0x120] sm:$0xee]  ;;  %v11407_v53 = vld [vmem:[%s16323_s1 + $0x168] sm:$0xff]  }
  0x6b   :  { %v9758_v52 = vcombine.low %v12640_v60, %v12658_v15  ;;  %v16381_v48 = vrot.slane %v11944_v16, 5  ;;  %v374_v39 = vshrl.u32 %v12669_v42, 16  ;;  %3675 = vmatprep.mubr.bf16.mxu0 %v9697_v2  ;;  %v16382_v16 = vrot.slane %v11970_v41, 5  ;;  %10553 = vmatpush3.bf16.msra.mxu1 %v11395_v44  ;;  %v11400_v44 = vld [vmem:[%s16323_s1 + $0x120] sm:$0xff]  }
  0x6c   :  { %v377_v1 = vshll.u32 %v12669_v42, 16  ;;  %v383_v38 = vshll.u32 %v12698_v59, 16  ;;  %v416_v46 = vshrl.u32 %v12674_v63, 16  ;;  %v344_v2 = vsel %vm11876_vm2, %v339_v23, %v343_v50  ;;  %10490 = vmatprep.subr.bf16.mxu0 %v11399_v29  ;;  %v867_v29 = vld [vmem:[%s16322_s0 + $0xf0] sm:$0xee]  ;;  %10554 = vmatprep.subr.bf16.mxu1 %v11401_v10 }
  0x6d   :  { %v12693_v49 = vsel %vm12431_vm5, %v9587_v56, %v16381_v48  ;;  %v12713_v22 = vsel %vm12431_vm5, %v9590_v62, %v16382_v16  ;;  %v376_v4 = vrot.slane %v374_v39, 4  ;;  %v419_v33 = vshll.u32 %v12674_v63, 16  ;;  %v865_v39 = vld [vmem:[%s16322_s0 + $0xd0] sm:$0xee]  ;;  %10491 = vmatpush3.bf16.msra.mxu0 %v11400_v44 }
  0x6e   :  { %v9761_v41 = vcombine.low %v12693_v49, %v12713_v22  ;;  %v9720_v45 = vcombine.low %v302_v58, %v344_v2  ;;  %v379_v56 = vrot.slane %v377_v1, 5  ;;  %v385_v62 = vrot.slane %v383_v38, 5  ;;  %1836 = vrot.lane.b32.xlu1 %v9758_v52, %s11750_s28  ;;  %v862_v58 = vld [vmem:[%s16322_s0 + $0xa8] sm:$0xee]  ;;  %v11689_v2 = vld [vmem:[%s16322_s0 + $0x104] sm:$0x11]  ;;  %10492 = vmatprep.subr.bf16.mxu0 %v11407_v53 }
  0x6f   :  { %v418_v48 = vrot.slane %v416_v46, 4  ;;  %v421_v50 = vrot.slane %v419_v33, 5  ;;  %v425_v23 = vshll.u32 %v12703_v20, 16  ;;  %v9762_v6 = vcombine.high %v12693_v49, %v12713_v22 }
  0x70   :  { %3765 = vmatmul.mubr.bf16.gmra.mrb[16].mxu1 %v9693_v17  ;;  %v9704_v5 = vcombine.high %v12318_v43, %v12323_v32  ;;  %1575 = vrot.lane.b32.xlu0 %v9720_v45, %s11749_s30  ;;  %v380_v17 = vor.u32 %v379_v56, %v376_v4  ;;  %v9588_v52 = vrot.slane %v862_v58, 9  ;;  %v9591_v16 = vrot.slane %v865_v39, 9  ;;  %v12782_v39 = vld [vmem:[%s16322_s0 + $0x100] sm:$0xf] }
  0x71   :  { %3772 = vmatprep.mubr.bf16.mxu1 %v9699_v8  ;;  %v422_v38 = vor.u32 %v421_v50, %v418_v48  ;;  %v427_v46 = vrot.slane %v425_v23, 5  ;;  %v870_v8 = vld [vmem:[%s16322_s0 + $0x118] sm:$0xee]  ;;  %v1070_v4 = vrot.slane %v11689_v2, 5  ;;  %v9703_v33 = vcombine.low %v12318_v43, %v12323_v32 }
  0x72   :  { %v381_v45 = vrot.slane %v380_v17, 4  ;;  %v12762_v56 = vsel %vm12431_vm5, %v9588_v52, %v1050_v54  ;;  %v16383_v48 = vrot.slane %v12011_v19, 5  ;;  %v9593_v50 = vrot.slane %v867_v29, 9  ;;  %3676 = vmatmul.mubr.bf16.gmra.mrb[20].mxu0 %v9696_v18  ;;  %1842 = vrot.lane.b32.xlu1 %v9761_v41, %s11750_s28  ;;  %v11690_v19 = vld [vmem:[%s16322_s0 + $0x12c] sm:$0x11] }
  0x73   :  { %v423_v23 = vrot.slane %v422_v38, 4  ;;  %v9596_v58 = vrot.slane %v870_v8, 9  ;;  %v1082_v54 = vrot.slane %v11690_v19, 5  ;;  %3683 = vmatprep.mubr.bf16.mxu0 %v9702_v57  ;;  %v12803_v41 = vld [vmem:[%s16322_s0 + $0x128] sm:$0xf]  ;;  %v9707_v24 = vcombine.high %v12356_v11, %v12361_v14 }
  0x74   :  { %v12768_v44 = vsel %vm12431_vm5, %v9591_v16, %v16383_v48  ;;  %1834 = vrot.lane.b32.xlu0 %v9757_v37, %s11750_s28  ;;  %v386_v25 = vsel %vm11876_vm2, %v381_v45, %v385_v62  ;;  %v12798_v18 = vsel %vm12431_vm5, %v9593_v50, %v1070_v4  ;;  %v12808_v57 = vld [vmem:[%s16322_s0 + $0x114] sm:$0x1]  ;;  %v458_v52 = vshrl.u32 %v12782_v39, 16  ;;  %v868_v50 = vld [vmem:[%s16322_s0 + $0xf8] sm:$0xee] }
  0x75   :  { %16384 = vst [vmem:[#allocation6_spill] sm:$0xff] %v12768_v44  ;;  %v9763_v51 = vcombine.low %v12762_v56, %v12768_v44  ;;  %v428_v62 = vsel %vm11876_vm2, %v423_v23, %v427_v46  ;;  %v12823_v17 = vsel %vm12431_vm5, %v9596_v58, %v1082_v54  ;;  %v461_v16 = vshll.u32 %v12782_v39, 16 }
  0x76   :  { %v9725_v38 = vcombine.low %v386_v25, %v428_v62  ;;  %v9766_v29 = vcombine.low %v12798_v18, %v12823_v17  ;;  %v467_v8 = vshll.u32 %v12808_v57, 16  ;;  %v500_v2 = vshrl.u32 %v12803_v41, 16 }
  0x77   :  { %1846 = vrot.lane.b32.xlu1 %v9763_v51, %s11750_s28  ;;  %v460_v46 = vrot.slane %v458_v52, 4  ;;  %v463_v4 = vrot.slane %v461_v16, 5  ;;  %v503_v45 = vshll.u32 %v12803_v41, 16  ;;  %v509_v48 = vshll.u32 %v12813_v40, 16  ;;  %v11692_v52 = vld [vmem:[%s16322_s0 + $0x134] sm:$0x11] }
  0x78   :  { %3773 = vmatmul.mubr.bf16.gmra.mrb[20].mxu1 %v9698_v7  ;;  %1585 = vrot.lane.b32.xlu0 %v9725_v38, %s11749_s30  ;;  %v469_v23 = vrot.slane %v467_v8, 5  ;;  %v502_v58 = vrot.slane %v500_v2, 4  ;;  %v9594_v21 = vrot.slane %v868_v50, 9  ;;  %v11691_v7 = vld [vmem:[%s16322_s0 + $0x10c] sm:$0x11]  ;;  %v9597_v25 = vrot.slane %v871_v36, 9 }
  0x79   :  { %3780 = vmatprep.mubr.bf16.mxu1 %v9704_v5  ;;  %v1074_v51 = vrot.slane %v11691_v7, 5  ;;  %v464_v19 = vor.u32 %v463_v4, %v460_v46  ;;  %v505_v54 = vrot.slane %v503_v45, 5  ;;  %v511_v10 = vrot.slane %v509_v48, 5  ;;  %v11403_v5 = vld [vmem:[%s16323_s1 + $0x1a0] sm:$0xff]   ;;  %v873_v38 = vld [vmem:[%s16322_s0 + $0x168] sm:$0xee] }
  0x7a   :  { %v1086_v16 = vrot.slane %v11692_v52, 5  ;;  %v11693_v8 = vld [vmem:[%s16322_s0 + $0x17c] sm:$0x11]  ;;  %3684 = vmatmul.mubr.bf16.gmra.mrb[24].mxu0 %v9701_v0  ;;  %v9706_v46 = vcombine.low %v12356_v11, %v12361_v14  ;;  %10555 = vmatpush3.bf16.msra.mxu1 %v11403_v5  ;;  %v876_v48 = vld [vmem:[%s16322_s0 + $0x190] sm:$0xee]  ;;  %v9599_v50 = vrot.slane %v873_v38, 9  ;;  %v9708_v7 = vcombine.low %v12394_v47, %v12399_v26 }
  0x7b   :  { %v12852_v62 = vsel %vm12431_vm5, %v9594_v21, %v1074_v51  ;;  %v1094_v2 = vrot.slane %v11693_v8, 5  ;;  %1852 = vrot.lane.b32.xlu1 %v9766_v29, %s11750_s28  ;;  %v465_v4 = vrot.slane %v464_v19, 4  ;;  %v506_v45 = vor.u32 %v505_v54, %v502_v58  ;;  %v11694_v36 = vld [vmem:[%s16322_s0 + $0x1a4] sm:$0x11]  ;;  %3691 = vmatprep.mubr.bf16.mxu0 %v9707_v24  ;;  %v12904_v24 = vld [vmem:[%s16322_s0 + $0x178] sm:$0xf] }
  0x7c   :  { %16385 = vst [vmem:[#allocation7_spill] sm:$0xff] %v12852_v62  ;;  %v1106_v21 = vrot.slane %v11694_v36, 5  ;;  %1844 = vrot.lane.b32.xlu0 %v9762_v6, %s11750_s28  ;;  %v12884_v9 = vsel %vm12431_vm5, %v9597_v25, %v1086_v16  ;;  %v9602_v0 = vrot.slane %v876_v48, 9  ;;  %v11408_v29 = vld [vmem:[%s16323_s1 + $0x128] sm:$0xff]   ;;  %v9709_v58 = vcombine.high %v12394_v47, %v12399_v26  ;;  %v12909_v19 = vld [vmem:[%s16322_s0 + $0x1a0] sm:$0xf] }
  0x7d   :  { %16386 = vst [vmem:[#allocation8_spill] sm:$0xff] %v12884_v9  ;;  %v470_v49 = vsel %vm11876_vm2, %v465_v4, %v469_v23  ;;  %v507_v22 = vrot.slane %v506_v45, 4  ;;  %v9768_v6 = vcombine.low %v12852_v62, %v12884_v9  ;;  %v12899_v51 = vsel %vm12431_vm5, %v9599_v50, %v1094_v2  ;;  %v11409_v23 = vld [vmem:[%s16323_s1 + $0x1e8] sm:$0xff]   ;;  %v12926_v5 = vld [vmem:[%s16322_s0 + $0x1b4] sm:$0x1]  ;;  %10493 = vmatpush3.bf16.msra.mxu0 %v11408_v29 }
  0x7e   :  { %v12916_v54 = vsel %vm12431_vm5, %v9602_v0, %v1106_v21  ;;  %v12921_v25 = vld [vmem:[%s16322_s0 + $0x18c] sm:$0x1]  ;;  %v542_v52 = vshrl.u32 %v12904_v24, 16  ;;  %v545_v16 = vshll.u32 %v12904_v24, 16  ;;  %v584_v48 = vshrl.u32 %v12909_v19, 16  ;;  %10556 = vmatprep.subr.bf16.mxu1 %v11409_v23 }
  0x7f   :  { %v512_v2 = vsel %vm11876_vm2, %v507_v22, %v511_v10  ;;  %1856 = vrot.lane.b32.xlu1 %v9768_v6, %s11750_s28  ;;  %v9771_v4 = vcombine.low %v12899_v51, %v12916_v54  ;;  %v551_v45 = vshll.u32 %v12921_v25, 16  ;;  %v587_v50 = vshll.u32 %v12909_v19, 16  ;;  %v11411_v36 = vld [vmem:[%s16323_s1 + $0x1a8] sm:$0xff]   ;;  %v877_v23 = vld [vmem:[%s16322_s0 + $0x198] sm:$0xee] }
  0x80   :  { %3781 = vmatmul.mubr.bf16.gmra.mrb[24].mxu1 %v9703_v33  ;;  %v12933_v38 = vpop.permute.xlu1 %1561  ;;  %v9730_v43 = vcombine.low %v470_v49, %v512_v2  ;;  %v544_v32 = vrot.slane %v542_v52, 4  ;;  %v547_v33 = vrot.slane %v545_v16, 5  ;;  %v586_v21 = vrot.slane %v584_v48, 4  ;;  %v11695_v0 = vld [vmem:[%s16322_s0 + $0x184] sm:$0x11] }
  0x81   :  { %3788 = vmatprep.mubr.bf16.mxu1 %v9709_v58  ;;  %v553_v10 = vrot.slane %v551_v45, 5  ;;  %v593_v53 = vshll.u32 %v12926_v5, 16  ;;  %v1098_v29 = vrot.slane %v11695_v0, 5  ;;  %v9767_v49 = vcombine.high %v12798_v18, %v12823_v17  ;;  %v874_v58 = vld [vmem:[%s16322_s0 + $0x170] sm:$0xee]  ;;  %10557 = vmatpush3.bf16.msra.mxu1 %v11411_v36 }
  0x82   :  { %1595 = vrot.lane.b32.xlu0 %v9730_v43, %s11749_s30  ;;  %v548_v22 = vor.u32 %v547_v33, %v544_v32  ;;  %v589_v6 = vrot.slane %v587_v50, 5  ;;  %v11696_v52 = vld [vmem:[%s16322_s0 + $0x1ac] sm:$0x11]  ;;  %v9600_v17 = vrot.slane %v874_v58, 9  ;;  %v9603_v48 = vrot.slane %v877_v23, 9  ;;  %3692 = vmatmul.mubr.bf16.gmra.mrb[28].mxu0 %v9706_v46 }
  0x83   :  { %v1110_v16 = vrot.slane %v11696_v52, 5  ;;  %1862 = vrot.lane.b32.xlu1 %v9771_v4, %s11750_s28  ;;  %v595_v18 = vrot.slane %v593_v53, 5  ;;  %v11697_v43 = vld [vmem:[%s16322_s0 + $0x1cc] sm:$0x11]  ;;  %v879_v36 = vld [vmem:[%s16322_s0 + $0x1b8] sm:$0xee] }
  0x84   :  { %v12964_v2 = vpop.permute.xlu0 %1557  ;;  %v12966_v45 = vpop.permute.xlu1 %1563  ;;  %v1118_v32 = vrot.slane %v11697_v43, 5  ;;  %v549_v33 = vrot.slane %v548_v22, 4  ;;  %v590_v50 = vor.u32 %v589_v6, %v586_v21  ;;  %v11698_v4 = vld [vmem:[%s16322_s0 + $0x1f4] sm:$0x11]  ;;  %v12983_v0 = vsel %vm12431_vm5, %v9600_v17, %v1098_v29  ;;  %v882_v11 = vld [vmem:[%s16322_s0 + $0x1e0] sm:$0xee] }
  0x85   :  { %16387 = vst [vmem:[#allocation9_spill] sm:$0xff] %v12966_v45  ;;  %v1130_v53 = vrot.slane %v11698_v4, 5  ;;  %16388 = vst [vmem:[#allocation10_spill] sm:$0xff] %v12983_v0  ;;  %v12987_v58 = vsel %vm12431_vm5, %v9603_v48, %v1110_v16  ;;  %v9605_v14 = vrot.slane %v879_v36, 9  ;;  %v11415_v46 = vld [vmem:[%s16323_s1 + $0x170] sm:$0xff]   ;;  %v9608_v6 = vrot.slane %v882_v11, 9 }
  0x86   :  { %16389 = vst [vmem:[#allocation11_spill] sm:$0xff] %v12987_v58  ;;  %1854 = vrot.lane.b32.xlu0 %v9767_v49, %s11750_s28  ;;  %v554_v21 = vsel %vm11876_vm2, %v549_v33, %v553_v10  ;;  %v591_v29 = vrot.slane %v590_v50, 4  ;;  %v9773_v22 = vcombine.low %v12983_v0, %v12987_v58  ;;  %v13003_v23 = vld [vmem:[%s16322_s0 + $0x1c8] sm:$0xf]  ;;  %10494 = vmatprep.subr.bf16.mxu0 %v11415_v46  ;;  %v13017_v10 = vld [vmem:[%s16322_s0 + $0x1f0] sm:$0xf] }
  0x87   :  { %v13012_v49 = vsel %vm12431_vm5, %v9605_v14, %v1118_v32  ;;  %v13022_v16 = vld [vmem:[%s16322_s0 + $0x1dc] sm:$0x1]  ;;  %v13027_v47 = vld [vmem:[%s16322_s0 + $0x204] sm:$0x1]  ;;  %v13038_v48 = vsel %vm12431_vm5, %v9608_v6, %v1130_v53  ;;  %v626_v43 = vshrl.u32 %v13003_v23, 16  ;;  %v629_v32 = vshll.u32 %v13003_v23, 16 }
  0x88   :  { %3789 = vmatmul.mubr.bf16.gmra.mrb[28].mxu1 %v9708_v7  ;;  %v13008_v52 = vpop.permute.xlu0 %1559  ;;  %16390 = vst [vmem:[#allocation12_spill] sm:$0xff] %v13022_v16  ;;  %16391 = vst [vmem:[#allocation13_spill] sm:$0xff] %v13027_v47  ;;  %v596_v17 = vsel %vm11876_vm2, %v591_v29, %v595_v18  ;;  %1866 = vrot.lane.b32.xlu1 %v9773_v22, %s11750_s28  ;;  %v9776_v36 = vcombine.low %v13012_v49, %v13038_v48  ;;  %v635_v4 = vshll.u32 %v13022_v16, 16  ;;  %v11416_v11 = vld [vmem:[%s16323_s1 + $0x130] sm:$0xff]   ;;  %v880_v8 = vld [vmem:[%s16322_s0 + $0x1c0] sm:$0xee] }
  0x89   :  { %v9735_v50 = vcombine.low %v554_v21, %v596_v17  ;;  %v668_v18 = vshrl.u32 %v13017_v10, 16  ;;  %v11417_v53 = vld [vmem:[%s16323_s1 + $0x1f0] sm:$0xff]   ;;  %v628_v14 = vrot.slane %v626_v43, 4  ;;  %v631_v46 = vrot.slane %v629_v32, 5  ;;  %10495 = vmatpush3.bf16.msra.mxu0 %v11416_v11  ;;  %v883_v43 = vld [vmem:[%s16322_s0 + $0x1e8] sm:$0xee] }
  0x8a   :  { %v13042_v33 = vpop.permute.xlu1 %1569  ;;  %v671_v29 = vshll.u32 %v13017_v10, 16  ;;  %v677_v21 = vshll.u32 %v13027_v47, 16  ;;  %v9772_v6 = vcombine.high %v12899_v51, %v12916_v54  ;;  %v637_v17 = vrot.slane %v635_v4, 5  ;;  %10558 = vmatprep.subr.bf16.mxu1 %v11417_v53  ;;  %v11419_v54 = vld [vmem:[%s16323_s1 + $0x1b0] sm:$0xff]   ;;  %v11701_v53 = vld [vmem:[%s16322_s0 + $0x21c] sm:$0x11] }
  0x8b   :  { %1605 = vrot.lane.b32.xlu0 %v9735_v50, %s11749_s30  ;;  %v670_v7 = vrot.slane %v668_v18, 4  ;;  %v632_v50 = vor.u32 %v631_v46, %v628_v14  ;;  %v9606_v51 = vrot.slane %v880_v8, 9  ;;  %v11699_v4 = vld [vmem:[%s16322_s0 + $0x1d4] sm:$0x11]  ;;  %v9609_v11 = vrot.slane %v883_v43, 9  ;;  %10559 = vmatpush3.bf16.msra.mxu1 %v11419_v54 }
  0x8c   :  { %v13056_v22 = vpop.permute.xlu0 %1567  ;;  %1872 = vrot.lane.b32.xlu1 %v9776_v36, %s11750_s28  ;;  %v673_v37 = vrot.slane %v671_v29, 5  ;;  %v679_v1 = vrot.slane %v677_v21, 5  ;;  %v1122_v18 = vrot.slane %v11699_v4, 5  ;;  %v1134_v36 = vrot.slane %v11700_v35, 5  ;;  %v885_v43 = vld [vmem:[%s16322_s0 + $0x208] sm:$0xee] }
  0x8d   :  { %v1142_v8 = vrot.slane %v11701_v53, 5  ;;  %v633_v46 = vrot.slane %v632_v50, 4  ;;  %v888_v35 = vld [vmem:[%s16322_s0 + $0x230] sm:$0xee]  ;;  %v11702_v4 = vld [vmem:[%s16322_s0 + $0x244] sm:$0x11] }
  0x8e   :  { %v674_v29 = vor.u32 %v673_v37, %v670_v7  ;;  %v1154_v53 = vrot.slane %v11702_v4, 5  ;;  %v13100_v37 = vsel %vm12431_vm5, %v9606_v51, %v1122_v18  ;;  %v13104_v7 = vsel %vm12431_vm5, %v9609_v11, %v1134_v36  ;;  %v13116_v51 = vld [vmem:[%s16322_s0 + $0x218] sm:$0xf]  ;;  %v13121_v18 = vld [vmem:[%s16322_s0 + $0x240] sm:$0xf] }
  0x8f   :  { %v13082_v14 = vpop.permute.xlu1 %1573  ;;  %1864 = vrot.lane.b32.xlu0 %v9772_v6, %s11750_s28  ;;  %16392 = vst [vmem:[#allocation14_spill] sm:$0xff] %v13100_v37  ;;  %16393 = vst [vmem:[#allocation15_spill] sm:$0xff] %v13104_v7  ;;  %v9611_v50 = vrot.slane %v885_v43, 9  ;;  %v9614_v54 = vrot.slane %v888_v35, 9  ;;  %v638_v21 = vsel %vm11876_vm2, %v633_v46, %v637_v17  ;;  %v9778_v4 = vcombine.low %v13100_v37, %v13104_v7  ;;  %v11423_v6 = vld [vmem:[%s16323_s1 + $0x178] sm:$0xff]  }
  0x90   :  { %v13095_v32 = vpop.permute.xlu0 %1571  ;;  %v675_v26 = vrot.slane %v674_v29, 4  ;;  %16394 = vst [vmem:[#allocation16_spill] sm:$0xff] %v13116_v51  ;;  %16395 = vst [vmem:[#allocation17_spill] sm:$0xff] %v13121_v18  ;;  %v13136_v46 = vld [vmem:[%s16322_s0 + $0x22c] sm:$0x1]  ;;  %v710_v43 = vshrl.u32 %v13116_v51, 16  ;;  %10496 = vmatprep.subr.bf16.mxu0 %v11423_v6 }
  0x91   :  { %v13127_v11 = vsel %vm12431_vm5, %v9611_v50, %v1142_v8  ;;  %v13131_v36 = vsel %vm12431_vm5, %v9614_v54, %v1154_v53  ;;  %16396 = vst [vmem:[#allocation18_spill] sm:$0xff] %v13136_v46  ;;  %v13141_v29 = vld [vmem:[%s16322_s0 + $0x254] sm:$0x1]  ;;  %v713_v35 = vshll.u32 %v13116_v51, 16  ;;  %1876 = vrot.lane.b32.xlu1 %v9778_v4, %s11750_s28  ;;  %v719_v50 = vshll.u32 %v13136_v46, 16 }
  0x92   :  { %16397 = vst [vmem:[#allocation19_spill] sm:$0xff] %v13141_v29  ;;  %v680_v8 = vsel %vm11876_vm2, %v675_v26, %v679_v1  ;;  %v9781_v53 = vcombine.low %v13127_v11, %v13131_v36  ;;  %v752_v54 = vshrl.u32 %v13121_v18, 16  ;;  %v712_v58 = vrot.slane %v710_v43, 4  ;;  %v11424_v1 = vld [vmem:[%s16323_s1 + $0x138] sm:$0xff]  }
  0x93   :  { %v9740_v37 = vcombine.low %v638_v21, %v680_v8  ;;  %v715_v0 = vrot.slane %v713_v35, 5  ;;  %v755_v9 = vshll.u32 %v13121_v18, 16  ;;  %v721_v26 = vrot.slane %v719_v50, 5  ;;  %10497 = vmatpush3.bf16.msra.mxu0 %v11424_v1  ;;  %v11426_v35 = vld [vmem:[%s16323_s1 + $0x1f8] sm:$0xff]   ;;  %v886_v8 = vld [vmem:[%s16322_s0 + $0x210] sm:$0xee] }
  0x94   :  { %v13152_v17 = vpop.permute.xlu1 %1579  ;;  %v13154_v7 = vpop.permute.xlu0 %1577  ;;  %v754_v4 = vrot.slane %v752_v54, 4  ;;  %v761_v6 = vshll.u32 %v13141_v29, 16  ;;  %v16398_v21 = vcombine.low %v12464_v30, %v12469_v27  ;;  %v9612_v27 = vrot.slane %v886_v8, 9  ;;  %10560 = vmatprep.subr.bf16.mxu1 %v11426_v35  ;;  %v11428_v8 = vld [vmem:[%s16323_s1 + $0x240] sm:$0xff]   ;;  %v891_v35 = vld [vmem:[%s16322_s0 + $0x258] sm:$0xee] }
  0x95   :  { %1615 = vrot.lane.b32.xlu0 %v9740_v37, %s11749_s30  ;;  %v716_v46 = vor.u32 %v715_v0, %v712_v58  ;;  %v757_v62 = vrot.slane %v755_v9, 5  ;;  %v889_v0 = vld [vmem:[%s16322_s0 + $0x238] sm:$0xee]  ;;  %1882 = vrot.lane.b32.xlu1 %v9781_v53, %s11750_s28  ;;  %v11703_v58 = vld [vmem:[%s16322_s0 + $0x224] sm:$0x11]  ;;  %v9617_v16 = vrot.slane %v891_v35, 9 }
  0x96   :  { %v2275_v43 = vsel %vm1637_vm6, %v16398_v21, %v12964_v2  ;;  %v763_v30 = vrot.slane %v761_v6, 5  ;;  %v1146_v37 = vrot.slane %v11703_v58, 5  ;;  %v9615_v50 = vrot.slane %v889_v0, 9  ;;  %v11704_v21 = vld [vmem:[%s16322_s0 + $0x24c] sm:$0x11]  ;;  %v11427_v53 = vld [vmem:[%s16323_s1 + $0x1b8] sm:$0xff]   ;;  %10610 = vmatprep.subr.bf16.mxu0 %v11428_v8 }
  0x97   :  { %v717_v54 = vrot.slane %v716_v46, 4  ;;  %v758_v1 = vor.u32 %v757_v62, %v754_v4  ;;  %v1158_v29 = vrot.slane %v11704_v21, 5  ;;  %v1639_v6 = vsel %vm1637_vm6, %v13008_v52, %v12933_v38  ;;  %v894_v0 = vld [vmem:[%s16322_s0 + $0x280] sm:$0xee]  ;;  %v11705_v58 = vld [vmem:[%s16322_s0 + $0x26c] sm:$0x11]  ;;  %10561 = vmatpush3.bf16.msra.mxu1 %v11427_v53 }
  0x98   :  { %v13200_v4 = vsel %vm12431_vm5, %v9612_v27, %v1146_v37  ;;  %v1166_v21 = vrot.slane %v11705_v58, 5  ;;  %v11706_v9 = vld [vmem:[%s16322_s0 + $0x294] sm:$0x11]  ;;  %v1640_v27 = vsel %vm1637_vm6, %v12933_v38, %v12966_v45  ;;  %v16399_v37 = vcombine.high %v13012_v49, %v13038_v48  ;;  %v13232_v38 = vld [vmem:[%s16322_s0 + $0x268] sm:$0xf] }
  0x99   :  { %v13194_v46 = vpop.permute.xlu1 %1583  ;;  %v13196_v62 = vpop.permute.xlu0 %1581  ;;  %v1178_v51 = vrot.slane %v11706_v9, 5  ;;  %v722_v18 = vsel %vm11876_vm2, %v717_v54, %v721_v26  ;;  %v759_v47 = vrot.slane %v758_v1, 4  ;;  %v13225_v58 = vsel %vm12431_vm5, %v9615_v50, %v1158_v29  ;;  %3926 = vmatprep.mubr.bf16.mxu1 %v1640_v27  ;;  %v13237_v49 = vld [vmem:[%s16322_s0 + $0x290] sm:$0xf]  ;;  %v11429_v29 = vld [vmem:[%s16323_s1 + $0x200] sm:$0xff]  }
  0x9a   :  { %1874 = vrot.lane.b32.xlu0 %v16399_v37, %s11750_s28  ;;  %v9783_v9 = vcombine.low %v13200_v4, %v13225_v58  ;;  %v9620_v44 = vrot.slane %v894_v0, 9  ;;  %v1638_v48 = vsel %vm1637_vm6, %v12964_v2, %v13008_v52  ;;  %v1642_v26 = vsel %vm1637_vm6, %v13056_v22, %v13042_v33  ;;  %v13257_v1 = vld [vmem:[%s16322_s0 + $0x27c] sm:$0x1]  ;;  %v13262_v2 = vld [vmem:[%s16322_s0 + $0x2a4] sm:$0x1]  ;;  %3927 = vmatmul.mubr.bf16.vlgmr.msra.gmra.mrb[32].mxu1 %v1639_v6 }
  0x9b   :  { %v764_v50 = vsel %vm11876_vm2, %v759_v47, %v763_v30  ;;  %v13252_v54 = vsel %vm12431_vm5, %v9617_v16, %v1166_v21  ;;  %v794_v52 = vshrl.u32 %v13232_v38, 16  ;;  %v797_v53 = vshll.u32 %v13232_v38, 16  ;;  %3829 = vmatprep.mubr.bf16.mxu0 %v1638_v48  ;;  %v11707_v48 = vld [vmem:[%s16322_s0 + $0x274] sm:$0x11]  ;;  %v892_v6 = vld [vmem:[%s16322_s0 + $0x260] sm:$0xee] }
  0x9c   :  { %v9745_v47 = vcombine.low %v722_v18, %v764_v50  ;;  %1886 = vrot.lane.b32.xlu1 %v9783_v9, %s11750_s28  ;;  %v13269_v16 = vsel %vm12431_vm5, %v9620_v44, %v1178_v51  ;;  %v803_v30 = vshll.u32 %v13257_v1, 16  ;;  %v836_v8 = vshrl.u32 %v13237_v49, 16  ;;  %3830 = vmatmul.mubr.bf16.vlgmr.msra.gmra.mrb[32].mxu0 %v2275_v43  ;;  %v11430_v44 = vld [vmem:[%s16323_s1 + $0x2c0] sm:$0xff]   ;;  %v851_v45 = vld [vmem:[%s16322_s0 + $0x10] sm:$0xe] }
  0x9d   :  { %v9786_v21 = vcombine.low %v13252_v54, %v13269_v16  ;;  %v796_v27 = vrot.slane %v794_v52, 4  ;;  %v799_v18 = vrot.slane %v797_v53, 5  ;;  %v839_v37 = vshll.u32 %v13237_v49, 16  ;;  %10611 = vmatpush3.bf16.msra.mxu0 %v11429_v29  ;;  %3837 = vmatprep.mubr.bf16.mxu0 %v1642_v26  ;;  %v895_v29 = vld [vmem:[%s16322_s0 + $0x288] sm:$0xee] }
  0x9e   :  { %v13273_v35 = vpop.permute.xlu1 %1589  ;;  %v13275_v0 = vpop.permute.xlu0 %1587  ;;  %1625 = vrot.lane.b32.xlu0 %v9745_v47, %s11749_s30  ;;  %v805_v51 = vrot.slane %v803_v30, 5  ;;  %v838_v43 = vrot.slane %v836_v8, 4  ;;  %v845_v9 = vshll.u32 %v13262_v2, 16  ;;  %v1170_v50 = vrot.slane %v11707_v48, 5  ;;  %10674 = vmatprep.subr.bf16.mxu1 %v11430_v44  ;;  %v11708_v47 = vld [vmem:[%s16322_s0 + $0x29c] sm:$0x11] }
  0x9f   :  { %v800_v52 = vor.u32 %v799_v18, %v796_v27  ;;  %v841_v53 = vrot.slane %v839_v37, 5  ;;  %v1182_v30 = vrot.slane %v11708_v47, 5  ;;  %v9618_v26 = vrot.slane %v892_v6, 9  ;;  %v11431_v18 = vld [vmem:[%s16323_s1 + $0x280] sm:$0xff]  }
  0xa0   :  { %1892 = vrot.lane.b32.xlu1 %v9786_v21, %s11750_s28  ;;  %v847_v8 = vrot.slane %v845_v9, 5  ;;  %v9621_v27 = vrot.slane %v895_v29, 9  ;;  %v1644_v37 = vsel %vm1637_vm6, %v13095_v32, %v13082_v14  ;;  %v11709_v21 = vld [vmem:[%s16322_s0 + $0x24] sm:$0x1]  ;;  %v16400_v6 = vcombine.low %v12567_v13, %v12580_v3  ;;  %10675 = vmatpush3.bf16.msra.mxu1 %v11431_v18  ;;  %v854_v13 = vld [vmem:[%s16322_s0 + $0x38] sm:$0xe] }
  0xa1   :  { %v801_v44 = vrot.slane %v800_v52, 4  ;;  %v842_v48 = vor.u32 %v841_v53, %v838_v43  ;;  %v1006_v9 = vrot.slane %v11709_v21, 5  ;;  %3934 = vmatprep.mubr.bf16.mxu1 %v1644_v37  ;;  %v16401_v43 = vcombine.high %v13127_v11, %v13131_v36 }
  0xa2   :  { %v2279_v29 = vsel %vm1637_vm6, %v16400_v6, %v13056_v22  ;;  %v13325_v53 = vsel %vm12431_vm5, %v9618_v26, %v1170_v50  ;;  %v13329_v37 = vsel %vm12431_vm5, %v9621_v27, %v1182_v30  ;;  %v9577_v3 = vrot.slane %v851_v45, 9  ;;  %v11710_v22 = vld [vmem:[%s16322_s0 + $0x4c] sm:$0x1] }
  0xa3   :  { %v13315_v47 = vpop.permute.xlu1 %1593  ;;  %v13317_v52 = vpop.permute.xlu0 %1591  ;;  %1884 = vrot.lane.b32.xlu0 %v16401_v43, %s11750_s28  ;;  %v1018_v11 = vrot.slane %v11710_v22, 5  ;;  %v806_v36 = vsel %vm11876_vm2, %v801_v44, %v805_v51  ;;  %v843_v50 = vrot.slane %v842_v48, 4  ;;  %v9788_v26 = vcombine.low %v13325_v53, %v13329_v37  ;;  %v11432_v27 = vld [vmem:[%s16323_s1 + $0x248] sm:$0xff]  }
  0xa4   :  { %v9580_v30 = vrot.slane %v854_v13, 9  ;;  %v11434_v45 = vld [vmem:[%s16323_s1 + $0x208] sm:$0xff]   ;;  %v1007_v18 = vsel %vm12431_vm5, %v9577_v3, %v1006_v9  ;;  %3838 = vmatmul.mubr.bf16.gmra.mrb[36].mxu0 %v2279_v29  ;;  %v1643_v51 = vsel %vm1637_vm6, %v13042_v33, %v13095_v32  ;;  %v1646_v44 = vsel %vm1637_vm6, %v13154_v7, %v13152_v17  ;;  %10612 = vmatprep.subr.bf16.mxu0 %v11432_v27 }
  0xa5   :  { %v848_v48 = vsel %vm11876_vm2, %v843_v50, %v847_v8  ;;  %1896 = vrot.lane.b32.xlu1 %v9788_v26, %s11750_s28  ;;  %v1648_v9 = vsel %vm1637_vm6, %v13196_v62, %v13194_v46  ;;  %3935 = vmatmul.mubr.bf16.gmra.mrb[36].mxu1 %v1643_v51  ;;  %v11438_v33 = vld [vmem:[%s16323_s1 + $0x2c8] sm:$0xff]   ;;  %v1030_v32 = vrot.slane %v12585_v34, 5  ;;  %v1042_v13 = vrot.slane %v12590_v31, 5  ;;  %v11440_v50 = vld [vmem:[%s16323_s1 + $0x250] sm:$0xff]  }
  0xa6   :  { %v1019_v21 = vsel %vm12431_vm5, %v9580_v30, %v1018_v11  ;;  %v9750_v6 = vcombine.low %v806_v36, %v848_v48  ;;  %10613 = vmatpush3.bf16.msra.mxu0 %v11434_v45  ;;  %v11435_v8 = vld [vmem:[%s16322_s0 + $0x2c] ss:$40 sps:$4 sm:$0xff]   ;;  %3845 = vmatprep.mubr.bf16.mxu0 %v1646_v44  ;;  %v9685_v3 = vcombine.low %v12669_v42, %v12674_v63  ;;  %v857_v36 = vld [vmem:[%s16322_s0 + $0x60] sm:$0xe]  ;;  %v860_v31 = vld [vmem:[%s16322_s0 + $0x88] sm:$0xe] }
  0xa7   :  { %v9755_v29 = vcombine.low %v1007_v18, %v1019_v21  ;;  %v11439_v43 = vld [vmem:[%s16323_s1 + $0x288] sm:$0xff]   ;;  %3942 = vmatprep.mubr.bf16.mxu1 %v1648_v9  ;;  %v9787_v34 = vcombine.high %v13252_v54, %v13269_v16  ;;  %10676 = vmatprep.subr.bf16.mxu1 %v11438_v33  ;;  %v9583_v42 = vrot.slane %v857_v36, 9  ;;  %v9586_v63 = vrot.slane %v860_v31, 9  ;;  %v11442_v54 = vld [vmem:[%s16323_s1 + $0x210] sm:$0xff]  }
  0xa8   :  { %v13376_v22 = vpop.permute.xlu1 %1599  ;;  %v13378_v11 = vpop.permute.xlu0 %1597  ;;  %1635 = vrot.lane.b32.xlu0 %v9750_v6, %s11749_s30  ;;  %10677 = vmatpush3.bf16.msra.mxu1 %v11439_v43  ;;  %v9784_v16 = vcombine.high %v13200_v4, %v13225_v58  ;;  %v9789_v26 = vcombine.high %v13325_v53, %v13329_v37  ;;  %v2283_v45 = vsel %vm1637_vm6, %v9685_v3, %v13154_v7  ;;  %v11446_v44 = vld [vmem:[%s16323_s1 + $0x2d0] sm:$0xff]   ;;  %v1054_v21 = vrot.slane %v12698_v59, 5  ;;  %v11527_v37 = vld [vmem:[%s16323_s1 + $0x320] sm:$0xff]  }
  0xa9   :  { %1830 = vrot.lane.b32.xlu1 %v9755_v29, %s11750_s28  ;;  %v1031_v30 = vsel %vm12431_vm5, %v9583_v42, %v1030_v32  ;;  %v1043_v27 = vsel %vm12431_vm5, %v9586_v63, %v1042_v13  ;;  %10614 = vmatprep.subr.bf16.mxu0 %v11440_v50  ;;  %v1647_v18 = vsel %vm1637_vm6, %v13152_v17, %v13196_v62  ;;  %v11447_v7 = vld [vmem:[%s16323_s1 + $0x290] sm:$0xff]   ;;  %v1066_v17 = vrot.slane %v12703_v20, 5  ;;  %v866_v20 = vld [vmem:[%s16322_s0 + $0xd8] sm:$0xe] }
  0xaa   :  { %v9760_v51 = vcombine.low %v1031_v30, %v1043_v27  ;;  %v1650_v48 = vsel %vm1637_vm6, %v13275_v0, %v13273_v35  ;;  %10615 = vmatpush3.bf16.msra.mxu0 %v11442_v54  ;;  %v1652_v62 = vsel %vm1637_vm6, %v13317_v52, %v13315_v47  ;;  %v11437_v59 = vld [vmem:[%s16322_s0 + $0x28] ss:$40 sps:$4 sm:$0xff]   ;;  %10678 = vmatprep.subr.bf16.mxu1 %v11446_v44  ;;  %v9592_v32 = vrot.slane %v866_v20, 9  ;;  %v11450_v13 = vld [vmem:[%s16323_s1 + $0x218] sm:$0xff]   ;;  %v11451_v44 = vld [vmem:[%s16322_s0 + $0xcc] ss:$40 sps:$4 sm:$0xff]  }
  0xab   :  { %v863_v29 = vld [vmem:[%s16322_s0 + $0xb0] sm:$0xe]  ;;  %v9690_v43 = vcombine.low %v12782_v39, %v12803_v41  ;;  %v16402_v3 = vcombine.high %v12544_v12, %v12562_v61  ;;  %v11454_v12 = vld [vmem:[%s16323_s1 + $0x2d8] sm:$0xff]   ;;  %v1078_v61 = vrot.slane %v12808_v57, 5  ;;  %v1651_v42 = vsel %vm1637_vm6, %v13273_v35, %v13317_v52  ;;  %v869_v35 = vld [vmem:[%s16322_s0 + $0x100] sm:$0xe] }
  0xac   :  { %1894 = vrot.lane.b32.xlu0 %v9787_v34, %s11750_s28  ;;  %3846 = vmatmul.mubr.bf16.gmra.mrb[40].mxu0 %v2283_v45  ;;  %v9589_v33 = vrot.slane %v863_v29, 9  ;;  %v11443_v34 = vld [vmem:[%s16322_s0 + $0x7c] ss:$40 sps:$4 sm:$0xff]   ;;  %v1067_v39 = vsel %vm12431_vm5, %v9592_v32, %v1066_v17  ;;  %v1654_v63 = vsel %vm1637_vm6, %v13378_v11, %v13376_v22  ;;  %v1090_v54 = vrot.slane %v12813_v40, 5  ;;  %v11512_v4 = vld [vmem:[%s16323_s1 + $0x3d0] sm:$0xff]  }
  0xad   :  { %2137 = vrot.lane.b32.xlu1 %v11435_v8, %s11751_s20  ;;  %v13425_v9 = vpop.permute.xlu1 %1603  ;;  %v13427_v6 = vpop.permute.xlu0 %1601  ;;  %3943 = vmatmul.mubr.bf16.gmra.mrb[40].mxu1 %v1647_v18  ;;  %v11448_v8 = vld [vmem:[%s16323_s1 + $0x258] sm:$0xff]   ;;  %v2287_v31 = vsel %vm1637_vm6, %v9690_v43, %v13275_v0  ;;  %v872_v0 = vld [vmem:[%s16322_s0 + $0x128] sm:$0xe]  ;;  %v9595_v40 = vrot.slane %v869_v35, 9  ;;  %v11456_v45 = vld [vmem:[%s16323_s1 + $0x260] sm:$0xff]   ;;  %v16403_v17 = vcombine.high %v12640_v60, %v12658_v15  ;;  %v1102_v29 = vrot.slane %v12921_v25, 5 }
  0xae   :  { %3853 = vmatprep.mubr.bf16.mxu0 %v1650_v48  ;;  %10679 = vmatpush3.bf16.msra.mxu1 %v11447_v7  ;;  %v1055_v36 = vsel %vm12431_vm5, %v9589_v33, %v1054_v21  ;;  %v11455_v50 = vld [vmem:[%s16323_s1 + $0x298] sm:$0xff]   ;;  %v1656_v52 = vsel %vm1637_vm6, %v13427_v6, %v13425_v9  ;;  %v9598_v27 = vrot.slane %v872_v0, 9  ;;  %v11458_v18 = vld [vmem:[%s16323_s1 + $0x220] sm:$0xff]   ;;  %v9695_v7 = vcombine.low %v12904_v24, %v12909_v19  ;;  %v881_v0 = vld [vmem:[%s16322_s0 + $0x1c8] sm:$0xe] }
  0xaf   :  { %3950 = vmatprep.mubr.bf16.mxu1 %v1652_v62  ;;  %10616 = vmatprep.subr.bf16.mxu0 %v11448_v8  ;;  %v9765_v41 = vcombine.low %v1055_v36, %v1067_v39  ;;  %v1079_v48 = vsel %vm12431_vm5, %v9595_v40, %v1078_v61  ;;  %v11463_v24 = vld [vmem:[%s16323_s1 + $0x2a0] sm:$0xff]   ;;  %v1114_v60 = vrot.slane %v12926_v5, 5  ;;  %v875_v25 = vld [vmem:[%s16322_s0 + $0x178] sm:$0xe]  ;;  %v1655_v5 = vsel %vm1637_vm6, %v13376_v22, %v13427_v6  ;;  %v11470_v36 = vld [vmem:[%s16323_s1 + $0x2e8] sm:$0xff]  }
  0xb0   :  { %1828 = vrot.lane.b32.xlu0 %v16402_v3, %s11750_s28  ;;  %10617 = vmatpush3.bf16.msra.mxu0 %v11450_v13  ;;  %v1091_v21 = vsel %vm12431_vm5, %v9598_v27, %v1090_v54  ;;  %v878_v33 = vld [vmem:[%s16322_s0 + $0x1a0] sm:$0xe]  ;;  %v2291_v32 = vsel %vm1637_vm6, %v9695_v7, %v13378_v11  ;;  %v9601_v8 = vrot.slane %v875_v25, 9  ;;  %v11464_v13 = vld [vmem:[%s16323_s1 + $0x268] sm:$0xff]   ;;  %v9700_v39 = vcombine.low %v13003_v23, %v13017_v10  ;;  %v11459_v23 = vld [vmem:[%s16322_s0 + $0x11c] ss:$40 sps:$4 sm:$0xff]  }
  0xb1   :  { %1840 = vrot.lane.b32.xlu1 %v9760_v51, %s11750_s28  ;;  %10680 = vmatprep.subr.bf16.mxu1 %v11454_v12  ;;  %v11445_v51 = vld [vmem:[%s16322_s0 + $0x78] ss:$40 sps:$4 sm:$0xff]   ;;  %v9770_v62 = vcombine.low %v1079_v48, %v1091_v21  ;;  %v9604_v43 = vrot.slane %v878_v33, 9  ;;  %v11466_v3 = vld [vmem:[%s16323_s1 + $0x228] sm:$0xff]   ;;  %v11472_v10 = vld [vmem:[%s16323_s1 + $0x270] sm:$0xff]   ;;  %v9607_v21 = vrot.slane %v881_v0, 9 }
  0xb2   :  { %v13474_v30 = vpop.permute.xlu1 %1609  ;;  %v13476_v57 = vpop.permute.xlu0 %1607  ;;  %10681 = vmatpush3.bf16.msra.mxu1 %v11455_v50  ;;  %10618 = vmatprep.subr.bf16.mxu0 %v11456_v45  ;;  %v1103_v22 = vsel %vm12431_vm5, %v9601_v8, %v1102_v29  ;;  %v11471_v61 = vld [vmem:[%s16323_s1 + $0x2a8] sm:$0xff]   ;;  %v16406_v40 = vld [vmem:[#allocation12_spill] sm:$0xff] }
  0xb3   :  { %v1658_v15 = vsel %vm1637_vm6, %v13476_v57, %v13474_v30  ;;  %v1115_v6 = vsel %vm12431_vm5, %v9604_v43, %v1114_v60  ;;  %v2295_v54 = vsel %vm1637_vm6, %v9700_v39, %v13476_v57  ;;  %v1126_v27 = vrot.slane %v16406_v40, 5  ;;  %v11478_v57 = vld [vmem:[%s16323_s1 + $0x2f0] sm:$0xff]   ;;  %v16409_v29 = vld [vmem:[#allocation16_spill] sm:$0xff]  ;;  %v11482_v60 = vld [vmem:[%s16323_s1 + $0x238] sm:$0xff]  }
  0xb4   :  { %2135 = vrot.lane.b32.xlu0 %v11437_v59, %s11751_s20  ;;  %3854 = vmatmul.mubr.bf16.gmra.mrb[44].mxu0 %v2287_v31  ;;  %v11462_v59 = vld [vmem:[%s16323_s1 + $0x2e0] sm:$0xff]   ;;  %v16404_v31 = vld [vmem:[#allocation6_spill] sm:$0xff] }
  0xb5   :  { %2147 = vrot.lane.b32.xlu1 %v11443_v34, %s11751_s20  ;;  %3951 = vmatmul.mubr.bf16.gmra.mrb[44].mxu1 %v1651_v42  ;;  %v9775_v34 = vcombine.low %v1103_v22, %v1115_v6  ;;  %v16405_v42 = vcombine.high %v12762_v56, %v16404_v31  ;;  %v11474_v56 = vld [vmem:[%s16323_s1 + $0x230] sm:$0xff]   ;;  %v16411_v25 = vld [vmem:[#allocation8_spill] sm:$0xff]  ;;  %v1127_v8 = vsel %vm12431_vm5, %v9607_v21, %v1126_v27 }
  0xb6   :  { %3861 = vmatprep.mubr.bf16.mxu0 %v1654_v63  ;;  %3958 = vmatprep.mubr.bf16.mxu1 %v1656_v52  ;;  %v11453_v63 = vld [vmem:[%s16322_s0 + $0xc8] ss:$40 sps:$4 sm:$0xff]   ;;  %v11493_v0 = vld [vmem:[%s16323_s1 + $0x3c0] sm:$0xff]  }
  0xb7   :  { %10619 = vmatpush3.bf16.msra.mxu0 %v11458_v18  ;;  %v13519_v19 = vpop.permute.xlu1 %1613  ;;  %v1612_v20 = vpop.permute.xlu0 %1611  ;;  %10682 = vmatprep.subr.bf16.mxu1 %v11462_v59  ;;  %v884_v52 = vld [vmem:[%s16322_s0 + $0x1f0] sm:$0xe]  ;;  %v16408_v59 = vld [vmem:[#allocation17_spill] sm:$0xff] }
  0xb8   :  { %1838 = vrot.lane.b32.xlu0 %v16403_v17, %s11750_s28  ;;  %10683 = vmatpush3.bf16.msra.mxu1 %v11463_v24  ;;  %v1660_v11 = vsel %vm1637_vm6, %v1612_v20, %v13519_v19  ;;  %v1659_v35 = vsel %vm1637_vm6, %v13474_v30, %v1612_v20  ;;  %v16407_v30 = vld [vmem:[#allocation13_spill] sm:$0xff]  ;;  %v11479_v18 = vld [vmem:[%s16323_s1 + $0x2b0] sm:$0xff]   ;;  %v9610_v7 = vrot.slane %v884_v52, 9  ;;  %v9705_v24 = vcombine.low %v16409_v29, %v16408_v59  ;;  %v11480_v20 = vld [vmem:[%s16323_s1 + $0x278] sm:$0xff]  }
  0xb9   :  { %1850 = vrot.lane.b32.xlu1 %v9765_v41, %s11750_s28  ;;  %10620 = vmatprep.subr.bf16.mxu0 %v11464_v13  ;;  %v1138_v45 = vrot.slane %v16407_v30, 5  ;;  %v11467_v17 = vld [vmem:[%s16322_s0 + $0x194] ss:$40 sps:$4 sm:$0xff]   ;;  %v11475_v52 = vld [vmem:[%s16322_s0 + $0x1e4] ss:$40 sps:$4 sm:$0xff]  }
  0xba   :  { %10684 = vmatprep.subr.bf16.mxu1 %v11470_v36  ;;  %v11486_v13 = vld [vmem:[%s16323_s1 + $0x2f8] sm:$0xff]   ;;  %v893_v30 = vld [vmem:[%s16322_s0 + $0x268] sm:$0xe]  ;;  %v16418_v29 = vld [vmem:[#allocation14_spill] sm:$0xff] }
  0xbb   :  { %10621 = vmatpush3.bf16.msra.mxu0 %v11466_v3  ;;  %v1139_v43 = vsel %vm12431_vm5, %v9610_v7, %v1138_v45  ;;  %v1174_v7 = vrot.slane %v13257_v1, 5  ;;  %v11483_v1 = vld [vmem:[%s16322_s0 + $0x234] ss:$40 sps:$4 sm:$0xff]  }
  0xbc   :  { %2145 = vrot.lane.b32.xlu0 %v11445_v51, %s11751_s20  ;;  %3862 = vmatmul.mubr.bf16.gmra.mrb[48].mxu0 %v2291_v32  ;;  %v11461_v51 = vld [vmem:[%s16322_s0 + $0x118] ss:$40 sps:$4 sm:$0xff]   ;;  %v9780_v39 = vcombine.low %v1127_v8, %v1139_v43  ;;  %v11498_v8 = vld [vmem:[%s16323_s1 + $0x348] sm:$0xff]  }
  0xbd   :  { %2157 = vrot.lane.b32.xlu1 %v11451_v44, %s11751_s20  ;;  %3869 = vmatprep.mubr.bf16.mxu0 %v1658_v15  ;;  %v1620_v41 = vpop.permute.xlu1 %1619  ;;  %v1618_v12 = vpop.permute.xlu0 %1617  ;;  %v16410_v15 = vld [vmem:[#allocation7_spill] sm:$0xff]  ;;  %v16421_v43 = vld [vmem:[#allocation9_spill] sm:$0xff] }
  0xbe   :  { %3959 = vmatmul.mubr.bf16.gmra.mrb[48].mxu1 %v1655_v5  ;;  %v1662_v50 = vsel %vm1637_vm6, %v1618_v12, %v1620_v41  ;;  %10622 = vmatprep.subr.bf16.mxu0 %v11472_v10  ;;  %v16412_v33 = vcombine.high %v16410_v15, %v16411_v25  ;;  %v887_v32 = vld [vmem:[%s16322_s0 + $0x218] sm:$0xe]  ;;  %v890_v5 = vld [vmem:[%s16322_s0 + $0x240] sm:$0xe]  ;;  %v2299_v3 = vsel %vm1637_vm6, %v9705_v24, %v1618_v12  ;;  %v16413_v12 = vld [vmem:[#allocation18_spill] sm:$0xff] }
  0xbf   :  { %3966 = vmatprep.mubr.bf16.mxu1 %v1660_v11  ;;  %10685 = vmatpush3.bf16.msra.mxu1 %v11471_v61  ;;  %v9613_v61 = vrot.slane %v887_v32, 9  ;;  %v1150_v31 = vrot.slane %v16413_v12, 5  ;;  %v11469_v10 = vld [vmem:[%s16322_s0 + $0x190] ss:$40 sps:$4 sm:$0xff]  }
  0xc0   :  { %1848 = vrot.lane.b32.xlu0 %v16405_v42, %s11750_s28  ;;  %10623 = vmatpush3.bf16.msra.mxu0 %v11474_v56  ;;  %v9710_v56 = vcombine.low %v13232_v38, %v13237_v49  ;;  %v16419_v24 = vld [vmem:[#allocation15_spill] sm:$0xff] }
  0xc1   :  { %1860 = vrot.lane.b32.xlu1 %v9770_v62, %s11750_s28  ;;  %10686 = vmatprep.subr.bf16.mxu1 %v11478_v57  ;;  %v1151_v49 = vsel %vm12431_vm5, %v9613_v61, %v1150_v31  ;;  %v11503_v61 = vld [vmem:[%s16323_s1 + $0x3c8] sm:$0xff]   ;;  %v11485_v12 = vld [vmem:[%s16322_s0 + $0x230] ss:$40 sps:$4 sm:$0xff]  }
  0xc2   :  { %10624 = vmatprep.subr.bf16.mxu0 %v11480_v20  ;;  %v16420_v20 = vcombine.high %v16418_v29, %v16419_v24  ;;  %v11507_v31 = vld [vmem:[%s16323_s1 + $0x350] sm:$0xff]   ;;  %v11532_v29 = vld [vmem:[%s16323_s1 + $0x3a0] sm:$0xff]  }
  0xc3   :  { %v13599_v44 = vpop.permute.xlu1 %1623  ;;  %v1622_v48 = vpop.permute.xlu0 %1621  ;;  %10687 = vmatpush3.bf16.msra.mxu1 %v11479_v18 }
  0xc4   :  { %2155 = vrot.lane.b32.xlu0 %v11453_v63, %s11751_s20  ;;  %3870 = vmatmul.mubr.bf16.gmra.mrb[52].mxu0 %v2295_v54  ;;  %v1664_v62 = vsel %vm1637_vm6, %v1622_v48, %v13599_v44  ;;  %v1663_v11 = vsel %vm1637_vm6, %v1620_v41, %v1622_v48  ;;  %v16414_v41 = vld [vmem:[#allocation19_spill] sm:$0xff]  ;;  %v11488_v63 = vld [vmem:[%s16323_s1 + $0x340] sm:$0xff]  }
  0xc5   :  { %2167 = vrot.lane.b32.xlu1 %v11459_v23, %s11751_s20  ;;  %3877 = vmatprep.mubr.bf16.mxu0 %v1662_v50  ;;  %v1162_v42 = vrot.slane %v16414_v41, 5  ;;  %v9616_v23 = vrot.slane %v890_v5, 9  ;;  %v16415_v50 = vld [vmem:[#allocation10_spill] sm:$0xff]  ;;  %v16416_v54 = vld [vmem:[#allocation11_spill] sm:$0xff]  ;;  %v11490_v41 = vld [vmem:[%s16322_s0 + $0x284] ss:$40 sps:$4 sm:$0xff]  }
  0xc6   :  { %3967 = vmatmul.mubr.bf16.gmra.mrb[52].mxu1 %v1659_v35  ;;  %10625 = vmatpush3.bf16.msra.mxu0 %v11482_v60  ;;  %v16417_v35 = vcombine.high %v16415_v50, %v16416_v54  ;;  %v11477_v60 = vld [vmem:[%s16322_s0 + $0x1e0] ss:$40 sps:$4 sm:$0xff]  }
  0xc7   :  { %3974 = vmatprep.mubr.bf16.mxu1 %v1664_v62  ;;  %10688 = vmatprep.subr.bf16.mxu1 %v11486_v13  ;;  %v1163_v27 = vsel %vm12431_vm5, %v9616_v23, %v1162_v42  ;;  %v9619_v62 = vrot.slane %v893_v30, 9  ;;  %v11504_v42 = vld [vmem:[%s16323_s1 + $0x388] sm:$0xff]   ;;  %v11508_v23 = vld [vmem:[%s16323_s1 + $0x310] sm:$0xff]   ;;  %v11522_v30 = vld [vmem:[%s16323_s1 + $0x398] sm:$0xff]  }
  0xc8   :  { %1858 = vrot.lane.b32.xlu0 %v16412_v33, %s11750_s28  ;;  %v1630_v22 = vpop.permute.xlu1 %1629  ;;  %v1628_v6 = vpop.permute.xlu0 %1627  ;;  %10738 = vmatprep.subr.bf16.mxu0 %v11488_v63  ;;  %v9785_v48 = vcombine.low %v1151_v49, %v1163_v27  ;;  %v11489_v33 = vld [vmem:[%s16323_s1 + $0x300] sm:$0xff]   ;;  %v11521_v27 = vld [vmem:[%s16323_s1 + $0x3d8] sm:$0xff]  }
  0xc9   :  { %1870 = vrot.lane.b32.xlu1 %v9775_v34, %s11750_s28  ;;  %v11487_v34 = vld [vmem:[%s16323_s1 + $0x2b8] sm:$0xff]   ;;  %v1666_v36 = vsel %vm1637_vm6, %v1628_v6, %v1630_v22  ;;  %v2303_v45 = vsel %vm1637_vm6, %v9710_v56, %v1628_v6  ;;  %v1175_v32 = vsel %vm12431_vm5, %v9619_v62, %v1174_v7 }
  0xca   :  { %10689 = vmatpush3.bf16.msra.mxu1 %v11487_v34  ;;  %v11495_v56 = vld [vmem:[%s16322_s0 + $0x34] ss:$40 sps:$4 sm:$0xff]   ;;  %v11502_v62 = vld [vmem:[%s16322_s0 + $0x38] ss:$40 sps:$4 sm:$0xff]  }
  0xcb   :  { %10802 = vmatprep.subr.bf16.mxu1 %v11493_v0  ;;  %v11492_v0 = vld [vmem:[%s16322_s0 + $0x280] ss:$40 sps:$4 sm:$0xff]  }
  0xcc   :  { %2165 = vrot.lane.b32.xlu0 %v11461_v51, %s11751_s20  ;;  %3878 = vmatmul.mubr.bf16.gmra.mrb[56].mxu0 %v2299_v3  ;;  %v896_v51 = vld [vmem:[%s16322_s0 + $0x290] sm:$0xe] }
  0xcd   :  { %2177 = vrot.lane.b32.xlu1 %v11467_v17, %s11751_s20  ;;  %3885 = vmatprep.mubr.bf16.mxu0 %v1666_v36  ;;  %v1186_v17 = vrot.slane %v13262_v2, 5  ;;  %v9622_v59 = vrot.slane %v896_v51, 9 }
  0xce   :  { %3975 = vmatmul.mubr.bf16.gmra.mrb[56].mxu1 %v1663_v11  ;;  %v11494_v11 = vld [vmem:[%s16323_s1 + $0x380] sm:$0xff]  }
  0xcf   :  { %v13661_v40 = vpop.permute.xlu1 %1633  ;;  %v1632_v38 = vpop.permute.xlu0 %1631  ;;  %v1187_v5 = vsel %vm12431_vm5, %v9622_v59, %v1186_v17  ;;  %v11531_v17 = vld [vmem:[%s16323_s1 + $0x3e0] sm:$0xff]  }
  0xd0   :  { %1868 = vrot.lane.b32.xlu0 %v16417_v35, %s11750_s28  ;;  %v1668_v57 = vsel %vm1637_vm6, %v1632_v38, %v13661_v40  ;;  %v1667_v18 = vsel %vm1637_vm6, %v1630_v22, %v1632_v38  ;;  %v9790_v6 = vcombine.low %v1175_v32, %v1187_v5  ;;  %v11513_v35 = vld [vmem:[%s16323_s1 + $0x390] sm:$0xff]   ;;  %v11518_v38 = vld [vmem:[%s16323_s1 + $0x318] sm:$0xff]   ;;  %v11540_v5 = vld [vmem:[%s16323_s1 + $0x3e8] sm:$0xff]  }
  0xd1   :  { %1880 = vrot.lane.b32.xlu1 %v9780_v39, %s11750_s28  ;;  %3982 = vmatprep.mubr.bf16.mxu1 %v1668_v57  ;;  %v11499_v39 = vld [vmem:[%s16323_s1 + $0x308] sm:$0xff]  }
  0xd2   :  { %v11500_v57 = vld [vmem:[%s16322_s0 + $0x84] ss:$40 sps:$4 sm:$0xff]  }
  0xd3   :  { %v1823_v21 = vpop.permute.xlu1 %1822 }
  0xd4   :  { %2175 = vrot.lane.b32.xlu0 %v11469_v10, %s11751_s20  ;;  %3886 = vmatmul.mubr.bf16.gmra.mrb[60].mxu0 %v2303_v45 }
  0xd5   :  { %2187 = vrot.lane.b32.xlu1 %v11475_v52, %s11751_s20 }
  0xd6   :  { %3983 = vmatmul.mubr.bf16.gmra.mrb[60].mxu1 %v1667_v18  ;;  %v11526_v18 = vld [vmem:[%s16323_s1 + $0x360] sm:$0xff]  }
  0xd7   :  { %v1566_v15 = vpop.permute.xlu0 %1565  ;;  %v13693_v25 = vpop.permute.xlu1 %1826 }
  0xd8   :  { %1878 = vrot.lane.b32.xlu0 %v16420_v20, %s11750_s28  ;;  %v2308_v2 = vsel %vm1902_vm7, %v1566_v15, %v1823_v21  ;;  %v1641_v13 = vsel %vm1637_vm6, %v16421_v43, %v1566_v15  ;;  %v11509_v20 = vld [vmem:[%s16322_s0 + $0xd4] ss:$40 sps:$4 sm:$0xff]  }
  0xd9   :  { %1890 = vrot.lane.b32.xlu1 %v9785_v48, %s11750_s28  ;;  %4023 = vmatprep.mubr.bf16.mxu0 %v2308_v2  ;;  %v11505_v48 = vld [vmem:[%s16322_s0 + $0x80] ss:$40 sps:$4 sm:$0xff]  }
  0xda   :  { %v11506_v2 = vld [vmem:[%s16322_s0 + $0x88] ss:$40 sps:$4 sm:$0xff]  }
  0xdb   :  { %v1825_v3 = vpop.permute.xlu0 %1824 }
  0xdc   :  { %2185 = vrot.lane.b32.xlu0 %v11477_v60, %s11751_s20  ;;  %4024 = vmatmul.mubr.bf16.vlgmr.msra.gmra.mrb[64].mxu0 %v1641_v13  ;;  %v1903_v22 = vsel %vm1902_vm7, %v1823_v21, %v1825_v3  ;;  %v1904_v34 = vsel %vm1902_vm7, %v1825_v3, %v13693_v25  ;;  %v1833_v36 = vpop.permute.xlu1 %1832  ;;  %v11535_v60 = vld [vmem:[%s16323_s1 + $0x368] sm:$0xff]   ;;  %v11511_v3 = vld [vmem:[%s16322_s0 + $0xd0] ss:$40 sps:$4 sm:$0xff]  }
  0xdd   :  { %2197 = vrot.lane.b32.xlu1 %v11483_v1, %s11751_s20  ;;  %10739 = vmatpush3.bf16.msra.mxu0 %v11489_v33  ;;  %v11536_v1 = vld [vmem:[%s16323_s1 + $0x328] sm:$0xff]  }
  0xde   :  { %4120 = vmatprep.mubr.bf16.mxu1 %v1904_v34  ;;  %10740 = vmatprep.subr.bf16.mxu0 %v11498_v8  ;;  %v11514_v33 = vld [vmem:[%s16322_s0 + $0x124] ss:$40 sps:$4 sm:$0xff]   ;;  %v11519_v34 = vld [vmem:[%s16322_s0 + $0x120] ss:$40 sps:$4 sm:$0xff]  }
  0xdf   :  { %4121 = vmatmul.mubr.bf16.vlgmr.msra.gmra.mrb[64].mxu1 %v1903_v22  ;;  %v11541_v13 = vld [vmem:[%s16323_s1 + $0x3a8] sm:$0xff]   ;;  %v11544_v22 = vld [vmem:[%s16323_s1 + $0x370] sm:$0xff]  }
  0xe0   :  { %1888 = vrot.lane.b32.xlu0 %v9784_v16, %s11750_s28  ;;  %10803 = vmatpush3.bf16.msra.mxu1 %v11494_v11  ;;  %v13738_v63 = vpop.permute.xlu1 %1836  ;;  %v11517_v16 = vld [vmem:[%s16323_s1 + $0x358] sm:$0xff]  }
  0xe1   :  { %1900 = vrot.lane.b32.xlu1 %v9790_v6, %s11750_s28  ;;  %10741 = vmatpush3.bf16.msra.mxu0 %v11499_v39 }
  0xe2   :  { %v1576_v10 = vpop.permute.xlu0 %1575  ;;  %10804 = vmatprep.subr.bf16.mxu1 %v11503_v61  ;;  %10742 = vmatprep.subr.bf16.mxu0 %v11507_v31  ;;  %v11547_v61 = vld [vmem:[%s16323_s1 + $0x3f0] sm:$0xff]  }
  0xe3   :  { %v2312_v58 = vsel %vm1902_vm7, %v1576_v10, %v1833_v36  ;;  %v1645_v50 = vsel %vm1637_vm6, %v13082_v14, %v1576_v10 }
  0xe4   :  { %2195 = vrot.lane.b32.xlu0 %v11485_v12, %s11751_s20  ;;  %4031 = vmatprep.mubr.bf16.mxu0 %v2312_v58  ;;  %v1843_v54 = vpop.permute.xlu1 %1842  ;;  %v11516_v12 = vld [vmem:[%s16322_s0 + $0xd8] ss:$40 sps:$4 sm:$0xff]   ;;  %v11520_v58 = vld [vmem:[%s16322_s0 + $0x128] ss:$40 sps:$4 sm:$0xff]  }
  0xe5   :  { %2207 = vrot.lane.b32.xlu1 %v11490_v41, %s11751_s20  ;;  %4032 = vmatmul.mubr.bf16.gmra.mrb[68].mxu0 %v1645_v50  ;;  %v11548_v41 = vld [vmem:[%s16323_s1 + $0x3b0] sm:$0xff]   ;;  %v11552_v50 = vld [vmem:[%s16323_s1 + $0x3f8] sm:$0xff]  }
  0xe6   :  { %v1835_v52 = vpop.permute.xlu0 %1834  ;;  %10805 = vmatpush3.bf16.msra.mxu1 %v11504_v42  ;;  %10743 = vmatpush3.bf16.msra.mxu0 %v11508_v23  ;;  %v11549_v42 = vld [vmem:[%s16323_s1 + $0x378] sm:$0xff]  }
  0xe7   :  { %v1908_v14 = vsel %vm1902_vm7, %v1835_v52, %v13738_v63  ;;  %v1907_v49 = vsel %vm1902_vm7, %v1833_v36, %v1835_v52  ;;  %10806 = vmatprep.subr.bf16.mxu1 %v11512_v4  ;;  %10744 = vmatprep.subr.bf16.mxu0 %v11517_v16  ;;  %v11545_v36 = vld [vmem:[%s16323_s1 + $0x330] sm:$0xff]   ;;  %v11523_v23 = vld [vmem:[%s16322_s0 + $0x19c] ss:$40 sps:$4 sm:$0xff]  }
  0xe8   :  { %1898 = vrot.lane.b32.xlu0 %v9789_v26, %s11750_s28  ;;  %4128 = vmatprep.mubr.bf16.mxu1 %v1908_v14  ;;  %v11497_v26 = vld [vmem:[%s16322_s0 + $0x30] ss:$40 sps:$4 sm:$0xff]  }
  0xe9   :  { %2141 = vrot.lane.b32.xlu1 %v11495_v56, %s11751_s20  ;;  %4129 = vmatmul.mubr.bf16.gmra.mrb[68].mxu1 %v1907_v49  ;;  %v13783_v45 = vpop.permute.xlu1 %1846  ;;  %v11551_v4 = vld [vmem:[%s16323_s1 + $0x338] sm:$0xff]   ;;  %v13909_v49 = vld [vmem:[%s16323_s1 + $0x480] sm:$0xff]  }
  0xea   :  { %v1586_v53 = vpop.permute.xlu0 %1585  ;;  %10807 = vmatpush3.bf16.msra.mxu1 %v11513_v35  ;;  %10745 = vmatpush3.bf16.msra.mxu0 %v11518_v38  ;;  %v11528_v35 = vld [vmem:[%s16322_s0 + $0x1ec] ss:$40 sps:$4 sm:$0xff]  }
  0xeb   :  { %v2316_v51 = vsel %vm1902_vm7, %v1586_v53, %v1843_v54  ;;  %10808 = vmatprep.subr.bf16.mxu1 %v11521_v27  ;;  %10746 = vmatprep.subr.bf16.mxu0 %v11526_v18  ;;  %v1649_v21 = vsel %vm1637_vm6, %v13194_v46, %v1586_v53  ;;  %v11525_v27 = vld [vmem:[%s16322_s0 + $0x198] ss:$40 sps:$4 sm:$0xff]  }
  0xec   :  { %2205 = vrot.lane.b32.xlu0 %v11492_v0, %s11751_s20  ;;  %4039 = vmatprep.mubr.bf16.mxu0 %v2316_v51  ;;  %v11554_v0 = vld [vmem:[%s16323_s1 + $0x3b8] sm:$0xff]   ;;  %v11530_v53 = vld [vmem:[%s16322_s0 + $0x1a0] ss:$40 sps:$4 sm:$0xff]  }
  0xed   :  { %2151 = vrot.lane.b32.xlu1 %v11500_v57, %s11751_s20  ;;  %4040 = vmatmul.mubr.bf16.gmra.mrb[72].mxu0 %v1649_v21  ;;  %v1853_v7 = vpop.permute.xlu1 %1852 }
  0xee   :  { %v1845_v59 = vpop.permute.xlu0 %1844  ;;  %10809 = vmatpush3.bf16.msra.mxu1 %v11522_v30  ;;  %10747 = vmatpush3.bf16.msra.mxu0 %v11527_v37  ;;  %v11533_v30 = vld [vmem:[%s16322_s0 + $0x1e8] ss:$40 sps:$4 sm:$0xff]  }
  0xef   :  { %v1912_v46 = vsel %vm1902_vm7, %v1845_v59, %v13783_v45  ;;  %v1911_v24 = vsel %vm1902_vm7, %v1843_v54, %v1845_v59  ;;  %10810 = vmatprep.subr.bf16.mxu1 %v11531_v17  ;;  %10748 = vmatprep.subr.bf16.mxu0 %v11535_v60 }
  0xf0   :  { %2139 = vrot.lane.b32.xlu0 %v11497_v26, %s11751_s20  ;;  %4136 = vmatprep.mubr.bf16.mxu1 %v1912_v46  ;;  %v11539_v46 = vld [vmem:[%s16322_s0 + $0x238] ss:$40 sps:$4 sm:$0xff]  }
  0xf1   :  { %2149 = vrot.lane.b32.xlu1 %v11505_v48, %s11751_s20  ;;  %4137 = vmatmul.mubr.bf16.gmra.mrb[72].mxu1 %v1911_v24  ;;  %v13822_v15 = vpop.permute.xlu1 %1856  ;;  %v11537_v48 = vld [vmem:[%s16322_s0 + $0x23c] ss:$40 sps:$4 sm:$0xff]  }
  0xf2   :  { %10811 = vmatpush3.bf16.msra.mxu1 %v11532_v29  ;;  %10749 = vmatpush3.bf16.msra.mxu0 %v11536_v1 }
  0xf3   :  { %10812 = vmatprep.subr.bf16.mxu1 %v11540_v5  ;;  %10750 = vmatprep.subr.bf16.mxu0 %v11544_v22  ;;  %v13978_v22 = vld [vmem:[%s16324_s2] ss:$0 sm:$0xff] }
  0xf4   :  { %2143 = vrot.lane.b32.xlu0 %v11502_v62, %s11751_s20  ;;  %v1596_v32 = vpop.permute.xlu0 %1595 }
  0xf5   :  { %2161 = vrot.lane.b32.xlu1 %v11509_v20, %s11751_s20  ;;  %v2320_v8 = vsel %vm1902_vm7, %v1596_v32, %v1853_v7  ;;  %v1863_v43 = vpop.permute.xlu1 %1862  ;;  %v1653_v11 = vsel %vm1637_vm6, %v13315_v47, %v1596_v32  ;;  %v11546_v20 = vld [vmem:[%s16322_s0 + $0x288] ss:$40 sps:$4 sm:$0xff]  }
  0xf6   :  { %4047 = vmatprep.mubr.bf16.mxu0 %v2320_v8  ;;  %10813 = vmatpush3.bf16.msra.mxu1 %v11541_v13 }
  0xf7   :  { %4048 = vmatmul.mubr.bf16.gmra.mrb[76].mxu0 %v1653_v11  ;;  %10814 = vmatprep.subr.bf16.mxu1 %v11547_v61 }
  0xf8   :  { %2153 = vrot.lane.b32.xlu0 %v11506_v2, %s11751_s20  ;;  %v1855_v6 = vpop.permute.xlu0 %1854  ;;  %10751 = vmatpush3.bf16.msra.mxu0 %v11545_v36 }
  0xf9   :  { %2171 = vrot.lane.b32.xlu1 %v11514_v33, %s11751_s20  ;;  %v1916_v47 = vsel %vm1902_vm7, %v1855_v6, %v13822_v15  ;;  %v1915_v39 = vsel %vm1902_vm7, %v1853_v7, %v1855_v6  ;;  %10752 = vmatprep.subr.bf16.mxu0 %v11549_v42  ;;  %v11534_v7 = vld [vmem:[%s16322_s0 + $0x1f0] ss:$40 sps:$4 sm:$0xff]   ;;  %v11550_v33 = vld [vmem:[%s16322_s0 + $0x240] ss:$40 sps:$4 sm:$0xff]  }
  0xfa   :  { %4144 = vmatprep.mubr.bf16.mxu1 %v1916_v47  ;;  %v13867_v31 = vpop.permute.xlu1 %1866  ;;  %10815 = vmatpush3.bf16.msra.mxu1 %v11548_v41 }
  0xfb   :  { %4145 = vmatmul.mubr.bf16.gmra.mrb[76].mxu1 %v1915_v39  ;;  %10816 = vmatprep.subr.bf16.mxu1 %v11552_v50 }
  0xfc   :  { %2159 = vrot.lane.b32.xlu0 %v11511_v3, %s11751_s20  ;;  %10753 = vmatpush3.bf16.msra.mxu0 %v11551_v4 }
  0xfd   :  { %v1606_v10 = vpop.permute.xlu0 %1605  ;;  %2169 = vrot.lane.b32.xlu1 %v11519_v34, %s11751_s20 }
  0xfe   :  { %v2324_v16 = vsel %vm1902_vm7, %v1606_v10, %v1863_v43  ;;  %v1873_v56 = vpop.permute.xlu1 %1872  ;;  %v1657_v54 = vsel %vm1637_vm6, %v13425_v9, %v1606_v10  ;;  %v11555_v9 = vld [vmem:[%s16323_s1 + $0x440] sm:$0xff]   ;;  %10817 = vmatpush3.bf16.msra.mxu1 %v11554_v0 }
  0xff   :  { %4055 = vmatprep.mubr.bf16.mxu0 %v2324_v16  ;;  %10866 = vmatprep.subr.bf16.mxu0 %v11555_v9 }
 0x100   :  { %2163 = vrot.lane.b32.xlu0 %v11516_v12, %s11751_s20  ;;  %4056 = vmatmul.mubr.bf16.gmra.mrb[80].mxu0 %v1657_v54  ;;  %v11558_v54 = vld [vmem:[%s16323_s1 + $0x448] sm:$0xff]  }
 0x101   :  { %v1865_v52 = vpop.permute.xlu0 %1864  ;;  %2181 = vrot.lane.b32.xlu1 %v11523_v23, %s11751_s20  ;;  %11184 = vmatprep.subr.bf16.mxu1 %v13909_v49 }
 0x102   :  { %v1920_v38 = vsel %vm1902_vm7, %v1865_v52, %v13867_v31  ;;  %v1919_v14 = vsel %vm1902_vm7, %v1863_v43, %v1865_v52 }
 0x103   :  { %4152 = vmatprep.mubr.bf16.mxu1 %v1920_v38  ;;  %v13915_v57 = vpop.permute.xlu1 %1876 }
 0x104   :  { %2173 = vrot.lane.b32.xlu0 %v11520_v58, %s11751_s20  ;;  %4153 = vmatmul.mubr.bf16.gmra.mrb[80].mxu1 %v1919_v14  ;;  %v11556_v58 = vld [vmem:[%s16323_s1 + $0x400] sm:$0xff]   ;;  %v11559_v14 = vld [vmem:[%s16323_s1 + $0x408] sm:$0xff]  }
 0x105   :  { %2191 = vrot.lane.b32.xlu1 %v11528_v35, %s11751_s20 }
 0x107   :  { %v1616_v18 = vpop.permute.xlu0 %1615  ;;  %v1883_v26 = vpop.permute.xlu1 %1882 }
 0x108   :  { %2179 = vrot.lane.b32.xlu0 %v11525_v27, %s11751_s20  ;;  %v2328_v37 = vsel %vm1902_vm7, %v1616_v18, %v1873_v56  ;;  %v1661_v51 = vsel %vm1637_vm6, %v13519_v19, %v1616_v18  ;;  %v11542_v19 = vld [vmem:[%s16322_s0 + $0x28c] ss:$40 sps:$4 sm:$0xff]  }
 0x109   :  { %4063 = vmatprep.mubr.bf16.mxu0 %v2328_v37  ;;  %2189 = vrot.lane.b32.xlu1 %v11533_v30, %s11751_s20  ;;  %v11560_v37 = vld [vmem:[%s16323_s1 + $0x488] sm:$0xff]  }
 0x10a   :  { %4064 = vmatmul.mubr.bf16.gmra.mrb[84].mxu0 %v1661_v51 }
 0x10c   :  { %v1875_v21 = vpop.permute.xlu0 %1874  ;;  %2183 = vrot.lane.b32.xlu0 %v11530_v53, %s11751_s20 }
 0x10d   :  { %v1924_v17 = vsel %vm1902_vm7, %v1875_v21, %v13915_v57  ;;  %v1923_v62 = vsel %vm1902_vm7, %v1873_v56, %v1875_v21  ;;  %2201 = vrot.lane.b32.xlu1 %v11537_v48, %s11751_s20  ;;  %v11561_v21 = vld [vmem:[%s16323_s1 + $0x450] sm:$0xff]  }
 0x10e   :  { %4160 = vmatprep.mubr.bf16.mxu1 %v1924_v17  ;;  %v13944_v59 = vpop.permute.xlu1 %1886 }
 0x10f   :  { %4161 = vmatmul.mubr.bf16.gmra.mrb[84].mxu1 %v1923_v62 }
 0x110   :  { %2193 = vrot.lane.b32.xlu0 %v11534_v7, %s11751_s20  ;;  %v1626_v29 = vpop.permute.xlu0 %1625 }
 0x111   :  { %v2332_v24 = vsel %vm1902_vm7, %v1626_v29, %v1883_v26  ;;  %2211 = vrot.lane.b32.xlu1 %v11542_v19, %s11751_s20  ;;  %v1665_v60 = vsel %vm1637_vm6, %v13599_v44, %v1626_v29  ;;  %v11553_v44 = vld [vmem:[%s16322_s0 + $0x290] ss:$40 sps:$4 sm:$0xff]  }
 0x112   :  { %4071 = vmatprep.mubr.bf16.mxu0 %v2332_v24  ;;  %v1893_v1 = vpop.permute.xlu1 %1892  ;;  %v11562_v29 = vld [vmem:[%s16323_s1 + $0x410] sm:$0xff]  }
 0x113   :  { %4072 = vmatmul.mubr.bf16.gmra.mrb[88].mxu0 %v1665_v60  ;;  %v11563_v60 = vld [vmem:[%s16323_s1 + $0x458] sm:$0xff]  }
 0x114   :  { %2199 = vrot.lane.b32.xlu0 %v11539_v46, %s11751_s20 }
 0x115   :  { %v1885_v2 = vpop.permute.xlu0 %1884  ;;  %2209 = vrot.lane.b32.xlu1 %v11546_v20, %s11751_s20 }
 0x116   :  { %v1928_v32 = vsel %vm1902_vm7, %v1885_v2, %v13944_v59  ;;  %v1927_v5 = vsel %vm1902_vm7, %v1883_v26, %v1885_v2 }
 0x117   :  { %4168 = vmatprep.mubr.bf16.mxu1 %v1928_v32  ;;  %v13968_v8 = vpop.permute.xlu1 %1896 }
 0x118   :  { %4169 = vmatmul.mubr.bf16.gmra.mrb[88].mxu1 %v1927_v5  ;;  %2203 = vrot.lane.b32.xlu0 %v11550_v33, %s11751_s20  ;;  %v11565_v5 = vld [vmem:[%s16323_s1 + $0x490] sm:$0xff]  }
 0x119   :  { %v10370_v6 = vpop.f32.mrb[0].mxu0 }
 0x11a   :  { %v1636_v43 = vpop.permute.xlu0 %1635  ;;  %v10371_v36 = vpop.f32.mrb[1].mxu0 }
 0x11b   :  { %v2336_v13 = vsel %vm1902_vm7, %v1636_v43, %v1893_v1  ;;  %v1831_v3 = vpop.permute.xlu1 %1830  ;;  %v1669_v11 = vsel %vm1637_vm6, %v13661_v40, %v1636_v43  ;;  %v10372_v12 = vadd.f32 %v10371_v36, %v10370_v6  ;;  %v10373_v40 = vpop.f32.mrb[2].mxu0  ;;  %v11564_v36 = vld [vmem:[%s16323_s1 + $0x418] sm:$0xff]  }
 0x11c   :  { %4079 = vmatprep.mubr.bf16.mxu0 %v2336_v13  ;;  %2213 = vrot.lane.b32.xlu0 %v11553_v44, %s11751_s20  ;;  %v10374_v41 = vpop.f32.mrb[3].mxu0  ;;  %v10434_v23 = vpop.f32.mrb[0].mxu1 }
 0x11d   :  { %4080 = vmatmul.mubr.bf16.gmra.mrb[92].mxu0 %v1669_v11  ;;  %v3638_v42 = vadd.f32 %v10372_v12, %v13978_v22  ;;  %v10375_v10 = vadd.f32 %v10374_v41, %v10373_v40  ;;  %v10435_v16 = vpop.f32.mrb[1].mxu1 }
 0x11e   :  { %v1895_v34 = vpop.permute.xlu0 %1894  ;;  %v10436_v0 = vadd.f32 %v10435_v16, %v10434_v23  ;;  %v10437_v52 = vpop.f32.mrb[2].mxu1 }
 0x11f   :  { %v1932_v47 = vsel %vm1902_vm7, %v1895_v34, %v13968_v8  ;;  %v1931_v39 = vsel %vm1902_vm7, %v1893_v1, %v1895_v34  ;;  %v13983_v61 = vpop.permute.xlu1 %2137  ;;  %v3641_v35 = vadd.f32 %v10375_v10, %v13978_v22  ;;  %v10438_v38 = vpop.f32.mrb[3].mxu1 }
 0x120   :  { %4176 = vmatprep.mubr.bf16.mxu1 %v1932_v47  ;;  %v13999_v27 = vadd.f32 %v10436_v0, %v3638_v42  ;;  %v10439_v30 = vadd.f32 %v10438_v38, %v10437_v52  ;;  %v11566_v42 = vld [vmem:[%s16323_s1 + $0x460] sm:$0xff]  }
 0x121   :  { %4177 = vmatmul.mubr.bf16.gmra.mrb[92].mxu1 %v1931_v39 }
 0x122   :  { %v1829_v4 = vpop.permute.xlu0 %1828  ;;  %v10376_v18 = vpop.f32.mrb[4].mxu0  ;;  %v14012_v7 = vadd.f32 %v10439_v30, %v3641_v35 }
 0x123   :  { %v1906_v56 = vsel %vm1902_vm7, %v1829_v4, %v1831_v3  ;;  %v1841_v50 = vpop.permute.xlu1 %1840  ;;  %v1905_v9 = vsel %vm1902_vm7, %v13693_v25, %v1829_v4  ;;  %v10377_v26 = vpop.f32.mrb[5].mxu0 }
 0x124   :  { %4217 = vmatprep.mubr.bf16.mxu0 %v1906_v56  ;;  %v10378_v17 = vadd.f32 %v10377_v26, %v10376_v18  ;;  %v10379_v62 = vpop.f32.mrb[6].mxu0  ;;  %v11569_v18 = vld [vmem:[%s16323_s1 + $0x468] sm:$0xff]   ;;  %v11571_v26 = vld [vmem:[%s16323_s1 + $0x4a0] sm:$0xff]  }
 0x125   :  { %4218 = vmatmul.mubr.bf16.vlgmr.msra.gmra.mrb[96].mxu0 %v1905_v9  ;;  %v10380_v19 = vpop.f32.mrb[7].mxu0 }
 0x126   :  { %v2136_v53 = vpop.permute.xlu0 %2135  ;;  %10867 = vmatpush3.bf16.msra.mxu0 %v11556_v58  ;;  %v10381_v24 = vadd.f32 %v10380_v19, %v10379_v62  ;;  %v3646_v1 = vadd.f32 %v10378_v17, %v13978_v22  ;;  %v11568_v58 = vld [vmem:[%s16323_s1 + $0x498] sm:$0xff]   ;;  %v11570_v62 = vld [vmem:[%s16323_s1 + $0x428] sm:$0xff]  }
 0x127   :  { %v2341_v25 = vsel %vm2215_vm8, %v1831_v3, %v2136_v53  ;;  %v2216_v51 = vsel %vm2215_vm8, %v2136_v53, %v13983_v61  ;;  %v14007_v48 = vpop.permute.xlu1 %2147  ;;  %10868 = vmatprep.subr.bf16.mxu0 %v11558_v54  ;;  %v11567_v54 = vld [vmem:[%s16323_s1 + $0x420] sm:$0xff]  }
 0x128   :  { %4314 = vmatprep.mubr.bf16.mxu1 %v2216_v51  ;;  %v10440_v46 = vpop.f32.mrb[4].mxu1 }
 0x129   :  { %4315 = vmatmul.mubr.bf16.vlgmr.msra.gmra.mrb[96].mxu1 %v2341_v25  ;;  %v10441_v2 = vpop.f32.mrb[5].mxu1 }
 0x12a   :  { %v1839_v20 = vpop.permute.xlu0 %1838  ;;  %11185 = vmatpush3.bf16.msra.mxu1 %v13909_v49  ;;  %10869 = vmatpush3.bf16.msra.mxu0 %v11559_v14  ;;  %v3649_v49 = vadd.f32 %v10381_v24, %v13978_v22  ;;  %v10443_v44 = vpop.f32.mrb[6].mxu1  ;;  %v10442_v13 = vadd.f32 %v10441_v2, %v10440_v46 }
 0x12b   :  { %v1910_v33 = vsel %vm1902_vm7, %v1839_v20, %v1841_v50  ;;  %v14023_v32 = vpop.permute.xlu1 %1850  ;;  %11186 = vmatprep.subr.bf16.mxu1 %v11560_v37  ;;  %10870 = vmatprep.subr.bf16.mxu0 %v11561_v21  ;;  %v1909_v43 = vsel %vm1902_vm7, %v13738_v63, %v1839_v20  ;;  %v10444_v3 = vpop.f32.mrb[7].mxu1 }
 0x12c   :  { %4225 = vmatprep.mubr.bf16.mxu0 %v1910_v33  ;;  %v10445_v11 = vadd.f32 %v10444_v3, %v10443_v44  ;;  %v14034_v47 = vadd.f32 %v10442_v13, %v3646_v1  ;;  %v11572_v1 = vld [vmem:[%s16323_s1 + $0x470] sm:$0xff]   ;;  %v11576_v33 = vld [vmem:[%s16323_s1 + $0x4a8] sm:$0xff]  }
 0x12d   :  { %4226 = vmatmul.mubr.bf16.gmra.mrb[100].mxu0 %v1909_v43  ;;  %v10382_v6 = vpop.f32.mrb[8].mxu0  ;;  %v11573_v13 = vld [vmem:[%s16323_s1 + $0x430] sm:$0xff]  }
 0x12e   :  { %v2146_v34 = vpop.permute.xlu0 %2145  ;;  %11187 = vmatpush3.bf16.msra.mxu1 %v11560_v37  ;;  %10871 = vmatpush3.bf16.msra.mxu0 %v11562_v29  ;;  %v10383_v39 = vpop.f32.mrb[9].mxu0  ;;  %v14041_v41 = vadd.f32 %v10445_v11, %v3649_v49 }
 0x12f   :  { %v2220_v12 = vsel %vm2215_vm8, %v2146_v34, %v14007_v48  ;;  %v2345_v63 = vsel %vm2215_vm8, %v1841_v50, %v2146_v34  ;;  %v14039_v40 = vpop.permute.xlu1 %2157  ;;  %10872 = vmatprep.subr.bf16.mxu0 %v11563_v60  ;;  %11188 = vmatprep.subr.bf16.mxu1 %v11565_v5  ;;  %v10385_v23 = vpop.f32.mrb[10].mxu0  ;;  %v10384_v10 = vadd.f32 %v10383_v39, %v10382_v6  ;;  %v11574_v39 = vld [vmem:[%s16323_s1 + $0x478] sm:$0xff]  }
 0x130   :  { %4322 = vmatprep.mubr.bf16.mxu1 %v2220_v12  ;;  %v10386_v4 = vpop.f32.mrb[11].mxu0 }
 0x131   :  { %4323 = vmatmul.mubr.bf16.gmra.mrb[100].mxu1 %v2345_v63  ;;  %v10446_v16 = vpop.f32.mrb[8].mxu1  ;;  %v10387_v56 = vadd.f32 %v10386_v4, %v10385_v23  ;;  %v3654_v35 = vadd.f32 %v10384_v10, %v13978_v22 }
 0x132   :  { %v1849_v50 = vpop.permute.xlu0 %1848  ;;  %10873 = vmatpush3.bf16.msra.mxu0 %v11564_v36  ;;  %11189 = vmatpush3.bf16.msra.mxu1 %v11565_v5  ;;  %v10447_v0 = vpop.f32.mrb[9].mxu1 }
 0x133   :  { %v1914_v52 = vsel %vm1902_vm7, %v1849_v50, %v14023_v32  ;;  %v14055_v9 = vpop.permute.xlu1 %1860  ;;  %10874 = vmatprep.subr.bf16.mxu0 %v11566_v42  ;;  %v3657_v38 = vadd.f32 %v10387_v56, %v13978_v22  ;;  %v10448_v14 = vadd.f32 %v10447_v0, %v10446_v16  ;;  %v10449_v30 = vpop.f32.mrb[10].mxu1  ;;  %v1913_v53 = vsel %vm1902_vm7, %v13783_v45, %v1849_v50  ;;  %v11575_v16 = vld [vmem:[%s16323_s1 + $0x438] sm:$0xff]  }
 0x134   :  { %4233 = vmatprep.mubr.bf16.mxu0 %v1914_v52  ;;  %11190 = vmatprep.subr.bf16.mxu1 %v11568_v58  ;;  %v10450_v37 = vpop.f32.mrb[11].mxu1 }
 0x135   :  { %4234 = vmatmul.mubr.bf16.gmra.mrb[104].mxu0 %v1913_v53  ;;  %v14066_v25 = vadd.f32 %v10448_v14, %v3654_v35  ;;  %v10451_v51 = vadd.f32 %v10450_v37, %v10449_v30  ;;  %v10388_v21 = vpop.f32.mrb[12].mxu0 }
 0x136   :  { %v2156_v17 = vpop.permute.xlu0 %2155  ;;  %10875 = vmatpush3.bf16.msra.mxu0 %v11567_v54  ;;  %11191 = vmatpush3.bf16.msra.mxu1 %v11568_v58  ;;  %v10389_v19 = vpop.f32.mrb[13].mxu0 }
 0x137   :  { %v2224_v45 = vsel %vm2215_vm8, %v2156_v17, %v14039_v40  ;;  %v2349_v29 = vsel %vm2215_vm8, %v14023_v32, %v2156_v17  ;;  %v14075_v46 = vpop.permute.xlu1 %2167  ;;  %v14077_v24 = vadd.f32 %v10451_v51, %v3657_v38  ;;  %10876 = vmatprep.subr.bf16.mxu0 %v11569_v18  ;;  %v10390_v20 = vadd.f32 %v10389_v19, %v10388_v21  ;;  %v10391_v60 = vpop.f32.mrb[14].mxu0 }
 0x138   :  { %4330 = vmatprep.mubr.bf16.mxu1 %v2224_v45  ;;  %v10392_v2 = vpop.f32.mrb[15].mxu0  ;;  %11192 = vmatprep.subr.bf16.mxu1 %v11571_v26 }
 0x139   :  { %4331 = vmatmul.mubr.bf16.gmra.mrb[104].mxu1 %v2349_v29  ;;  %v3662_v32 = vadd.f32 %v10390_v20, %v13978_v22  ;;  %v10393_v49 = vadd.f32 %v10392_v2, %v10391_v60 }
 0x13a   :  { %v1859_v44 = vpop.permute.xlu0 %1858  ;;  %10877 = vmatpush3.bf16.msra.mxu0 %v11570_v62  ;;  %11193 = vmatpush3.bf16.msra.mxu1 %v11571_v26 }
 0x13b   :  { %v10452_v5 = vpop.f32.mrb[12].mxu1  ;;  %v1918_v3 = vsel %vm1902_vm7, %v1859_v44, %v14055_v9  ;;  %v1871_v11 = vpop.permute.xlu1 %1870  ;;  %v3665_v6 = vadd.f32 %v10393_v49, %v13978_v22  ;;  %10878 = vmatprep.subr.bf16.mxu0 %v11572_v1  ;;  %v1917_v12 = vsel %vm1902_vm7, %v13822_v15, %v1859_v44  ;;  %11194 = vmatprep.subr.bf16.mxu1 %v11576_v33 }
 0x13c   :  { %v10453_v43 = vpop.f32.mrb[13].mxu1  ;;  %4241 = vmatprep.mubr.bf16.mxu0 %v1918_v3 }
 0x13d   :  { %v10454_v34 = vadd.f32 %v10453_v43, %v10452_v5  ;;  %v10455_v36 = vpop.f32.mrb[14].mxu1  ;;  %4242 = vmatmul.mubr.bf16.gmra.mrb[108].mxu0 %v1917_v12  ;;  %v10394_v10 = vpop.f32.mrb[16].mxu0 }
 0x13e   :  { %v10456_v63 = vpop.f32.mrb[15].mxu1  ;;  %v2166_v4 = vpop.permute.xlu0 %2165  ;;  %10879 = vmatpush3.bf16.msra.mxu0 %v11573_v13  ;;  %11195 = vmatpush3.bf16.msra.mxu1 %v11576_v33 }
 0x13f   :  { %v14097_v42 = vadd.f32 %v10454_v34, %v3662_v32  ;;  %v10457_v23 = vadd.f32 %v10456_v63, %v10455_v36  ;;  %v10395_v58 = vpop.f32.mrb[17].mxu0  ;;  %v2228_v56 = vsel %vm2215_vm8, %v2166_v4, %v14075_v46  ;;  %v2353_v15 = vsel %vm2215_vm8, %v14055_v9, %v2166_v4  ;;  %v14106_v50 = vpop.permute.xlu1 %2177  ;;  %10880 = vmatprep.subr.bf16.mxu0 %v11574_v39 }
 0x140   :  { %v10396_v35 = vadd.f32 %v10395_v58, %v10394_v10  ;;  %v10397_v0 = vpop.f32.mrb[18].mxu0  ;;  %4338 = vmatprep.mubr.bf16.mxu1 %v2228_v56 }
 0x141   :  { %v14108_v54 = vadd.f32 %v10457_v23, %v3665_v6  ;;  %v10398_v52 = vpop.f32.mrb[19].mxu0  ;;  %4339 = vmatmul.mubr.bf16.gmra.mrb[108].mxu1 %v2353_v15 }
 0x142   :  { %v3670_v38 = vadd.f32 %v10396_v35, %v13978_v22  ;;  %v10399_v30 = vadd.f32 %v10398_v52, %v10397_v0  ;;  %v1869_v18 = vpop.permute.xlu0 %1868  ;;  %10881 = vmatpush3.bf16.msra.mxu0 %v11575_v16 }
 0x143   :  { %v10458_v14 = vpop.f32.mrb[16].mxu1  ;;  %v1922_v37 = vsel %vm1902_vm7, %v1869_v18, %v1871_v11  ;;  %v1881_v9 = vpop.permute.xlu1 %1880  ;;  %v1921_v17 = vsel %vm1902_vm7, %v13867_v31, %v1869_v18 }
 0x144   :  { %v10459_v53 = vpop.f32.mrb[17].mxu1  ;;  %v3673_v26 = vadd.f32 %v10399_v30, %v13978_v22  ;;  %4249 = vmatprep.mubr.bf16.mxu0 %v1922_v37 }
 0x145   :  { %v10460_v51 = vadd.f32 %v10459_v53, %v10458_v14  ;;  %v10461_v21 = vpop.f32.mrb[18].mxu1  ;;  %4250 = vmatmul.mubr.bf16.gmra.mrb[112].mxu0 %v1921_v17  ;;  %v10400_v29 = vpop.f32.mrb[20].mxu0 }
 0x146   :  { %v10462_v62 = vpop.f32.mrb[19].mxu1  ;;  %v2176_v20 = vpop.permute.xlu0 %2175 }
 0x147   :  { %v14115_v19 = vadd.f32 %v10460_v51, %v3670_v38  ;;  %v10463_v45 = vadd.f32 %v10462_v62, %v10461_v21  ;;  %v10401_v60 = vpop.f32.mrb[21].mxu0  ;;  %v2232_v1 = vsel %vm2215_vm8, %v2176_v20, %v14106_v50  ;;  %v2357_v2 = vsel %vm2215_vm8, %v1871_v11, %v2176_v20  ;;  %v14120_v33 = vpop.permute.xlu1 %2187 }
 0x148   :  { %v10402_v5 = vadd.f32 %v10401_v60, %v10400_v29  ;;  %v10403_v49 = vpop.f32.mrb[22].mxu0  ;;  %4346 = vmatprep.mubr.bf16.mxu1 %v2232_v1 }
 0x149   :  { %v14122_v32 = vadd.f32 %v10463_v45, %v3673_v26  ;;  %v10404_v31 = vpop.f32.mrb[23].mxu0  ;;  %4347 = vmatmul.mubr.bf16.gmra.mrb[112].mxu1 %v2357_v2 }
 0x14a   :  { %v3678_v44 = vadd.f32 %v10402_v5, %v13978_v22  ;;  %v10405_v13 = vadd.f32 %v10404_v31, %v10403_v49  ;;  %v1879_v3 = vpop.permute.xlu0 %1878 }
 0x14b   :  { %v10464_v43 = vpop.f32.mrb[20].mxu1  ;;  %v1926_v34 = vsel %vm1902_vm7, %v1879_v3, %v1881_v9  ;;  %v1891_v36 = vpop.permute.xlu1 %1890  ;;  %v1925_v63 = vsel %vm1902_vm7, %v13915_v57, %v1879_v3 }
 0x14c   :  { %v10465_v6 = vpop.f32.mrb[21].mxu1  ;;  %v3681_v11 = vadd.f32 %v10405_v13, %v13978_v22  ;;  %4257 = vmatprep.mubr.bf16.mxu0 %v1926_v34 }
 0x14d   :  { %v10466_v39 = vadd.f32 %v10465_v6, %v10464_v43  ;;  %v10467_v12 = vpop.f32.mrb[22].mxu1  ;;  %4258 = vmatmul.mubr.bf16.gmra.mrb[116].mxu0 %v1925_v63  ;;  %v10406_v58 = vpop.f32.mrb[24].mxu0 }
 0x14e   :  { %v10468_v23 = vpop.f32.mrb[23].mxu1  ;;  %v2186_v16 = vpop.permute.xlu0 %2185 }
 0x14f   :  { %v14129_v10 = vadd.f32 %v10466_v39, %v3678_v44  ;;  %v10469_v4 = vadd.f32 %v10468_v23, %v10467_v12  ;;  %v10407_v56 = vpop.f32.mrb[25].mxu0  ;;  %v2236_v15 = vsel %vm2215_vm8, %v2186_v16, %v14120_v33  ;;  %v2361_v35 = vsel %vm2215_vm8, %v1881_v9, %v2186_v16  ;;  %v14134_v0 = vpop.permute.xlu1 %2197 }
 0x150   :  { %v10408_v38 = vadd.f32 %v10407_v56, %v10406_v58  ;;  %v10409_v14 = vpop.f32.mrb[26].mxu0  ;;  %4354 = vmatprep.mubr.bf16.mxu1 %v2236_v15 }
 0x151   :  { %v14136_v52 = vadd.f32 %v10469_v4, %v3681_v11  ;;  %v10410_v57 = vpop.f32.mrb[27].mxu0  ;;  %4355 = vmatmul.mubr.bf16.gmra.mrb[116].mxu1 %v2361_v35 }
 0x152   :  { %v3686_v30 = vadd.f32 %v10408_v38, %v13978_v22  ;;  %v10411_v53 = vadd.f32 %v10410_v57, %v10409_v14  ;;  %v1889_v37 = vpop.permute.xlu0 %1888 }
 0x153   :  { %v10470_v18 = vpop.f32.mrb[24].mxu1  ;;  %v1930_v51 = vsel %vm1902_vm7, %v1889_v37, %v1891_v36  ;;  %v1901_v21 = vpop.permute.xlu1 %1900  ;;  %v1929_v45 = vsel %vm1902_vm7, %v13944_v59, %v1889_v37 }
 0x154   :  { %v10471_v26 = vpop.f32.mrb[25].mxu1  ;;  %v3689_v9 = vadd.f32 %v10411_v53, %v13978_v22  ;;  %4265 = vmatprep.mubr.bf16.mxu0 %v1930_v51 }
 0x155   :  { %v10472_v17 = vadd.f32 %v10471_v26, %v10470_v18  ;;  %v10473_v62 = vpop.f32.mrb[26].mxu1 }
 0x156   :  { %v10474_v29 = vpop.f32.mrb[27].mxu1 }
 0x157   :  { %16 = vsyncpa [#allocation4], 0  ;;  %4266 = vmatmul.mubr.bf16.gmra.mrb[120].mxu0 %v1929_v45  ;;  %v14143_v20 = vadd.f32 %v10472_v17, %v3686_v30  ;;  %v10475_v60 = vadd.f32 %v10474_v29, %v10473_v62  ;;  %v2196_v1 = vpop.permute.xlu0 %2195  ;;  %v10412_v2 = vpop.f32.mrb[28].mxu0  ;;  %vm3578_vm9 = vcmask 785408   ;;  %vm40_vm10 = vcmask 519168   ;;  %s11753_s15 = smov 64  }
 0x158   :  { %v2240_v5 = vsel %vm2215_vm8, %v2196_v1, %v14134_v0  ;;  %v2365_v49 = vsel %vm2215_vm8, %v1891_v36, %v2196_v1  ;;  %v14148_v31 = vpop.permute.xlu1 %2207  ;;  %v10413_v43 = vpop.f32.mrb[29].mxu0  ;;  %vm42_vm11 = vcmask 516096   ;;  %vm4815_vm12 = vsmask.f32 7938 }
 0x159   :  { %v14150_v44 = vadd.f32 %v10475_v60, %v3689_v9  ;;  %4362 = vmatprep.mubr.bf16.mxu1 %v2240_v5  ;;  %v10414_v59 = vadd.f32 %v10413_v43, %v10412_v2  ;;  %v10415_v13 = vpop.f32.mrb[30].mxu0  ;;  %vm4821_vm13 = vsmask.f32 256  ;;  %vm14420_vm14 = vmand %vm40_vm10, %vm4815_vm12  ;;  %vm5724_vm0 = vcmask 523264  }
 0x15a   :  { %4363 = vmatmul.mubr.bf16.gmra.mrb[120].mxu1 %v2365_v49  ;;  %v10416_v6 = vpop.f32.mrb[31].mxu0  ;;  %vm14426_vm15 = vmand %vm42_vm11, %vm4821_vm13  ;;  %vm9542_vm1 = vcmask 130048  }
 0x15b   :  { %v10476_v3 = vpop.f32.mrb[28].mxu1  ;;  %v1899_v34 = vpop.permute.xlu0 %1898  ;;  %v3694_v11 = vadd.f32 %v10414_v59, %v13978_v22  ;;  %v10417_v39 = vadd.f32 %v10416_v6, %v10415_v13 }
 0x15c   :  { %v10477_v12 = vpop.f32.mrb[29].mxu1  ;;  %v1934_v63 = vsel %vm1902_vm7, %v1899_v34, %v1901_v21  ;;  %v2142_v23 = vpop.permute.xlu1 %2141  ;;  %v1933_v58 = vsel %vm1902_vm7, %v13968_v8, %v1899_v34 }
 0x15d   :  { %v10478_v36 = vadd.f32 %v10477_v12, %v10476_v3  ;;  %v10479_v4 = vpop.f32.mrb[30].mxu1  ;;  %4273 = vmatprep.mubr.bf16.mxu0 %v1934_v63  ;;  %v3697_v16 = vadd.f32 %v10417_v39, %v13978_v22 }
 0x15e   :  { %v10480_v56 = vpop.f32.mrb[31].mxu1 }
 0x15f   :  { %4274 = vmatmul.mubr.bf16.gmra.mrb[124].mxu0 %v1933_v58  ;;  %v14157_v15 = vadd.f32 %v10478_v36, %v3694_v11  ;;  %v10481_v35 = vadd.f32 %v10480_v56, %v10479_v4  ;;  %v2206_v38 = vpop.permute.xlu0 %2205 }
 0x160   :  { %v2244_v14 = vsel %vm2215_vm8, %v2206_v38, %v14148_v31  ;;  %v2369_v57 = vsel %vm2215_vm8, %v1901_v21, %v2206_v38  ;;  %v2152_v30 = vpop.permute.xlu1 %2151 }
 0x161   :  { %v14162_v18 = vadd.f32 %v10481_v35, %v3697_v16  ;;  %4370 = vmatprep.mubr.bf16.mxu1 %v2244_v14 }
 0x162   :  { %4371 = vmatmul.mubr.bf16.gmra.mrb[124].mxu1 %v2369_v57 }
 0x163   :  { %v2140_v53 = vpop.permute.xlu0 %2139 }
 0x164   :  { %v2218_v8 = vsel %vm2215_vm8, %v2140_v53, %v2142_v23  ;;  %v2150_v22 = vpop.permute.xlu1 %2149  ;;  %v2217_v37 = vsel %vm2215_vm8, %v13983_v61, %v2140_v53 }
 0x165   :  { %4411 = vmatprep.mubr.bf16.mxu0 %v2218_v8  ;;  %v2222_v26 = vsel %vm2215_vm8, %v2150_v22, %v2152_v30  ;;  %v2221_v61 = vsel %vm2215_vm8, %v14007_v48, %v2150_v22 }
 0x167   :  { %4412 = vmatmul.mubr.bf16.vlgmr.msra.gmra.mrb[128].mxu0 %v2217_v37  ;;  %v2144_v51 = vpop.permute.xlu0 %2143 }
 0x168   :  { %4419 = vmatprep.mubr.bf16.mxu0 %v2222_v26  ;;  %v2219_v21 = vsel %vm2215_vm8, %v2142_v23, %v2144_v51  ;;  %v2162_v9 = vpop.permute.xlu1 %2161 }
 0x169   :  { %11196 = vmatprep.mubr.msk.bf16.mxu1 %vm3578_vm9, %v2219_v21 }
 0x16b   :  { %v2154_v17 = vpop.permute.xlu0 %2153 }
 0x16c   :  { %v2223_v62 = vsel %vm2215_vm8, %v2152_v30, %v2154_v17  ;;  %v2172_v45 = vpop.permute.xlu1 %2171 }
 0x16d   :  { %11197 = vmatmul.mubr.msk.bf16.vlgmr.msra.gmra.mrb[128].mxu1 %vm3578_vm9, %v2223_v62  ;;  %v10562_v5 = vpop.f32.mrb[32].mxu1 }
 0x16e   :  { %v10563_v59 = vpop.f32.mrb[33].mxu1 }
 0x16f   :  { %4420 = vmatmul.mubr.bf16.gmra.mrb[132].mxu0 %v2221_v61  ;;  %v2160_v29 = vpop.permute.xlu0 %2159  ;;  %v10498_v2 = vpop.f32.mrb[32].mxu0  ;;  %v10564_v6 = vadd.f32 %v10563_v59, %v10562_v5 }
 0x170   :  { %v2226_v60 = vsel %vm2215_vm8, %v2160_v29, %v2162_v9  ;;  %v2170_v1 = vpop.permute.xlu1 %2169  ;;  %v10499_v49 = vpop.f32.mrb[33].mxu0  ;;  %v2225_v23 = vsel %vm2215_vm8, %v14039_v40, %v2160_v29 }
 0x171   :  { %4427 = vmatprep.mubr.bf16.mxu0 %v2226_v60  ;;  %v10500_v43 = vadd.f32 %v10499_v49, %v10498_v2  ;;  %v10501_v13 = vpop.f32.mrb[34].mxu0  ;;  %v10565_v34 = vpop.f32.mrb[34].mxu1  ;;  %v2230_v48 = vsel %vm2215_vm8, %v2170_v1, %v2172_v45  ;;  %v2229_v17 = vsel %vm2215_vm8, %v14075_v46, %v2170_v1 }
 0x172   :  { %v10502_v63 = vpop.f32.mrb[35].mxu0  ;;  %v10566_v4 = vpop.f32.mrb[35].mxu1 }
 0x173   :  { %v2164_v3 = vpop.permute.xlu0 %2163  ;;  %v3832_v12 = vadd.f32 %v10500_v43, %v13999_v27  ;;  %v10503_v36 = vadd.f32 %v10502_v63, %v10501_v13  ;;  %v10567_v16 = vadd.f32 %v10566_v4, %v10565_v34 }
 0x174   :  { %v2227_v11 = vsel %vm2215_vm8, %v2162_v9, %v2164_v3  ;;  %v2182_v39 = vpop.permute.xlu1 %2181 }
 0x175   :  { %11200 = vmatprep.mubr.msk.bf16.mxu1 %vm3578_vm9, %v2227_v11  ;;  %v14181_v58 = vadd.f32 %v10564_v6, %v3832_v12  ;;  %v3835_v35 = vadd.f32 %v10503_v36, %v14012_v7 }
 0x177   :  { %4428 = vmatmul.mubr.bf16.gmra.mrb[136].mxu0 %v2225_v23  ;;  %v2174_v56 = vpop.permute.xlu0 %2173  ;;  %v10504_v27 = vpop.f32.mrb[36].mxu0  ;;  %v14186_v57 = vadd.f32 %v10567_v16, %v3835_v35 }
 0x178   :  { %4435 = vmatprep.mubr.bf16.mxu0 %v2230_v48  ;;  %v2231_v38 = vsel %vm2215_vm8, %v2172_v45, %v2174_v56  ;;  %v2192_v14 = vpop.permute.xlu1 %2191  ;;  %v10505_v30 = vpop.f32.mrb[37].mxu0 }
 0x179   :  { %11201 = vmatmul.mubr.msk.bf16.gmra.mrb[132].mxu1 %vm3578_vm9, %v2231_v38  ;;  %v10568_v40 = vpop.f32.mrb[36].mxu1  ;;  %v10506_v53 = vadd.f32 %v10505_v30, %v10504_v27  ;;  %v10507_v8 = vpop.f32.mrb[38].mxu0 }
 0x17a   :  { %v10569_v37 = vpop.f32.mrb[37].mxu1  ;;  %v10508_v62 = vpop.f32.mrb[39].mxu0 }
 0x17b   :  { %v2180_v22 = vpop.permute.xlu0 %2179  ;;  %v3840_v51 = vadd.f32 %v10506_v53, %v14034_v47  ;;  %v10570_v21 = vadd.f32 %v10569_v37, %v10568_v40  ;;  %v10571_v9 = vpop.f32.mrb[38].mxu1  ;;  %v10509_v29 = vadd.f32 %v10508_v62, %v10507_v8 }
 0x17c   :  { %v2190_v26 = vpop.permute.xlu1 %2189  ;;  %v2234_v7 = vsel %vm2215_vm8, %v2180_v22, %v2182_v39  ;;  %v10572_v45 = vpop.f32.mrb[39].mxu1  ;;  %v2233_v63 = vsel %vm2215_vm8, %v14106_v50, %v2180_v22 }
 0x17d   :  { %v14192_v61 = vadd.f32 %v10570_v21, %v3840_v51  ;;  %v10573_v60 = vadd.f32 %v10572_v45, %v10571_v9  ;;  %v3843_v47 = vadd.f32 %v10509_v29, %v14041_v41  ;;  %v2238_v48 = vsel %vm2215_vm8, %v2190_v26, %v2192_v14 }
 0x17f   :  { %4436 = vmatmul.mubr.bf16.gmra.mrb[140].mxu0 %v2229_v17  ;;  %v2184_v2 = vpop.permute.xlu0 %2183  ;;  %v10510_v49 = vpop.f32.mrb[40].mxu0  ;;  %v14197_v13 = vadd.f32 %v10573_v60, %v3843_v47 }
 0x180   :  { %4443 = vmatprep.mubr.bf16.mxu0 %v2234_v7  ;;  %v2235_v5 = vsel %vm2215_vm8, %v2182_v39, %v2184_v2  ;;  %v2202_v43 = vpop.permute.xlu1 %2201  ;;  %v10511_v59 = vpop.f32.mrb[41].mxu0 }
 0x181   :  { %11204 = vmatprep.mubr.msk.bf16.mxu1 %vm3578_vm9, %v2235_v5  ;;  %v10574_v46 = vpop.f32.mrb[40].mxu1  ;;  %v10512_v1 = vadd.f32 %v10511_v59, %v10510_v49  ;;  %v10513_v3 = vpop.f32.mrb[42].mxu0 }
 0x182   :  { %v10575_v34 = vpop.f32.mrb[41].mxu1  ;;  %v10514_v23 = vpop.f32.mrb[43].mxu0 }
 0x183   :  { %v2194_v6 = vpop.permute.xlu0 %2193  ;;  %v3848_v39 = vadd.f32 %v10512_v1, %v14066_v25  ;;  %v10576_v12 = vadd.f32 %v10575_v34, %v10574_v46  ;;  %v10577_v41 = vpop.f32.mrb[42].mxu1  ;;  %v10515_v16 = vadd.f32 %v10514_v23, %v10513_v3 }
 0x184   :  { %v2239_v11 = vsel %vm2215_vm8, %v2192_v14, %v2194_v6  ;;  %v10578_v36 = vpop.f32.mrb[43].mxu1  ;;  %v2212_v25 = vpop.permute.xlu1 %2211 }
 0x185   :  { %11205 = vmatmul.mubr.msk.bf16.gmra.mrb[136].mxu1 %vm3578_vm9, %v2239_v11  ;;  %v14205_v4 = vadd.f32 %v10576_v12, %v3848_v39  ;;  %v10579_v56 = vadd.f32 %v10578_v36, %v10577_v41  ;;  %v3851_v38 = vadd.f32 %v10515_v16, %v14077_v24  ;;  %v2237_v24 = vsel %vm2215_vm8, %v14120_v33, %v2190_v26 }
 0x187   :  { %4444 = vmatmul.mubr.bf16.gmra.mrb[144].mxu0 %v2233_v63  ;;  %v2200_v35 = vpop.permute.xlu0 %2199  ;;  %v10516_v14 = vpop.f32.mrb[44].mxu0  ;;  %v14208_v30 = vadd.f32 %v10579_v56, %v3851_v38 }
 0x188   :  { %4451 = vmatprep.mubr.bf16.mxu0 %v2238_v48  ;;  %v10517_v27 = vpop.f32.mrb[45].mxu0  ;;  %v10580_v40 = vpop.f32.mrb[44].mxu1  ;;  %v2242_v7 = vsel %vm2215_vm8, %v2200_v35, %v2202_v43  ;;  %v2241_v39 = vsel %vm2215_vm8, %v14134_v0, %v2200_v35 }
 0x189   :  { %v10518_v50 = vadd.f32 %v10517_v27, %v10516_v14  ;;  %v10519_v53 = vpop.f32.mrb[46].mxu0  ;;  %v10581_v22 = vpop.f32.mrb[45].mxu1 }
 0x18a   :  { %v10582_v21 = vadd.f32 %v10581_v22, %v10580_v40  ;;  %v10583_v9 = vpop.f32.mrb[46].mxu1  ;;  %v10520_v17 = vpop.f32.mrb[47].mxu0 }
 0x18b   :  { %v2204_v8 = vpop.permute.xlu0 %2203  ;;  %v3856_v51 = vadd.f32 %v10518_v50, %v14097_v42  ;;  %v10521_v62 = vadd.f32 %v10520_v17, %v10519_v53  ;;  %v10584_v45 = vpop.f32.mrb[47].mxu1 }
 0x18c   :  { %v2243_v37 = vsel %vm2215_vm8, %v2202_v43, %v2204_v8  ;;  %v10585_v60 = vadd.f32 %v10584_v45, %v10583_v9  ;;  %v2210_v49 = vpop.permute.xlu1 %2209 }
 0x18d   :  { %11208 = vmatprep.mubr.msk.bf16.mxu1 %vm3578_vm9, %v2243_v37  ;;  %v14216_v29 = vadd.f32 %v10582_v21, %v3856_v51  ;;  %v3859_v2 = vadd.f32 %v10521_v62, %v14108_v54  ;;  %v2246_v6 = vsel %vm2215_vm8, %v2210_v49, %v2212_v25  ;;  %v2245_v53 = vsel %vm2215_vm8, %v14148_v31, %v2210_v49 }
 0x18f   :  { %4452 = vmatmul.mubr.bf16.gmra.mrb[148].mxu0 %v2237_v24  ;;  %v2214_v42 = vpop.permute.xlu0 %2213  ;;  %v10522_v47 = vpop.f32.mrb[48].mxu0  ;;  %v14220_v43 = vadd.f32 %v10585_v60, %v3859_v2 }
 0x190   :  { %4459 = vmatprep.mubr.bf16.mxu0 %v2242_v7  ;;  %v2247_v5 = vsel %vm2215_vm8, %v2212_v25, %v2214_v42  ;;  %v10523_v33 = vpop.f32.mrb[49].mxu0 }
 0x191   :  { %11209 = vmatmul.mubr.msk.bf16.gmra.mrb[140].mxu1 %vm3578_vm9, %v2247_v5  ;;  %v10586_v26 = vpop.f32.mrb[48].mxu1  ;;  %v10524_v59 = vadd.f32 %v10523_v33, %v10522_v47  ;;  %v10525_v46 = vpop.f32.mrb[50].mxu0 }
 0x192   :  { %v10587_v1 = vpop.f32.mrb[49].mxu1  ;;  %v10526_v3 = vpop.f32.mrb[51].mxu0 }
 0x193   :  { %v3864_v34 = vadd.f32 %v10524_v59, %v14115_v19  ;;  %v10588_v54 = vadd.f32 %v10587_v1, %v10586_v26  ;;  %v10589_v11 = vpop.f32.mrb[50].mxu1  ;;  %v10527_v48 = vadd.f32 %v10526_v3, %v10525_v46 }
 0x194   :  { %v10590_v12 = vpop.f32.mrb[51].mxu1 }
 0x195   :  { %v14227_v41 = vadd.f32 %v10588_v54, %v3864_v34  ;;  %v3867_v63 = vadd.f32 %v10527_v48, %v14122_v32  ;;  %v10591_v23 = vadd.f32 %v10590_v12, %v10589_v11 }
 0x197   :  { %4460 = vmatmul.mubr.bf16.gmra.mrb[152].mxu0 %v2241_v39  ;;  %v14230_v36 = vadd.f32 %v10591_v23, %v3867_v63  ;;  %v10528_v16 = vpop.f32.mrb[52].mxu0 }
 0x198   :  { %4467 = vmatprep.mubr.bf16.mxu0 %v2246_v6  ;;  %v10529_v56 = vpop.f32.mrb[53].mxu0 }
 0x199   :  { %v10592_v38 = vpop.f32.mrb[52].mxu1  ;;  %v10530_v19 = vadd.f32 %v10529_v56, %v10528_v16  ;;  %v10531_v14 = vpop.f32.mrb[54].mxu0 }
 0x19a   :  { %v10593_v25 = vpop.f32.mrb[53].mxu1  ;;  %v10532_v27 = vpop.f32.mrb[55].mxu0 }
 0x19b   :  { %v3872_v40 = vadd.f32 %v10530_v19, %v14129_v10  ;;  %v10594_v0 = vadd.f32 %v10593_v25, %v10592_v38  ;;  %v10595_v35 = vpop.f32.mrb[54].mxu1  ;;  %v10533_v50 = vadd.f32 %v10532_v27, %v10531_v14 }
 0x19c   :  { %v10596_v32 = vpop.f32.mrb[55].mxu1 }
 0x19d   :  { %v14235_v8 = vadd.f32 %v10594_v0, %v3872_v40  ;;  %v3875_v22 = vadd.f32 %v10533_v50, %v14136_v52  ;;  %v10597_v37 = vadd.f32 %v10596_v32, %v10595_v35 }
 0x19f   :  { %4468 = vmatmul.mubr.bf16.gmra.mrb[156].mxu0 %v2245_v53  ;;  %v14238_v51 = vadd.f32 %v10597_v37, %v3875_v22  ;;  %v10534_v21 = vpop.f32.mrb[56].mxu0 }
 0x1a0   :  { %v10535_v7 = vpop.f32.mrb[57].mxu0 }
 0x1a1   :  { %v10598_v9 = vpop.f32.mrb[56].mxu1  ;;  %v10536_v17 = vadd.f32 %v10535_v7, %v10534_v21  ;;  %v10537_v10 = vpop.f32.mrb[58].mxu0 }
 0x1a2   :  { %v10599_v24 = vpop.f32.mrb[57].mxu1  ;;  %v10538_v62 = vpop.f32.mrb[59].mxu0 }
 0x1a3   :  { %v3880_v45 = vadd.f32 %v10536_v17, %v14143_v20  ;;  %v10600_v60 = vadd.f32 %v10599_v24, %v10598_v9  ;;  %v10601_v31 = vpop.f32.mrb[58].mxu1  ;;  %v10539_v2 = vadd.f32 %v10538_v62, %v10537_v10 }
 0x1a4   :  { %v10602_v42 = vpop.f32.mrb[59].mxu1 }
 0x1a5   :  { %v14241_v5 = vadd.f32 %v10600_v60, %v3880_v45  ;;  %v3883_v52 = vadd.f32 %v10539_v2, %v14150_v44  ;;  %v10603_v47 = vadd.f32 %v10602_v42, %v10601_v31 }
 0x1a7   :  { %v14244_v49 = vadd.f32 %v10603_v47, %v3883_v52  ;;  %v10540_v33 = vpop.f32.mrb[60].mxu0  ;;  %v11752_v52 = vmov 0  }
 0x1a8   :  { %v10541_v26 = vpop.f32.mrb[61].mxu0  ;;  %44 = vst.msk [vmem:[#allocation2 + $0x8] sm:$0xf] %vm40_vm10, %v11752_v52  ;;  %41 = vst.msk [vmem:[#allocation2] sm:$0xf] %vm40_vm10, %v11752_v52 }
 0x1a9   :  { %v10604_v59 = vpop.f32.mrb[60].mxu1  ;;  %v10542_v46 = vadd.f32 %v10541_v26, %v10540_v33  ;;  %v10543_v1 = vpop.f32.mrb[62].mxu0  ;;  %45 = vst.msk [vmem:[#allocation2 + $0xc] sm:$0x1] %vm42_vm11, %v11752_v52  ;;  %43 = vst.msk [vmem:[#allocation2 + $0x4] sm:$0x1] %vm42_vm11, %v11752_v52 }
 0x1aa   :  { %v10605_v3 = vpop.f32.mrb[61].mxu1  ;;  %v10544_v6 = vpop.f32.mrb[63].mxu0  ;;  %46 = vst.msk [vmem:[#allocation2 + $0x10] sm:$0xf] %vm40_vm10, %v11752_v52  ;;  %48 = vst.msk [vmem:[#allocation2 + $0x18] sm:$0xf] %vm40_vm10, %v11752_v52 }
 0x1ab   :  { %v3888_v20 = vadd.f32 %v10542_v46, %v14157_v15  ;;  %v10606_v34 = vadd.f32 %v10605_v3, %v10604_v59  ;;  %v10607_v54 = vpop.f32.mrb[62].mxu1  ;;  %v10545_v11 = vadd.f32 %v10544_v6, %v10543_v1  ;;  %47 = vst.msk [vmem:[#allocation2 + $0x14] sm:$0x1] %vm42_vm11, %v11752_v52  ;;  %49 = vst.msk [vmem:[#allocation2 + $0x1c] sm:$0x1] %vm42_vm11, %v11752_v52 }
 0x1ac   :  { %v10608_v48 = vpop.f32.mrb[63].mxu1  ;;  %50 = vst.msk [vmem:[#allocation2 + $0x20] sm:$0xf] %vm40_vm10, %v11752_v52  ;;  %52 = vst.msk [vmem:[#allocation2 + $0x28] sm:$0xf] %vm40_vm10, %v11752_v52 }
 0x1ad   :  { %v14247_v39 = vadd.f32 %v10606_v34, %v3888_v20  ;;  %v3891_v44 = vadd.f32 %v10545_v11, %v14162_v18  ;;  %v10609_v12 = vadd.f32 %v10608_v48, %v10607_v54  ;;  %51 = vst.msk [vmem:[#allocation2 + $0x24] sm:$0x1] %vm42_vm11, %v11752_v52  ;;  %53 = vst.msk [vmem:[#allocation2 + $0x2c] sm:$0x1] %vm42_vm11, %v11752_v52 }
 0x1ae   :  { %54 = vst.msk [vmem:[#allocation2 + $0x30] sm:$0xf] %vm40_vm10, %v11752_v52  ;;  %56 = vst.msk [vmem:[#allocation2 + $0x38] sm:$0xf] %vm40_vm10, %v11752_v52 }
 0x1af   :  { %v14250_v63 = vadd.f32 %v10609_v12, %v3891_v44  ;;  %v10626_v23 = vpop.f32.mrb[64].mxu0  ;;  %55 = vst.msk [vmem:[#allocation2 + $0x34] sm:$0x1] %vm42_vm11, %v11752_v52  ;;  %57 = vst.msk [vmem:[#allocation2 + $0x3c] sm:$0x1] %vm42_vm11, %v11752_v52 }
 0x1b0   :  { %v10627_v16 = vpop.f32.mrb[65].mxu0  ;;  %58 = vst.msk [vmem:[#allocation2 + $0x40] sm:$0xf] %vm40_vm10, %v11752_v52  ;;  %60 = vst.msk [vmem:[#allocation2 + $0x48] sm:$0xf] %vm40_vm10, %v11752_v52 }
 0x1b1   :  { %v10628_v56 = vadd.f32 %v10627_v16, %v10626_v23  ;;  %v10629_v38 = vpop.f32.mrb[66].mxu0  ;;  %59 = vst.msk [vmem:[#allocation2 + $0x44] sm:$0x1] %vm42_vm11, %v11752_v52  ;;  %61 = vst.msk [vmem:[#allocation2 + $0x4c] sm:$0x1] %vm42_vm11, %v11752_v52 }
 0x1b2   :  { %v10690_v19 = vpop.f32.mrb[64].mxu1  ;;  %v10630_v14 = vpop.f32.mrb[67].mxu0  ;;  %62 = vst.msk [vmem:[#allocation2 + $0x50] sm:$0xf] %vm40_vm10, %v11752_v52  ;;  %64 = vst.msk [vmem:[#allocation2 + $0x58] sm:$0xf] %vm40_vm10, %v11752_v52 }
 0x1b3   :  { %v4026_v25 = vadd.f32 %v10628_v56, %v14181_v58  ;;  %v10691_v15 = vpop.f32.mrb[65].mxu1  ;;  %v10631_v27 = vadd.f32 %v10630_v14, %v10629_v38  ;;  %63 = vst.msk [vmem:[#allocation2 + $0x54] sm:$0x1] %vm42_vm11, %v11752_v52  ;;  %65 = vst.msk [vmem:[#allocation2 + $0x5c] sm:$0x1] %vm42_vm11, %v11752_v52 }
 0x1b4   :  { %v10692_v40 = vadd.f32 %v10691_v15, %v10690_v19  ;;  %v10693_v0 = vpop.f32.mrb[66].mxu1  ;;  %66 = vst.msk [vmem:[#allocation2 + $0x60] sm:$0xf] %vm40_vm10, %v11752_v52  ;;  %68 = vst.msk [vmem:[#allocation2 + $0x68] sm:$0xf] %vm40_vm10, %v11752_v52 }
 0x1b5   :  { %v4029_v35 = vadd.f32 %v10631_v27, %v14186_v57  ;;  %v10694_v50 = vpop.f32.mrb[67].mxu1  ;;  %67 = vst.msk [vmem:[#allocation2 + $0x64] sm:$0x1] %vm42_vm11, %v11752_v52  ;;  %69 = vst.msk [vmem:[#allocation2 + $0x6c] sm:$0x1] %vm42_vm11, %v11752_v52 }
 0x1b6   :  { %v14254_v53 = vadd.f32 %v10692_v40, %v4026_v25  ;;  %v10695_v18 = vadd.f32 %v10694_v50, %v10693_v0  ;;  %70 = vst.msk [vmem:[#allocation2 + $0x70] sm:$0xf] %vm40_vm10, %v11752_v52  ;;  %72 = vst.msk [vmem:[#allocation2 + $0x78] sm:$0xf] %vm40_vm10, %v11752_v52 }
 0x1b7   :  { %71 = vst.msk [vmem:[#allocation2 + $0x74] sm:$0x1] %vm42_vm11, %v11752_v52  ;;  %73 = vst.msk [vmem:[#allocation2 + $0x7c] sm:$0x1] %vm42_vm11, %v11752_v52 }
 0x1b8   :  { %v14256_v32 = vadd.f32 %v10695_v18, %v4029_v35  ;;  %v10632_v22 = vpop.f32.mrb[68].mxu0  ;;  %74 = vst.msk [vmem:[#allocation2 + $0x80] sm:$0xf] %vm40_vm10, %v11752_v52  ;;  %76 = vst.msk [vmem:[#allocation2 + $0x88] sm:$0xf] %vm40_vm10, %v11752_v52 }
 0x1b9   :  { %v10633_v37 = vpop.f32.mrb[69].mxu0  ;;  %75 = vst.msk [vmem:[#allocation2 + $0x84] sm:$0x1] %vm42_vm11, %v11752_v52  ;;  %77 = vst.msk [vmem:[#allocation2 + $0x8c] sm:$0x1] %vm42_vm11, %v11752_v52  ;;  %v11579_v52 = vld [vmem:[%s16325_s3 + $0x88] sm:$0xff]  }
 0x1ba   :  { %v10634_v21 = vadd.f32 %v10633_v37, %v10632_v22  ;;  %v10635_v7 = vpop.f32.mrb[70].mxu0 }
 0x1bb   :  { %v10636_v9 = vpop.f32.mrb[71].mxu0 }
 0x1bc   :  { %v10696_v17 = vpop.f32.mrb[68].mxu1  ;;  %v4034_v58 = vadd.f32 %v10634_v21, %v14192_v61  ;;  %v10637_v10 = vadd.f32 %v10636_v9, %v10635_v7 }
 0x1bd   :  { %v10697_v24 = vpop.f32.mrb[69].mxu1 }
 0x1be   :  { %v10698_v62 = vadd.f32 %v10697_v24, %v10696_v17  ;;  %v10699_v45 = vpop.f32.mrb[70].mxu1  ;;  %v4037_v57 = vadd.f32 %v10637_v10, %v14197_v13 }
 0x1bf   :  { %v10700_v60 = vpop.f32.mrb[71].mxu1 }
 0x1c0   :  { %v14260_v31 = vadd.f32 %v10698_v62, %v4034_v58  ;;  %v10701_v2 = vadd.f32 %v10700_v60, %v10699_v45  ;;  %v10638_v42 = vpop.f32.mrb[72].mxu0  ;;  %v11578_v45 = vld [vmem:[%s16325_s3 + $0x80] sm:$0xff]  }
 0x1c1   :  { %v10639_v61 = vpop.f32.mrb[73].mxu0  ;;  %11212 = vmatprep.subr.bf16.mxu0 %v11578_v45 }
 0x1c2   :  { %v14298_v13 = vadd.f32 %v10701_v2, %v4037_v57  ;;  %v10640_v47 = vadd.f32 %v10639_v61, %v10638_v42  ;;  %v10641_v33 = vpop.f32.mrb[74].mxu0  ;;  %11213 = vmatpush3.bf16.msra.mxu0 %v11578_v45 }
 0x1c3   :  { %v10642_v26 = vpop.f32.mrb[75].mxu0  ;;  %11214 = vmatprep.subr.bf16.mxu0 %v11579_v52 }
 0x1c4   :  { %v10702_v59 = vpop.f32.mrb[72].mxu1  ;;  %v4042_v46 = vadd.f32 %v10640_v47, %v14205_v4  ;;  %v10643_v1 = vadd.f32 %v10642_v26, %v10641_v33 }
 0x1c5   :  { %v10703_v3 = vpop.f32.mrb[73].mxu1 }
 0x1c6   :  { %v10704_v6 = vadd.f32 %v10703_v3, %v10702_v59  ;;  %v10705_v20 = vpop.f32.mrb[74].mxu1  ;;  %v4045_v34 = vadd.f32 %v10643_v1, %v14208_v30  ;;  %11215 = vmatpush3.bf16.msra.mxu0 %v11579_v52 }
 0x1c7   :  { %v10706_v54 = vpop.f32.mrb[75].mxu1 }
 0x1c8   :  { %v14302_v11 = vadd.f32 %v10704_v6, %v4042_v46  ;;  %v10707_v48 = vadd.f32 %v10706_v54, %v10705_v20 }
 0x1ca   :  { %v14304_v44 = vadd.f32 %v10707_v48, %v4045_v34  ;;  %v10644_v12 = vpop.f32.mrb[76].mxu0 }
 0x1cb   :  { %v10645_v23 = vpop.f32.mrb[77].mxu0 }
 0x1cc   :  { %v10646_v16 = vadd.f32 %v10645_v23, %v10644_v12  ;;  %v10647_v56 = vpop.f32.mrb[78].mxu0 }
 0x1cd   :  { %v10648_v38 = vpop.f32.mrb[79].mxu0 }
 0x1ce   :  { %v10708_v19 = vpop.f32.mrb[76].mxu1  ;;  %v4050_v4 = vadd.f32 %v10646_v16, %v14216_v29  ;;  %v10649_v14 = vadd.f32 %v10648_v38, %v10647_v56  ;;  %v11581_v16 = vld [vmem:[%s16325_s3 + $0x90] sm:$0xff]  }
 0x1cf   :  { %v10709_v25 = vpop.f32.mrb[77].mxu1  ;;  %11216 = vmatprep.subr.bf16.mxu0 %v11581_v16 }
 0x1d0   :  { %v10710_v15 = vadd.f32 %v10709_v25, %v10708_v19  ;;  %v10711_v27 = vpop.f32.mrb[78].mxu1  ;;  %v4053_v30 = vadd.f32 %v10649_v14, %v14220_v43  ;;  %11217 = vmatpush3.bf16.msra.mxu0 %v11581_v16 }
 0x1d1   :  { %v10712_v40 = vpop.f32.mrb[79].mxu1 }
 0x1d2   :  { %v14308_v0 = vadd.f32 %v10710_v15, %v4050_v4  ;;  %v10713_v35 = vadd.f32 %v10712_v40, %v10711_v27 }
 0x1d3   :  { %v10650_v50 = vpop.f32.mrb[80].mxu0 }
 0x1d4   :  { %v14310_v18 = vadd.f32 %v10713_v35, %v4053_v30  ;;  %v10651_v22 = vpop.f32.mrb[81].mxu0 }
 0x1d5   :  { %v10652_v37 = vadd.f32 %v10651_v22, %v10650_v50  ;;  %v10653_v21 = vpop.f32.mrb[82].mxu0 }
 0x1d6   :  { %v10654_v7 = vpop.f32.mrb[83].mxu0 }
 0x1d7   :  { %v10714_v9 = vpop.f32.mrb[80].mxu1  ;;  %v4058_v29 = vadd.f32 %v10652_v37, %v14227_v41  ;;  %v10655_v17 = vadd.f32 %v10654_v7, %v10653_v21 }
 0x1d8   :  { %v10715_v58 = vpop.f32.mrb[81].mxu1 }
 0x1d9   :  { %v10716_v10 = vadd.f32 %v10715_v58, %v10714_v9  ;;  %v10717_v24 = vpop.f32.mrb[82].mxu1  ;;  %v4061_v43 = vadd.f32 %v10655_v17, %v14230_v36 }
 0x1da   :  { %v10718_v62 = vpop.f32.mrb[83].mxu1 }
 0x1db   :  { %v14317_v57 = vadd.f32 %v10716_v10, %v4058_v29  ;;  %v10719_v60 = vadd.f32 %v10718_v62, %v10717_v24 }
 0x1dd   :  { %v14319_v2 = vadd.f32 %v10719_v60, %v4061_v43  ;;  %v10656_v42 = vpop.f32.mrb[84].mxu0 }
 0x1de   :  { %v10657_v41 = vpop.f32.mrb[85].mxu0 }
 0x1df   :  { %v10658_v61 = vadd.f32 %v10657_v41, %v10656_v42  ;;  %v10659_v36 = vpop.f32.mrb[86].mxu0  ;;  %v11582_v41 = vld [vmem:[%s16325_s3 + $0x98] sm:$0xff]  }
 0x1e0   :  { %v10660_v47 = vpop.f32.mrb[87].mxu0  ;;  %11218 = vmatprep.subr.bf16.mxu0 %v11582_v41 }
 0x1e1   :  { %v4066_v26 = vadd.f32 %v10658_v61, %v14235_v8  ;;  %v10661_v59 = vadd.f32 %v10660_v47, %v10659_v36  ;;  %11219 = vmatpush3.bf16.msra.mxu0 %v11582_v41 }
 0x1e2   :  { %v10720_v33 = vpop.f32.mrb[84].mxu1 }
 0x1e3   :  { %v10721_v46 = vpop.f32.mrb[85].mxu1  ;;  %v4069_v6 = vadd.f32 %v10661_v59, %v14238_v51 }
 0x1e4   :  { %v10722_v1 = vadd.f32 %v10721_v46, %v10720_v33  ;;  %v10723_v3 = vpop.f32.mrb[86].mxu1 }
 0x1e5   :  { %v10724_v20 = vpop.f32.mrb[87].mxu1 }
 0x1e6   :  { %v14326_v34 = vadd.f32 %v10722_v1, %v4066_v26  ;;  %v10725_v54 = vadd.f32 %v10724_v20, %v10723_v3  ;;  %v10662_v48 = vpop.f32.mrb[88].mxu0 }
 0x1e7   :  { %v10663_v23 = vpop.f32.mrb[89].mxu0 }
 0x1e8   :  { %v14328_v12 = vadd.f32 %v10725_v54, %v4069_v6  ;;  %v10664_v8 = vadd.f32 %v10663_v23, %v10662_v48  ;;  %v10665_v56 = vpop.f32.mrb[90].mxu0 }
 0x1e9   :  { %v10666_v38 = vpop.f32.mrb[91].mxu0 }
 0x1ea   :  { %v4074_v4 = vadd.f32 %v10664_v8, %v14241_v5  ;;  %v10667_v51 = vadd.f32 %v10666_v38, %v10665_v56 }
 0x1eb   :  { %v10726_v19 = vpop.f32.mrb[88].mxu1 }
 0x1ec   :  { %v10727_v14 = vpop.f32.mrb[89].mxu1  ;;  %v4077_v27 = vadd.f32 %v10667_v51, %v14244_v49 }
 0x1ed   :  { %v10728_v25 = vadd.f32 %v10727_v14, %v10726_v19  ;;  %v10729_v15 = vpop.f32.mrb[90].mxu1 }
 0x1ee   :  { %v10730_v30 = vpop.f32.mrb[91].mxu1 }
 0x1ef   :  { %v14335_v40 = vadd.f32 %v10728_v25, %v4074_v4  ;;  %v10731_v35 = vadd.f32 %v10730_v30, %v10729_v15 }
 0x1f0   :  { %v10668_v22 = vpop.f32.mrb[92].mxu0 }
 0x1f1   :  { %v14337_v50 = vadd.f32 %v10731_v35, %v4077_v27  ;;  %v10669_v37 = vpop.f32.mrb[93].mxu0 }
 0x1f2   :  { %v10670_v21 = vadd.f32 %v10669_v37, %v10668_v22  ;;  %v10671_v7 = vpop.f32.mrb[94].mxu0 }
 0x1f3   :  { %v10672_v9 = vpop.f32.mrb[95].mxu0 }
 0x1f4   :  { %v10732_v29 = vpop.f32.mrb[92].mxu1  ;;  %v4082_v5 = vadd.f32 %v10670_v21, %v14247_v39  ;;  %v10673_v17 = vadd.f32 %v10672_v9, %v10671_v7 }
 0x1f5   :  { %v10733_v58 = vpop.f32.mrb[93].mxu1 }
 0x1f6   :  { %v10734_v10 = vadd.f32 %v10733_v58, %v10732_v29  ;;  %v10735_v24 = vpop.f32.mrb[94].mxu1  ;;  %v4085_v49 = vadd.f32 %v10673_v17, %v14250_v63 }
 0x1f7   :  { %v10736_v43 = vpop.f32.mrb[95].mxu1 }
 0x1f8   :  { %v14341_v62 = vadd.f32 %v10734_v10, %v4082_v5  ;;  %v10737_v45 = vadd.f32 %v10736_v43, %v10735_v24  ;;  %v10754_v60 = vpop.f32.mrb[96].mxu0 }
 0x1f9   :  { %v10755_v42 = vpop.f32.mrb[97].mxu0 }
 0x1fa   :  { %v14346_v52 = vadd.f32 %v10737_v45, %v4085_v49  ;;  %v10756_v61 = vadd.f32 %v10755_v42, %v10754_v60  ;;  %v10757_v39 = vpop.f32.mrb[98].mxu0 }
 0x1fb   :  { %v10758_v36 = vpop.f32.mrb[99].mxu0 }
 0x1fc   :  { %v10818_v47 = vpop.f32.mrb[96].mxu1  ;;  %v4220_v33 = vadd.f32 %v10756_v61, %v14254_v53  ;;  %v10759_v63 = vadd.f32 %v10758_v36, %v10757_v39 }
 0x1fd   :  { %v10819_v26 = vpop.f32.mrb[97].mxu1 }
 0x1fe   :  { %v10820_v59 = vadd.f32 %v10819_v26, %v10818_v47  ;;  %v10821_v46 = vpop.f32.mrb[98].mxu1  ;;  %v4223_v1 = vadd.f32 %v10759_v63, %v14256_v32 }
 0x1ff   :  { %v10822_v3 = vpop.f32.mrb[99].mxu1 }
 0x200   :  { %v14350_v6 = vadd.f32 %v10820_v59, %v4220_v33  ;;  %v10823_v20 = vadd.f32 %v10822_v3, %v10821_v46  ;;  %v10760_v54 = vpop.f32.mrb[100].mxu0 }
 0x201   :  { %v10761_v48 = vpop.f32.mrb[101].mxu0 }
 0x202   :  { %v14352_v23 = vadd.f32 %v10823_v20, %v4223_v1  ;;  %v10762_v16 = vadd.f32 %v10761_v48, %v10760_v54  ;;  %v10763_v8 = vpop.f32.mrb[102].mxu0 }
 0x203   :  { %v10764_v56 = vpop.f32.mrb[103].mxu0 }
 0x204   :  { %v10824_v38 = vpop.f32.mrb[100].mxu1  ;;  %v4228_v53 = vadd.f32 %v10762_v16, %v14260_v31  ;;  %v10765_v19 = vadd.f32 %v10764_v56, %v10763_v8 }
 0x205   :  { %v10825_v4 = vpop.f32.mrb[101].mxu1 }
 0x206   :  { %v10826_v51 = vadd.f32 %v10825_v4, %v10824_v38  ;;  %v10827_v14 = vpop.f32.mrb[102].mxu1  ;;  %v4231_v32 = vadd.f32 %v10765_v19, %v14298_v13 }
 0x207   :  { %v10828_v25 = vpop.f32.mrb[103].mxu1 }
 0x208   :  { %v14356_v15 = vadd.f32 %v10826_v51, %v4228_v53  ;;  %v10829_v27 = vadd.f32 %v10828_v25, %v10827_v14  ;;  %v10766_v30 = vpop.f32.mrb[104].mxu0 }
 0x209   :  { %v10767_v35 = vpop.f32.mrb[105].mxu0 }
 0x20a   :  { %v14358_v22 = vadd.f32 %v10829_v27, %v4231_v32  ;;  %v10768_v37 = vadd.f32 %v10767_v35, %v10766_v30  ;;  %v10769_v21 = vpop.f32.mrb[106].mxu0 }
 0x20b   :  { %v10770_v7 = vpop.f32.mrb[107].mxu0 }
 0x20c   :  { %v10830_v9 = vpop.f32.mrb[104].mxu1  ;;  %v4236_v31 = vadd.f32 %v10768_v37, %v14302_v11  ;;  %v10771_v29 = vadd.f32 %v10770_v7, %v10769_v21 }
 0x20d   :  { %v10831_v5 = vpop.f32.mrb[105].mxu1 }
 0x20e   :  { %v10832_v17 = vadd.f32 %v10831_v5, %v10830_v9  ;;  %v10833_v58 = vpop.f32.mrb[106].mxu1  ;;  %v4239_v13 = vadd.f32 %v10771_v29, %v14304_v44 }
 0x20f   :  { %v10834_v10 = vpop.f32.mrb[107].mxu1 }
 0x210   :  { %v14362_v24 = vadd.f32 %v10832_v17, %v4236_v31  ;;  %v10835_v49 = vadd.f32 %v10834_v10, %v10833_v58  ;;  %v10772_v43 = vpop.f32.mrb[108].mxu0 }
 0x211   :  { %v10773_v45 = vpop.f32.mrb[109].mxu0 }
 0x212   :  { %v14364_v60 = vadd.f32 %v10835_v49, %v4239_v13  ;;  %v10774_v42 = vadd.f32 %v10773_v45, %v10772_v43  ;;  %v10775_v41 = vpop.f32.mrb[110].mxu0 }
 0x213   :  { %v10776_v61 = vpop.f32.mrb[111].mxu0 }
 0x214   :  { %v10836_v39 = vpop.f32.mrb[108].mxu1  ;;  %v4244_v11 = vadd.f32 %v10774_v42, %v14308_v0  ;;  %v10777_v36 = vadd.f32 %v10776_v61, %v10775_v41 }
 0x215   :  { %v10837_v47 = vpop.f32.mrb[109].mxu1 }
 0x216   :  { %v10838_v33 = vadd.f32 %v10837_v47, %v10836_v39  ;;  %v10839_v63 = vpop.f32.mrb[110].mxu1  ;;  %v4247_v44 = vadd.f32 %v10777_v36, %v14310_v18 }
 0x217   :  { %v10840_v26 = vpop.f32.mrb[111].mxu1 }
 0x218   :  { %v14368_v59 = vadd.f32 %v10838_v33, %v4244_v11  ;;  %v10841_v46 = vadd.f32 %v10840_v26, %v10839_v63  ;;  %v10778_v1 = vpop.f32.mrb[112].mxu0 }
 0x219   :  { %v10779_v3 = vpop.f32.mrb[113].mxu0 }
 0x21a   :  { %v14370_v20 = vadd.f32 %v10841_v46, %v4247_v44  ;;  %v10780_v54 = vadd.f32 %v10779_v3, %v10778_v1  ;;  %v10781_v48 = vpop.f32.mrb[114].mxu0 }
 0x21b   :  { %v10782_v16 = vpop.f32.mrb[115].mxu0 }
 0x21c   :  { %v10842_v8 = vpop.f32.mrb[112].mxu1  ;;  %v4252_v0 = vadd.f32 %v10780_v54, %v14317_v57  ;;  %v10783_v56 = vadd.f32 %v10782_v16, %v10781_v48 }
 0x21d   :  { %v10843_v38 = vpop.f32.mrb[113].mxu1 }
 0x21e   :  { %v10844_v53 = vadd.f32 %v10843_v38, %v10842_v8  ;;  %v10845_v19 = vpop.f32.mrb[114].mxu1  ;;  %v4255_v18 = vadd.f32 %v10783_v56, %v14319_v2 }
 0x21f   :  { %v10846_v4 = vpop.f32.mrb[115].mxu1 }
 0x220   :  { %v14374_v51 = vadd.f32 %v10844_v53, %v4252_v0  ;;  %v10847_v14 = vadd.f32 %v10846_v4, %v10845_v19  ;;  %v10784_v32 = vpop.f32.mrb[116].mxu0  ;;  %v4916_v4 = vld [vmem:[#allocation2] sm:$0xf] }
 0x221   :  { %v10785_v25 = vpop.f32.mrb[117].mxu0 }
 0x222   :  { %v14376_v27 = vadd.f32 %v10847_v14, %v4255_v18  ;;  %v10786_v30 = vadd.f32 %v10785_v25, %v10784_v32  ;;  %v10787_v35 = vpop.f32.mrb[118].mxu0 }
 0x223   :  { %v10788_v37 = vpop.f32.mrb[119].mxu0 }
 0x224   :  { %v10848_v21 = vpop.f32.mrb[116].mxu1  ;;  %v4260_v57 = vadd.f32 %v10786_v30, %v14326_v34  ;;  %v10789_v7 = vadd.f32 %v10788_v37, %v10787_v35  ;;  %v4949_v37 = vshrl.u32 %v4916_v4, 16 }
 0x225   :  { %v10849_v9 = vpop.f32.mrb[117].mxu1 }
 0x226   :  { %v10850_v31 = vadd.f32 %v10849_v9, %v10848_v21  ;;  %v10851_v29 = vpop.f32.mrb[118].mxu1  ;;  %v4263_v2 = vadd.f32 %v10789_v7, %v14328_v12  ;;  %v4951_v9 = vrot.slane %v4949_v37, 4  ;;  %v16425_v37 = vmov 0 }
 0x227   :  { %v10852_v5 = vpop.f32.mrb[119].mxu1  ;;  %v16426_v37 = vsel %vm14426_vm15, 4294967295, %v16425_v37 }
 0x228   :  { %v14380_v17 = vadd.f32 %v10850_v31, %v4260_v57  ;;  %v10853_v58 = vadd.f32 %v10852_v5, %v10851_v29  ;;  %v4924_v5 = vld [vmem:[#allocation2 + $0x48] sm:$0xf]  ;;  %16427 = vst [vmem:[#allocation12_spill] sm:$0xff] %v16426_v37 }
 0x22a   :  { %v10790_v13 = vpop.f32.mrb[120].mxu0  ;;  %v14382_v49 = vadd.f32 %v10853_v58, %v4263_v2 }
 0x22b   :  { %v10791_v10 = vpop.f32.mrb[121].mxu0 }
 0x22c   :  { %v10792_v43 = vadd.f32 %v10791_v10, %v10790_v13  ;;  %v10793_v45 = vpop.f32.mrb[122].mxu0 }
 0x22d   :  { %v10794_v42 = vpop.f32.mrb[123].mxu0  ;;  %v10854_v41 = vpop.f32.mrb[120].mxu1 }
 0x22e   :  { %v4268_v34 = vadd.f32 %v10792_v43, %v14335_v40  ;;  %v10795_v61 = vadd.f32 %v10794_v42, %v10793_v45  ;;  %v10855_v39 = vpop.f32.mrb[121].mxu1 }
 0x22f   :  { %v10856_v11 = vadd.f32 %v10855_v39, %v10854_v41  ;;  %v10857_v36 = vpop.f32.mrb[122].mxu1 }
 0x230   :  { %v4271_v12 = vadd.f32 %v10795_v61, %v14337_v50  ;;  %v10858_v47 = vpop.f32.mrb[123].mxu1 }
 0x231   :  { %v14386_v33 = vadd.f32 %v10856_v11, %v4268_v34  ;;  %v10859_v63 = vadd.f32 %v10858_v47, %v10857_v36  ;;  %v5061_v11 = vshrl.u32 %v4924_v5, 16  ;;  %v5064_v36 = vshll.u32 %v4924_v5, 16 }
 0x232   :  { %v10796_v44 = vpop.f32.mrb[124].mxu0 }
 0x233   :  { %v10797_v26 = vpop.f32.mrb[125].mxu0  ;;  %v14388_v46 = vadd.f32 %v10859_v63, %v4271_v12  ;;  %v14399_v63 = vld [vmem:[#allocation2 + $0x4] sm:$0x1] }
 0x234   :  { %v10798_v1 = vadd.f32 %v10797_v26, %v10796_v44  ;;  %v10799_v3 = vpop.f32.mrb[126].mxu0 }
 0x235   :  { %v10800_v54 = vpop.f32.mrb[127].mxu0  ;;  %v10860_v48 = vpop.f32.mrb[124].mxu1 }
 0x236   :  { %v4276_v40 = vadd.f32 %v10798_v1, %v14341_v62  ;;  %v10801_v16 = vadd.f32 %v10800_v54, %v10799_v3  ;;  %v10861_v8 = vpop.f32.mrb[125].mxu1  ;;  %v4952_v62 = vshll.u32 %v4916_v4, 16  ;;  %v4958_v1 = vshll.u32 %v14399_v63, 16 }
 0x237   :  { %v10862_v0 = vadd.f32 %v10861_v8, %v10860_v48  ;;  %v10863_v56 = vpop.f32.mrb[126].mxu1 }
 0x238   :  { %v4279_v50 = vadd.f32 %v10801_v16, %v14346_v52  ;;  %v10864_v38 = vpop.f32.mrb[127].mxu1  ;;  %v4954_v31 = vrot.slane %v4952_v62, 5  ;;  %v4823_v16 = vld [vmem:[#allocation2 + $0xc] sm:$0x1]  ;;  %v4826_v62 = vld [vmem:[#allocation2 + $0x10] sm:$0xf] }
 0x239   :  { %v14392_v53 = vadd.f32 %v10862_v0, %v4276_v40  ;;  %v10865_v19 = vadd.f32 %v10864_v38, %v10863_v56  ;;  %v14405_v40 = vrot.slane %v5061_v11, 4  ;;  %v11589_v38 = vld [vmem:[%s16325_s3 + $0x40] sm:$0xff]  }
 0x23a   :  { %v10882_v18 = vpop.f32.mrb[128].mxu0  ;;  %v4955_v39 = vor.u32 %v4954_v31, %v4951_v9  ;;  %10944 = vmatprep.subr.bf16.mxu1 %v11589_v38 }
 0x23b   :  { %v10883_v14 = vpop.f32.mrb[129].mxu0  ;;  %v14394_v32 = vadd.f32 %v10865_v19, %v4279_v50  ;;  %v14407_v50 = vrot.slane %v5064_v36, 5  ;;  %v11591_v19 = vld [vmem:[%s16325_s3 + $0x48] sm:$0xff]  }
 0x23c   :  { %v10884_v25 = vadd.f32 %v10883_v14, %v10882_v18  ;;  %v10885_v30 = vpop.f32.mrb[130].mxu0  ;;  %v14403_v48 = vrot.slane %v4955_v39, 4  ;;  %v16422_v14 = vmov 0  ;;  %v11593_v39 = vld [vmem:[%s16325_s3 + $0x50] sm:$0xff]  }
 0x23d   :  { %v10886_v35 = vpop.f32.mrb[131].mxu0  ;;  %v16423_v14 = vsel %vm14420_vm14, 4294967295, %v16422_v14 }
 0x23e   :  { %v10887_v21 = vadd.f32 %v10886_v35, %v10885_v30  ;;  %v4414_v57 = vadd.f32 %v10884_v25, %v14350_v6  ;;  %16424 = vst [vmem:[#allocation6_spill] sm:$0xff] %v16423_v14  ;;  %v4940_v35 = vld [vmem:[#allocation2 + $0x4c] sm:$0x1] }
 0x23f   :  { %v5070_v9 = vshll.u32 %v4940_v35, 16 }
 0x240   :  { %v4417_v7 = vadd.f32 %v10887_v21, %v14352_v23  ;;  %v11198_v52 = vpop.f32.mrb[128].mxu1 }
 0x241   :  { %v4510_v29 = vpop.f32.mrb[129].mxu1 }
 0x242   :  { %v10888_v2 = vpop.f32.mrb[132].mxu0  ;;  %v4511_v58 = vadd.f32 %v4510_v29, %v4414_v57  ;;  %v11199_v13 = vpop.f32.mrb[130].mxu1 }
 0x243   :  { %v10889_v10 = vpop.f32.mrb[133].mxu0  ;;  %v4513_v43 = vpop.f32.mrb[131].mxu1 }
 0x244   :  { %v10890_v45 = vadd.f32 %v10889_v10, %v10888_v2  ;;  %v10891_v42 = vpop.f32.mrb[134].mxu0  ;;  %v4573_v41 = vmax.f32 %v4511_v58, 0.0  ;;  %v4514_v34 = vadd.f32 %v4513_v43, %v4417_v7  ;;  %v11592_v10 = vld [vmem:[%s16325_s3 + $0x8] sm:$0xff]   ;;  %v4829_v43 = vld [vmem:[#allocation2 + $0x14] sm:$0x1] }
 0x245   :  { %v10892_v61 = vpop.f32.mrb[135].mxu0 }
 0x246   :  { %v4422_v6 = vadd.f32 %v10890_v45, %v14356_v15  ;;  %v10893_v23 = vadd.f32 %v10892_v61, %v10891_v42  ;;  %v10306_v12 = vpack.c.bf16 %v4573_v41, %v4573_v41  ;;  %v4574_v47 = vmax.f32 %v4514_v34, 0.0  ;;  %v4817_v15 = vld [vmem:[#allocation2 + $0x8] sm:$0xf] }
 0x247   :  { %v5067_v61 = vor.u32 %v14407_v50, %v14405_v40  ;;  %v11594_v50 = vld [vmem:[%s16325_s3 + $0x10] sm:$0xff]  }
 0x248   :  { %v4519_v44 = vadd.f32 %v11198_v52, %v4422_v6  ;;  %v4425_v26 = vadd.f32 %v10893_v23, %v14358_v22  ;;  %v4654_v3 = vshrl.u32 %v10306_v12, 16  ;;  %v10307_v54 = vpack.c.bf16 %v4574_v47, %v4574_v47  ;;  %v11590_v22 = vld [vmem:[%s16325_s3] sm:$0xff]  }
 0x249   :  { %v4657_v4 = vshll.u32 %v10306_v12, 16  ;;  %10945 = vmatpush3.bf16.msra.mxu1 %v11590_v22 }
 0x24a   :  { %v4575_v8 = vmax.f32 %v4519_v44, 0.0  ;;  %v4522_v0 = vadd.f32 %v11199_v13, %v4425_v26  ;;  %v10894_v56 = vpop.f32.mrb[136].mxu0  ;;  %v4656_v18 = vrot.slane %v4654_v3, 7  ;;  %v4662_v25 = vshrl.u32 %v10307_v54, 16  ;;  %10946 = vmatprep.subr.bf16.mxu1 %v11591_v19  ;;  %v4832_v44 = vld [vmem:[#allocation2 + $0x18] sm:$0xf] }
 0x24b   :  { %v10895_v30 = vpop.f32.mrb[137].mxu0  ;;  %v4665_v5 = vshll.u32 %v10307_v54, 16 }
 0x24c   :  { %v10308_v21 = vpack.c.bf16 %v4575_v8, %v4575_v8  ;;  %v4576_v57 = vmax.f32 %v4522_v0, 0.0  ;;  %v10896_v7 = vadd.f32 %v10895_v30, %v10894_v56  ;;  %v10897_v52 = vpop.f32.mrb[138].mxu0  ;;  %v4659_v31 = vor.u32 %v4657_v4, %v4656_v18  ;;  %v14430_v58 = vpop.f32.mrb[132].mxu1  ;;  %v4835_v8 = vld [vmem:[#allocation2 + $0x1c] sm:$0x1] }
 0x24d   :  { %v4660_v29 = vrot.slane %v4656_v18, 4  ;;  %v4664_v2 = vrot.slane %v4662_v25, 7  ;;  %v10898_v13 = vpop.f32.mrb[139].mxu0  ;;  %v4526_v34 = vpop.f32.mrb[133].mxu1  ;;  %v4838_v0 = vld [vmem:[#allocation2 + $0x20] sm:$0xf]  ;;  %10947 = vmatpush3.bf16.msra.mxu1 %v11592_v10 }
 0x24e   :  { %v4670_v45 = vshrl.u32 %v10308_v21, 16  ;;  %v10309_v42 = vpack.c.bf16 %v4576_v57, %v4576_v57  ;;  %v4430_v41 = vadd.f32 %v10896_v7, %v14362_v24  ;;  %v4818_v11 = vsel %vm14420_vm14, %v4659_v31, %v4817_v15  ;;  %v14445_v12 = vpop.f32.mrb[134].mxu1  ;;  %10948 = vmatprep.subr.bf16.mxu1 %v11593_v39  ;;  %v11595_v25 = vld [vmem:[%s16325_s3 + $0x58] sm:$0xff]   ;;  %v4841_v30 = vld [vmem:[#allocation2 + $0x24] sm:$0x1] }
 0x24f   :  { %v4824_v6 = vsel %vm14426_vm15, %v4660_v29, %v4823_v16  ;;  %v4667_v23 = vor.u32 %v4665_v5, %v4664_v2  ;;  %v4668_v36 = vrot.slane %v4664_v2, 4  ;;  %4819 = vst [vmem:[#allocation2 + $0x8] sm:$0xf] %v4818_v11  ;;  %v4673_v47 = vshll.u32 %v10308_v21, 16  ;;  %v4529_v54 = vpop.f32.mrb[135].mxu1 }
 0x250   :  { %4825 = vst [vmem:[#allocation2 + $0xc] sm:$0x1] %v4824_v6  ;;  %v4672_v24 = vrot.slane %v4670_v45, 7  ;;  %v4678_v26 = vshrl.u32 %v10309_v42, 16  ;;  %v4527_v3 = vadd.f32 %v4526_v34, %v4430_v41  ;;  %v4681_v16 = vshll.u32 %v10309_v42, 16  ;;  %v11597_v42 = vld [vmem:[%s16325_s3 + $0x60] sm:$0xff]  }
 0x251   :  { %v4827_v40 = vsel %vm14420_vm14, %v4667_v23, %v4826_v62  ;;  %v4830_v15 = vsel %vm14426_vm15, %v4668_v36, %v4829_v43  ;;  %v10899_v56 = vadd.f32 %v10898_v13, %v10897_v52  ;;  %v14460_v21 = vrot.slane %v4958_v1, 5  ;;  %10949 = vmatpush3.bf16.msra.mxu1 %v11594_v50  ;;  %v4844_v11 = vld [vmem:[#allocation2 + $0x28] sm:$0xf]  ;;  %v4847_v6 = vld [vmem:[#allocation2 + $0x2c] sm:$0x1] }
 0x252   :  { %4828 = vst [vmem:[#allocation2 + $0x10] sm:$0xf] %v4827_v40  ;;  %4831 = vst [vmem:[#allocation2 + $0x14] sm:$0x1] %v4830_v15  ;;  %v4675_v38 = vor.u32 %v4673_v47, %v4672_v24  ;;  %v4676_v22 = vrot.slane %v4672_v24, 4  ;;  %v4680_v19 = vrot.slane %v4678_v26, 7  ;;  %10950 = vmatprep.subr.bf16.mxu1 %v11595_v25 }
 0x253   :  { %v4577_v18 = vmax.f32 %v4527_v3, 0.0  ;;  %v10900_v4 = vpop.f32.mrb[140].mxu0  ;;  %v4433_v35 = vadd.f32 %v10899_v56, %v14364_v60  ;;  %v14462_v57 = vrot.slane %v5067_v61, 4  ;;  %v14464_v7 = vrot.slane %v5070_v9, 5  ;;  %v11596_v9 = vld [vmem:[%s16325_s3 + $0x18] sm:$0xff]  }
 0x254   :  { %v10901_v62 = vpop.f32.mrb[141].mxu0  ;;  %v4833_v52 = vsel %vm14420_vm14, %v4675_v38, %v4832_v44  ;;  %v4836_v31 = vsel %vm14426_vm15, %v4676_v22, %v4835_v8  ;;  %v4683_v29 = vor.u32 %v4681_v16, %v4680_v19  ;;  %v4684_v2 = vrot.slane %v4680_v19, 4  ;;  %v11598_v8 = vld [vmem:[%s16325_s3 + $0x20] sm:$0xff]  }
 0x255   :  { %v10903_v5 = vpop.f32.mrb[142].mxu0  ;;  %4834 = vst [vmem:[#allocation2 + $0x18] sm:$0xf] %v4833_v52  ;;  %4837 = vst [vmem:[#allocation2 + $0x1c] sm:$0x1] %v4836_v31  ;;  %v10310_v60 = vpack.c.bf16 %v4577_v18, %v4577_v18  ;;  %v4530_v13 = vadd.f32 %v4529_v54, %v4433_v35  ;;  %v10902_v63 = vadd.f32 %v10901_v62, %v10900_v4  ;;  %10951 = vmatpush3.bf16.msra.mxu1 %v11596_v9  ;;  %v11600_v9 = vld [vmem:[%s16325_s3 + $0x28] sm:$0xff]  }
 0x256   :  { %v10904_v1 = vpop.f32.mrb[143].mxu0  ;;  %v4839_v10 = vsel %vm14420_vm14, %v4683_v29, %v4838_v0  ;;  %v4842_v43 = vsel %vm14426_vm15, %v4684_v2, %v4841_v30  ;;  %v14482_v36 = vld [vmem:[#allocation2 + $0x8] sm:$0xf]  ;;  %v4961_v44 = vsel %vm11876_vm2, %v14403_v48, %v14460_v21  ;;  %v5073_v26 = vsel %vm11876_vm2, %v14462_v57, %v14464_v7  ;;  %10952 = vmatprep.subr.bf16.mxu1 %v11597_v42 }
 0x257   :  { %v10905_v45 = vadd.f32 %v10904_v1, %v10903_v5  ;;  %4840 = vst [vmem:[#allocation2 + $0x20] sm:$0xf] %v4839_v10  ;;  %4843 = vst [vmem:[#allocation2 + $0x24] sm:$0x1] %v4842_v43  ;;  %v4686_v41 = vshrl.u32 %v10310_v60, 16  ;;  %v4689_v34 = vshll.u32 %v10310_v60, 16  ;;  %v4438_v39 = vadd.f32 %v10902_v63, %v14368_v59 }
 0x258   :  { %v4578_v61 = vmax.f32 %v4530_v13, 0.0  ;;  %v4917_v24 = vld [vmem:[#allocation2 + $0x8] sm:$0xf]  ;;  %v4933_v47 = vld [vmem:[#allocation2 + $0xc] sm:$0x1]  ;;  %v5317_v21 = vshrl.u32 %v14482_v36, 16 }
 0x259   :  { %v4441_v23 = vadd.f32 %v10905_v45, %v14370_v20  ;;  %v4688_v3 = vrot.slane %v4686_v41, 7  ;;  %v4535_v54 = vadd.f32 %v14430_v58, %v4438_v39  ;;  %v14493_v40 = vld [vmem:[#allocation2 + $0x10] sm:$0xf]  ;;  %v14495_v20 = vpop.f32.mrb[136].mxu1  ;;  %v4963_v15 = vshrl.u32 %v4917_v24, 16  ;;  %v11599_v58 = vld [vmem:[%s16325_s3 + $0x68] sm:$0xff]   ;;  %10953 = vmatpush3.bf16.msra.mxu1 %v11598_v8 }
 0x25a   :  { %v10311_v59 = vpack.c.bf16 %v4578_v61, %v4578_v61  ;;  %v10046_v0 = vcombine.low %v14482_v36, %v14493_v40  ;;  %v10906_v56 = vpop.f32.mrb[144].mxu0  ;;  %v4542_v50 = vpop.f32.mrb[137].mxu1  ;;  %v4966_v38 = vshll.u32 %v4917_v24, 16  ;;  %v4972_v22 = vshll.u32 %v4933_v47, 16  ;;  %v4850_v10 = vld [vmem:[#allocation2 + $0x30] sm:$0xf]  ;;  %10954 = vmatprep.subr.bf16.mxu1 %v11599_v58 }
 0x25b   :  { %v4538_v16 = vadd.f32 %v14445_v12, %v4441_v23  ;;  %v4691_v19 = vor.u32 %v4689_v34, %v4688_v3  ;;  %v4692_v18 = vrot.slane %v4688_v3, 4  ;;  %v10907_v30 = vpop.f32.mrb[145].mxu0  ;;  %v14506_v35 = vpop.f32.mrb[138].mxu1  ;;  %v4579_v12 = vmax.f32 %v4535_v54, 0.0  ;;  %v4853_v43 = vld [vmem:[#allocation2 + $0x34] sm:$0x1] }
 0x25c   :  { %v4694_v4 = vshrl.u32 %v10311_v59, 16  ;;  %v4697_v25 = vshll.u32 %v10311_v59, 16  ;;  %5684 = vrot.lane.b32.xlu0 %v10046_v0, %s11753_s15  ;;  %v10908_v52 = vadd.f32 %v10907_v30, %v10906_v56  ;;  %v10909_v31 = vpop.f32.mrb[146].mxu0  ;;  %v4545_v29 = vpop.f32.mrb[139].mxu1  ;;  %v4965_v2 = vrot.slane %v4963_v15, 4  ;;  %v11601_v61 = vld [vmem:[%s16325_s3 + $0x70] sm:$0xff]  }
 0x25d   :  { %v4580_v62 = vmax.f32 %v4538_v16, 0.0  ;;  %v4845_v5 = vsel %vm14420_vm14, %v4691_v19, %v4844_v11  ;;  %v4848_v60 = vsel %vm14426_vm15, %v4692_v18, %v4847_v6  ;;  %v10910_v63 = vpop.f32.mrb[147].mxu0  ;;  %v4968_v1 = vrot.slane %v4966_v38, 5  ;;  %v14520_v24 = vld [vmem:[#allocation2 + $0x18] sm:$0xf]  ;;  %10955 = vmatpush3.bf16.msra.mxu1 %v11600_v9  ;;  %v11602_v58 = vld [vmem:[%s16325_s3 + $0x30] sm:$0xff]  }
 0x25e   :  { %v4696_v13 = vrot.slane %v4694_v4, 7  ;;  %4846 = vst [vmem:[#allocation2 + $0x28] sm:$0xf] %v4845_v5  ;;  %4849 = vst [vmem:[#allocation2 + $0x2c] sm:$0x1] %v4848_v60  ;;  %v10312_v45 = vpack.c.bf16 %v4579_v12, %v4579_v12  ;;  %v4446_v41 = vadd.f32 %v10908_v52, %v14374_v51  ;;  %v10911_v34 = vadd.f32 %v10910_v63, %v10909_v31 }
 0x25f   :  { %v10313_v42 = vpack.c.bf16 %v4580_v62, %v4580_v62  ;;  %v4969_v6 = vor.u32 %v4968_v1, %v4965_v2  ;;  %v4974_v23 = vrot.slane %v4972_v22, 5  ;;  %v14522_v15 = vld [vmem:[#allocation2 + $0x20] sm:$0xf]  ;;  %v4856_v16 = vld [vmem:[#allocation2 + $0x38] sm:$0xf]  ;;  %10956 = vmatprep.subr.bf16.mxu1 %v11601_v61  ;;  %v5348_v52 = vshll.u32 %v14520_v24, 16 }
 0x260   :  { %v4699_v39 = vor.u32 %v4697_v25, %v4696_v13  ;;  %v4700_v11 = vrot.slane %v4696_v13, 4  ;;  %v4702_v47 = vshrl.u32 %v10312_v45, 16  ;;  %v4705_v3 = vshll.u32 %v10312_v45, 16  ;;  %v4859_v0 = vld [vmem:[#allocation2 + $0x3c] sm:$0x1] }
 0x261   :  { %v4710_v59 = vshrl.u32 %v10313_v42, 16  ;;  %v4713_v54 = vshll.u32 %v10313_v42, 16  ;;  %v4862_v56 = vld [vmem:[#allocation2 + $0x40] sm:$0xf]  ;;  %v4543_v38 = vadd.f32 %v4542_v50, %v4446_v41  ;;  %v4449_v22 = vadd.f32 %v10911_v34, %v14376_v27  ;;  %v11603_v50 = vld [vmem:[%s16325_s3 + $0x78] sm:$0xff]   ;;  %10957 = vmatpush3.bf16.msra.mxu1 %v11602_v58 }
 0x262   :  { %v4851_v51 = vsel %vm14420_vm14, %v4699_v39, %v4850_v10  ;;  %v4854_v8 = vsel %vm14426_vm15, %v4700_v11, %v4853_v43  ;;  %v4704_v19 = vrot.slane %v4702_v47, 7  ;;  %v4970_v4 = vrot.slane %v4969_v6, 4  ;;  %v14533_v30 = vpop.f32.mrb[148].mxu0  ;;  %v4865_v27 = vld [vmem:[#allocation2 + $0x44] sm:$0x1]  ;;  %v11604_v41 = vld [vmem:[%s16325_s3 + $0x38] sm:$0xff]   ;;  %10958 = vmatprep.subr.bf16.mxu1 %v11603_v50 }
 0x263   :  { %4852 = vst [vmem:[#allocation2 + $0x30] sm:$0xf] %v4851_v51  ;;  %4855 = vst [vmem:[#allocation2 + $0x34] sm:$0x1] %v4854_v8  ;;  %v4712_v18 = vrot.slane %v4710_v59, 7  ;;  %v5345_v25 = vshrl.u32 %v14520_v24, 16  ;;  %v4546_v62 = vadd.f32 %v4545_v29, %v4449_v22 }
 0x264   :  { %v4581_v12 = vmax.f32 %v4543_v38, 0.0  ;;  %v5359_v31 = vshrl.u32 %v14522_v15, 16  ;;  %v14540_v2 = vpop.f32.mrb[149].mxu0  ;;  %v4707_v5 = vor.u32 %v4705_v3, %v4704_v19  ;;  %v4708_v60 = vrot.slane %v4704_v19, 4  ;;  %v14550_v42 = vpop.f32.mrb[140].mxu1 }
 0x265   :  { %v4715_v13 = vor.u32 %v4713_v54, %v4712_v18  ;;  %v4716_v63 = vrot.slane %v4712_v18, 4  ;;  %v14542_v1 = vpop.f32.mrb[150].mxu0  ;;  %v4582_v10 = vmax.f32 %v4546_v62, 0.0  ;;  %v4975_v43 = vsel %vm11876_vm2, %v4970_v4, %v4974_v23  ;;  %v14563_v6 = vpop.f32.mrb[141].mxu1  ;;  %v5300_v54 = vld [vmem:[#allocation2 + $0xc] sm:$0x1]  ;;  %10959 = vmatpush3.bf16.msra.mxu1 %v11604_v41 }
 0x266   :  { %v10314_v9 = vpack.c.bf16 %v4581_v12, %v4581_v12  ;;  %v14546_v45 = vrot.slane %v5345_v25, 4  ;;  %v14548_v29 = vpop.f32.mrb[151].mxu0  ;;  %v4857_v34 = vsel %vm14420_vm14, %v4707_v5, %v4856_v16  ;;  %v4860_v61 = vsel %vm14426_vm15, %v4708_v60, %v4859_v0  ;;  %v14570_v51 = vpop.f32.mrb[142].mxu1  ;;  %v4868_v8 = vld [vmem:[#allocation2 + $0x50] sm:$0xf] }
 0x267   :  { %v4863_v39 = vsel %vm14420_vm14, %v4715_v13, %v4862_v56  ;;  %v4866_v11 = vsel %vm14426_vm15, %v4716_v63, %v4865_v27  ;;  %4858 = vst [vmem:[#allocation2 + $0x38] sm:$0xf] %v4857_v34  ;;  %4861 = vst [vmem:[#allocation2 + $0x3c] sm:$0x1] %v4860_v61  ;;  %v10315_v3 = vpack.c.bf16 %v4582_v10, %v4582_v10  ;;  %v14572_v16 = vrot.slane %v5348_v52, 5  ;;  %v14579_v22 = vpop.f32.mrb[143].mxu1 }
 0x268   :  { %4864 = vst [vmem:[#allocation2 + $0x40] sm:$0xf] %v4863_v39  ;;  %4867 = vst [vmem:[#allocation2 + $0x44] sm:$0x1] %v4866_v11  ;;  %v4718_v23 = vshrl.u32 %v10314_v9, 16  ;;  %v4721_v47 = vshll.u32 %v10314_v9, 16  ;;  %v10030_v59 = vcombine.low %v4961_v44, %v4975_v43  ;;  %v10047_v38 = vcombine.low %v14520_v24, %v14522_v15 }
 0x269   :  { %v14574_v0 = vrot.slane %v5359_v31, 4  ;;  %v5362_v56 = vshll.u32 %v14522_v15, 16  ;;  %v4871_v19 = vld [vmem:[#allocation2 + $0x54] sm:$0x1]  ;;  %v4726_v18 = vshrl.u32 %v10315_v3, 16  ;;  %v4729_v48 = vshll.u32 %v10315_v3, 16 }
 0x26a   :  { %v4720_v58 = vrot.slane %v4718_v23, 7  ;;  %5604 = vrot.lane.b32.xlu1 %v10030_v59, %s11753_s15  ;;  %v4874_v44 = vld [vmem:[#allocation2 + $0x58] sm:$0xf]  ;;  %v5351_v4 = vor.u32 %v14572_v16, %v14546_v45  ;;  %5686 = vrot.lane.b32.xlu0 %v10047_v38, %s11753_s15  ;;  %v5320_v24 = vshll.u32 %v14482_v36, 16  ;;  %v5326_v15 = vshll.u32 %v5300_v54, 16  ;;  %v14589_v50 = vpop.f32.mrb[152].mxu0 }
 0x26b   :  { %v14585_v25 = vrot.slane %v5362_v56, 5  ;;  %v4728_v62 = vrot.slane %v4726_v18, 7  ;;  %v5301_v52 = vld [vmem:[#allocation2 + $0x14] sm:$0x1]  ;;  %v5319_v31 = vrot.slane %v5317_v21, 4  ;;  %v14591_v5 = vpop.f32.mrb[153].mxu0  ;;  %v10914_v38 = vadd.f32 %v14540_v2, %v14533_v30 }
 0x26c   :  { %v4723_v27 = vor.u32 %v4721_v47, %v4720_v58  ;;  %v4724_v12 = vrot.slane %v4720_v58, 4  ;;  %v4877_v60 = vld [vmem:[#allocation2 + $0x5c] sm:$0x1]  ;;  %v5322_v63 = vrot.slane %v5320_v24, 5  ;;  %v5328_v9 = vrot.slane %v5326_v15, 5  ;;  %v14596_v43 = vpop.f32.mrb[154].mxu0 }
 0x26d   :  { %v5365_v13 = vor.u32 %v14585_v25, %v14574_v0  ;;  %v5331_v10 = vshrl.u32 %v14493_v40, 16  ;;  %v4731_v34 = vor.u32 %v4729_v48, %v4728_v62  ;;  %v4732_v61 = vrot.slane %v4728_v62, 4  ;;  %v14602_v39 = vld [vmem:[#allocation2 + $0x10] sm:$0xf]  ;;  %v14604_v11 = vpop.f32.mrb[155].mxu0 }
 0x26e   :  { %v4869_v36 = vsel %vm14420_vm14, %v4723_v27, %v4868_v8  ;;  %v4872_v41 = vsel %vm14426_vm15, %v4724_v12, %v4871_v19  ;;  %v5323_v23 = vor.u32 %v5322_v63, %v5319_v31  ;;  %v5334_v3 = vshll.u32 %v14493_v40, 16  ;;  %v14607_v54 = vld [vmem:[#allocation2 + $0x14] sm:$0x1]  ;;  %v14617_v19 = vld [vmem:[#allocation2 + $0x18] sm:$0xf] }
 0x26f   :  { %4870 = vst [vmem:[#allocation2 + $0x50] sm:$0xf] %v4869_v36  ;;  %4873 = vst [vmem:[#allocation2 + $0x54] sm:$0x1] %v4872_v41  ;;  %v5333_v47 = vrot.slane %v5331_v10, 4  ;;  %v5340_v59 = vshll.u32 %v5301_v52, 16  ;;  %v4875_v8 = vsel %vm14420_vm14, %v4731_v34, %v4874_v44  ;;  %v4878_v56 = vsel %vm14426_vm15, %v4732_v61, %v4877_v60 }
 0x270   :  { %v10917_v58 = vadd.f32 %v14548_v29, %v14542_v1  ;;  %4876 = vst [vmem:[#allocation2 + $0x58] sm:$0xf] %v4875_v8  ;;  %4879 = vst [vmem:[#allocation2 + $0x5c] sm:$0x1] %v4878_v56  ;;  %v5324_v40 = vrot.slane %v5323_v23, 4  ;;  %v5336_v18 = vrot.slane %v5334_v3, 5  ;;  %v4454_v44 = vadd.f32 %v10914_v38, %v14380_v17 }
 0x271   :  { %v5342_v48 = vrot.slane %v5340_v59, 5  ;;  %v4977_v21 = vshrl.u32 %v14602_v39, 16  ;;  %v14622_v15 = vld [vmem:[#allocation2 + $0x1c] sm:$0x1]  ;;  %v4980_v30 = vshll.u32 %v14602_v39, 16  ;;  %v4986_v2 = vshll.u32 %v14607_v54, 16 }
 0x272   :  { %v4457_v24 = vadd.f32 %v10917_v58, %v14382_v49  ;;  %v5329_v1 = vsel %vm11876_vm2, %v5324_v40, %v5328_v9  ;;  %v5337_v29 = vor.u32 %v5336_v18, %v5333_v47  ;;  %v4991_v12 = vshrl.u32 %v14617_v19, 16  ;;  %v14629_v62 = vld [vmem:[#allocation2 + $0x30] sm:$0xf]  ;;  %v14631_v52 = vpop.f32.mrb[156].mxu0  ;;  %v14635_v63 = vld [vmem:[#allocation2 + $0x28] sm:$0xf] }
 0x273   :  { %v4979_v27 = vrot.slane %v4977_v21, 4  ;;  %v4551_v17 = vadd.f32 %v14495_v20, %v4454_v44  ;;  %v4982_v31 = vrot.slane %v4980_v30, 5  ;;  %v4988_v60 = vrot.slane %v4986_v2, 5  ;;  %v5302_v10 = vld [vmem:[#allocation2 + $0x1c] sm:$0x1]  ;;  %v14637_v36 = vpop.f32.mrb[157].mxu0 }
 0x274   :  { %v4554_v49 = vadd.f32 %v14506_v35, %v4457_v24  ;;  %v5338_v9 = vrot.slane %v5337_v29, 4  ;;  %v4993_v41 = vrot.slane %v4991_v12, 4  ;;  %v4994_v34 = vshll.u32 %v14617_v19, 16  ;;  %v14641_v23 = vpop.f32.mrb[158].mxu0  ;;  %v5303_v59 = vld [vmem:[#allocation2 + $0x24] sm:$0x1] }
 0x275   :  { %v5000_v61 = vshll.u32 %v14622_v15, 16  ;;  %v4583_v47 = vmax.f32 %v4551_v17, 0.0  ;;  %v4983_v20 = vor.u32 %v4982_v31, %v4979_v27  ;;  %v10048_v35 = vcombine.low %v14635_v63, %v14629_v62  ;;  %v14645_v8 = vpop.f32.mrb[159].mxu0  ;;  %v14657_v16 = vld [vmem:[#allocation2 + $0x20] sm:$0xf] }
 0x276   :  { %v4584_v3 = vmax.f32 %v4554_v49, 0.0  ;;  %v5343_v56 = vsel %vm11876_vm2, %v5338_v9, %v5342_v48  ;;  %v4996_v38 = vrot.slane %v4994_v34, 5  ;;  %v5352_v40 = vrot.slane %v5351_v4, 4  ;;  %v4880_v9 = vld [vmem:[#allocation2 + $0x60] sm:$0xf] }
 0x277   :  { %v5002_v58 = vrot.slane %v5000_v61, 5  ;;  %v10054_v18 = vcombine.low %v5329_v1, %v5343_v56  ;;  %v10316_v21 = vpack.c.bf16 %v4583_v47, %v4583_v47  ;;  %v4984_v24 = vrot.slane %v4983_v20, 4  ;;  %5688 = vrot.lane.b32.xlu0 %v10048_v35, %s11753_s15  ;;  %v4886_v34 = vld [vmem:[#allocation2 + $0x68] sm:$0xf]  ;;  %v4889_v61 = vld [vmem:[#allocation2 + $0x6c] sm:$0x1] }
 0x278   :  { %v10317_v44 = vpack.c.bf16 %v4584_v3, %v4584_v3  ;;  %v4997_v30 = vor.u32 %v4996_v38, %v4993_v41  ;;  %v5354_v2 = vshll.u32 %v5302_v10, 16  ;;  %v5366_v29 = vrot.slane %v5365_v13, 4  ;;  %v4883_v41 = vld [vmem:[#allocation2 + $0x64] sm:$0x1] }
 0x279   :  { %v5368_v27 = vshll.u32 %v5303_v59, 16  ;;  %11220 = vmatprep.mubr.msk.bf16.mxu0 %vm5724_vm0, %v10054_v18  ;;  %v4734_v48 = vshrl.u32 %v10316_v21, 16  ;;  %v4737_v12 = vshll.u32 %v10316_v21, 16  ;;  %v4989_v4 = vsel %vm11876_vm2, %v4984_v24, %v4988_v60  ;;  %v14674_v18 = vld [vmem:[#allocation2 + $0x28] sm:$0xf] }
 0x27a   :  { %v4742_v17 = vshrl.u32 %v10317_v44, 16  ;;  %v4745_v45 = vshll.u32 %v10317_v44, 16  ;;  %v4998_v1 = vrot.slane %v4997_v30, 4  ;;  %v5356_v49 = vrot.slane %v5354_v2, 5  ;;  %v14688_v30 = vld [vmem:[#allocation2 + $0x40] sm:$0xf] }
 0x27b   :  { %v5370_v31 = vrot.slane %v5368_v27, 5  ;;  %v4736_v10 = vrot.slane %v4734_v48, 7  ;;  %v10920_v25 = vadd.f32 %v14591_v5, %v14589_v50  ;;  %v10923_v13 = vadd.f32 %v14604_v11, %v14596_v43 }
 0x27c   :  { %v4744_v0 = vrot.slane %v4742_v17, 7  ;;  %v5003_v47 = vsel %vm11876_vm2, %v4998_v1, %v5002_v58  ;;  %v5357_v60 = vsel %vm11876_vm2, %v5352_v40, %v5356_v49  ;;  %v5005_v20 = vshrl.u32 %v14657_v16, 16  ;;  %v14676_v58 = vld [vmem:[#allocation2 + $0x24] sm:$0x1]  ;;  %v14678_v40 = vld [vmem:[#allocation2 + $0x2c] sm:$0x1] }
 0x27d   :  { %v5371_v3 = vsel %vm11876_vm2, %v5366_v29, %v5370_v31  ;;  %v4739_v35 = vor.u32 %v4737_v12, %v4736_v10  ;;  %v4740_v59 = vrot.slane %v4736_v10, 4  ;;  %v10031_v5 = vcombine.low %v4989_v4, %v5003_v47  ;;  %v14699_v4 = vld [vmem:[#allocation2 + $0x38] sm:$0xf] }
 0x27e   :  { %v4747_v56 = vor.u32 %v4745_v45, %v4744_v0  ;;  %v4748_v50 = vrot.slane %v4744_v0, 4  ;;  %v10055_v38 = vcombine.low %v5357_v60, %v5371_v3  ;;  %v4462_v43 = vadd.f32 %v10920_v25, %v14386_v33 }
 0x27f   :  { %v4465_v11 = vadd.f32 %v10923_v13, %v14388_v46  ;;  %v4881_v21 = vsel %vm14420_vm14, %v4739_v35, %v4880_v9  ;;  %v4884_v44 = vsel %vm14426_vm15, %v4740_v59, %v4883_v41  ;;  %5606 = vrot.lane.b32.xlu1 %v10031_v5, %s11753_s15  ;;  %v5007_v29 = vrot.slane %v5005_v20, 4  ;;  %v4892_v5 = vld [vmem:[#allocation2 + $0x70] sm:$0xf] }
 0x280   :  { %v4887_v24 = vsel %vm14420_vm14, %v4747_v56, %v4886_v34  ;;  %v4890_v33 = vsel %vm14426_vm15, %v4748_v50, %v4889_v61  ;;  %4882 = vst [vmem:[#allocation2 + $0x60] sm:$0xf] %v4881_v21  ;;  %4885 = vst [vmem:[#allocation2 + $0x64] sm:$0x1] %v4884_v44  ;;  %11221 = vmatmul.mubr.msk.bf16.vlgmr.msra.gmra.mrb[160].mxu0 %vm5724_vm0, %v10055_v38  ;;  %v4559_v46 = vadd.f32 %v14563_v6, %v4462_v43  ;;  %v4895_v38 = vld [vmem:[#allocation2 + $0x74] sm:$0x1] }
 0x281   :  { %4888 = vst [vmem:[#allocation2 + $0x68] sm:$0xf] %v4887_v24  ;;  %4891 = vst [vmem:[#allocation2 + $0x6c] sm:$0x1] %v4890_v33  ;;  %v4562_v2 = vadd.f32 %v14579_v22, %v4465_v11  ;;  %v5008_v27 = vshll.u32 %v14657_v16, 16  ;;  %v5014_v48 = vshll.u32 %v14676_v58, 16  ;;  %v10049_v6 = vcombine.low %v14699_v4, %v14688_v30 }
 0x282   :  { %v5019_v12 = vshrl.u32 %v14674_v18, 16  ;;  %v5022_v17 = vshll.u32 %v14674_v18, 16  ;;  %v5028_v45 = vshll.u32 %v14678_v40, 16  ;;  %v4585_v1 = vmax.f32 %v4559_v46, 0.0  ;;  %v5304_v22 = vld [vmem:[#allocation2 + $0x2c] sm:$0x1] }
 0x283   :  { %v4586_v49 = vmax.f32 %v4562_v2, 0.0  ;;  %v5010_v31 = vrot.slane %v5008_v27, 5  ;;  %v5016_v10 = vrot.slane %v5014_v48, 5  ;;  %5690 = vrot.lane.b32.xlu0 %v10049_v6, %s11753_s15  ;;  %v5373_v61 = vshrl.u32 %v14635_v63, 16  ;;  %v5305_v46 = vld [vmem:[#allocation2 + $0x34] sm:$0x1] }
 0x284   :  { %v5021_v9 = vrot.slane %v5019_v12, 4  ;;  %v5024_v41 = vrot.slane %v5022_v17, 5  ;;  %v5030_v0 = vrot.slane %v5028_v45, 5  ;;  %v10318_v25 = vpack.c.bf16 %v4585_v1, %v4585_v1  ;;  %v4898_v27 = vld [vmem:[#allocation2 + $0x78] sm:$0xf] }
 0x285   :  { %v10319_v13 = vpack.c.bf16 %v4586_v49, %v4586_v49  ;;  %v5011_v34 = vor.u32 %v5010_v31, %v5007_v29  ;;  %v5376_v60 = vshll.u32 %v14635_v63, 16  ;;  %v5382_v3 = vshll.u32 %v5304_v22, 16  ;;  %v4901_v63 = vld [vmem:[#allocation2 + $0x7c] sm:$0x1]  ;;  %v14712_v22 = vld [vmem:[#allocation2 + $0x30] sm:$0xf] }
 0x286   :  { %v5025_v47 = vor.u32 %v5024_v41, %v5021_v9  ;;  %v5387_v20 = vshrl.u32 %v14629_v62, 16  ;;  %v4750_v35 = vshrl.u32 %v10318_v25, 16  ;;  %v4753_v59 = vshll.u32 %v10318_v25, 16 }
 0x287   :  { %v4758_v56 = vshrl.u32 %v10319_v13, 16  ;;  %v4761_v50 = vshll.u32 %v10319_v13, 16  ;;  %v5012_v43 = vrot.slane %v5011_v34, 4  ;;  %v5375_v21 = vrot.slane %v5373_v61, 4  ;;  %v14714_v34 = vld [vmem:[#allocation2 + $0x34] sm:$0x1] }
 0x288   :  { %v5026_v11 = vrot.slane %v5025_v47, 4  ;;  %v5378_v44 = vrot.slane %v5376_v60, 5  ;;  %v4752_v24 = vrot.slane %v4750_v35, 7  ;;  %v5384_v2 = vrot.slane %v5382_v3, 5  ;;  %v14724_v47 = vld [vmem:[#allocation2 + $0x38] sm:$0xf] }
 0x289   :  { %v4760_v33 = vrot.slane %v4758_v56, 7  ;;  %v5389_v29 = vrot.slane %v5387_v20, 4  ;;  %v5017_v48 = vsel %vm11876_vm2, %v5012_v43, %v5016_v10  ;;  %v5390_v45 = vshll.u32 %v14629_v62, 16 }
 0x28a   :  { %v5031_v12 = vsel %vm11876_vm2, %v5026_v11, %v5030_v0  ;;  %v5379_v17 = vor.u32 %v5378_v44, %v5375_v21  ;;  %v4755_v1 = vor.u32 %v4753_v59, %v4752_v24  ;;  %v4756_v49 = vrot.slane %v4752_v24, 4  ;;  %v14737_v11 = vld [vmem:[#allocation2 + $0x3c] sm:$0x1] }
 0x28b   :  { %v4763_v31 = vor.u32 %v4761_v50, %v4760_v33  ;;  %v4764_v6 = vrot.slane %v4760_v33, 4  ;;  %v10032_v9 = vcombine.low %v5017_v48, %v5031_v12  ;;  %v5392_v25 = vrot.slane %v5390_v45, 5  ;;  %v14749_v12 = vld [vmem:[#allocation2 + $0x50] sm:$0xf] }
 0x28c   :  { %v5380_v41 = vrot.slane %v5379_v17, 4  ;;  %v5396_v13 = vshll.u32 %v5305_v46, 16  ;;  %v4893_v10 = vsel %vm14420_vm14, %v4755_v1, %v4892_v5  ;;  %v4896_v0 = vsel %vm14426_vm15, %v4756_v49, %v4895_v38 }
 0x28d   :  { %v4899_v62 = vsel %vm14420_vm14, %v4763_v31, %v4898_v27  ;;  %v4902_v61 = vsel %vm14426_vm15, %v4764_v6, %v4901_v63  ;;  %4894 = vst [vmem:[#allocation2 + $0x70] sm:$0xf] %v4893_v10  ;;  %4897 = vst [vmem:[#allocation2 + $0x74] sm:$0x1] %v4896_v0  ;;  %5608 = vrot.lane.b32.xlu1 %v10032_v9, %s11753_s15  ;;  %v5393_v3 = vor.u32 %v5392_v25, %v5389_v29 }
 0x28e   :  { %4900 = vst [vmem:[#allocation2 + $0x78] sm:$0xf] %v4899_v62  ;;  %4903 = vst [vmem:[#allocation2 + $0x7c] sm:$0x1] %v4902_v61  ;;  %v5385_v60 = vsel %vm11876_vm2, %v5380_v41, %v5384_v2  ;;  %v5398_v20 = vrot.slane %v5396_v13, 5  ;;  %v10926_v35 = vadd.f32 %v14637_v36, %v14631_v52  ;;  %v10929_v59 = vadd.f32 %v14645_v8, %v14641_v23 }
 0x28f   :  { %v5033_v56 = vshrl.u32 %v14712_v22, 16  ;;  %v5036_v50 = vshll.u32 %v14712_v22, 16  ;;  %v5042_v5 = vshll.u32 %v14714_v34, 16  ;;  %v5394_v38 = vrot.slane %v5393_v3, 4  ;;  %v14742_v8 = vld [vmem:[#allocation2 + $0x58] sm:$0xf] }
 0x290   :  { %v4470_v43 = vadd.f32 %v10926_v35, %v14392_v53  ;;  %v5047_v21 = vshrl.u32 %v14724_v47, 16  ;;  %v5050_v44 = vshll.u32 %v14724_v47, 16  ;;  %v4473_v52 = vadd.f32 %v10929_v59, %v14394_v32  ;;  %v5306_v32 = vld [vmem:[#allocation2 + $0x3c] sm:$0x1]  ;;  %v5307_v62 = vld [vmem:[#allocation2 + $0x44] sm:$0x1] }
 0x291   :  { %v5035_v36 = vrot.slane %v5033_v56, 4  ;;  %v5038_v24 = vrot.slane %v5036_v50, 5  ;;  %v5044_v23 = vrot.slane %v5042_v5, 5  ;;  %v5399_v33 = vsel %vm11876_vm2, %v5394_v38, %v5398_v20  ;;  %v14762_v59 = vld [vmem:[#allocation2 + $0x50] sm:$0xf] }
 0x292   :  { %v4567_v46 = vadd.f32 %v14550_v42, %v4470_v43  ;;  %v5049_v2 = vrot.slane %v5047_v21, 4  ;;  %v5052_v53 = vrot.slane %v5050_v44, 5  ;;  %v10056_v29 = vcombine.low %v5385_v60, %v5399_v33  ;;  %v4904_v56 = vld [vmem:[#allocation2 + $0x80] sm:$0xf]  ;;  %v4907_v50 = vld [vmem:[#allocation2 + $0x84] sm:$0x1] }
 0x293   :  { %v4570_v27 = vadd.f32 %v14570_v51, %v4473_v52  ;;  %v5039_v63 = vor.u32 %v5038_v24, %v5035_v36  ;;  %v5056_v48 = vshll.u32 %v14737_v11, 16  ;;  %v10050_v1 = vcombine.low %v14749_v12, %v14742_v8  ;;  %v4910_v52 = vld [vmem:[#allocation2 + $0x88] sm:$0xf]  ;;  %v4913_v36 = vld [vmem:[#allocation2 + $0x8c] sm:$0x1] }
 0x294   :  { %v4587_v17 = vmax.f32 %v4567_v46, 0.0  ;;  %v5053_v45 = vor.u32 %v5052_v53, %v5049_v2  ;;  %v5401_v49 = vshrl.u32 %v14699_v4, 16  ;;  %11224 = vmatprep.mubr.msk.bf16.mxu0 %vm5724_vm0, %v10056_v29  ;;  %v5404_v51 = vshll.u32 %v14699_v4, 16  ;;  %v14766_v53 = vld [vmem:[#allocation2 + $0x54] sm:$0x1] }
 0x295   :  { %v4588_v42 = vmax.f32 %v4570_v27, 0.0  ;;  %v5040_v31 = vrot.slane %v5039_v63, 4  ;;  %v5058_v6 = vrot.slane %v5056_v48, 5  ;;  %5692 = vrot.lane.b32.xlu0 %v10050_v1, %s11753_s15  ;;  %v5410_v13 = vshll.u32 %v5306_v32, 16 }
 0x296   :  { %v10320_v9 = vpack.c.bf16 %v4587_v17, %v4587_v17  ;;  %v5054_v41 = vrot.slane %v5053_v45, 4  ;;  %v5403_v25 = vrot.slane %v5401_v49, 4  ;;  %v5406_v61 = vrot.slane %v5404_v51, 5  ;;  %v14770_v45 = vld [vmem:[#allocation2 + $0x68] sm:$0xf] }
 0x297   :  { %v10321_v10 = vpack.c.bf16 %v4588_v42, %v4588_v42  ;;  %v5045_v0 = vsel %vm11876_vm2, %v5040_v31, %v5044_v23  ;;  %v5415_v60 = vshrl.u32 %v14688_v30, 16  ;;  %v5412_v4 = vrot.slane %v5410_v13, 5 }
 0x298   :  { %v4766_v3 = vshrl.u32 %v10320_v9, 16  ;;  %v4769_v20 = vshll.u32 %v10320_v9, 16  ;;  %v5059_v35 = vsel %vm11876_vm2, %v5054_v41, %v5058_v6  ;;  %v5407_v21 = vor.u32 %v5406_v61, %v5403_v25  ;;  %v14778_v41 = vld [vmem:[#allocation2 + $0x60] sm:$0xf]  ;;  %v5308_v25 = vld [vmem:[#allocation2 + $0x54] sm:$0x1] }
 0x299   :  { %v4774_v5 = vshrl.u32 %v10321_v10, 16  ;;  %v4777_v38 = vshll.u32 %v10321_v10, 16  ;;  %v10033_v43 = vcombine.low %v5045_v0, %v5059_v35  ;;  %v5417_v24 = vrot.slane %v5415_v60, 4 }
 0x29a   :  { %v4768_v44 = vrot.slane %v4766_v3, 7  ;;  %v5418_v23 = vshll.u32 %v14688_v30, 16  ;;  %v5424_v33 = vshll.u32 %v5307_v62, 16  ;;  %v5408_v2 = vrot.slane %v5407_v21, 4  ;;  %v5309_v3 = vld [vmem:[#allocation2 + $0x5c] sm:$0x1] }
 0x29b   :  { %v4776_v46 = vrot.slane %v4774_v5, 7  ;;  %5610 = vrot.lane.b32.xlu1 %v10033_v43, %s11753_s15  ;;  %v5075_v29 = vshrl.u32 %v14762_v59, 16  ;;  %v5078_v27 = vshll.u32 %v14762_v59, 16  ;;  %v5084_v0 = vshll.u32 %v14766_v53, 16 }
 0x29c   :  { %v4771_v63 = vor.u32 %v4769_v20, %v4768_v44  ;;  %v4772_v48 = vrot.slane %v4768_v44, 4  ;;  %v5420_v32 = vrot.slane %v5418_v23, 5  ;;  %v5426_v17 = vrot.slane %v5424_v33, 5  ;;  %v14798_v33 = vld [vmem:[#allocation2 + $0x5c] sm:$0x1] }
 0x29d   :  { %v4779_v1 = vor.u32 %v4777_v38, %v4776_v46  ;;  %v4780_v49 = vrot.slane %v4776_v46, 4  ;;  %v5413_v30 = vsel %vm11876_vm2, %v5408_v2, %v5412_v4  ;;  %v5077_v42 = vrot.slane %v5075_v29, 4  ;;  %v14792_v38 = vld [vmem:[#allocation2 + $0x58] sm:$0xf] }
 0x29e   :  { %v4905_v31 = vsel %vm14420_vm14, %v4771_v63, %v4904_v56  ;;  %v4908_v6 = vsel %vm14426_vm15, %v4772_v48, %v4907_v50  ;;  %v5421_v51 = vor.u32 %v5420_v32, %v5417_v24  ;;  %v5080_v9 = vrot.slane %v5078_v27, 5  ;;  %v14809_v32 = vld [vmem:[#allocation2 + $0x64] sm:$0x1] }
 0x29f   :  { %4906 = vst [vmem:[#allocation2 + $0x80] sm:$0xf] %v4905_v31  ;;  %4909 = vst [vmem:[#allocation2 + $0x84] sm:$0x1] %v4908_v6  ;;  %v4911_v13 = vsel %vm14420_vm14, %v4779_v1, %v4910_v52  ;;  %v4914_v10 = vsel %vm14426_vm15, %v4780_v49, %v4913_v36  ;;  %v10051_v62 = vcombine.low %v14778_v41, %v14770_v45  ;;  %v5429_v20 = vshrl.u32 %v14749_v12, 16 }
 0x2a0   :  { %4912 = vst [vmem:[#allocation2 + $0x88] sm:$0xf] %v4911_v13  ;;  %4915 = vst [vmem:[#allocation2 + $0x8c] sm:$0x1] %v4914_v10  ;;  %v5422_v61 = vrot.slane %v5421_v51, 4  ;;  %v5081_v60 = vor.u32 %v5080_v9, %v5077_v42  ;;  %v5432_v35 = vshll.u32 %v14749_v12, 16 }
 0x2a1   :  { %v5086_v4 = vrot.slane %v5084_v0, 5  ;;  %5694 = vrot.lane.b32.xlu0 %v10051_v62, %s11753_s15  ;;  %v5438_v56 = vshll.u32 %v5308_v25, 16  ;;  %v5443_v50 = vshrl.u32 %v14742_v8, 16  ;;  %v5446_v5 = vshll.u32 %v14742_v8, 16  ;;  %v14796_v12 = vld [vmem:[#allocation2 + $0x60] sm:$0xf] }
 0x2a2   :  { %v5427_v43 = vsel %vm11876_vm2, %v5422_v61, %v5426_v17  ;;  %v5082_v21 = vrot.slane %v5081_v60, 4  ;;  %v5431_v44 = vrot.slane %v5429_v20, 4  ;;  %v5434_v52 = vrot.slane %v5432_v35, 5  ;;  %v14812_v1 = vld [vmem:[#allocation2 + $0x78] sm:$0xf] }
 0x2a3   :  { %v10057_v36 = vcombine.low %v5413_v30, %v5427_v43  ;;  %v5445_v24 = vrot.slane %v5443_v50, 4  ;;  %v5448_v23 = vrot.slane %v5446_v5, 5  ;;  %v5452_v8 = vshll.u32 %v5309_v3, 16  ;;  %v5310_v60 = vld [vmem:[#allocation2 + $0x64] sm:$0x1] }
 0x2a4   :  { %v5087_v46 = vsel %vm11876_vm2, %v5082_v21, %v5086_v4  ;;  %v5435_v2 = vor.u32 %v5434_v52, %v5431_v44  ;;  %v5089_v29 = vshrl.u32 %v14792_v38, 16  ;;  %v5440_v63 = vrot.slane %v5438_v56, 5  ;;  %v5311_v4 = vld [vmem:[#allocation2 + $0x6c] sm:$0x1]  ;;  %v14830_v50 = vld [vmem:[#allocation2 + $0x68] sm:$0xf] }
 0x2a5   :  { %11225 = vmatmul.mubr.msk.bf16.gmra.mrb[164].mxu0 %vm5724_vm0, %v10057_v36  ;;  %v10034_v27 = vcombine.low %v5073_v26, %v5087_v46  ;;  %v5449_v48 = vor.u32 %v5448_v23, %v5445_v24  ;;  %v5092_v17 = vshll.u32 %v14792_v38, 16  ;;  %v5098_v42 = vshll.u32 %v14798_v33, 16  ;;  %v14818_v26 = vld [vmem:[#allocation2 + $0x70] sm:$0xf]  ;;  %v14833_v52 = vld [vmem:[#allocation2 + $0x6c] sm:$0x1] }
 0x2a6   :  { %v5436_v49 = vrot.slane %v5435_v2, 4  ;;  %v5091_v30 = vrot.slane %v5089_v29, 4  ;;  %v5103_v31 = vshrl.u32 %v14796_v12, 16  ;;  %v5454_v51 = vrot.slane %v5452_v8, 5  ;;  %v14837_v2 = vld [vmem:[#allocation2 + $0x70] sm:$0xf] }
 0x2a7   :  { %5612 = vrot.lane.b32.xlu1 %v10034_v27, %s11753_s15  ;;  %v5450_v6 = vrot.slane %v5449_v48, 4  ;;  %v5094_v57 = vrot.slane %v5092_v17, 5  ;;  %v5106_v7 = vshll.u32 %v14796_v12, 16  ;;  %v5112_v13 = vshll.u32 %v14809_v32, 16 }
 0x2a8   :  { %v5441_v9 = vsel %vm11876_vm2, %v5436_v49, %v5440_v63  ;;  %v5105_v25 = vrot.slane %v5103_v31, 4  ;;  %v10052_v10 = vcombine.low %v14818_v26, %v14812_v1  ;;  %v5457_v3 = vshrl.u32 %v14778_v41, 16  ;;  %v14842_v49 = vld [vmem:[#allocation2 + $0x74] sm:$0x1] }
 0x2a9   :  { %v5455_v0 = vsel %vm11876_vm2, %v5450_v6, %v5454_v51  ;;  %v5095_v62 = vor.u32 %v5094_v57, %v5091_v30  ;;  %v5108_v61 = vrot.slane %v5106_v7, 5  ;;  %v5100_v35 = vrot.slane %v5098_v42, 5  ;;  %v14849_v51 = vld [vmem:[#allocation2 + $0x88] sm:$0xf] }
 0x2aa   :  { %v10058_v20 = vcombine.low %v5441_v9, %v5455_v0  ;;  %5696 = vrot.lane.b32.xlu0 %v10052_v10, %s11753_s15  ;;  %v5460_v56 = vshll.u32 %v14778_v41, 16  ;;  %v5459_v21 = vrot.slane %v5457_v3, 4  ;;  %v5471_v44 = vshrl.u32 %v14770_v45, 16 }
 0x2ab   :  { %v5096_v5 = vrot.slane %v5095_v62, 4  ;;  %v5109_v43 = vor.u32 %v5108_v61, %v5105_v25  ;;  %v5114_v36 = vrot.slane %v5112_v13, 5  ;;  %v5466_v23 = vshll.u32 %v5310_v60, 16  ;;  %v5298_v61 = vld [vmem:[#allocation2 + $0x80] sm:$0xf] }
 0x2ac   :  { %11228 = vmatprep.mubr.msk.bf16.mxu0 %vm5724_vm0, %v10058_v20  ;;  %v5462_v24 = vrot.slane %v5460_v56, 5  ;;  %v5474_v46 = vshll.u32 %v14770_v45, 16  ;;  %v5473_v41 = vrot.slane %v5471_v44, 4  ;;  %v5480_v29 = vshll.u32 %v5311_v4, 16 }
 0x2ad   :  { %v5110_v8 = vrot.slane %v5109_v43, 4  ;;  %v5117_v27 = vshrl.u32 %v14830_v50, 16  ;;  %v5101_v63 = vsel %vm11876_vm2, %v5096_v5, %v5100_v35  ;;  %v5120_v30 = vshll.u32 %v14830_v50, 16  ;;  %v5312_v5 = vld [vmem:[#allocation2 + $0x74] sm:$0x1] }
 0x2ae   :  { %v5463_v48 = vor.u32 %v5462_v24, %v5459_v21  ;;  %v5476_v17 = vrot.slane %v5474_v46, 5  ;;  %v5126_v31 = vshll.u32 %v14833_v52, 16  ;;  %v5131_v6 = vshrl.u32 %v14837_v2, 16 }
 0x2af   :  { %v5115_v42 = vsel %vm11876_vm2, %v5110_v8, %v5114_v36  ;;  %v5119_v45 = vrot.slane %v5117_v27, 4  ;;  %v5122_v25 = vrot.slane %v5120_v30, 5  ;;  %v5468_v13 = vrot.slane %v5466_v23, 5  ;;  %v5313_v23 = vld [vmem:[#allocation2 + $0x7c] sm:$0x1] }
 0x2b0   :  { %v10035_v57 = vcombine.low %v5101_v63, %v5115_v42  ;;  %v5464_v7 = vrot.slane %v5463_v48, 4  ;;  %v5477_v9 = vor.u32 %v5476_v17, %v5473_v41  ;;  %v5482_v10 = vrot.slane %v5480_v29, 5  ;;  %v14863_v8 = vld [vmem:[#allocation2 + $0x78] sm:$0xf]  ;;  %v14865_v48 = vld [vmem:[#allocation2 + $0x80] sm:$0xf] }
 0x2b1   :  { %v5133_v0 = vrot.slane %v5131_v6, 4  ;;  %v5134_v62 = vshll.u32 %v14837_v2, 16  ;;  %v5123_v3 = vor.u32 %v5122_v25, %v5119_v45  ;;  %v5140_v20 = vshll.u32 %v14842_v49, 16 }
 0x2b2   :  { %5614 = vrot.lane.b32.xlu1 %v10035_v57, %s11753_s15  ;;  %v5478_v60 = vrot.slane %v5477_v9, 4  ;;  %v10053_v35 = vcombine.low %v5298_v61, %v14849_v51  ;;  %v5128_v4 = vrot.slane %v5126_v31, 5  ;;  %v5485_v43 = vshrl.u32 %v14818_v26, 16 }
 0x2b3   :  { %v5136_v56 = vrot.slane %v5134_v62, 5  ;;  %v5488_v21 = vshll.u32 %v14818_v26, 16  ;;  %v5469_v44 = vsel %vm11876_vm2, %v5464_v7, %v5468_v13  ;;  %v5124_v24 = vrot.slane %v5123_v3, 4  ;;  %v14876_v3 = vld [vmem:[#allocation2 + $0x7c] sm:$0x1] }
 0x2b4   :  { %v5483_v36 = vsel %vm11876_vm2, %v5478_v60, %v5482_v10  ;;  %5698 = vrot.lane.b32.xlu0 %v10053_v35, %s11753_s15  ;;  %v5499_v46 = vshrl.u32 %v14812_v1, 16  ;;  %v5487_v27 = vrot.slane %v5485_v43, 4  ;;  %v5142_v26 = vrot.slane %v5140_v20, 5  ;;  %v14878_v20 = vld [vmem:[#allocation2 + $0x84] sm:$0x1] }
 0x2b5   :  { %v10059_v41 = vcombine.low %v5469_v44, %v5483_v36  ;;  %v5137_v29 = vor.u32 %v5136_v56, %v5133_v0  ;;  %v5490_v63 = vrot.slane %v5488_v21, 5  ;;  %v5494_v17 = vshll.u32 %v5312_v5, 16 }
 0x2b6   :  { %v5501_v30 = vrot.slane %v5499_v46, 4  ;;  %v5502_v42 = vshll.u32 %v14812_v1, 16  ;;  %v5508_v6 = vshll.u32 %v5313_v23, 16  ;;  %v5145_v57 = vshrl.u32 %v14863_v8, 16 }
 0x2b7   :  { %11229 = vmatmul.mubr.msk.bf16.gmra.mrb[168].mxu0 %vm5724_vm0, %v10059_v41  ;;  %v5138_v45 = vrot.slane %v5137_v29, 4  ;;  %v5491_v31 = vor.u32 %v5490_v63, %v5487_v27  ;;  %v5148_v9 = vshll.u32 %v14863_v8, 16  ;;  %v5159_v25 = vshrl.u32 %v14865_v48, 16 }
 0x2b8   :  { %v5504_v7 = vrot.slane %v5502_v42, 5  ;;  %v5129_v13 = vsel %vm11876_vm2, %v5124_v24, %v5128_v4  ;;  %v5147_v0 = vrot.slane %v5145_v57, 4  ;;  %v5496_v56 = vrot.slane %v5494_v17, 5 }
 0x2b9   :  { %v5143_v10 = vsel %vm11876_vm2, %v5138_v45, %v5142_v26  ;;  %v5492_v62 = vrot.slane %v5491_v31, 4  ;;  %v5150_v35 = vrot.slane %v5148_v9, 5  ;;  %v5510_v5 = vrot.slane %v5508_v6, 5  ;;  %v5314_v31 = vld [vmem:[#allocation2 + $0x84] sm:$0x1] }
 0x2ba   :  { %v10036_v1 = vcombine.low %v5129_v13, %v5143_v10  ;;  %v5505_v60 = vor.u32 %v5504_v7, %v5501_v30  ;;  %v5161_v43 = vrot.slane %v5159_v25, 4  ;;  %v5162_v21 = vshll.u32 %v14865_v48, 16 }
 0x2bb   :  { %v5151_v44 = vor.u32 %v5150_v35, %v5147_v0  ;;  %v5513_v36 = vshrl.u32 %v5298_v61, 16  ;;  %v5516_v24 = vshll.u32 %v5298_v61, 16  ;;  %v5154_v23 = vshll.u32 %v14876_v3, 16  ;;  %v5315_v61 = vld [vmem:[#allocation2 + $0x8c] sm:$0x1] }
 0x2bc   :  { %5616 = vrot.lane.b32.xlu1 %v10036_v1, %s11753_s15  ;;  %v5506_v4 = vrot.slane %v5505_v60, 4  ;;  %v5164_v46 = vrot.slane %v5162_v21, 5  ;;  %v5168_v41 = vshll.u32 %v14878_v20, 16  ;;  %v5527_v29 = vshrl.u32 %v14849_v51, 16  ;;  %v5173_v21 = vld [vmem:[#allocation2 + $0x8] sm:$0xe] }
 0x2bd   :  { %v5497_v27 = vsel %vm11876_vm2, %v5492_v62, %v5496_v56  ;;  %v5515_v26 = vrot.slane %v5513_v36, 4  ;;  %v5518_v17 = vrot.slane %v5516_v24, 5  ;;  %v5152_v42 = vrot.slane %v5151_v44, 4  ;;  %v11711_v24 = vld [vmem:[#allocation2 + $0x4] sm:$0x1] }
 0x2be   :  { %v5511_v63 = vsel %vm11876_vm2, %v5506_v4, %v5510_v5  ;;  %v5165_v45 = vor.u32 %v5164_v46, %v5161_v43  ;;  %v5529_v57 = vrot.slane %v5527_v29, 4  ;;  %v5530_v7 = vshll.u32 %v14849_v51, 16  ;;  %v5172_v43 = vld [vmem:[#allocation2] sm:$0xe] }
 0x2bf   :  { %v10060_v30 = vcombine.low %v5497_v27, %v5511_v63  ;;  %v5519_v6 = vor.u32 %v5518_v17, %v5515_v26  ;;  %v5156_v9 = vrot.slane %v5154_v23, 5  ;;  %v5170_v13 = vrot.slane %v5168_v41, 5  ;;  %v11712_v41 = vld [vmem:[#allocation2 + $0xc] sm:$0x1] }
 0x2c0   :  { %v5166_v25 = vrot.slane %v5165_v45, 4  ;;  %v5522_v10 = vshll.u32 %v5314_v31, 16  ;;  %v5532_v0 = vrot.slane %v5530_v7, 5  ;;  %v5536_v1 = vshll.u32 %v5315_v61, 16  ;;  %v5175_v61 = vld [vmem:[#allocation2 + $0x18] sm:$0xe] }
 0x2c1   :  { %11232 = vmatprep.mubr.msk.bf16.mxu0 %vm5724_vm0, %v10060_v30  ;;  %v5157_v62 = vsel %vm11876_vm2, %v5152_v42, %v5156_v9  ;;  %v5520_v56 = vrot.slane %v5519_v6, 4  ;;  %v10006_v36 = vrot.slane %v5172_v43, 9  ;;  %v5222_v23 = vrot.slane %v11711_v24, 5  ;;  %v5174_v6 = vld [vmem:[#allocation2 + $0x10] sm:$0xe] }
 0x2c2   :  { %v5171_v60 = vsel %vm11876_vm2, %v5166_v25, %v5170_v13  ;;  %v5533_v5 = vor.u32 %v5532_v0, %v5529_v57  ;;  %v5524_v51 = vrot.slane %v5522_v10, 5  ;;  %v5538_v44 = vrot.slane %v5536_v1, 5  ;;  %v11713_v10 = vld [vmem:[#allocation2] sm:$0xf]  ;;  %v11714_v0 = vld [vmem:[#allocation2 + $0x8] sm:$0xf] }
 0x2c3   :  { %v10037_v35 = vcombine.low %v5157_v62, %v5171_v60  ;;  %v10007_v46 = vrot.slane %v5173_v21, 9  ;;  %v5226_v29 = vrot.slane %v11712_v41, 5  ;;  %v5223_v17 = vsel %vm12431_vm5, %v10006_v36, %v5222_v23  ;;  %v5177_v43 = vld [vmem:[#allocation2 + $0x28] sm:$0xe] }
 0x2c4   :  { %v5534_v4 = vrot.slane %v5533_v5, 4  ;;  %v5525_v27 = vsel %vm11876_vm2, %v5520_v56, %v5524_v51  ;;  %v10009_v57 = vrot.slane %v5175_v61, 9  ;;  %v5234_v7 = vrot.slane %v14622_v15, 5 }
 0x2c5   :  { %5618 = vrot.lane.b32.xlu1 %v10037_v35, %s11753_s15  ;;  %v5227_v30 = vsel %vm12431_vm5, %v10007_v46, %v5226_v29  ;;  %v10008_v9 = vrot.slane %v5174_v6, 9  ;;  %v5230_v25 = vrot.slane %v14607_v54, 5  ;;  %v10022_v1 = vcombine.low %v11713_v10, %v11714_v0  ;;  %v5176_v54 = vld [vmem:[#allocation2 + $0x20] sm:$0xe] }
 0x2c6   :  { %v5539_v63 = vsel %vm11876_vm2, %v5534_v4, %v5538_v44  ;;  %v10038_v42 = vcombine.low %v5223_v17, %v5227_v30  ;;  %v5235_v13 = vsel %vm12431_vm5, %v10009_v57, %v5234_v7  ;;  %v10011_v21 = vrot.slane %v5177_v43, 9  ;;  %v5182_v43 = vld [vmem:[#allocation2 + $0x58] sm:$0xe] }
 0x2c7   :  { %v10061_v26 = vcombine.low %v5525_v27, %v5539_v63  ;;  %v5231_v62 = vsel %vm12431_vm5, %v10008_v9, %v5230_v25  ;;  %v5242_v51 = vrot.slane %v14678_v40, 5  ;;  %v10010_v4 = vrot.slane %v5176_v54, 9  ;;  %v5179_v40 = vld [vmem:[#allocation2 + $0x38] sm:$0xe]  ;;  %v5181_v9 = vld [vmem:[#allocation2 + $0x50] sm:$0xe] }
 0x2c8   :  { %v10039_v35 = vcombine.low %v5231_v62, %v5235_v13  ;;  %v5238_v44 = vrot.slane %v14676_v58, 5  ;;  %v10023_v41 = vcombine.low %v14602_v39, %v14617_v19  ;;  %v5178_v58 = vld [vmem:[#allocation2 + $0x30] sm:$0xe]  ;;  %v5250_v17 = vrot.slane %v14737_v11, 5  ;;  %v5180_v11 = vld [vmem:[#allocation2 + $0x48] sm:$0xe] }
 0x2c9   :  { %11233 = vmatmul.mubr.msk.bf16.gmra.mrb[172].mxu0 %vm5724_vm0, %v10061_v26  ;;  %v5243_v36 = vsel %vm12431_vm5, %v10011_v21, %v5242_v51  ;;  %v10013_v26 = vrot.slane %v5179_v40, 9  ;;  %v10012_v30 = vrot.slane %v5178_v58, 9  ;;  %v10024_v61 = vcombine.low %v14657_v16, %v14674_v18  ;;  %v11715_v25 = vld [vmem:[#allocation2 + $0x4c] sm:$0x1] }
 0x2ca   :  { %v5239_v23 = vsel %vm12431_vm5, %v10010_v4, %v5238_v44  ;;  %v5254_v13 = vrot.slane %v11715_v25, 5  ;;  %v10015_v10 = vrot.slane %v5181_v9, 9  ;;  %v5258_v0 = vrot.slane %v14766_v53, 5 }
 0x2cb   :  { %v10040_v46 = vcombine.low %v5239_v23, %v5243_v36  ;;  %v5266_v54 = vrot.slane %v14809_v32, 5  ;;  %v10016_v21 = vrot.slane %v5182_v43, 9  ;;  %v5262_v51 = vrot.slane %v14798_v33, 5  ;;  %v11716_v36 = vld [vmem:[#allocation2 + $0x48] sm:$0xf] }
 0x2cc   :  { %v5259_v16 = vsel %vm12431_vm5, %v10015_v10, %v5258_v0  ;;  %v5185_v23 = vld [vmem:[#allocation2 + $0x70] sm:$0xe]  ;;  %v5270_v40 = vrot.slane %v14833_v52, 5  ;;  %v5282_v52 = vrot.slane %v14878_v20, 5 }
 0x2cd   :  { %v10019_v33 = vrot.slane %v5185_v23, 9 }
 0x2ce   :  { %v5685_v45 = vpop.permute.xlu0 %5684 }
 0x2cf   :  { %v5759_v31 = vsel %vm5724_vm0, %v10038_v42, %v5685_v45  ;;  %v5246_v42 = vrot.slane %v14714_v34, 5  ;;  %v5251_v45 = vsel %vm12431_vm5, %v10013_v26, %v5250_v17  ;;  %v10014_v34 = vrot.slane %v5180_v11, 9 }
 0x2d0   :  { %6012 = vmatprep.mubr.bf16.mxu1 %v5759_v31  ;;  %v10028_v11 = vcombine.low %v14830_v50, %v14837_v2 }
 0x2d1   :  { %v5247_v39 = vsel %vm12431_vm5, %v10012_v30, %v5246_v42  ;;  %v5187_v30 = vld [vmem:[#allocation2 + $0x80] sm:$0xe]  ;;  %v10027_v42 = vcombine.low %v14792_v38, %v14796_v12 }
 0x2d2   :  { %v10041_v19 = vcombine.low %v5247_v39, %v5251_v45 }
 0x2dc   :  { %v5605_v60 = vpop.permute.xlu1 %5604  ;;  %v5687_v5 = vpop.permute.xlu0 %5686 }
 0x2dd   :  { %v5727_v56 = vsel %vm5724_vm0, %v10022_v1, %v5605_v60  ;;  %v5763_v15 = vsel %vm5724_vm0, %v10039_v35, %v5687_v5  ;;  %v5255_v1 = vsel %vm12431_vm5, %v10014_v34, %v5254_v13  ;;  %v10025_v60 = vcombine.low %v14712_v22, %v14724_v47  ;;  %v5183_v5 = vld [vmem:[#allocation2 + $0x60] sm:$0xe] }
 0x2de   :  { %6013 = vmatmul.mubr.bf16.vlgmr.msra.gmra.mrb[144].mxu1 %v5727_v56  ;;  %v10042_v62 = vcombine.low %v5255_v1, %v5259_v16  ;;  %v10017_v53 = vrot.slane %v5183_v5, 9  ;;  %v5263_v22 = vsel %vm12431_vm5, %v10016_v21, %v5262_v51 }
 0x2df   :  { %6020 = vmatprep.mubr.bf16.mxu1 %v5763_v15 }
 0x2e0   :  { %v5267_v4 = vsel %vm12431_vm5, %v10017_v53, %v5266_v54  ;;  %v15004_v54 = vld [vmem:[%s16326_s4] ss:$0 sm:$0xff] }
 0x2e1   :  { %v10043_v47 = vcombine.low %v5263_v22, %v5267_v4 }
 0x2e9   :  { %v5689_v24 = vpop.permute.xlu0 %5688 }
 0x2ea   :  { %v5767_v27 = vsel %vm5724_vm0, %v10040_v46, %v5689_v24  ;;  %v10026_v24 = vcombine.low %v11716_v36, %v14762_v59 }
 0x2f1   :  { %v5607_v29 = vpop.permute.xlu1 %5606 }
 0x2f2   :  { %v5731_v63 = vsel %vm5724_vm0, %v10023_v41, %v5607_v29  ;;  %v5184_v29 = vld [vmem:[#allocation2 + $0x68] sm:$0xe] }
 0x2f3   :  { %6021 = vmatmul.mubr.bf16.gmra.mrb[148].mxu1 %v5731_v63  ;;  %v10018_v63 = vrot.slane %v5184_v29, 9 }
 0x2f4   :  { %6028 = vmatprep.mubr.bf16.mxu1 %v5767_v27  ;;  %v5274_v27 = vrot.slane %v14842_v49, 5  ;;  %v5186_v49 = vld [vmem:[#allocation2 + $0x78] sm:$0xe] }
 0x2f5   :  { %v5691_v31 = vpop.permute.xlu0 %5690  ;;  %v5271_v59 = vsel %vm12431_vm5, %v10018_v63, %v5270_v40 }
 0x2f6   :  { %v5771_v57 = vsel %vm5724_vm0, %v10041_v19, %v5691_v31  ;;  %v5275_v58 = vsel %vm12431_vm5, %v10019_v33, %v5274_v27  ;;  %v10021_v19 = vrot.slane %v5187_v30, 9  ;;  %v6416_v30 = vld [vmem:[#allocation2 + $0xc] sm:$0x1] }
 0x2f7   :  { %v10044_v17 = vcombine.low %v5271_v59, %v5275_v58 }
 0x2ff   :  { %v5609_v6 = vpop.permute.xlu1 %5608 }
 0x300   :  { %v5735_v7 = vsel %vm5724_vm0, %v10024_v61, %v5609_v6  ;;  %v10020_v61 = vrot.slane %v5186_v49, 9  ;;  %v5278_v6 = vrot.slane %v14876_v3, 5  ;;  %v10029_v3 = vcombine.low %v14863_v8, %v14865_v48 }
 0x301   :  { %6029 = vmatmul.mubr.bf16.gmra.mrb[152].mxu1 %v5735_v7 }
 0x302   :  { %6036 = vmatprep.mubr.bf16.mxu1 %v5771_v57  ;;  %v5283_v57 = vsel %vm12431_vm5, %v10021_v19, %v5282_v52  ;;  %v5279_v38 = vsel %vm12431_vm5, %v10020_v61, %v5278_v6  ;;  %v6419_v19 = vld [vmem:[#allocation2 + $0x10] sm:$0xf]  ;;  %v6422_v52 = vld [vmem:[#allocation2 + $0x14] sm:$0x1] }
 0x303   :  { %v10045_v12 = vcombine.low %v5279_v38, %v5283_v57 }
 0x307   :  { %v5693_v18 = vpop.permute.xlu0 %5692 }
 0x308   :  { %v5775_v56 = vsel %vm5724_vm0, %v10042_v62, %v5693_v18 }
 0x30d   :  { %v5611_v35 = vpop.permute.xlu1 %5610 }
 0x30e   :  { %v5739_v15 = vsel %vm5724_vm0, %v10025_v60, %v5611_v35 }
 0x30f   :  { %6037 = vmatmul.mubr.bf16.gmra.mrb[156].mxu1 %v5739_v15 }
 0x310   :  { %6044 = vmatprep.mubr.bf16.mxu1 %v5775_v56 }
 0x313   :  { %v5695_v44 = vpop.permute.xlu0 %5694 }
 0x314   :  { %v5779_v41 = vsel %vm5724_vm0, %v10043_v47, %v5695_v44 }
 0x319   :  { %v5613_v46 = vpop.permute.xlu1 %5612 }
 0x31a   :  { %v5743_v32 = vsel %vm5724_vm0, %v10026_v24, %v5613_v46 }
 0x31b   :  { %6045 = vmatmul.mubr.bf16.gmra.mrb[160].mxu1 %v5743_v32 }
 0x31c   :  { %6052 = vmatprep.mubr.bf16.mxu1 %v5779_v41  ;;  %v5697_v26 = vpop.permute.xlu0 %5696 }
 0x31d   :  { %v5783_v31 = vsel %vm5724_vm0, %v10044_v17, %v5697_v26 }
 0x324   :  { %v5615_v45 = vpop.permute.xlu1 %5614 }
 0x325   :  { %v5747_v39 = vsel %vm5724_vm0, %v10027_v42, %v5615_v45  ;;  %v11717_v42 = vld [vmem:[#allocation2 + $0x8] sm:$0xf] }
 0x326   :  { %6053 = vmatmul.mubr.bf16.gmra.mrb[164].mxu1 %v5747_v39  ;;  %v5699_v7 = vpop.permute.xlu0 %5698 }
 0x327   :  { %6060 = vmatprep.mubr.bf16.mxu1 %v5783_v31  ;;  %v5787_v34 = vsel %vm5724_vm0, %v10045_v12, %v5699_v7 }
 0x32e   :  { %v5617_v9 = vpop.permute.xlu1 %5616 }
 0x32f   :  { %v5751_v20 = vsel %vm5724_vm0, %v10028_v11, %v5617_v9 }
 0x330   :  { %6061 = vmatmul.mubr.bf16.gmra.mrb[168].mxu1 %v5751_v20 }
 0x331   :  { %6068 = vmatprep.mubr.bf16.mxu1 %v5787_v34 }
 0x337   :  { %v5619_v25 = vpop.permute.xlu1 %5618 }
 0x338   :  { %v5755_v13 = vsel %vm5724_vm0, %v10029_v3, %v5619_v25  ;;  %v11621_v25 = vld [vmem:[%s16327_s5 + $0x40] sm:$0xff]  }
 0x339   :  { %6069 = vmatmul.mubr.bf16.gmra.mrb[172].mxu1 %v5755_v13  ;;  %v11622_v13 = vld [vmem:[%s16327_s5] sm:$0xff]   ;;  %11308 = vmatprep.subr.bf16.mxu1 %v11621_v25 }
 0x33a   :  { %11020 = vmatprep.subr.bf16.mxu0 %v11621_v25  ;;  %11316 = vmatpush3.bf16.msra.mxu1 %v11622_v13 }
 0x33b   :  { %11021 = vmatpush3.bf16.msra.mxu0 %v11622_v13 }
 0x353   :  { %v11222_v10 = vpop.f32.mrb[160].mxu0 }
 0x354   :  { %v6111_v0 = vpop.f32.mrb[161].mxu0 }
 0x355   :  { %v14975_v1 = vpop.f32.mrb[162].mxu0 }
 0x356   :  { %v6114_v16 = vpop.f32.mrb[163].mxu0 }
 0x378   :  { %v14977_v50 = vpop.f32.mrb[164].mxu0 }
 0x379   :  { %v14979_v2 = vpop.f32.mrb[165].mxu0 }
 0x37a   :  { %v14981_v18 = vpop.f32.mrb[166].mxu0 }
 0x37b   :  { %v14983_v62 = vpop.f32.mrb[167].mxu0 }
 0x38a   :  { %v14985_v60 = vpop.f32.mrb[168].mxu0 }
 0x38b   :  { %v14987_v8 = vpop.f32.mrb[169].mxu0 }
 0x38c   :  { %v14989_v48 = vpop.f32.mrb[170].mxu0 }
 0x38d   :  { %v14991_v35 = vpop.f32.mrb[171].mxu0 }
 0x39c   :  { %v14993_v56 = vpop.f32.mrb[172].mxu0 }
 0x39d   :  { %v14995_v5 = vpop.f32.mrb[173].mxu0 }
 0x39e   :  { %v14997_v15 = vpop.f32.mrb[174].mxu0 }
 0x39f   :  { %v14999_v43 = vpop.f32.mrb[175].mxu0 }
 0x3b1   :  { %v10960_v53 = vpop.f32.mrb[144].mxu1 }
 0x3b2   :  { %v10961_v21 = vpop.f32.mrb[145].mxu1 }
 0x3b3   :  { %v10962_v51 = vadd.f32 %v10961_v21, %v10960_v53  ;;  %v10963_v4 = vpop.f32.mrb[146].mxu1 }
 0x3b4   :  { %v10964_v44 = vpop.f32.mrb[147].mxu1 }
 0x3b5   :  { %v6015_v22 = vadd.f32 %v10962_v51, %v15004_v54  ;;  %v10965_v47 = vadd.f32 %v10964_v44, %v10963_v4  ;;  %v11625_v4 = vld [vmem:[%s16327_s5 + $0x50] sm:$0xff]  }
 0x3b7   :  { %v6112_v36 = vadd.f32 %v6111_v0, %v6015_v22  ;;  %v6018_v24 = vadd.f32 %v10965_v47, %v15004_v54  ;;  %v11623_v0 = vld [vmem:[%s16327_s5 + $0x48] sm:$0xff]  }
 0x3b8   :  { %11309 = vmatprep.subr.bf16.mxu1 %v11623_v0  ;;  %11022 = vmatprep.subr.bf16.mxu0 %v11623_v0  ;;  %v11633_v0 = vld [vmem:[%s16327_s5 + $0x70] sm:$0xff]  }
 0x3b9   :  { %v6174_v23 = vmax.f32 %v6112_v36, 0.0  ;;  %v6115_v46 = vadd.f32 %v6114_v16, %v6018_v24 }
 0x3bb   :  { %v10322_v41 = vpack.c.bf16 %v6174_v23, %v6174_v23  ;;  %v6175_v32 = vmax.f32 %v6115_v46, 0.0 }
 0x3bd   :  { %v6255_v29 = vshrl.u32 %v10322_v41, 16  ;;  %v10323_v33 = vpack.c.bf16 %v6175_v32, %v6175_v32  ;;  %v6258_v63 = vshll.u32 %v10322_v41, 16  ;;  %v11627_v41 = vld [vmem:[%s16327_s5 + $0x58] sm:$0xff]  }
 0x3bf   :  { %v6257_v27 = vrot.slane %v6255_v29, 7  ;;  %v6263_v40 = vshrl.u32 %v10323_v33, 16  ;;  %v6266_v17 = vshll.u32 %v10323_v33, 16 }
 0x3c1   :  { %v6260_v58 = vor.u32 %v6258_v63, %v6257_v27  ;;  %v6261_v26 = vrot.slane %v6257_v27, 4  ;;  %v6265_v59 = vrot.slane %v6263_v40, 7 }
 0x3c3   :  { %v6414_v45 = vsel %vm14420_vm14, %v6260_v58, %v11717_v42  ;;  %v6417_v31 = vsel %vm14426_vm15, %v6261_v26, %v6416_v30  ;;  %v6268_v49 = vor.u32 %v6266_v17, %v6265_v59  ;;  %v6269_v39 = vrot.slane %v6265_v59, 4  ;;  %v6425_v26 = vld [vmem:[#allocation2 + $0x18] sm:$0xf]  ;;  %v6428_v59 = vld [vmem:[#allocation2 + $0x1c] sm:$0x1] }
 0x3c4   :  { %6415 = vst [vmem:[#allocation2 + $0x8] sm:$0xf] %v6414_v45  ;;  %6418 = vst [vmem:[#allocation2 + $0xc] sm:$0x1] %v6417_v31  ;;  %v11628_v42 = vld [vmem:[%s16327_s5 + $0x18] sm:$0xff]  }
 0x3c5   :  { %v6420_v61 = vsel %vm14420_vm14, %v6268_v49, %v6419_v19  ;;  %v6423_v6 = vsel %vm14426_vm15, %v6269_v39, %v6422_v52  ;;  %v11629_v19 = vld [vmem:[%s16327_s5 + $0x60] sm:$0xff]  }
 0x3c6   :  { %6421 = vst [vmem:[#allocation2 + $0x10] sm:$0xf] %v6420_v61  ;;  %6424 = vst [vmem:[#allocation2 + $0x14] sm:$0x1] %v6423_v6  ;;  %v10966_v57 = vpop.f32.mrb[148].mxu1 }
 0x3c7   :  { %v10967_v7 = vpop.f32.mrb[149].mxu1  ;;  %v6431_v52 = vld [vmem:[#allocation2 + $0x20] sm:$0xf]  ;;  %v6434_v61 = vld [vmem:[#allocation2 + $0x24] sm:$0x1] }
 0x3c8   :  { %v10968_v38 = vadd.f32 %v10967_v7, %v10966_v57  ;;  %v10969_v12 = vpop.f32.mrb[150].mxu1 }
 0x3c9   :  { %v10970_v11 = vpop.f32.mrb[151].mxu1 }
 0x3ca   :  { %v6023_v9 = vadd.f32 %v10968_v38, %v15004_v54  ;;  %v10971_v34 = vadd.f32 %v10970_v11, %v10969_v12 }
 0x3cc   :  { %v6120_v20 = vadd.f32 %v11222_v10, %v6023_v9  ;;  %v6026_v3 = vadd.f32 %v10971_v34, %v15004_v54  ;;  %v11624_v10 = vld [vmem:[%s16327_s5 + $0x8] sm:$0xff]   ;;  %v11630_v9 = vld [vmem:[%s16327_s5 + $0x20] sm:$0xff]  }
 0x3cd   :  { %11317 = vmatpush3.bf16.msra.mxu1 %v11624_v10  ;;  %11023 = vmatpush3.bf16.msra.mxu0 %v11624_v10 }
 0x3ce   :  { %v6176_v16 = vmax.f32 %v6120_v20, 0.0  ;;  %v6123_v53 = vadd.f32 %v14975_v1, %v6026_v3  ;;  %v11626_v1 = vld [vmem:[%s16327_s5 + $0x10] sm:$0xff]   ;;  %11310 = vmatprep.subr.bf16.mxu1 %v11625_v4  ;;  %11024 = vmatprep.subr.bf16.mxu0 %v11625_v4 }
 0x3d0   :  { %v10324_v21 = vpack.c.bf16 %v6176_v16, %v6176_v16  ;;  %v6177_v51 = vmax.f32 %v6123_v53, 0.0 }
 0x3d1   :  { %11318 = vmatpush3.bf16.msra.mxu1 %v11626_v1  ;;  %11025 = vmatpush3.bf16.msra.mxu0 %v11626_v1 }
 0x3d2   :  { %v6271_v44 = vshrl.u32 %v10324_v21, 16  ;;  %v10325_v22 = vpack.c.bf16 %v6177_v51, %v6177_v51  ;;  %v6274_v24 = vshll.u32 %v10324_v21, 16  ;;  %11311 = vmatprep.subr.bf16.mxu1 %v11627_v41  ;;  %11026 = vmatprep.subr.bf16.mxu0 %v11627_v41 }
 0x3d4   :  { %v10972_v47 = vpop.f32.mrb[152].mxu1  ;;  %v6273_v36 = vrot.slane %v6271_v44, 7  ;;  %v6279_v23 = vshrl.u32 %v10325_v22, 16  ;;  %v6282_v40 = vshll.u32 %v10325_v22, 16 }
 0x3d5   :  { %v10973_v46 = vpop.f32.mrb[153].mxu1  ;;  %11319 = vmatpush3.bf16.msra.mxu1 %v11628_v42  ;;  %11027 = vmatpush3.bf16.msra.mxu0 %v11628_v42 }
 0x3d6   :  { %v10974_v32 = vadd.f32 %v10973_v46, %v10972_v47  ;;  %v10975_v29 = vpop.f32.mrb[154].mxu1  ;;  %v6276_v33 = vor.u32 %v6274_v24, %v6273_v36  ;;  %v6277_v27 = vrot.slane %v6273_v36, 4  ;;  %v6281_v63 = vrot.slane %v6279_v23, 7  ;;  %11312 = vmatprep.subr.bf16.mxu1 %v11629_v19  ;;  %11028 = vmatprep.subr.bf16.mxu0 %v11629_v19  ;;  %v11634_v24 = vld [vmem:[%s16327_s5 + $0x30] sm:$0xff]   ;;  %v6437_v23 = vld [vmem:[#allocation2 + $0x28] sm:$0xf] }
 0x3d7   :  { %v10976_v58 = vpop.f32.mrb[155].mxu1  ;;  %v6440_v46 = vld [vmem:[#allocation2 + $0x2c] sm:$0x1] }
 0x3d8   :  { %v6031_v17 = vadd.f32 %v10974_v32, %v15004_v54  ;;  %v10977_v30 = vadd.f32 %v10976_v58, %v10975_v29  ;;  %v6426_v45 = vsel %vm14420_vm14, %v6276_v33, %v6425_v26  ;;  %v6429_v31 = vsel %vm14426_vm15, %v6277_v27, %v6428_v59  ;;  %v11635_v29 = vld [vmem:[%s16327_s5 + $0x78] sm:$0xff]   ;;  %v6443_v58 = vld [vmem:[#allocation2 + $0x30] sm:$0xf]  ;;  %v6446_v26 = vld [vmem:[#allocation2 + $0x34] sm:$0x1] }
 0x3d9   :  { %v6284_v49 = vor.u32 %v6282_v40, %v6281_v63  ;;  %v6285_v39 = vrot.slane %v6281_v63, 4  ;;  %6427 = vst [vmem:[#allocation2 + $0x18] sm:$0xf] %v6426_v45  ;;  %6430 = vst [vmem:[#allocation2 + $0x1c] sm:$0x1] %v6429_v31  ;;  %11320 = vmatpush3.bf16.msra.mxu1 %v11630_v9  ;;  %11029 = vmatpush3.bf16.msra.mxu0 %v11630_v9 }
 0x3da   :  { %v6128_v6 = vadd.f32 %v14979_v2, %v6031_v17  ;;  %v6034_v57 = vadd.f32 %v10977_v30, %v15004_v54  ;;  %v11631_v2 = vld [vmem:[%s16327_s5 + $0x68] sm:$0xff]  }
 0x3db   :  { %v6432_v7 = vsel %vm14420_vm14, %v6284_v49, %v6431_v52  ;;  %v6435_v38 = vsel %vm14426_vm15, %v6285_v39, %v6434_v61  ;;  %11313 = vmatprep.subr.bf16.mxu1 %v11631_v2  ;;  %11030 = vmatprep.subr.bf16.mxu0 %v11631_v2 }
 0x3dc   :  { %6433 = vst [vmem:[#allocation2 + $0x20] sm:$0xf] %v6432_v7  ;;  %6436 = vst [vmem:[#allocation2 + $0x24] sm:$0x1] %v6435_v38  ;;  %v6178_v12 = vmax.f32 %v6128_v6, 0.0  ;;  %v6131_v11 = vadd.f32 %v14983_v62, %v6034_v57  ;;  %v11632_v62 = vld [vmem:[%s16327_s5 + $0x28] sm:$0xff]  }
 0x3dd   :  { %11321 = vmatpush3.bf16.msra.mxu1 %v11632_v62  ;;  %11031 = vmatpush3.bf16.msra.mxu0 %v11632_v62 }
 0x3de   :  { %v10326_v34 = vpack.c.bf16 %v6178_v12, %v6178_v12  ;;  %v6179_v20 = vmax.f32 %v6131_v11, 0.0  ;;  %11314 = vmatprep.subr.bf16.mxu1 %v11633_v0  ;;  %11032 = vmatprep.subr.bf16.mxu0 %v11633_v0 }
 0x3e0   :  { %v6287_v3 = vshrl.u32 %v10326_v34, 16  ;;  %v10327_v25 = vpack.c.bf16 %v6179_v20, %v6179_v20  ;;  %v6290_v53 = vshll.u32 %v10326_v34, 16 }
 0x3e1   :  { %11322 = vmatpush3.bf16.msra.mxu1 %v11634_v24  ;;  %11033 = vmatpush3.bf16.msra.mxu0 %v11634_v24 }
 0x3e2   :  { %v10978_v13 = vpop.f32.mrb[156].mxu1  ;;  %v6289_v16 = vrot.slane %v6287_v3, 7  ;;  %v6295_v10 = vshrl.u32 %v10327_v25, 16  ;;  %v6298_v1 = vshll.u32 %v10327_v25, 16  ;;  %11315 = vmatprep.subr.bf16.mxu1 %v11635_v29  ;;  %11034 = vmatprep.subr.bf16.mxu0 %v11635_v29  ;;  %v6449_v3 = vld [vmem:[#allocation2 + $0x38] sm:$0xf] }
 0x3e3   :  { %v10979_v21 = vpop.f32.mrb[157].mxu1  ;;  %v6452_v25 = vld [vmem:[#allocation2 + $0x3c] sm:$0x1] }
 0x3e4   :  { %v10980_v51 = vadd.f32 %v10979_v21, %v10978_v13  ;;  %v10981_v4 = vpop.f32.mrb[158].mxu1  ;;  %v6292_v44 = vor.u32 %v6290_v53, %v6289_v16  ;;  %v6293_v22 = vrot.slane %v6289_v16, 4  ;;  %v6297_v47 = vrot.slane %v6295_v10, 7  ;;  %v6455_v10 = vld [vmem:[#allocation2 + $0x40] sm:$0xf] }
 0x3e5   :  { %v10982_v36 = vpop.f32.mrb[159].mxu1  ;;  %v6458_v21 = vld [vmem:[#allocation2 + $0x44] sm:$0x1] }
 0x3e6   :  { %v6039_v41 = vadd.f32 %v10980_v51, %v15004_v54  ;;  %v10983_v32 = vadd.f32 %v10982_v36, %v10981_v4  ;;  %v6438_v33 = vsel %vm14420_vm14, %v6292_v44, %v6437_v23  ;;  %v6441_v27 = vsel %vm14426_vm15, %v6293_v22, %v6440_v46 }
 0x3e7   :  { %v6300_v63 = vor.u32 %v6298_v1, %v6297_v47  ;;  %v6301_v40 = vrot.slane %v6297_v47, 4  ;;  %6439 = vst [vmem:[#allocation2 + $0x28] sm:$0xf] %v6438_v33  ;;  %6442 = vst [vmem:[#allocation2 + $0x2c] sm:$0x1] %v6441_v27 }
 0x3e8   :  { %v6136_v59 = vadd.f32 %v14977_v50, %v6039_v41  ;;  %v6042_v17 = vadd.f32 %v10983_v32, %v15004_v54 }
 0x3e9   :  { %v6444_v30 = vsel %vm14420_vm14, %v6300_v63, %v6443_v58  ;;  %v6447_v42 = vsel %vm14426_vm15, %v6301_v40, %v6446_v26 }
 0x3ea   :  { %6445 = vst [vmem:[#allocation2 + $0x30] sm:$0xf] %v6444_v30  ;;  %6448 = vst [vmem:[#allocation2 + $0x34] sm:$0x1] %v6447_v42  ;;  %v6180_v45 = vmax.f32 %v6136_v59, 0.0  ;;  %v6139_v31 = vadd.f32 %v14981_v18, %v6042_v17 }
 0x3ec   :  { %v10328_v49 = vpack.c.bf16 %v6180_v45, %v6180_v45  ;;  %v6181_v39 = vmax.f32 %v6139_v31, 0.0  ;;  %v6461_v45 = vld [vmem:[#allocation2 + $0x50] sm:$0xf]  ;;  %v6464_v31 = vld [vmem:[#allocation2 + $0x54] sm:$0x1] }
 0x3ee   :  { %v6303_v50 = vshrl.u32 %v10328_v49, 16  ;;  %v10329_v19 = vpack.c.bf16 %v6181_v39, %v6181_v39  ;;  %v10984_v52 = vpop.f32.mrb[160].mxu1  ;;  %v6306_v57 = vshll.u32 %v10328_v49, 16 }
 0x3ef   :  { %v10985_v61 = vpop.f32.mrb[161].mxu1 }
 0x3f0   :  { %v6305_v6 = vrot.slane %v6303_v50, 7  ;;  %v6311_v7 = vshrl.u32 %v10329_v19, 16  ;;  %v10986_v38 = vadd.f32 %v10985_v61, %v10984_v52  ;;  %v10987_v12 = vpop.f32.mrb[162].mxu1  ;;  %v6314_v11 = vshll.u32 %v10329_v19, 16  ;;  %v6467_v61 = vld [vmem:[#allocation2 + $0x58] sm:$0xf] }
 0x3f1   :  { %v10988_v9 = vpop.f32.mrb[163].mxu1 }
 0x3f2   :  { %v6308_v2 = vor.u32 %v6306_v57, %v6305_v6  ;;  %v6309_v34 = vrot.slane %v6305_v6, 4  ;;  %v6313_v20 = vrot.slane %v6311_v7, 7  ;;  %v6047_v18 = vadd.f32 %v10986_v38, %v15004_v54  ;;  %v6470_v6 = vld [vmem:[#allocation2 + $0x5c] sm:$0x1] }
 0x3f3   :  { %v10989_v62 = vadd.f32 %v10988_v9, %v10987_v12 }
 0x3f4   :  { %v6450_v13 = vsel %vm14420_vm14, %v6308_v2, %v6449_v3  ;;  %v6453_v0 = vsel %vm14426_vm15, %v6309_v34, %v6452_v25  ;;  %v6316_v16 = vor.u32 %v6314_v11, %v6313_v20  ;;  %v6317_v53 = vrot.slane %v6313_v20, 4 }
 0x3f5   :  { %6451 = vst [vmem:[#allocation2 + $0x38] sm:$0xf] %v6450_v13  ;;  %6454 = vst [vmem:[#allocation2 + $0x3c] sm:$0x1] %v6453_v0  ;;  %v6144_v51 = vadd.f32 %v14987_v8, %v6047_v18  ;;  %v6050_v4 = vadd.f32 %v10989_v62, %v15004_v54 }
 0x3f6   :  { %v6456_v44 = vsel %vm14420_vm14, %v6316_v16, %v6455_v10  ;;  %v6459_v22 = vsel %vm14426_vm15, %v6317_v53, %v6458_v21 }
 0x3f7   :  { %6457 = vst [vmem:[#allocation2 + $0x40] sm:$0xf] %v6456_v44  ;;  %6460 = vst [vmem:[#allocation2 + $0x44] sm:$0x1] %v6459_v22  ;;  %v6182_v47 = vmax.f32 %v6144_v51, 0.0  ;;  %v6147_v1 = vadd.f32 %v14991_v35, %v6050_v4 }
 0x3f8   :  { %v6473_v4 = vld [vmem:[#allocation2 + $0x60] sm:$0xf] }
 0x3f9   :  { %v10330_v36 = vpack.c.bf16 %v6182_v47, %v6182_v47  ;;  %v6183_v24 = vmax.f32 %v6147_v1, 0.0  ;;  %v10990_v23 = vpop.f32.mrb[164].mxu1  ;;  %v6476_v47 = vld [vmem:[#allocation2 + $0x64] sm:$0x1] }
 0x3fa   :  { %v10991_v46 = vpop.f32.mrb[165].mxu1 }
 0x3fb   :  { %v6319_v41 = vshrl.u32 %v10330_v36, 16  ;;  %v10331_v32 = vpack.c.bf16 %v6183_v24, %v6183_v24  ;;  %v10992_v8 = vadd.f32 %v10991_v46, %v10990_v23  ;;  %v10993_v29 = vpop.f32.mrb[166].mxu1  ;;  %v6322_v63 = vshll.u32 %v10330_v36, 16  ;;  %v15116_v24 = vld [vmem:[#allocation2] sm:$0xf] }
 0x3fc   :  { %v10994_v33 = vpop.f32.mrb[167].mxu1 }
 0x3fd   :  { %v6321_v27 = vrot.slane %v6319_v41, 7  ;;  %v6327_v40 = vshrl.u32 %v10331_v32, 16  ;;  %v6055_v58 = vadd.f32 %v10992_v8, %v15004_v54  ;;  %v6330_v26 = vshll.u32 %v10331_v32, 16  ;;  %v6479_v32 = vld [vmem:[#allocation2 + $0x68] sm:$0xf] }
 0x3fe   :  { %v10995_v59 = vadd.f32 %v10994_v33, %v10993_v29  ;;  %v6482_v8 = vld [vmem:[#allocation2 + $0x6c] sm:$0x1] }
 0x3ff   :  { %v6324_v17 = vor.u32 %v6322_v63, %v6321_v27  ;;  %v6325_v30 = vrot.slane %v6321_v27, 4  ;;  %v6329_v42 = vrot.slane %v6327_v40, 7  ;;  %v6152_v35 = vadd.f32 %v14985_v60, %v6055_v58 }
 0x400   :  { %v6058_v49 = vadd.f32 %v10995_v59, %v15004_v54  ;;  %v6542_v58 = vshrl.u32 %v15116_v24, 16 }
 0x401   :  { %v6462_v39 = vsel %vm14420_vm14, %v6324_v17, %v6461_v45  ;;  %v6465_v50 = vsel %vm14426_vm15, %v6325_v30, %v6464_v31  ;;  %v6332_v19 = vor.u32 %v6330_v26, %v6329_v42  ;;  %v6333_v52 = vrot.slane %v6329_v42, 4 }
 0x402   :  { %6463 = vst [vmem:[#allocation2 + $0x50] sm:$0xf] %v6462_v39  ;;  %6466 = vst [vmem:[#allocation2 + $0x54] sm:$0x1] %v6465_v50  ;;  %v6184_v57 = vmax.f32 %v6152_v35, 0.0  ;;  %v6155_v7 = vadd.f32 %v14989_v48, %v6058_v49  ;;  %v6545_v26 = vshll.u32 %v15116_v24, 16 }
 0x403   :  { %v6468_v60 = vsel %vm14420_vm14, %v6332_v19, %v6467_v61  ;;  %v6471_v38 = vsel %vm14426_vm15, %v6333_v52, %v6470_v6  ;;  %v10996_v12 = vpop.f32.mrb[168].mxu1  ;;  %v6544_v52 = vrot.slane %v6542_v58, 4 }
 0x404   :  { %6469 = vst [vmem:[#allocation2 + $0x58] sm:$0xf] %v6468_v60  ;;  %6472 = vst [vmem:[#allocation2 + $0x5c] sm:$0x1] %v6471_v38  ;;  %v10332_v11 = vpack.c.bf16 %v6184_v57, %v6184_v57  ;;  %v6185_v9 = vmax.f32 %v6155_v7, 0.0  ;;  %v10997_v2 = vpop.f32.mrb[169].mxu1 }
 0x405   :  { %v10998_v34 = vadd.f32 %v10997_v2, %v10996_v12  ;;  %v10999_v20 = vpop.f32.mrb[170].mxu1  ;;  %v6547_v61 = vrot.slane %v6545_v26, 5  ;;  %v6485_v38 = vld [vmem:[#allocation2 + $0x70] sm:$0xf]  ;;  %v6488_v12 = vld [vmem:[#allocation2 + $0x74] sm:$0x1] }
 0x406   :  { %v6335_v18 = vshrl.u32 %v10332_v11, 16  ;;  %v10333_v3 = vpack.c.bf16 %v6185_v9, %v6185_v9  ;;  %v11000_v25 = vpop.f32.mrb[171].mxu1  ;;  %v6338_v0 = vshll.u32 %v10332_v11, 16  ;;  %v6491_v11 = vld [vmem:[#allocation2 + $0x78] sm:$0xf] }
 0x407   :  { %v6063_v62 = vadd.f32 %v10998_v34, %v15004_v54  ;;  %v11001_v48 = vadd.f32 %v11000_v25, %v10999_v20  ;;  %v15135_v25 = vld [vmem:[#allocation2 + $0x4] sm:$0x1] }
 0x408   :  { %v6337_v13 = vrot.slane %v6335_v18, 7  ;;  %v6343_v16 = vshrl.u32 %v10333_v3, 16  ;;  %v6346_v22 = vshll.u32 %v10333_v3, 16  ;;  %v6494_v3 = vld [vmem:[#allocation2 + $0x7c] sm:$0x1] }
 0x409   :  { %v6160_v53 = vadd.f32 %v14995_v5, %v6063_v62  ;;  %v6066_v10 = vadd.f32 %v11001_v48, %v15004_v54 }
 0x40a   :  { %v6340_v21 = vor.u32 %v6338_v0, %v6337_v13  ;;  %v6341_v51 = vrot.slane %v6337_v13, 4  ;;  %v6345_v44 = vrot.slane %v6343_v16, 7  ;;  %v15143_v13 = vld [vmem:[#allocation2 + $0x8] sm:$0xf]  ;;  %v6548_v0 = vor.u32 %v6547_v61, %v6544_v52 }
 0x40b   :  { %v6186_v1 = vmax.f32 %v6160_v53, 0.0  ;;  %v6163_v36 = vadd.f32 %v14999_v43, %v6066_v10  ;;  %v6551_v16 = vshll.u32 %v15135_v25, 16 }
 0x40c   :  { %v6474_v23 = vsel %vm14420_vm14, %v6340_v21, %v6473_v4  ;;  %v6477_v46 = vsel %vm14426_vm15, %v6341_v51, %v6476_v47  ;;  %v6348_v5 = vor.u32 %v6346_v22, %v6345_v44  ;;  %v6349_v41 = vrot.slane %v6345_v44, 4  ;;  %v11002_v27 = vpop.f32.mrb[172].mxu1  ;;  %v15152_v44 = vld [vmem:[#allocation2 + $0x48] sm:$0xf] }
 0x40d   :  { %6475 = vst [vmem:[#allocation2 + $0x60] sm:$0xf] %v6474_v23  ;;  %6478 = vst [vmem:[#allocation2 + $0x64] sm:$0x1] %v6477_v46  ;;  %v10334_v29 = vpack.c.bf16 %v6186_v1, %v6186_v1  ;;  %v6187_v33 = vmax.f32 %v6163_v36, 0.0  ;;  %v11003_v40 = vpop.f32.mrb[173].mxu1 }
 0x40e   :  { %v6480_v43 = vsel %vm14420_vm14, %v6348_v5, %v6479_v32  ;;  %v6483_v63 = vsel %vm14426_vm15, %v6349_v41, %v6482_v8  ;;  %v11004_v30 = vadd.f32 %v11003_v40, %v11002_v27  ;;  %v11005_v42 = vpop.f32.mrb[174].mxu1  ;;  %v6556_v22 = vshrl.u32 %v15143_v13, 16 }
 0x40f   :  { %6481 = vst [vmem:[#allocation2 + $0x68] sm:$0xf] %v6480_v43  ;;  %6484 = vst [vmem:[#allocation2 + $0x6c] sm:$0x1] %v6483_v63  ;;  %v6351_v59 = vshrl.u32 %v10334_v29, 16  ;;  %v10335_v17 = vpack.c.bf16 %v6187_v33, %v6187_v33  ;;  %v11006_v35 = vpop.f32.mrb[175].mxu1 }
 0x410   :  { %v6354_v31 = vshll.u32 %v10334_v29, 16  ;;  %v6071_v39 = vadd.f32 %v11004_v30, %v15004_v54  ;;  %v11007_v19 = vadd.f32 %v11006_v35, %v11005_v42  ;;  %v6559_v47 = vshll.u32 %v15143_v13, 16  ;;  %v6497_v43 = vld [vmem:[#allocation2 + $0x80] sm:$0xf]  ;;  %v6500_v63 = vld [vmem:[#allocation2 + $0x84] sm:$0x1] }
 0x411   :  { %v6353_v45 = vrot.slane %v6351_v59, 7  ;;  %v6359_v49 = vshrl.u32 %v10335_v17, 16  ;;  %v6362_v50 = vshll.u32 %v10335_v17, 16  ;;  %v15156_v23 = vrot.slane %v6548_v0, 4  ;;  %v15164_v59 = vld [vmem:[#allocation2 + $0x10] sm:$0xf] }
 0x412   :  { %v6168_v60 = vadd.f32 %v14993_v56, %v6071_v39  ;;  %v6074_v9 = vadd.f32 %v11007_v19, %v15004_v54  ;;  %v11636_v56 = vld [vmem:[%s16327_s5 + $0x38] sm:$0xff]   ;;  %v15158_v41 = vrot.slane %v6551_v16, 5  ;;  %v6654_v32 = vshrl.u32 %v15152_v44, 16 }
 0x413   :  { %v6356_v6 = vor.u32 %v6354_v31, %v6353_v45  ;;  %v6357_v57 = vrot.slane %v6353_v45, 4  ;;  %v6361_v7 = vrot.slane %v6359_v49, 7  ;;  %11323 = vmatpush3.bf16.msra.mxu1 %v11636_v56  ;;  %11035 = vmatpush3.bf16.msra.mxu0 %v11636_v56  ;;  %v6657_v27 = vshll.u32 %v15152_v44, 16  ;;  %v15171_v31 = vld [vmem:[%s16327_s5 + $0x80] sm:$0xff]   ;;  %v6503_v49 = vld [vmem:[#allocation2 + $0x88] sm:$0xf] }
 0x414   :  { %v6188_v62 = vmax.f32 %v6168_v60, 0.0  ;;  %v6171_v54 = vadd.f32 %v14997_v15, %v6074_v9  ;;  %v6558_v58 = vrot.slane %v6556_v22, 4  ;;  %v6561_v26 = vrot.slane %v6559_v47, 5  ;;  %11236 = vmatprep.subr.bf16.mxu1 %v15171_v31 }
 0x415   :  { %v6486_v2 = vsel %vm14420_vm14, %v6356_v6, %v6485_v38  ;;  %v6489_v34 = vsel %vm14426_vm15, %v6357_v57, %v6488_v12  ;;  %v6364_v20 = vor.u32 %v6362_v50, %v6361_v7  ;;  %v6365_v18 = vrot.slane %v6361_v7, 4 }
 0x416   :  { %6487 = vst [vmem:[#allocation2 + $0x70] sm:$0xf] %v6486_v2  ;;  %6490 = vst [vmem:[#allocation2 + $0x74] sm:$0x1] %v6489_v34  ;;  %v15141_v48 = vld [vmem:[#allocation2 + $0x68] sm:$0xf]  ;;  %v10336_v15 = vpack.c.bf16 %v6188_v62, %v6188_v62 }
 0x417   :  { %v6492_v53 = vsel %vm14420_vm14, %v6364_v20, %v6491_v11  ;;  %v6495_v10 = vsel %vm14426_vm15, %v6365_v18, %v6494_v3  ;;  %v6710_v21 = vshrl.u32 %v15141_v48, 16  ;;  %v6713_v51 = vshll.u32 %v15141_v48, 16  ;;  %v15166_v45 = vld [vmem:[#allocation2 + $0x6c] sm:$0x1] }
 0x418   :  { %6493 = vst [vmem:[#allocation2 + $0x78] sm:$0xf] %v6492_v53  ;;  %6496 = vst [vmem:[#allocation2 + $0x7c] sm:$0x1] %v6495_v10  ;;  %v6189_v4 = vmax.f32 %v6171_v54, 0.0  ;;  %v6367_v1 = vshrl.u32 %v10336_v15, 16  ;;  %v6562_v10 = vor.u32 %v6561_v26, %v6558_v58 }
 0x419   :  { %v6712_v46 = vrot.slane %v6710_v21, 4  ;;  %v6715_v5 = vrot.slane %v6713_v51, 5  ;;  %v6370_v29 = vshll.u32 %v10336_v15, 16  ;;  %v6506_v11 = vld [vmem:[#allocation2 + $0x8c] sm:$0x1]  ;;  %v6719_v2 = vshll.u32 %v15166_v45, 16 }
 0x41a   :  { %v10337_v36 = vpack.c.bf16 %v6189_v4, %v6189_v4  ;;  %v6369_v8 = vrot.slane %v6367_v1, 7  ;;  %v6570_v34 = vshrl.u32 %v15164_v59, 16  ;;  %v6573_v20 = vshll.u32 %v15164_v59, 16  ;;  %v15197_v54 = vld [vmem:[#allocation2 + $0x18] sm:$0xf] }
 0x41b   :  { %v6716_v19 = vor.u32 %v6715_v5, %v6712_v46  ;;  %v15203_v21 = vld [vmem:[#allocation2 + $0x4c] sm:$0x1]  ;;  %v15207_v44 = vrot.slane %v6654_v32, 4  ;;  %v6721_v47 = vrot.slane %v6719_v2, 5  ;;  %v6584_v1 = vshrl.u32 %v15197_v54, 16 }
 0x41c   :  { %v6375_v33 = vshrl.u32 %v10337_v36, 16  ;;  %v6372_v17 = vor.u32 %v6370_v29, %v6369_v8  ;;  %v6373_v30 = vrot.slane %v6369_v8, 4  ;;  %v6378_v35 = vshll.u32 %v10337_v36, 16  ;;  %v15205_v4 = vld [vmem:[#allocation2 + $0xc] sm:$0x1] }
 0x41d   :  { %v15162_v40 = vld [vmem:[#allocation2 + $0x70] sm:$0xf]  ;;  %v15183_v38 = vld [vmem:[#allocation2 + $0x74] sm:$0x1]  ;;  %v6717_v51 = vrot.slane %v6716_v19, 4  ;;  %v6587_v36 = vshll.u32 %v15197_v54, 16 }
 0x41e   :  { %v6377_v42 = vrot.slane %v6375_v33, 7  ;;  %v15173_v39 = vld [vmem:[#allocation2 + $0x70] sm:$0xf]  ;;  %v6724_v52 = vshrl.u32 %v15162_v40, 16  ;;  %v6727_v61 = vshll.u32 %v15162_v40, 16  ;;  %v6498_v6 = vsel %vm14420_vm14, %v6372_v17, %v6497_v43 }
 0x41f   :  { %v15175_v50 = vld [vmem:[#allocation2 + $0x78] sm:$0xf]  ;;  %v6501_v57 = vsel %vm14426_vm15, %v6373_v30, %v6500_v63  ;;  %6499 = vst [vmem:[#allocation2 + $0x80] sm:$0xf] %v6498_v6  ;;  %v6733_v0 = vshll.u32 %v15183_v38, 16  ;;  %v15212_v46 = vrot.slane %v6657_v27, 5  ;;  %v6722_v27 = vsel %vm11876_vm2, %v6717_v51, %v6721_v47 }
 0x420   :  { %v6380_v7 = vor.u32 %v6378_v35, %v6377_v42  ;;  %v6381_v60 = vrot.slane %v6377_v42, 4  ;;  %v15185_v12 = vld [vmem:[#allocation2 + $0x78] sm:$0xf]  ;;  %6502 = vst [vmem:[#allocation2 + $0x84] sm:$0x1] %v6501_v57  ;;  %v10153_v9 = vcombine.low %v15173_v39, %v15175_v50  ;;  %v6726_v56 = vrot.slane %v6724_v52, 4 }
 0x421   :  { %v6729_v62 = vrot.slane %v6727_v61, 5  ;;  %v6738_v16 = vshrl.u32 %v15185_v12, 16  ;;  %v6741_v53 = vshll.u32 %v15185_v12, 16  ;;  %v6735_v8 = vrot.slane %v6733_v0, 5  ;;  %v15214_v43 = vld [vmem:[#allocation2 + $0x8] sm:$0xf] }
 0x422   :  { %v6504_v18 = vsel %vm14420_vm14, %v6380_v7, %v6503_v49  ;;  %v6507_v3 = vsel %vm14426_vm15, %v6381_v60, %v6506_v11  ;;  %7289 = vrot.lane.b32.xlu0 %v10153_v9, %s11753_s15  ;;  %v15216_v63 = vld [vmem:[#allocation2 + $0x10] sm:$0xf]  ;;  %v15218_v58 = vrot.slane %v6562_v10, 4  ;;  %v6565_v32 = vshll.u32 %v15205_v4, 16  ;;  %v15231_v35 = vld [vmem:[#allocation2 + $0x14] sm:$0x1] }
 0x423   :  { %6505 = vst [vmem:[#allocation2 + $0x88] sm:$0xf] %v6504_v18  ;;  %6508 = vst [vmem:[#allocation2 + $0x8c] sm:$0x1] %v6507_v3  ;;  %v6730_v15 = vor.u32 %v6729_v62, %v6726_v56  ;;  %v6740_v29 = vrot.slane %v6738_v16, 4  ;;  %v6743_v33 = vrot.slane %v6741_v53, 5  ;;  %v10147_v2 = vcombine.low %v15214_v43, %v15216_v63 }
 0x424   :  { %v15221_v26 = vrot.slane %v6570_v34, 4  ;;  %v15223_v17 = vrot.slane %v6573_v20, 5  ;;  %v15233_v49 = vld [vmem:[#allocation2 + $0x20] sm:$0xf]  ;;  %v15235_v19 = vld [vmem:[#allocation2 + $0x28] sm:$0xf] }
 0x425   :  { %v6731_v5 = vrot.slane %v6730_v15, 4  ;;  %16428 = vst [vmem:[#allocation13_spill] sm:$0xff] %v15233_v49  ;;  %16429 = vst [vmem:[#allocation17_spill] sm:$0xff] %v15235_v19  ;;  %v15237_v61 = vld [vmem:[#allocation2 + $0x7c] sm:$0x1]  ;;  %v6586_v7 = vrot.slane %v6584_v1, 4  ;;  %v6744_v34 = vor.u32 %v6743_v33, %v6740_v29 }
 0x426   :  { %v15229_v42 = vld [vmem:[#allocation2 + $0x80] sm:$0xf]  ;;  %v6589_v60 = vrot.slane %v6587_v36, 5  ;;  %v6567_v56 = vrot.slane %v6565_v32, 5  ;;  %v6612_v62 = vshrl.u32 %v15235_v19, 16  ;;  %v6615_v0 = vshll.u32 %v15235_v19, 16 }
 0x427   :  { %v6736_v30 = vsel %vm11876_vm2, %v6731_v5, %v6735_v8  ;;  %v15239_v6 = vld [vmem:[#allocation2 + $0x84] sm:$0x1]  ;;  %v15245_v11 = vld [vmem:[#allocation2 + $0x80] sm:$0xf]  ;;  %v6752_v20 = vshrl.u32 %v15229_v42, 16  ;;  %v6755_v18 = vshll.u32 %v15229_v42, 16  ;;  %v6576_v1 = vor.u32 %v15223_v17, %v15221_v26 }
 0x428   :  { %v10137_v52 = vcombine.low %v6722_v27, %v6736_v30  ;;  %v6747_v16 = vshll.u32 %v15237_v61, 16  ;;  %v6761_v51 = vshll.u32 %v15239_v6, 16  ;;  %v15260_v15 = vld [vmem:[#allocation2 + $0x38] sm:$0xf]  ;;  %v15263_v47 = vld [vmem:[#allocation2 + $0x1c] sm:$0x1]  ;;  %v6568_v32 = vsel %vm11876_vm2, %v15218_v58, %v6567_v56 }
 0x429   :  { %v6754_v53 = vrot.slane %v6752_v20, 4  ;;  %v6757_v10 = vrot.slane %v6755_v18, 5  ;;  %16430 = vst [vmem:[#allocation16_spill] sm:$0xff] %v15260_v15  ;;  %v6579_v36 = vshll.u32 %v15231_v35, 16  ;;  %v6598_v5 = vshrl.u32 %v15233_v49, 16 }
 0x42a   :  { %v15247_v9 = vld [vmem:[#allocation2 + $0x88] sm:$0xf]  ;;  %7209 = vrot.lane.b32.xlu1 %v10137_v52, %s11753_s15  ;;  %v6601_v8 = vshll.u32 %v15233_v49, 16  ;;  %v6745_v29 = vrot.slane %v6744_v34, 4  ;;  %v6590_v27 = vor.u32 %v6589_v60, %v6586_v7  ;;  %v15273_v30 = vld [vmem:[#allocation2 + $0x30] sm:$0xf] }
 0x42b   :  { %v10154_v3 = vcombine.low %v15245_v11, %v15247_v9  ;;  %v6758_v33 = vor.u32 %v6757_v10, %v6754_v53  ;;  %16431 = vst [vmem:[#allocation7_spill] sm:$0xff] %v15273_v30  ;;  %v15275_v52 = vld [vmem:[#allocation2 + $0x20] sm:$0xf]  ;;  %v6614_v20 = vrot.slane %v6612_v62, 4  ;;  %v6617_v18 = vrot.slane %v6615_v0, 5 }
 0x42c   :  { %v6640_v26 = vshrl.u32 %v15260_v15, 16  ;;  %v6643_v17 = vshll.u32 %v15260_v15, 16  ;;  %v6763_v57 = vrot.slane %v6761_v51, 5  ;;  %v15279_v34 = vld [vmem:[#allocation2 + $0x18] sm:$0xf]  ;;  %v6593_v53 = vshll.u32 %v15263_v47, 16 }
 0x42d   :  { %7291 = vrot.lane.b32.xlu0 %v10154_v3, %s11753_s15  ;;  %v6749_v3 = vrot.slane %v6747_v16, 5  ;;  %v6759_v22 = vrot.slane %v6758_v33, 4  ;;  %v6600_v58 = vrot.slane %v6598_v5, 4  ;;  %v6603_v7 = vrot.slane %v6601_v8, 5  ;;  %v15285_v62 = vld [vmem:[#allocation2 + $0x50] sm:$0xf] }
 0x42e   :  { %v6626_v60 = vshrl.u32 %v15273_v30, 16  ;;  %v6629_v56 = vshll.u32 %v15273_v30, 16  ;;  %16432 = vst [vmem:[#allocation8_spill] sm:$0xff] %v15285_v62  ;;  %v10148_v10 = vcombine.low %v15279_v34, %v15275_v52  ;;  %v6591_v51 = vrot.slane %v6590_v27, 4  ;;  %v15293_v33 = vld [vmem:[#allocation2 + $0x2c] sm:$0x1] }
 0x42f   :  { %v6750_v0 = vsel %vm11876_vm2, %v6745_v29, %v6749_v3  ;;  %v6764_v16 = vsel %vm11876_vm2, %v6759_v22, %v6763_v57  ;;  %v15295_v5 = vld [vmem:[#allocation2 + $0x30] sm:$0xf]  ;;  %v15297_v8 = vld [vmem:[#allocation2 + $0x24] sm:$0x1]  ;;  %v6618_v37 = vor.u32 %v6617_v18, %v6614_v20  ;;  %v6642_v14 = vrot.slane %v6640_v26, 4 }
 0x430   :  { %v6645_v30 = vrot.slane %v6643_v17, 5  ;;  %v15299_v15 = vld [vmem:[#allocation2 + $0x28] sm:$0xf]  ;;  %v6577_v29 = vrot.slane %v6576_v1, 4  ;;  %v6595_v3 = vrot.slane %v6593_v53, 5  ;;  %v6668_v22 = vshrl.u32 %v15285_v62, 16 }
 0x431   :  { %7277 = vrot.lane.b32.xlu0 %v10147_v2, %s11753_s15  ;;  %v10138_v2 = vcombine.low %v6750_v0, %v6764_v16  ;;  %v6671_v57 = vshll.u32 %v15285_v62, 16  ;;  %v6604_v27 = vor.u32 %v6603_v7, %v6600_v58  ;;  %v6621_v0 = vshll.u32 %v15293_v33, 16  ;;  %v15306_v20 = vld [vmem:[#allocation2 + $0x60] sm:$0xf]  ;;  %v15315_v53 = vld [vmem:[#allocation2 + $0x34] sm:$0x1] }
 0x432   :  { %v6628_v16 = vrot.slane %v6626_v60, 4  ;;  %v6631_v49 = vrot.slane %v6629_v56, 5  ;;  %16433 = vst [vmem:[#allocation18_spill] sm:$0xff] %v15306_v20  ;;  %v16434_v1 = vsel %vm11876_vm2, %v15156_v23, %v15158_v41  ;;  %v10149_v26 = vcombine.low %v15299_v15, %v15295_v5  ;;  %16435 = vst [vmem:[#allocation19_spill] sm:$0xff] %v15315_v53  ;;  %v15324_v23 = vld [vmem:[#allocation2 + $0x58] sm:$0xf] }
 0x433   :  { %7211 = vrot.lane.b32.xlu1 %v10138_v2, %s11753_s15  ;;  %v10131_v18 = vcombine.low %v16434_v1, %v6568_v32  ;;  %v6581_v17 = vrot.slane %v6579_v36, 5  ;;  %v6660_v58 = vor.u32 %v15212_v46, %v15207_v44  ;;  %v6596_v7 = vsel %vm11876_vm2, %v6591_v51, %v6595_v3  ;;  %16437 = vst [vmem:[#allocation11_spill] sm:$0xff] %v15324_v23  ;;  %v15326_v41 = vld [vmem:[#allocation2 + $0x40] sm:$0xf]  ;;  %v15334_v51 = vld [vmem:[#allocation2 + $0x38] sm:$0xf] }
 0x434   :  { %v6607_v60 = vshll.u32 %v15297_v8, 16  ;;  %v6619_v56 = vrot.slane %v6618_v37, 4  ;;  %v6646_v2 = vor.u32 %v6645_v30, %v6642_v14  ;;  %v6670_v32 = vrot.slane %v6668_v22, 4 }
 0x435   :  { %7279 = vrot.lane.b32.xlu0 %v10148_v10, %s11753_s15  ;;  %v15322_v10 = vld [vmem:[#allocation2 + $0x3c] sm:$0x1]  ;;  %v6673_v36 = vrot.slane %v6671_v57, 5  ;;  %v6696_v1 = vshrl.u32 %v15306_v20, 16  ;;  %v6699_v62 = vshll.u32 %v15306_v20, 16  ;;  %v6582_v37 = vsel %vm11876_vm2, %v6577_v29, %v6581_v17 }
 0x436   :  { %16436 = vst [vmem:[#allocation10_spill] sm:$0xff] %v15322_v10  ;;  %v6605_v44 = vrot.slane %v6604_v27, 4  ;;  %v6623_v46 = vrot.slane %v6621_v0, 5  ;;  %v6632_v14 = vor.u32 %v6631_v49, %v6628_v16  ;;  %v10132_v30 = vcombine.low %v6582_v37, %v6596_v7  ;;  %v15344_v27 = vld [vmem:[#allocation2 + $0x54] sm:$0x1] }
 0x437   :  { %7197 = vrot.lane.b32.xlu1 %v10131_v18, %s11753_s15  ;;  %v6649_v3 = vshll.u32 %v15322_v10, 16  ;;  %v6682_v22 = vshrl.u32 %v15324_v23, 16  ;;  %v6685_v57 = vshll.u32 %v15324_v23, 16  ;;  %v10150_v18 = vcombine.low %v15334_v51, %v15326_v41  ;;  %v15346_v49 = vld [vmem:[#allocation2 + $0x58] sm:$0xf] }
 0x438   :  { %v6609_v20 = vrot.slane %v6607_v60, 5  ;;  %v6635_v29 = vshll.u32 %v15315_v53, 16  ;;  %v6647_v0 = vrot.slane %v6646_v2, 4  ;;  %v6674_v16 = vor.u32 %v6673_v36, %v6670_v32  ;;  %v15352_v23 = vld [vmem:[#allocation2 + $0x50] sm:$0xf] }
 0x439   :  { %7281 = vrot.lane.b32.xlu0 %v10149_v26, %s11753_s15  ;;  %v6624_v26 = vsel %vm11876_vm2, %v6619_v56, %v6623_v46  ;;  %v6698_v17 = vrot.slane %v6696_v1, 4  ;;  %v6701_v7 = vrot.slane %v6699_v62, 5  ;;  %v6633_v37 = vrot.slane %v6632_v14, 4  ;;  %v15359_v1 = vld [vmem:[#allocation2 + $0x64] sm:$0x1] }
 0x43a   :  { %v6610_v60 = vsel %vm11876_vm2, %v6605_v44, %v6609_v20  ;;  %v6651_v56 = vrot.slane %v6649_v3, 5  ;;  %v6677_v46 = vshll.u32 %v15344_v27, 16  ;;  %v6684_v19 = vrot.slane %v6682_v22, 4  ;;  %v15363_v44 = vld [vmem:[#allocation2 + $0x68] sm:$0xf] }
 0x43b   :  { %7199 = vrot.lane.b32.xlu1 %v10132_v30, %s11753_s15  ;;  %v6687_v10 = vrot.slane %v6685_v57, 5  ;;  %v10133_v53 = vcombine.low %v6610_v60, %v6624_v26  ;;  %v10151_v2 = vcombine.low %v15352_v23, %v15346_v49  ;;  %v6661_v62 = vrot.slane %v6660_v58, 4  ;;  %v15367_v22 = vld [vmem:[#allocation2 + $0x5c] sm:$0x1]  ;;  %v15371_v57 = vld [vmem:[#allocation2 + $0x60] sm:$0xf] }
 0x43c   :  { %v16438_v32 = vshll.u32 %v15203_v21, 16  ;;  %v6637_v30 = vrot.slane %v6635_v29, 5  ;;  %v6652_v20 = vsel %vm11876_vm2, %v6647_v0, %v6651_v56  ;;  %v6675_v14 = vrot.slane %v6674_v16, 4 }
 0x43d   :  { %7283 = vrot.lane.b32.xlu0 %v10150_v18, %s11753_s15  ;;  %v6702_v3 = vor.u32 %v6701_v7, %v6698_v17  ;;  %v6679_v18 = vrot.slane %v6677_v46, 5  ;;  %v6688_v26 = vor.u32 %v6687_v10, %v6684_v19  ;;  %v6705_v29 = vshll.u32 %v15359_v1, 16 }
 0x43e   :  { %v6665_v36 = vrot.slane %v16438_v32, 5  ;;  %v6638_v58 = vsel %vm11876_vm2, %v6633_v37, %v6637_v30  ;;  %v10152_v16 = vcombine.low %v15371_v57, %v15363_v44  ;;  %v6691_v7 = vshll.u32 %v15367_v22, 16 }
 0x43f   :  { %7201 = vrot.lane.b32.xlu1 %v10133_v53, %s11753_s15  ;;  %v10134_v0 = vcombine.low %v6638_v58, %v6652_v20  ;;  %v6680_v17 = vsel %vm11876_vm2, %v6675_v14, %v6679_v18  ;;  %v6703_v60 = vrot.slane %v6702_v3, 4  ;;  %v6689_v19 = vrot.slane %v6688_v26, 4  ;;  %v6765_v14 = vld [vmem:[#allocation2] sm:$0xe]  ;;  %v6766_v3 = vld [vmem:[#allocation2 + $0x8] sm:$0xe] }
 0x440   :  { %v6666_v53 = vsel %vm11876_vm2, %v6661_v62, %v6665_v36  ;;  %v6707_v10 = vrot.slane %v6705_v29, 5  ;;  %v6693_v56 = vrot.slane %v6691_v7, 5  ;;  %v6924_v32 = vshrl.u32 %v15216_v63, 16  ;;  %v6778_v26 = vld [vmem:[#allocation2 + $0x70] sm:$0xe] }
 0x441   :  { %7285 = vrot.lane.b32.xlu0 %v10151_v2, %s11753_s15  ;;  %v10135_v37 = vcombine.low %v6666_v53, %v6680_v17  ;;  %v6927_v36 = vshll.u32 %v15216_v63, 16  ;;  %v6910_v30 = vshrl.u32 %v15214_v43, 16  ;;  %v6913_v20 = vshll.u32 %v15214_v43, 16 }
 0x442   :  { %v6708_v46 = vsel %vm11876_vm2, %v6703_v60, %v6707_v10  ;;  %v6694_v2 = vsel %vm11876_vm2, %v6689_v19, %v6693_v56  ;;  %v6926_v58 = vrot.slane %v6924_v32, 4  ;;  %v10107_v53 = vrot.slane %v6765_v14, 9  ;;  %v6894_v10 = vld [vmem:[#allocation2 + $0x14] sm:$0x1] }
 0x443   :  { %7203 = vrot.lane.b32.xlu1 %v10134_v0, %s11753_s15  ;;  %v10136_v62 = vcombine.low %v6694_v2, %v6708_v46  ;;  %v6929_v18 = vrot.slane %v6927_v36, 5  ;;  %v6912_v29 = vrot.slane %v6910_v30, 4  ;;  %v6915_v0 = vrot.slane %v6913_v20, 5 }
 0x444   :  { %v6815_v17 = vrot.slane %v15135_v25, 5  ;;  %v10108_v7 = vrot.slane %v6766_v3, 9  ;;  %v10120_v60 = vrot.slane %v6778_v26, 9  ;;  %v6867_v19 = vrot.slane %v15183_v38, 5 }
 0x445   :  { %7287 = vrot.lane.b32.xlu0 %v10152_v16, %s11753_s15  ;;  %v6777_v16 = vld [vmem:[#allocation2 + $0x68] sm:$0xe]  ;;  %v6819_v63 = vrot.slane %v15205_v4, 5  ;;  %v6938_v43 = vshrl.u32 %v15279_v34, 16  ;;  %v6941_v56 = vshll.u32 %v15279_v34, 16  ;;  %v6952_v46 = vshrl.u32 %v15275_v52, 16 }
 0x446   :  { %v6955_v2 = vshll.u32 %v15275_v52, 16  ;;  %v10119_v32 = vrot.slane %v6777_v16, 9  ;;  %v6863_v25 = vrot.slane %v15166_v45, 5  ;;  %v6916_v36 = vor.u32 %v6915_v0, %v6912_v29  ;;  %v6767_v52 = vld [vmem:[#allocation2 + $0x10] sm:$0xe] }
 0x447   :  { %7205 = vrot.lane.b32.xlu1 %v10135_v37, %s11753_s15  ;;  %v6930_v37 = vor.u32 %v6929_v18, %v6926_v58  ;;  %v15403_v38 = vsel %vm12431_vm5, %v10107_v53, %v6815_v17  ;;  %v6933_v4 = vshll.u32 %v6894_v10, 16  ;;  %v6868_v30 = vsel %vm12431_vm5, %v10120_v60, %v6867_v19  ;;  %v15413_v0 = vld [vmem:[#allocation2 + $0x48] sm:$0xe]  ;;  %v6780_v53 = vld [vmem:[#allocation2 + $0x80] sm:$0xe] }
 0x448   :  { %v15409_v34 = vsel %vm12431_vm5, %v10108_v7, %v6819_v63  ;;  %v6940_v3 = vrot.slane %v6938_v43, 4  ;;  %v6943_v58 = vrot.slane %v6941_v56, 5  ;;  %v6954_v18 = vrot.slane %v6952_v46, 4  ;;  %v6768_v43 = vld [vmem:[#allocation2 + $0x18] sm:$0xe] }
 0x449   :  { %v6931_v14 = vrot.slane %v6930_v37, 4  ;;  %v6957_v45 = vrot.slane %v6955_v2, 5  ;;  %v6864_v26 = vsel %vm12431_vm5, %v10119_v32, %v6863_v25  ;;  %v6917_v29 = vrot.slane %v6916_v36, 4 }
 0x44a   :  { %v10145_v16 = vcombine.low %v6864_v26, %v6868_v30  ;;  %v6935_v17 = vrot.slane %v6933_v4, 5  ;;  %v10109_v60 = vrot.slane %v6767_v52, 9  ;;  %v6823_v7 = vrot.slane %v15231_v35, 5 }
 0x44b   :  { %7207 = vrot.lane.b32.xlu1 %v10136_v62, %s11753_s15  ;;  %v6893_v62 = vld [vmem:[#allocation2 + $0xc] sm:$0x1]  ;;  %v10139_v63 = vcombine.low %v15403_v38, %v15409_v34  ;;  %v10123_v37 = vcombine.low %v15116_v24, %v15143_v13  ;;  %v6944_v56 = vor.u32 %v6943_v58, %v6940_v3  ;;  %v6958_v46 = vor.u32 %v6957_v45, %v6954_v18  ;;  %v6771_v24 = vld [vmem:[#allocation2 + $0x30] sm:$0xe] }
 0x44c   :  { %v6919_v20 = vshll.u32 %v6893_v62, 16  ;;  %v6779_v62 = vld [vmem:[#allocation2 + $0x78] sm:$0xe]  ;;  %v6936_v32 = vsel %vm11876_vm2, %v6931_v14, %v6935_v17  ;;  %v10122_v25 = vrot.slane %v6780_v53, 9  ;;  %v6875_v35 = vrot.slane %v15239_v6, 5 }
 0x44d   :  { %v15429_v30 = vsel %vm12431_vm5, %v10109_v60, %v6823_v7  ;;  %v6827_v52 = vrot.slane %v15263_v47, 5  ;;  %v10121_v58 = vrot.slane %v6779_v62, 9  ;;  %v6871_v14 = vrot.slane %v15237_v61, 5  ;;  %v6896_v62 = vld [vmem:[#allocation2 + $0x24] sm:$0x1] }
 0x44e   :  { %v6921_v10 = vrot.slane %v6919_v20, 5  ;;  %v10110_v20 = vrot.slane %v6768_v43, 9  ;;  %v15438_v45 = vrot.slane %v6944_v56, 4  ;;  %v15440_v26 = vrot.slane %v6958_v46, 4 }
 0x44f   :  { %v6966_v47 = vshrl.u32 %v15299_v15, 16  ;;  %v6969_v53 = vshll.u32 %v15299_v15, 16  ;;  %v6994_v17 = vshrl.u32 %v15334_v51, 16  ;;  %v6876_v61 = vsel %vm12431_vm5, %v10122_v25, %v6875_v35 }
 0x450   :  { %v6922_v36 = vsel %vm11876_vm2, %v6917_v29, %v6921_v10  ;;  %v6980_v29 = vshrl.u32 %v15295_v5, 16  ;;  %v6997_v60 = vshll.u32 %v15334_v51, 16  ;;  %v7008_v7 = vshrl.u32 %v15326_v41, 16  ;;  %v11639_v51 = vld [vmem:[%s16327_s5 + $0x88] sm:$0xff]  }
 0x451   :  { %v15434_v18 = vcombine.low %v6922_v36, %v6936_v32  ;;  %v15455_v10 = vsel %vm12431_vm5, %v10110_v20, %v6827_v52  ;;  %v7022_v15 = vshrl.u32 %v15352_v23, 16  ;;  %v7025_v43 = vshll.u32 %v15352_v23, 16 }
 0x452   :  { %v6872_v46 = vsel %vm12431_vm5, %v10121_v58, %v6871_v14  ;;  %v6982_v32 = vrot.slane %v6980_v29, 4  ;;  %v7036_v35 = vshrl.u32 %v15346_v49, 16  ;;  %v7039_v36 = vshll.u32 %v15346_v49, 16  ;;  %v6897_v14 = vld [vmem:[#allocation2 + $0x2c] sm:$0x1] }
 0x453   :  { %v6968_v3 = vrot.slane %v6966_v47, 4  ;;  %v6971_v6 = vrot.slane %v6969_v53, 5  ;;  %v7092_v4 = vshrl.u32 %v15175_v50, 16  ;;  %v10130_v53 = vcombine.low %v15185_v12, %v15229_v42 }
 0x454   :  { %v6835_v38 = vrot.slane %v15293_v33, 5  ;;  %v6996_v34 = vrot.slane %v6994_v17, 4  ;;  %v7027_v49 = vrot.slane %v7025_v43, 5 }
 0x494   :  { %v7290_v19 = vpop.permute.xlu0 %7289 }
 0x495   :  { %v7375_v2 = vsel %vm5724_vm0, %v10145_v16, %v7290_v19  ;;  %v6983_v16 = vshll.u32 %v15295_v5, 16  ;;  %v10129_v19 = vcombine.low %v15141_v48, %v15162_v40  ;;  %v7011_v5 = vshll.u32 %v15326_v41, 16 }
 0x496   :  { %7652 = vmatprep.mubr.bf16.mxu1 %v7375_v2  ;;  %v10146_v40 = vcombine.low %v6872_v46, %v6876_v61  ;;  %v6895_v2 = vld [vmem:[#allocation2 + $0x1c] sm:$0x1]  ;;  %v6770_v61 = vld [vmem:[#allocation2 + $0x28] sm:$0xe]  ;;  %v7041_v41 = vrot.slane %v7039_v36, 5  ;;  %v7123_v36 = vshll.u32 %v15247_v9, 16 }
 0x497   :  { %v6985_v25 = vrot.slane %v6983_v16, 5  ;;  %v6898_v16 = vld [vmem:[#allocation2 + $0x34] sm:$0x1]  ;;  %v6947_v46 = vshll.u32 %v6895_v2, 16 }
 0x49c   :  { %v7210_v56 = vpop.permute.xlu1 %7209 }
 0x49d   :  { %v7343_v48 = vsel %vm5724_vm0, %v10129_v19, %v7210_v56  ;;  %v11640_v56 = vld [vmem:[%s16327_s5 + $0x90] sm:$0xff]   ;;  %v10112_v19 = vrot.slane %v6770_v61, 9 }
 0x49e   :  { %7653 = vmatmul.mubr.bf16.vlgmr.msra.gmra.mrb[176].mxu1 %v7343_v48  ;;  %v6961_v48 = vshll.u32 %v6896_v62, 16  ;;  %v6975_v62 = vshll.u32 %v6897_v14, 16  ;;  %v6899_v14 = vld [vmem:[#allocation2 + $0x3c] sm:$0x1] }
 0x49f   :  { %v7292_v52 = vpop.permute.xlu0 %7291  ;;  %11237 = vmatpush3.bf16.msra.mxu1 %v15171_v31  ;;  %v6986_v31 = vor.u32 %v6985_v25, %v6982_v32  ;;  %v6989_v32 = vshll.u32 %v6898_v16, 16  ;;  %v11643_v25 = vld [vmem:[%s16327_s5 + $0x98] sm:$0xff]   ;;  %v6900_v16 = vld [vmem:[#allocation2 + $0x44] sm:$0x1] }
 0x4a0   :  { %v7379_v29 = vsel %vm5724_vm0, %v10146_v40, %v7292_v52  ;;  %11238 = vmatprep.subr.bf16.mxu1 %v11639_v51  ;;  %v7095_v40 = vshll.u32 %v15175_v50, 16  ;;  %v6963_v58 = vrot.slane %v6961_v48, 5  ;;  %v6972_v52 = vor.u32 %v6971_v6, %v6968_v3 }
 0x4a1   :  { %7660 = vmatprep.mubr.bf16.mxu1 %v7379_v29  ;;  %v6949_v29 = vrot.slane %v6947_v46, 5  ;;  %v6987_v20 = vrot.slane %v6986_v31, 4  ;;  %v7010_v3 = vrot.slane %v7008_v7, 4  ;;  %v7013_v6 = vrot.slane %v7011_v5, 5 }
 0x4a2   :  { %v6964_v42 = vsel %vm11876_vm2, %v15440_v26, %v6963_v58  ;;  %v6977_v17 = vrot.slane %v6975_v62, 5  ;;  %v6831_v46 = vrot.slane %v15297_v8, 5  ;;  %v6902_v26 = vld [vmem:[#allocation2 + $0x5c] sm:$0x1]  ;;  %v7038_v58 = vrot.slane %v7036_v35, 4 }
 0x4a3   :  { %v7278_v2 = vpop.permute.xlu0 %7277  ;;  %11239 = vmatpush3.bf16.msra.mxu1 %v11639_v51  ;;  %v6769_v51 = vld [vmem:[#allocation2 + $0x20] sm:$0xe]  ;;  %v6950_v12 = vsel %vm11876_vm2, %v15438_v45, %v6949_v29  ;;  %v6973_v45 = vrot.slane %v6972_v52, 4  ;;  %v7003_v31 = vshll.u32 %v6899_v14, 16  ;;  %v7014_v52 = vor.u32 %v7013_v6, %v7010_v3 }
 0x4a4   :  { %v7351_v47 = vsel %vm5724_vm0, %v10139_v63, %v7278_v2  ;;  %11240 = vmatprep.subr.bf16.mxu1 %v11640_v56  ;;  %v6999_v63 = vrot.slane %v6997_v60, 5  ;;  %v6991_v60 = vrot.slane %v6989_v32, 5  ;;  %v10111_v61 = vrot.slane %v6769_v51, 9 }
 0x4a5   :  { %7604 = vmatprep.mubr.bf16.mxu0 %v7351_v47  ;;  %v7212_v2 = vpop.permute.xlu1 %7211  ;;  %v7017_v29 = vshll.u32 %v6900_v16, 16  ;;  %v7024_v35 = vrot.slane %v7022_v15, 4  ;;  %v7045_v47 = vshll.u32 %v6902_v26, 16  ;;  %v6978_v23 = vsel %vm11876_vm2, %v6973_v45, %v6977_v17  ;;  %v16442_v17 = vld [vmem:[#allocation19_spill] sm:$0xff]  ;;  %v16443_v26 = vld [vmem:[#allocation10_spill] sm:$0xff] }
 0x4a6   :  { %v7347_v33 = vsel %vm5724_vm0, %v10130_v53, %v7212_v2  ;;  %v6992_v5 = vsel %vm11876_vm2, %v6987_v20, %v6991_v60  ;;  %v7000_v48 = vor.u32 %v6999_v63, %v6996_v34  ;;  %v10156_v20 = vcombine.low %v6950_v12, %v6964_v42 }
 0x4a7   :  { %11241 = vmatpush3.bf16.msra.mxu1 %v11640_v56  ;;  %v7280_v7 = vpop.permute.xlu0 %7279  ;;  %v6836_v56 = vsel %vm12431_vm5, %v10112_v19, %v6835_v38  ;;  %v6901_v19 = vld [vmem:[#allocation2 + $0x54] sm:$0x1]  ;;  %v16439_v53 = vcombine.low %v15429_v30, %v15455_v10  ;;  %v6832_v43 = vsel %vm12431_vm5, %v10111_v61, %v6831_v46  ;;  %v7042_v62 = vor.u32 %v7041_v41, %v7038_v58  ;;  %v6772_v30 = vld [vmem:[#allocation2 + $0x38] sm:$0xe] }
 0x4a8   :  { %7661 = vmatmul.mubr.bf16.gmra.mrb[180].mxu1 %v7347_v33  ;;  %11242 = vmatprep.subr.bf16.mxu1 %v11643_v25  ;;  %v10157_v13 = vcombine.low %v6978_v23, %v6992_v5  ;;  %v7001_v32 = vrot.slane %v7000_v48, 4  ;;  %v7015_v51 = vrot.slane %v7014_v52, 4  ;;  %v7019_v38 = vrot.slane %v7017_v29, 5 }
 0x4a9   :  { %11244 = vmatprep.mubr.msk.bf16.mxu1 %vm5724_vm0, %v15434_v18  ;;  %v7198_v8 = vpop.permute.xlu1 %7197  ;;  %v7355_v15 = vsel %vm5724_vm0, %v16439_v53, %v7280_v7  ;;  %v7028_v34 = vor.u32 %v7027_v49, %v7024_v35  ;;  %v7031_v63 = vshll.u32 %v6901_v19, 16  ;;  %v7047_v10 = vrot.slane %v7045_v47, 5  ;;  %v6903_v49 = vld [vmem:[#allocation2 + $0x64] sm:$0x1] }
 0x4aa   :  { %v7319_v18 = vsel %vm5724_vm0, %v10123_v37, %v7198_v8  ;;  %v10141_v37 = vcombine.low %v6832_v43, %v6836_v56  ;;  %v10113_v2 = vrot.slane %v6771_v24, 9  ;;  %v16440_v12 = vshrl.u32 %v15363_v44, 16  ;;  %v6905_v43 = vld [vmem:[#allocation2 + $0x74] sm:$0x1] }
 0x4ab   :  { %11243 = vmatpush3.bf16.msra.mxu1 %v11643_v25  ;;  %7605 = vmatmul.mubr.bf16.vlgmr.msra.gmra.mrb[176].mxu0 %v7319_v18  ;;  %v7005_v25 = vrot.slane %v7003_v31, 5  ;;  %v16441_v14 = vshll.u32 %v15363_v44, 16  ;;  %v7043_v33 = vrot.slane %v7042_v62, 4  ;;  %v6839_v60 = vrot.slane %v16442_v17, 5  ;;  %v7282_v45 = vpop.permute.xlu0 %7281 }
 0x4ac   :  { %7612 = vmatprep.mubr.bf16.mxu0 %v7355_v15  ;;  %v7066_v42 = vrot.slane %v16440_v12, 4  ;;  %v7094_v61 = vrot.slane %v7092_v4, 4  ;;  %v7097_v16 = vrot.slane %v7095_v40, 5  ;;  %v10114_v46 = vrot.slane %v6772_v30, 9  ;;  %v6904_v4 = vld [vmem:[#allocation2 + $0x6c] sm:$0x1] }
 0x4ad   :  { %v7069_v3 = vrot.slane %v16441_v14, 5  ;;  %v7200_v6 = vpop.permute.xlu1 %7199  ;;  %v6843_v58 = vrot.slane %v16443_v26, 5  ;;  %v16444_v44 = vshrl.u32 %v15371_v57, 16  ;;  %v16445_v7 = vshll.u32 %v15371_v57, 16 }
 0x4ae   :  { %v7020_v56 = vsel %vm11876_vm2, %v7015_v51, %v7019_v38  ;;  %v7029_v48 = vrot.slane %v7028_v34, 4  ;;  %v16446_v50 = vshrl.u32 %v15173_v39, 16  ;;  %v16447_v31 = vshll.u32 %v15173_v39, 16  ;;  %v6774_v51 = vld [vmem:[#allocation2 + $0x50] sm:$0xe] }
 0x4af   :  { %v7052_v41 = vrot.slane %v16444_v44, 4  ;;  %v7055_v5 = vrot.slane %v16445_v7, 5  ;;  %v16448_v52 = vcombine.low %v15164_v59, %v15197_v54  ;;  %v7006_v57 = vsel %vm11876_vm2, %v7001_v32, %v7005_v25 }
 0x4b0   :  { %11245 = vmatmul.mubr.msk.bf16.vlgmr.msra.gmra.mrb[184].mxu1 %vm5724_vm0, %v10156_v20  ;;  %v7080_v40 = vrot.slane %v16446_v50, 4  ;;  %v7083_v8 = vrot.slane %v16447_v31, 5  ;;  %v7033_v35 = vrot.slane %v7031_v63, 5  ;;  %v7070_v18 = vor.u32 %v7069_v3, %v7066_v42  ;;  %v6906_v20 = vld [vmem:[#allocation2 + $0x7c] sm:$0x1] }
 0x4b1   :  { %11248 = vmatprep.mubr.msk.bf16.mxu1 %vm5724_vm0, %v10157_v13  ;;  %v7323_v29 = vsel %vm5724_vm0, %v16448_v52, %v7200_v6  ;;  %v7359_v19 = vsel %vm5724_vm0, %v10141_v37, %v7282_v45  ;;  %v7048_v47 = vsel %vm11876_vm2, %v7043_v33, %v7047_v10  ;;  %v6840_v39 = vsel %vm12431_vm5, %v10113_v2, %v6839_v60  ;;  %v7202_v30 = vpop.permute.xlu1 %7201  ;;  %v16450_v10 = vld [vmem:[#allocation17_spill] sm:$0xff]  ;;  %v7284_v6 = vpop.permute.xlu0 %7283 }
 0x4b2   :  { %v7098_v53 = vor.u32 %v7097_v16, %v7094_v61  ;;  %v10158_v59 = vcombine.low %v7006_v57, %v7020_v56  ;;  %v6844_v54 = vsel %vm12431_vm5, %v10114_v46, %v6843_v58  ;;  %v7056_v15 = vor.u32 %v7055_v5, %v7052_v41  ;;  %v16451_v2 = vld [vmem:[#allocation13_spill] sm:$0xff]  ;;  %v6907_v5 = vld [vmem:[#allocation2 + $0x84] sm:$0x1] }
 0x4b3   :  { %7613 = vmatmul.mubr.bf16.gmra.mrb[180].mxu0 %v7323_v29  ;;  %v7073_v23 = vshll.u32 %v6904_v4, 16  ;;  %v7034_v62 = vsel %vm11876_vm2, %v7029_v48, %v7033_v35  ;;  %v7059_v24 = vshll.u32 %v6903_v49, 16  ;;  %v7084_v13 = vor.u32 %v7083_v8, %v7080_v40  ;;  %v6908_v58 = vld [vmem:[#allocation2 + $0x8c] sm:$0x1] }
 0x4b4   :  { %7620 = vmatprep.mubr.bf16.mxu0 %v7359_v19  ;;  %v7101_v37 = vshll.u32 %v6906_v20, 16  ;;  %v10159_v32 = vcombine.low %v7034_v62, %v7048_v47  ;;  %v7071_v25 = vrot.slane %v7070_v18, 4  ;;  %v16449_v38 = vshrl.u32 %v15247_v9, 16  ;;  %v6776_v47 = vld [vmem:[#allocation2 + $0x60] sm:$0xe] }
 0x4b5   :  { %v7125_v63 = vrot.slane %v7123_v36, 5  ;;  %v10125_v12 = vcombine.low %v16451_v2, %v16450_v10  ;;  %v10142_v42 = vcombine.low %v6840_v39, %v6844_v54  ;;  %v7087_v14 = vshll.u32 %v6905_v43, 16  ;;  %v7204_v19 = vpop.permute.xlu1 %7203  ;;  %v7286_v39 = vpop.permute.xlu0 %7285  ;;  %v6775_v43 = vld [vmem:[#allocation2 + $0x58] sm:$0xe]  ;;  %v11718_v2 = vld [vmem:[#allocation2 + $0x48] sm:$0xf] }
 0x4b6   :  { %v7122_v34 = vrot.slane %v16449_v38, 4  ;;  %v7099_v3 = vrot.slane %v7098_v53, 4  ;;  %v7057_v33 = vrot.slane %v7056_v15, 4  ;;  %v7075_v17 = vrot.slane %v7073_v23, 5  ;;  %v16456_v53 = vld [vmem:[#allocation16_spill] sm:$0xff] }
 0x4b7   :  { %v16452_v60 = vshrl.u32 %v15245_v11, 16  ;;  %v16453_v9 = vshll.u32 %v15245_v11, 16  ;;  %v7061_v16 = vrot.slane %v7059_v24, 5  ;;  %v7085_v45 = vrot.slane %v7084_v13, 4 }
 0x4b8   :  { %11249 = vmatmul.mubr.msk.bf16.gmra.mrb[188].mxu1 %vm5724_vm0, %v10158_v59  ;;  %v7103_v46 = vrot.slane %v7101_v37, 5  ;;  %v10116_v26 = vrot.slane %v6774_v51, 9  ;;  %v7327_v44 = vsel %vm5724_vm0, %v10125_v12, %v7202_v30  ;;  %v7076_v41 = vsel %vm11876_vm2, %v7071_v25, %v7075_v17  ;;  %v16457_v59 = vld [vmem:[#allocation7_spill] sm:$0xff] }
 0x4b9   :  { %11252 = vmatprep.mubr.msk.bf16.mxu1 %vm5724_vm0, %v10159_v32  ;;  %v7108_v61 = vrot.slane %v16452_v60, 4  ;;  %v7111_v36 = vrot.slane %v16453_v9, 5  ;;  %v6851_v7 = vrot.slane %v15344_v27, 5  ;;  %v7126_v56 = vor.u32 %v7125_v63, %v7122_v34  ;;  %v7206_v30 = vpop.permute.xlu1 %7205  ;;  %v7288_v10 = vpop.permute.xlu0 %7287  ;;  %v16460_v17 = vld [vmem:[#allocation11_spill] sm:$0xff]  ;;  %v11650_v9 = vld [vmem:[%s16329_s7 + $0x80] sm:$0xff]  }
 0x4ba   :  { %v7363_v48 = vsel %vm5724_vm0, %v10142_v42, %v7284_v6  ;;  %v7089_v4 = vrot.slane %v7087_v14, 5  ;;  %v7104_v11 = vsel %vm11876_vm2, %v7099_v3, %v7103_v46  ;;  %v7062_v50 = vsel %vm11876_vm2, %v7057_v33, %v7061_v16  ;;  %v16459_v33 = vld [vmem:[#allocation18_spill] sm:$0xff]  ;;  %11260 = vmatprep.subr.bf16.mxu0 %v11650_v9 }
 0x4bb   :  { %7621 = vmatmul.mubr.bf16.gmra.mrb[184].mxu0 %v7327_v44  ;;  %v7112_v40 = vor.u32 %v7111_v36, %v7108_v61  ;;  %v7129_v31 = vshll.u32 %v6908_v58, 16  ;;  %v10160_v8 = vcombine.low %v7062_v50, %v7076_v41  ;;  %v7115_v27 = vshll.u32 %v6907_v5, 16  ;;  %v11651_v36 = vld [vmem:[%s16329_s7 + $0x88] sm:$0xff]   ;;  %v11653_v16 = vld [vmem:[%s16329_s7 + $0x90] sm:$0xff]  }
 0x4bc   :  { %7628 = vmatprep.mubr.bf16.mxu0 %v7363_v48  ;;  %v7090_v52 = vsel %vm11876_vm2, %v7085_v45, %v7089_v4  ;;  %v16454_v57 = vrot.slane %v15203_v21, 5  ;;  %v16455_v35 = vrot.slane %v15413_v0, 9  ;;  %v6852_v18 = vsel %vm12431_vm5, %v10116_v26, %v6851_v7  ;;  %11261 = vmatpush3.bf16.msra.mxu0 %v11650_v9  ;;  %v11654_v45 = vld [vmem:[%s16329_s7 + $0x98] sm:$0xff]   ;;  %v11665_v9 = vld [vmem:[%s16329_s7 + $0x50] sm:$0xff]  }
 0x4bd   :  { %v10161_v29 = vcombine.low %v7090_v52, %v7104_v11  ;;  %v7127_v20 = vrot.slane %v7126_v56, 4  ;;  %v10126_v54 = vcombine.low %v16457_v59, %v16456_v53  ;;  %v7113_v21 = vrot.slane %v7112_v40, 4  ;;  %v7208_v6 = vpop.permute.xlu1 %7207  ;;  %11262 = vmatprep.subr.bf16.mxu0 %v11651_v36 }
 0x4be   :  { %v6848_v49 = vsel %vm12431_vm5, %v16455_v35, %v16454_v57  ;;  %v7131_v15 = vrot.slane %v7129_v31, 5  ;;  %v7117_v23 = vrot.slane %v7115_v27, 5  ;;  %v10118_v13 = vrot.slane %v6776_v47, 9  ;;  %v15649_v57 = vld [vmem:[%s16328_s6] ss:$0 sm:$0xff] }
 0x4bf   :  { %v10143_v0 = vcombine.low %v6848_v49, %v6852_v18  ;;  %v7331_v62 = vsel %vm5724_vm0, %v10126_v54, %v7204_v19  ;;  %v6859_v37 = vrot.slane %v15359_v1, 5  ;;  %v10117_v51 = vrot.slane %v6775_v43, 9  ;;  %v16458_v1 = vld [vmem:[#allocation8_spill] sm:$0xff]  ;;  %v8109_v54 = vld [vmem:[#allocation2 + $0x48] sm:$0xf] }
 0x4c0   :  { %11253 = vmatmul.mubr.msk.bf16.gmra.mrb[192].mxu1 %vm5724_vm0, %v10160_v8  ;;  %v7132_v24 = vsel %vm11876_vm2, %v7127_v20, %v7131_v15  ;;  %v7118_v25 = vsel %vm11876_vm2, %v7113_v21, %v7117_v23  ;;  %v6855_v38 = vrot.slane %v15367_v22, 5  ;;  %v10127_v12 = vcombine.low %v11718_v2, %v16458_v1  ;;  %11263 = vmatpush3.bf16.msra.mxu0 %v11651_v36  ;;  %v8101_v8 = vld [vmem:[#allocation2] sm:$0xf] }
 0x4c1   :  { %11256 = vmatprep.mubr.msk.bf16.mxu1 %vm5724_vm0, %v10161_v29  ;;  %v7367_v32 = vsel %vm5724_vm0, %v10143_v0, %v7286_v39  ;;  %v10162_v34 = vcombine.low %v7118_v25, %v7132_v24  ;;  %v6860_v63 = vsel %vm12431_vm5, %v10118_v13, %v6859_v37  ;;  %v10128_v60 = vcombine.low %v16460_v17, %v16459_v33  ;;  %v11662_v25 = vld [vmem:[%s16329_s7] sm:$0xff]  }
 0x4c2   :  { %v6856_v42 = vsel %vm12431_vm5, %v10117_v51, %v6855_v38  ;;  %v7335_v3 = vsel %vm5724_vm0, %v10127_v12, %v7206_v30  ;;  %11264 = vmatprep.subr.bf16.mxu0 %v11653_v16  ;;  %v8134_v20 = vshrl.u32 %v8101_v8, 16  ;;  %v8137_v19 = vshll.u32 %v8101_v8, 16  ;;  %v11663_v51 = vld [vmem:[%s16329_s7 + $0x48] sm:$0xff]  }
 0x4c3   :  { %7629 = vmatmul.mubr.bf16.gmra.mrb[188].mxu0 %v7331_v62  ;;  %v10144_v14 = vcombine.low %v6856_v42, %v6860_v63  ;;  %v7339_v61 = vsel %vm5724_vm0, %v10128_v60, %v7208_v6  ;;  %v8246_v13 = vshrl.u32 %v8109_v54, 16  ;;  %v8249_v37 = vshll.u32 %v8109_v54, 16 }
 0x4c4   :  { %7636 = vmatprep.mubr.bf16.mxu0 %v7367_v32  ;;  %11265 = vmatpush3.bf16.msra.mxu0 %v11653_v16  ;;  %v8136_v43 = vrot.slane %v8134_v20, 4  ;;  %v8139_v62 = vrot.slane %v8137_v19, 5  ;;  %v11661_v32 = vld [vmem:[%s16329_s7 + $0x40] sm:$0xff]  }
 0x4c5   :  { %v7371_v22 = vsel %vm5724_vm0, %v10144_v14, %v7288_v10  ;;  %11266 = vmatprep.subr.bf16.mxu0 %v11654_v45  ;;  %v8117_v10 = vld [vmem:[#allocation2 + $0x4] sm:$0x1]  ;;  %11096 = vmatprep.subr.bf16.mxu1 %v11661_v32  ;;  %v8248_v60 = vrot.slane %v8246_v13, 4 }
 0x4c6   :  { %v8143_v1 = vshll.u32 %v8117_v10, 16  ;;  %11097 = vmatpush3.bf16.msra.mxu1 %v11662_v25  ;;  %v8140_v17 = vor.u32 %v8139_v62, %v8136_v43  ;;  %v8011_v43 = vld [vmem:[#allocation2 + $0x10] sm:$0xf]  ;;  %v8014_v62 = vld [vmem:[#allocation2 + $0x14] sm:$0x1] }
 0x4c7   :  { %11098 = vmatprep.subr.bf16.mxu1 %v11663_v51 }
 0x4c8   :  { %11257 = vmatmul.mubr.msk.bf16.gmra.mrb[196].mxu1 %vm5724_vm0, %v10162_v34  ;;  %11267 = vmatpush3.bf16.msra.mxu0 %v11654_v45 }
 0x4cb   :  { %7637 = vmatmul.mubr.bf16.gmra.mrb[192].mxu0 %v7335_v3 }
 0x4cc   :  { %7644 = vmatprep.mubr.bf16.mxu0 %v7371_v22  ;;  %v11664_v22 = vld [vmem:[%s16329_s7 + $0x8] sm:$0xff]  }
 0x4cd   :  { %11099 = vmatpush3.bf16.msra.mxu1 %v11664_v22 }
 0x4ce   :  { %11100 = vmatprep.subr.bf16.mxu1 %v11665_v9 }
 0x4d3   :  { %7645 = vmatmul.mubr.bf16.gmra.mrb[196].mxu0 %v7339_v61  ;;  %v8251_v61 = vrot.slane %v8249_v37, 5 }
 0x4d5   :  { %v8252_v20 = vor.u32 %v8251_v61, %v8248_v60 }
 0x571   :  { %v11072_v46 = vpop.f32.mrb[176].mxu1 }
 0x572   :  { %v11073_v26 = vpop.f32.mrb[177].mxu1 }
 0x573   :  { %v15638_v58 = vadd.f32 %v11073_v26, %v11072_v46  ;;  %v11075_v44 = vpop.f32.mrb[178].mxu1 }
 0x574   :  { %v11076_v41 = vpop.f32.mrb[179].mxu1 }
 0x575   :  { %v15640_v7 = vadd.f32 %v11076_v41, %v11075_v44 }
 0x57b   :  { %v11078_v5 = vpop.f32.mrb[180].mxu1 }
 0x57c   :  { %v11079_v56 = vpop.f32.mrb[181].mxu1 }
 0x57d   :  { %v15642_v48 = vadd.f32 %v11079_v56, %v11078_v5  ;;  %v11081_v4 = vpop.f32.mrb[182].mxu1  ;;  %v15676_v56 = vrot.slane %v8143_v1, 5 }
 0x57e   :  { %v11082_v11 = vpop.f32.mrb[183].mxu1  ;;  %v11036_v40 = vpop.f32.mrb[176].mxu0 }
 0x57f   :  { %v15644_v50 = vadd.f32 %v11082_v11, %v11081_v4  ;;  %v11037_v31 = vpop.f32.mrb[177].mxu0  ;;  %v8125_v4 = vld [vmem:[#allocation2 + $0x4c] sm:$0x1] }
 0x580   :  { %v11038_v52 = vadd.f32 %v11037_v31, %v11036_v40  ;;  %v11039_v27 = vpop.f32.mrb[178].mxu0  ;;  %v8255_v19 = vshll.u32 %v8125_v4, 16  ;;  %v7658_v4 = vadd.f32 %v15640_v7, %v15649_v57 }
 0x581   :  { %v11040_v29 = vpop.f32.mrb[179].mxu0 }
 0x582   :  { %v11041_v35 = vadd.f32 %v11040_v29, %v11039_v27  ;;  %v7607_v18 = vadd.f32 %v11038_v52, %v15649_v57  ;;  %v11666_v27 = vld [vmem:[%s16329_s7 + $0x10] sm:$0xff]   ;;  %v8008_v29 = vld [vmem:[#allocation2 + $0xc] sm:$0x1] }
 0x583   :  { %v11246_v49 = vpop.f32.mrb[184].mxu1  ;;  %11101 = vmatpush3.bf16.msra.mxu1 %v11666_v27  ;;  %v8017_v27 = vld [vmem:[#allocation2 + $0x18] sm:$0xf] }
 0x584   :  { %v7703_v47 = vpop.f32.mrb[185].mxu1  ;;  %v7610_v59 = vadd.f32 %v11041_v35, %v15649_v57 }
 0x585   :  { %v7704_v39 = vadd.f32 %v7703_v47, %v7607_v18  ;;  %v11247_v53 = vpop.f32.mrb[186].mxu1  ;;  %v15681_v18 = vrot.slane %v8140_v17, 4  ;;  %v11667_v47 = vld [vmem:[%s16329_s7 + $0x58] sm:$0xff]   ;;  %v15714_v17 = vrot.slane %v8255_v19, 5 }
 0x586   :  { %v7706_v21 = vpop.f32.mrb[187].mxu1  ;;  %v11042_v23 = vpop.f32.mrb[180].mxu0  ;;  %11102 = vmatprep.subr.bf16.mxu1 %v11667_v47 }
 0x587   :  { %v7766_v15 = vmax.f32 %v7704_v39, 0.0  ;;  %v7707_v0 = vadd.f32 %v7706_v21, %v7610_v59  ;;  %v11043_v24 = vpop.f32.mrb[181].mxu0  ;;  %v11719_v39 = vld [vmem:[#allocation2 + $0x8] sm:$0xf]  ;;  %v8146_v22 = vsel %vm11876_vm2, %v15681_v18, %v15676_v56 }
 0x588   :  { %v11044_v63 = vadd.f32 %v11043_v24, %v11042_v23  ;;  %v11045_v30 = vpop.f32.mrb[182].mxu0 }
 0x589   :  { %v10338_v38 = vpack.c.bf16 %v7766_v15, %v7766_v15  ;;  %v7767_v34 = vmax.f32 %v7707_v0, 0.0  ;;  %v11046_v2 = vpop.f32.mrb[183].mxu0 }
 0x58a   :  { %v7615_v14 = vadd.f32 %v11044_v63, %v15649_v57  ;;  %v11047_v6 = vadd.f32 %v11046_v2, %v11045_v30  ;;  %v11668_v63 = vld [vmem:[%s16329_s7 + $0x18] sm:$0xff]  }
 0x58b   :  { %v7847_v12 = vshrl.u32 %v10338_v38, 16  ;;  %v10339_v42 = vpack.c.bf16 %v7767_v34, %v7767_v34  ;;  %v15663_v3 = vpop.f32.mrb[188].mxu1  ;;  %v7850_v16 = vshll.u32 %v10338_v38, 16  ;;  %11103 = vmatpush3.bf16.msra.mxu1 %v11668_v63  ;;  %v11673_v63 = vld [vmem:[%s16329_s7 + $0x70] sm:$0xff]  }
 0x58c   :  { %v15668_v33 = vpop.f32.mrb[189].mxu1  ;;  %v7712_v46 = vadd.f32 %v11246_v49, %v7615_v14  ;;  %v7618_v41 = vadd.f32 %v11047_v6, %v15649_v57  ;;  %v15712_v6 = vrot.slane %v8252_v20, 4  ;;  %v7666_v20 = vadd.f32 %v15644_v50, %v15649_v57 }
 0x58d   :  { %v7849_v36 = vrot.slane %v7847_v12, 7  ;;  %v7855_v45 = vshrl.u32 %v10339_v42, 16  ;;  %v15673_v26 = vpop.f32.mrb[190].mxu1  ;;  %v7858_v44 = vshll.u32 %v10339_v42, 16  ;;  %v11669_v12 = vld [vmem:[%s16329_s7 + $0x60] sm:$0xff]  }
 0x58e   :  { %v7722_v5 = vpop.f32.mrb[191].mxu1  ;;  %v7768_v8 = vmax.f32 %v7712_v46, 0.0  ;;  %v11048_v52 = vpop.f32.mrb[184].mxu0  ;;  %v7715_v35 = vadd.f32 %v11247_v53, %v7618_v41  ;;  %v7655_v41 = vadd.f32 %v15638_v58, %v15649_v57  ;;  %11104 = vmatprep.subr.bf16.mxu1 %v11669_v12  ;;  %v8020_v58 = vld [vmem:[#allocation2 + $0x1c] sm:$0x1] }
 0x58f   :  { %v7852_v11 = vor.u32 %v7850_v16, %v7849_v36  ;;  %v7853_v40 = vrot.slane %v7849_v36, 4  ;;  %v7857_v31 = vrot.slane %v7855_v45, 7  ;;  %v11049_v49 = vpop.f32.mrb[185].mxu0 }
 0x590   :  { %v11051_v53 = vpop.f32.mrb[186].mxu0  ;;  %v10340_v24 = vpack.c.bf16 %v7768_v8, %v7768_v8  ;;  %v7769_v13 = vmax.f32 %v7715_v35, 0.0  ;;  %v11050_v37 = vadd.f32 %v11049_v49, %v11048_v52  ;;  %v7663_v49 = vadd.f32 %v15642_v48, %v15649_v57 }
 0x591   :  { %v8006_v54 = vsel %vm14420_vm14, %v7852_v11, %v11719_v39  ;;  %v8009_v15 = vsel %vm14426_vm15, %v7853_v40, %v8008_v29  ;;  %v7860_v0 = vor.u32 %v7858_v44, %v7857_v31  ;;  %v7861_v23 = vrot.slane %v7857_v31, 4  ;;  %v11052_v32 = vpop.f32.mrb[187].mxu0  ;;  %v11670_v11 = vld [vmem:[%s16329_s7 + $0x20] sm:$0xff]  }
 0x592   :  { %8007 = vst [vmem:[#allocation2 + $0x8] sm:$0xf] %v8006_v54  ;;  %8010 = vst [vmem:[#allocation2 + $0xc] sm:$0x1] %v8009_v15  ;;  %v11053_v38 = vadd.f32 %v11052_v32, %v11051_v53  ;;  %v7863_v30 = vshrl.u32 %v10340_v24, 16  ;;  %v10341_v10 = vpack.c.bf16 %v7769_v13, %v7769_v13  ;;  %v7623_v2 = vadd.f32 %v11050_v37, %v15649_v57  ;;  %v11672_v13 = vld [vmem:[%s16329_s7 + $0x28] sm:$0xff]  }
 0x593   :  { %v8012_v25 = vsel %vm14420_vm14, %v7860_v0, %v8011_v43  ;;  %v8015_v51 = vsel %vm14426_vm15, %v7861_v23, %v8014_v62  ;;  %v15694_v34 = vpop.f32.mrb[192].mxu1  ;;  %v7866_v61 = vshll.u32 %v10340_v24, 16  ;;  %v8023_v15 = vld [vmem:[#allocation2 + $0x20] sm:$0xf]  ;;  %v8026_v23 = vld [vmem:[#allocation2 + $0x24] sm:$0x1]  ;;  %11105 = vmatpush3.bf16.msra.mxu1 %v11670_v11 }
 0x594   :  { %8013 = vst [vmem:[#allocation2 + $0x10] sm:$0xf] %v8012_v25  ;;  %8016 = vst [vmem:[#allocation2 + $0x14] sm:$0x1] %v8015_v51  ;;  %v15700_v1 = vpop.f32.mrb[193].mxu1  ;;  %v7626_v42 = vadd.f32 %v11053_v38, %v15649_v57  ;;  %v7865_v60 = vrot.slane %v7863_v30, 7  ;;  %v7720_v36 = vadd.f32 %v15668_v33, %v7623_v2 }
 0x595   :  { %v15706_v14 = vpop.f32.mrb[194].mxu1  ;;  %v7871_v9 = vshrl.u32 %v10341_v10, 16  ;;  %v7874_v45 = vshll.u32 %v10341_v10, 16 }
 0x596   :  { %v15717_v16 = vpop.f32.mrb[195].mxu1  ;;  %v7723_v46 = vadd.f32 %v7722_v5, %v7626_v42  ;;  %v11054_v44 = vpop.f32.mrb[188].mxu0  ;;  %v7868_v40 = vor.u32 %v7866_v61, %v7865_v60  ;;  %v7869_v31 = vrot.slane %v7865_v60, 4  ;;  %v7770_v33 = vmax.f32 %v7720_v36, 0.0  ;;  %v11671_v5 = vld [vmem:[%s16329_s7 + $0x68] sm:$0xff]  }
 0x597   :  { %v7873_v8 = vrot.slane %v7871_v9, 7  ;;  %v11055_v52 = vpop.f32.mrb[189].mxu0  ;;  %11106 = vmatprep.subr.bf16.mxu1 %v11671_v5 }
 0x598   :  { %v7771_v29 = vmax.f32 %v7723_v46, 0.0  ;;  %v11056_v35 = vadd.f32 %v11055_v52, %v11054_v44  ;;  %v11057_v7 = vpop.f32.mrb[190].mxu0  ;;  %v8018_v19 = vsel %vm14420_vm14, %v7868_v40, %v8017_v27  ;;  %v8021_v47 = vsel %vm14426_vm15, %v7869_v31, %v8020_v58  ;;  %11107 = vmatpush3.bf16.msra.mxu1 %v11672_v13 }
 0x599   :  { %v7876_v39 = vor.u32 %v7874_v45, %v7873_v8  ;;  %v7877_v54 = vrot.slane %v7873_v8, 4  ;;  %v11058_v0 = vpop.f32.mrb[191].mxu0  ;;  %8022 = vst [vmem:[#allocation2 + $0x1c] sm:$0x1] %v8021_v47  ;;  %8019 = vst [vmem:[#allocation2 + $0x18] sm:$0xf] %v8018_v19  ;;  %v10342_v53 = vpack.c.bf16 %v7770_v33, %v7770_v33  ;;  %11108 = vmatprep.subr.bf16.mxu1 %v11673_v63 }
 0x59a   :  { %v10343_v43 = vpack.c.bf16 %v7771_v29, %v7771_v29  ;;  %v7631_v48 = vadd.f32 %v11056_v35, %v15649_v57  ;;  %v11059_v62 = vadd.f32 %v11058_v0, %v11057_v7  ;;  %v8029_v8 = vld [vmem:[#allocation2 + $0x28] sm:$0xf]  ;;  %v8032_v33 = vld [vmem:[#allocation2 + $0x2c] sm:$0x1]  ;;  %v8038_v19 = vld [vmem:[#allocation2 + $0x34] sm:$0x1] }
 0x59b   :  { %v11258_v24 = vpop.f32.mrb[196].mxu1  ;;  %v15738_v50 = vld [vmem:[#allocation2 + $0x10] sm:$0xf]  ;;  %v8024_v37 = vsel %vm14420_vm14, %v7876_v39, %v8023_v15  ;;  %v8027_v32 = vsel %vm14426_vm15, %v7877_v54, %v8026_v23  ;;  %v7879_v30 = vshrl.u32 %v10342_v53, 16  ;;  %v7882_v10 = vshll.u32 %v10342_v53, 16 }
 0x59c   :  { %v7760_v25 = vadd.f32 %v11258_v24, %v7663_v49  ;;  %v7751_v51 = vpop.f32.mrb[197].mxu1  ;;  %v8516_v38 = vshrl.u32 %v15738_v50, 16  ;;  %8028 = vst [vmem:[#allocation2 + $0x24] sm:$0x1] %v8027_v32  ;;  %8025 = vst [vmem:[#allocation2 + $0x20] sm:$0xf] %v8024_v37  ;;  %v7728_v60 = vadd.f32 %v15663_v3, %v7631_v48  ;;  %v7634_v61 = vadd.f32 %v11059_v62, %v15649_v57 }
 0x59d   :  { %v7887_v2 = vshrl.u32 %v10343_v43, 16  ;;  %v7890_v12 = vshll.u32 %v10343_v43, 16  ;;  %v11259_v42 = vpop.f32.mrb[198].mxu1  ;;  %v7752_v36 = vadd.f32 %v7751_v51, %v7655_v41  ;;  %v7881_v46 = vrot.slane %v7879_v30, 7  ;;  %v11674_v41 = vld [vmem:[%s16329_s7 + $0x30] sm:$0xff]   ;;  %v11675_v37 = vld [vmem:[%s16329_s7 + $0x78] sm:$0xff]  }
 0x59e   :  { %v7780_v9 = vmax.f32 %v7760_v25, 0.0  ;;  %v7754_v45 = vpop.f32.mrb[199].mxu1  ;;  %v7763_v11 = vadd.f32 %v11259_v42, %v7666_v20  ;;  %v15755_v31 = vpop.f32.mrb[192].mxu0  ;;  %v7772_v52 = vmax.f32 %v7728_v60, 0.0  ;;  %v7731_v5 = vadd.f32 %v15673_v26, %v7634_v61  ;;  %v8035_v49 = vld [vmem:[#allocation2 + $0x30] sm:$0xf]  ;;  %11109 = vmatpush3.bf16.msra.mxu1 %v11674_v41 }
 0x59f   :  { %v7889_v44 = vrot.slane %v7887_v2, 7  ;;  %v15753_v40 = vadd.f32 %v7754_v45, %v7658_v4  ;;  %v7778_v3 = vmax.f32 %v7752_v36, 0.0  ;;  %v15758_v58 = vpop.f32.mrb[193].mxu0  ;;  %v7884_v29 = vor.u32 %v7882_v10, %v7881_v46  ;;  %v11676_v30 = vld [vmem:[%s16329_s7 + $0x38] sm:$0xff]   ;;  %11110 = vmatprep.subr.bf16.mxu1 %v11675_v37  ;;  %v8095_v37 = vld [vmem:[#allocation2 + $0x88] sm:$0xf] }
 0x5a0   :  { %v10352_v27 = vpack.c.bf16 %v7780_v9, %v7780_v9  ;;  %v7885_v4 = vrot.slane %v7881_v46, 4  ;;  %v15763_v20 = vpop.f32.mrb[194].mxu0  ;;  %v10344_v47 = vpack.c.bf16 %v7772_v52, %v7772_v52  ;;  %v7773_v39 = vmax.f32 %v7731_v5, 0.0  ;;  %v8041_v60 = vld [vmem:[#allocation2 + $0x38] sm:$0xf] }
 0x5a1   :  { %v7892_v35 = vor.u32 %v7890_v12, %v7889_v44  ;;  %v7893_v7 = vrot.slane %v7889_v44, 4  ;;  %v15765_v15 = vpop.f32.mrb[195].mxu0  ;;  %v8030_v0 = vsel %vm14420_vm14, %v7884_v29, %v8029_v8  ;;  %v10350_v32 = vpack.c.bf16 %v7778_v3, %v7778_v3  ;;  %v8089_v9 = vld [vmem:[#allocation2 + $0x80] sm:$0xf]  ;;  %v8044_v5 = vld [vmem:[#allocation2 + $0x3c] sm:$0x1] }
 0x5a2   :  { %v7959_v26 = vshrl.u32 %v10352_v27, 16  ;;  %v7962_v54 = vshll.u32 %v10352_v27, 16  ;;  %v8033_v23 = vsel %vm14426_vm15, %v7885_v4, %v8032_v33  ;;  %8031 = vst [vmem:[#allocation2 + $0x28] sm:$0xf] %v8030_v0  ;;  %v7895_v48 = vshrl.u32 %v10344_v47, 16  ;;  %11111 = vmatpush3.bf16.msra.mxu1 %v11676_v30 }
 0x5a3   :  { %v8036_v53 = vsel %vm14420_vm14, %v7892_v35, %v8035_v49  ;;  %v8039_v43 = vsel %vm14426_vm15, %v7893_v7, %v8038_v19  ;;  %8034 = vst [vmem:[#allocation2 + $0x2c] sm:$0x1] %v8033_v23  ;;  %v7898_v62 = vshll.u32 %v10344_v47, 16  ;;  %v10345_v24 = vpack.c.bf16 %v7773_v39, %v7773_v39  ;;  %v8092_v33 = vld [vmem:[#allocation2 + $0x84] sm:$0x1] }
 0x5a4   :  { %8040 = vst [vmem:[#allocation2 + $0x34] sm:$0x1] %v8039_v43  ;;  %8037 = vst [vmem:[#allocation2 + $0x30] sm:$0xf] %v8036_v53  ;;  %v7961_v13 = vrot.slane %v7959_v26, 7  ;;  %v7781_v25 = vmax.f32 %v7763_v11, 0.0 }
 0x5a5   :  { %v7779_v51 = vmax.f32 %v15753_v40, 0.0  ;;  %v15779_v63 = vrot.slane %v8516_v38, 4  ;;  %v7897_v10 = vrot.slane %v7895_v48, 7  ;;  %v7903_v2 = vshrl.u32 %v10345_v24, 16  ;;  %v8047_v47 = vld [vmem:[#allocation2 + $0x40] sm:$0xf] }
 0x5a6   :  { %v7906_v12 = vshll.u32 %v10345_v24, 16  ;;  %v7964_v42 = vor.u32 %v7962_v54, %v7961_v13  ;;  %v7965_v61 = vrot.slane %v7961_v13, 4  ;;  %v7943_v36 = vshrl.u32 %v10350_v32, 16  ;;  %v15784_v44 = vpop.f32.mrb[196].mxu0  ;;  %v8050_v39 = vld [vmem:[#allocation2 + $0x44] sm:$0x1] }
 0x5a7   :  { %v7946_v45 = vshll.u32 %v10350_v32, 16  ;;  %v10353_v46 = vpack.c.bf16 %v7781_v25, %v7781_v25  ;;  %v7900_v38 = vor.u32 %v7898_v62, %v7897_v10  ;;  %v7901_v11 = vrot.slane %v7897_v10, 4  ;;  %v15788_v52 = vpop.f32.mrb[197].mxu0  ;;  %v8077_v23 = vld [vmem:[#allocation2 + $0x70] sm:$0xf] }
 0x5a8   :  { %v7905_v40 = vrot.slane %v7903_v2, 7  ;;  %v8090_v8 = vsel %vm14420_vm14, %v7964_v42, %v8089_v9  ;;  %v8093_v27 = vsel %vm14426_vm15, %v7965_v61, %v8092_v33  ;;  %v7945_v3 = vrot.slane %v7943_v36, 7  ;;  %v15792_v4 = vpop.f32.mrb[198].mxu0  ;;  %v8469_v48 = vld [vmem:[#allocation2 + $0x8] sm:$0xf] }
 0x5a9   :  { %8091 = vst [vmem:[#allocation2 + $0x80] sm:$0xf] %v8090_v8  ;;  %v7967_v41 = vshrl.u32 %v10353_v46, 16  ;;  %v7970_v29 = vshll.u32 %v10353_v46, 16  ;;  %v8042_v35 = vsel %vm14420_vm14, %v7900_v38, %v8041_v60  ;;  %v8045_v7 = vsel %vm14426_vm15, %v7901_v11, %v8044_v5  ;;  %8094 = vst [vmem:[#allocation2 + $0x84] sm:$0x1] %v8093_v27 }
 0x5aa   :  { %v7908_v49 = vor.u32 %v7906_v12, %v7905_v40  ;;  %v7909_v19 = vrot.slane %v7905_v40, 4  ;;  %v15798_v26 = vpop.f32.mrb[199].mxu0  ;;  %8046 = vst [vmem:[#allocation2 + $0x3c] sm:$0x1] %v8045_v7  ;;  %8043 = vst [vmem:[#allocation2 + $0x38] sm:$0xf] %v8042_v35  ;;  %v7948_v54 = vor.u32 %v7946_v45, %v7945_v3  ;;  %v10351_v43 = vpack.c.bf16 %v7779_v51, %v7779_v51 }
 0x5ab   :  { %v7949_v0 = vrot.slane %v7945_v3, 4  ;;  %v7969_v53 = vrot.slane %v7967_v41, 7  ;;  %v8080_v13 = vld [vmem:[#allocation2 + $0x74] sm:$0x1]  ;;  %v8519_v32 = vshll.u32 %v15738_v50, 16  ;;  %v10248_v25 = vcombine.low %v8469_v48, %v15738_v50 }
 0x5ac   :  { %v8048_v62 = vsel %vm14420_vm14, %v7908_v49, %v8047_v47  ;;  %v8051_v24 = vsel %vm14426_vm15, %v7909_v19, %v8050_v39  ;;  %v8078_v30 = vsel %vm14420_vm14, %v7948_v54, %v8077_v23  ;;  %v8098_v12 = vld [vmem:[#allocation2 + $0x8c] sm:$0x1]  ;;  %v8102_v42 = vld [vmem:[#allocation2 + $0x8] sm:$0xf]  ;;  %v7951_v60 = vshrl.u32 %v10351_v43, 16 }
 0x5ad   :  { %8049 = vst [vmem:[#allocation2 + $0x40] sm:$0xf] %v8048_v62  ;;  %8052 = vst [vmem:[#allocation2 + $0x44] sm:$0x1] %v8051_v24  ;;  %v8081_v51 = vsel %vm14426_vm15, %v7949_v0, %v8080_v13  ;;  %v7972_v10 = vor.u32 %v7970_v29, %v7969_v53  ;;  %v7973_v2 = vrot.slane %v7969_v53, 4  ;;  %v7954_v61 = vshll.u32 %v10351_v43, 16  ;;  %8869 = vrot.lane.b32.xlu0 %v10248_v25, %s11753_s15 }
 0x5ae   :  { %8079 = vst [vmem:[#allocation2 + $0x70] sm:$0xf] %v8078_v30  ;;  %8082 = vst [vmem:[#allocation2 + $0x74] sm:$0x1] %v8081_v51  ;;  %v15810_v9 = vrot.slane %v8519_v32, 5  ;;  %v8502_v50 = vshrl.u32 %v8469_v48, 16  ;;  %v11062_v11 = vadd.f32 %v15758_v58, %v15755_v31  ;;  %v11065_v33 = vadd.f32 %v15765_v15, %v15763_v20 }
 0x5af   :  { %v15813_v36 = vld [vmem:[#allocation2 + $0xc] sm:$0x1]  ;;  %v8096_v45 = vsel %vm14420_vm14, %v7972_v10, %v8095_v37  ;;  %v8099_v46 = vsel %vm14426_vm15, %v7973_v2, %v8098_v12  ;;  %v8505_v38 = vshll.u32 %v8469_v48, 16  ;;  %v7953_v40 = vrot.slane %v7951_v60, 7  ;;  %v8472_v27 = vld [vmem:[#allocation2 + $0x20] sm:$0xf] }
 0x5b0   :  { %8097 = vst [vmem:[#allocation2 + $0x88] sm:$0xf] %v8096_v45  ;;  %8100 = vst [vmem:[#allocation2 + $0x8c] sm:$0x1] %v8099_v46  ;;  %v8504_v8 = vrot.slane %v8502_v50, 4  ;;  %v8148_v5 = vshrl.u32 %v8102_v42, 16  ;;  %v7639_v41 = vadd.f32 %v11062_v11, %v15649_v57  ;;  %v7642_v31 = vadd.f32 %v11065_v33, %v15649_v57 }
 0x5b1   :  { %v8507_v3 = vrot.slane %v8505_v38, 5  ;;  %v8151_v29 = vshll.u32 %v8102_v42, 16  ;;  %v8157_v35 = vshll.u32 %v15813_v36, 16  ;;  %v7956_v7 = vor.u32 %v7954_v61, %v7953_v40  ;;  %v8083_v19 = vld [vmem:[#allocation2 + $0x78] sm:$0xf] }
 0x5b2   :  { %v7957_v49 = vrot.slane %v7953_v40, 4  ;;  %v8086_v47 = vld [vmem:[#allocation2 + $0x7c] sm:$0x1]  ;;  %v8150_v58 = vrot.slane %v8148_v5, 4  ;;  %v7736_v39 = vadd.f32 %v15700_v1, %v7639_v41  ;;  %v8471_v20 = vld [vmem:[#allocation2 + $0x18] sm:$0xf]  ;;  %v7739_v43 = vadd.f32 %v15717_v16, %v7642_v31 }
 0x5b3   :  { %v8153_v54 = vrot.slane %v8151_v29, 5  ;;  %v8159_v0 = vrot.slane %v8157_v35, 5  ;;  %v8544_v15 = vshrl.u32 %v8472_v27, 16  ;;  %v8084_v23 = vsel %vm14420_vm14, %v7956_v7, %v8083_v19  ;;  %v8485_v62 = vld [vmem:[#allocation2 + $0xc] sm:$0x1] }
 0x5b4   :  { %v8087_v53 = vsel %vm14426_vm15, %v7957_v49, %v8086_v47  ;;  %v8547_v48 = vshll.u32 %v8472_v27, 16  ;;  %8085 = vst [vmem:[#allocation2 + $0x78] sm:$0xf] %v8084_v23  ;;  %v7774_v24 = vmax.f32 %v7736_v39, 0.0  ;;  %v10249_v1 = vcombine.low %v8471_v20, %v8472_v27  ;;  %v8486_v11 = vld [vmem:[#allocation2 + $0x14] sm:$0x1] }
 0x5b5   :  { %8088 = vst [vmem:[#allocation2 + $0x7c] sm:$0x1] %v8087_v53  ;;  %v8154_v13 = vor.u32 %v8153_v54, %v8150_v58  ;;  %v8546_v37 = vrot.slane %v8544_v15, 4  ;;  %v7775_v32 = vmax.f32 %v7739_v43, 0.0  ;;  %v8530_v30 = vshrl.u32 %v8471_v20, 16 }
 0x5b6   :  { %v8549_v25 = vrot.slane %v8547_v48, 5  ;;  %v8533_v51 = vshll.u32 %v8471_v20, 16  ;;  %v10346_v10 = vpack.c.bf16 %v7774_v24, %v7774_v24  ;;  %8871 = vrot.lane.b32.xlu0 %v10249_v1, %s11753_s15  ;;  %v8508_v12 = vor.u32 %v8507_v3, %v8504_v8  ;;  %v8053_v7 = vld [vmem:[#allocation2 + $0x50] sm:$0xf]  ;;  %v8056_v31 = vld [vmem:[#allocation2 + $0x54] sm:$0x1] }
 0x5b7   :  { %v8155_v2 = vrot.slane %v8154_v13, 4  ;;  %v8511_v42 = vshll.u32 %v8485_v62, 16  ;;  %v10347_v60 = vpack.c.bf16 %v7775_v32, %v7775_v32  ;;  %v8532_v61 = vrot.slane %v8530_v30, 4  ;;  %v15861_v53 = vld [vmem:[#allocation2 + $0x18] sm:$0xf] }
 0x5b8   :  { %v8550_v16 = vor.u32 %v8549_v25, %v8546_v37  ;;  %v8535_v50 = vrot.slane %v8533_v51, 5  ;;  %v7911_v45 = vshrl.u32 %v10346_v10, 16  ;;  %v7914_v46 = vshll.u32 %v10346_v10, 16  ;;  %v15863_v43 = vld [vmem:[#allocation2 + $0x14] sm:$0x1] }
 0x5b9   :  { %v8160_v38 = vsel %vm11876_vm2, %v8155_v2, %v8159_v0  ;;  %v8509_v40 = vrot.slane %v8508_v12, 4  ;;  %v7919_v33 = vshrl.u32 %v10347_v60, 16  ;;  %v7922_v5 = vshll.u32 %v10347_v60, 16  ;;  %v8059_v0 = vld [vmem:[#allocation2 + $0x58] sm:$0xf] }
 0x5ba   :  { %v10232_v8 = vcombine.low %v8146_v22, %v8160_v38  ;;  %v15840_v27 = vrot.slane %v8550_v16, 4  ;;  %v7913_v3 = vrot.slane %v7911_v45, 7  ;;  %v8536_v41 = vor.u32 %v8535_v50, %v8532_v61  ;;  %v15871_v13 = vld [vmem:[#allocation2 + $0x1c] sm:$0x1]  ;;  %v8474_v30 = vld [vmem:[#allocation2 + $0x30] sm:$0xf] }
 0x5bb   :  { %v8513_v29 = vrot.slane %v8511_v42, 5  ;;  %v8522_v35 = vor.u32 %v15810_v9, %v15779_v63  ;;  %v7921_v49 = vrot.slane %v7919_v33, 7  ;;  %v8525_v19 = vshll.u32 %v8486_v11, 16  ;;  %v15853_v63 = vld [vmem:[#allocation2 + $0x10] sm:$0xf] }
 0x5bc   :  { %8789 = vrot.lane.b32.xlu1 %v10232_v8, %s11753_s15  ;;  %v11068_v47 = vadd.f32 %v15788_v52, %v15784_v44  ;;  %v11071_v56 = vadd.f32 %v15798_v26, %v15792_v4  ;;  %v7916_v18 = vor.u32 %v7914_v46, %v7913_v3  ;;  %v7917_v22 = vrot.slane %v7913_v3, 4  ;;  %v8062_v4 = vld [vmem:[#allocation2 + $0x5c] sm:$0x1]  ;;  %v8473_v33 = vld [vmem:[#allocation2 + $0x28] sm:$0xf] }
 0x5bd   :  { %v15849_v58 = vrot.slane %v8536_v41, 4  ;;  %v8514_v39 = vsel %vm11876_vm2, %v8509_v40, %v8513_v29  ;;  %v7924_v9 = vor.u32 %v7922_v5, %v7921_v49  ;;  %v7925_v54 = vrot.slane %v7921_v49, 4  ;;  %v8487_v29 = vld [vmem:[#allocation2 + $0x1c] sm:$0x1] }
 0x5be   :  { %v8523_v20 = vrot.slane %v8522_v35, 4  ;;  %v8527_v15 = vrot.slane %v8525_v19, 5  ;;  %v8054_v44 = vsel %vm14420_vm14, %v7916_v18, %v8053_v7  ;;  %v8057_v52 = vsel %vm14426_vm15, %v7917_v22, %v8056_v31 }
 0x5bf   :  { %v7647_v26 = vadd.f32 %v11068_v47, %v15649_v57  ;;  %v7650_v23 = vadd.f32 %v11071_v56, %v15649_v57  ;;  %8058 = vst [vmem:[#allocation2 + $0x54] sm:$0x1] %v8057_v52  ;;  %8055 = vst [vmem:[#allocation2 + $0x50] sm:$0xf] %v8054_v44  ;;  %v8060_v48 = vsel %vm14420_vm14, %v7924_v9, %v8059_v0  ;;  %v8162_v37 = vshrl.u32 %v15853_v63, 16 }
 0x5c0   :  { %v8063_v62 = vsel %vm14426_vm15, %v7925_v54, %v8062_v4  ;;  %v8528_v24 = vsel %vm11876_vm2, %v8523_v20, %v8527_v15  ;;  %8061 = vst [vmem:[#allocation2 + $0x58] sm:$0xf] %v8060_v48  ;;  %v8165_v25 = vshll.u32 %v15853_v63, 16  ;;  %v8171_v10 = vshll.u32 %v15863_v43, 16  ;;  %v8488_v47 = vld [vmem:[#allocation2 + $0x24] sm:$0x1] }
 0x5c1   :  { %8064 = vst [vmem:[#allocation2 + $0x5c] sm:$0x1] %v8063_v62  ;;  %v10256_v57 = vcombine.low %v8514_v39, %v8528_v24  ;;  %v7744_v1 = vadd.f32 %v15694_v34, %v7647_v26  ;;  %v7747_v32 = vadd.f32 %v15706_v14, %v7650_v23  ;;  %v8164_v51 = vrot.slane %v8162_v37, 4  ;;  %v8065_v20 = vld [vmem:[#allocation2 + $0x60] sm:$0xf] }
 0x5c2   :  { %v8176_v2 = vshrl.u32 %v15861_v53, 16  ;;  %v8179_v12 = vshll.u32 %v15861_v53, 16  ;;  %v8167_v16 = vrot.slane %v8165_v25, 5  ;;  %v8185_v61 = vshll.u32 %v15871_v13, 16  ;;  %v8068_v15 = vld [vmem:[#allocation2 + $0x64] sm:$0x1] }
 0x5c3   :  { %11268 = vmatprep.mubr.msk.bf16.mxu0 %vm5724_vm0, %v10256_v57  ;;  %v7776_v42 = vmax.f32 %v7744_v1, 0.0  ;;  %v7777_v60 = vmax.f32 %v7747_v32, 0.0  ;;  %v8173_v34 = vrot.slane %v8171_v10, 5  ;;  %v8572_v45 = vshrl.u32 %v8474_v30, 16  ;;  %v8071_v44 = vld [vmem:[#allocation2 + $0x68] sm:$0xf] }
 0x5c4   :  { %v8178_v50 = vrot.slane %v8176_v2, 4  ;;  %v8181_v14 = vrot.slane %v8179_v12, 5  ;;  %v8168_v11 = vor.u32 %v8167_v16, %v8164_v51  ;;  %v8187_v40 = vrot.slane %v8185_v61, 5  ;;  %v8074_v52 = vld [vmem:[#allocation2 + $0x6c] sm:$0x1] }
 0x5c5   :  { %v10348_v46 = vpack.c.bf16 %v7776_v42, %v7776_v42  ;;  %v10349_v38 = vpack.c.bf16 %v7777_v60, %v7777_v60  ;;  %v15882_v8 = vrot.slane %v8572_v45, 4  ;;  %v8575_v3 = vshll.u32 %v8474_v30, 16  ;;  %v15893_v1 = vld [vmem:[#allocation2 + $0x20] sm:$0xf]  ;;  %v15895_v32 = vld [vmem:[#allocation2 + $0x24] sm:$0x1] }
 0x5c6   :  { %v8182_v5 = vor.u32 %v8181_v14, %v8178_v50  ;;  %v10250_v41 = vcombine.low %v8473_v33, %v8474_v30  ;;  %v8169_v56 = vrot.slane %v8168_v11, 4  ;;  %v8558_v31 = vshrl.u32 %v8473_v33, 16  ;;  %v15897_v2 = vld [vmem:[#allocation2 + $0x28] sm:$0xf]  ;;  %v15907_v61 = vld [vmem:[#allocation2 + $0x2c] sm:$0x1] }
 0x5c7   :  { %v7927_v35 = vshrl.u32 %v10348_v46, 16  ;;  %v7930_v7 = vshll.u32 %v10348_v46, 16  ;;  %v7935_v49 = vshrl.u32 %v10349_v38, 16  ;;  %v7938_v19 = vshll.u32 %v10349_v38, 16 }
 0x5c8   :  { %v8183_v18 = vrot.slane %v8182_v5, 4  ;;  %v15884_v22 = vrot.slane %v8575_v3, 5  ;;  %8873 = vrot.lane.b32.xlu0 %v10250_v41, %s11753_s15  ;;  %v8561_v54 = vshll.u32 %v8473_v33, 16  ;;  %v8539_v0 = vshll.u32 %v8487_v29, 16 }
 0x5c9   :  { %v7929_v39 = vrot.slane %v7927_v35, 7  ;;  %v7937_v9 = vrot.slane %v7935_v49, 7  ;;  %v8174_v4 = vsel %vm11876_vm2, %v8169_v56, %v8173_v34  ;;  %v15891_v23 = vrot.slane %v8558_v31, 4  ;;  %v8476_v34 = vld [vmem:[#allocation2 + $0x40] sm:$0xf] }
 0x5ca   :  { %v8188_v26 = vsel %vm11876_vm2, %v8183_v18, %v8187_v40  ;;  %v8553_v48 = vshll.u32 %v8488_v47, 16  ;;  %v8563_v30 = vrot.slane %v8561_v54, 5  ;;  %v8541_v51 = vrot.slane %v8539_v0, 5  ;;  %v8489_v35 = vld [vmem:[#allocation2 + $0x2c] sm:$0x1] }
 0x5cb   :  { %v7932_v62 = vor.u32 %v7930_v7, %v7929_v39  ;;  %v7933_v24 = vrot.slane %v7929_v39, 4  ;;  %v7940_v37 = vor.u32 %v7938_v19, %v7937_v9  ;;  %v7941_v57 = vrot.slane %v7937_v9, 4  ;;  %v8490_v18 = vld [vmem:[#allocation2 + $0x34] sm:$0x1] }
 0x5cc   :  { %v10233_v25 = vcombine.low %v8174_v4, %v8188_v26  ;;  %v8555_v10 = vrot.slane %v8553_v48, 5  ;;  %v8542_v50 = vsel %vm11876_vm2, %v15849_v58, %v8541_v51  ;;  %v8190_v21 = vshrl.u32 %v15893_v1, 16  ;;  %v8475_v58 = vld [vmem:[#allocation2 + $0x38] sm:$0xf]  ;;  %v15937_v4 = vld [vmem:[#allocation2 + $0x34] sm:$0x1] }
 0x5cd   :  { %v8066_v12 = vsel %vm14420_vm14, %v7932_v62, %v8065_v20  ;;  %v8069_v42 = vsel %vm14426_vm15, %v7933_v24, %v8068_v15  ;;  %v8072_v60 = vsel %vm14420_vm14, %v7940_v37, %v8071_v44  ;;  %v8075_v16 = vsel %vm14426_vm15, %v7941_v57, %v8074_v52  ;;  %v15935_v52 = vld [vmem:[#allocation2 + $0x30] sm:$0xf]  ;;  %v15939_v37 = vld [vmem:[#allocation2 + $0x38] sm:$0xf] }
 0x5ce   :  { %8070 = vst [vmem:[#allocation2 + $0x64] sm:$0x1] %v8069_v42  ;;  %8067 = vst [vmem:[#allocation2 + $0x60] sm:$0xf] %v8066_v12  ;;  %8791 = vrot.lane.b32.xlu1 %v10233_v25, %s11753_s15  ;;  %v8556_v59 = vsel %vm11876_vm2, %v15840_v27, %v8555_v10  ;;  %v8193_v14 = vshll.u32 %v15893_v1, 16  ;;  %v8199_v46 = vshll.u32 %v15895_v32, 16  ;;  %v8258_v7 = vsel %vm11876_vm2, %v15712_v6, %v15714_v17 }
 0x5cf   :  { %8076 = vst [vmem:[#allocation2 + $0x6c] sm:$0x1] %v8075_v16  ;;  %8073 = vst [vmem:[#allocation2 + $0x68] sm:$0xf] %v8072_v60  ;;  %v10257_v45 = vcombine.low %v8542_v50, %v8556_v59  ;;  %v8204_v38 = vshrl.u32 %v15897_v2, 16  ;;  %v8207_v11 = vshll.u32 %v15897_v2, 16  ;;  %v10251_v56 = vcombine.low %v8475_v58, %v8476_v34 }
 0x5d0   :  { %v8192_v40 = vrot.slane %v8190_v21, 4  ;;  %v8195_v33 = vrot.slane %v8193_v14, 5  ;;  %v8213_v5 = vshll.u32 %v15907_v61, 16  ;;  %v8600_v3 = vshrl.u32 %v8476_v34, 16  ;;  %v8478_v50 = vld [vmem:[#allocation2 + $0x58] sm:$0xf] }
 0x5d1   :  { %11269 = vmatmul.mubr.msk.bf16.vlgmr.msra.gmra.mrb[200].mxu0 %vm5724_vm0, %v10257_v45  ;;  %v8206_v27 = vrot.slane %v8204_v38, 4  ;;  %v8209_v41 = vrot.slane %v8207_v11, 5  ;;  %v8603_v29 = vshll.u32 %v8476_v34, 16  ;;  %v8201_v19 = vrot.slane %v8199_v46, 5  ;;  %8875 = vrot.lane.b32.xlu0 %v10251_v56, %s11753_s15  ;;  %v8477_v46 = vld [vmem:[#allocation2 + $0x50] sm:$0xf] }
 0x5d2   :  { %v8196_v49 = vor.u32 %v8195_v33, %v8192_v40  ;;  %v8215_v47 = vrot.slane %v8213_v5, 5  ;;  %v15927_v39 = vrot.slane %v8600_v3, 4  ;;  %v8586_v54 = vshrl.u32 %v8475_v58, 16 }
 0x5d3   :  { %v8210_v31 = vor.u32 %v8209_v41, %v8206_v27  ;;  %v15929_v9 = vrot.slane %v8603_v29, 5  ;;  %v8564_v20 = vor.u32 %v8563_v30, %v15891_v23  ;;  %v8567_v15 = vshll.u32 %v8489_v35, 16  ;;  %v8491_v41 = vld [vmem:[#allocation2 + $0x3c] sm:$0x1] }
 0x5d4   :  { %v8197_v0 = vrot.slane %v8196_v49, 4  ;;  %v8578_v44 = vor.u32 %v15884_v22, %v15882_v8  ;;  %v8588_v48 = vrot.slane %v8586_v54, 4  ;;  %v8589_v62 = vshll.u32 %v8475_v58, 16  ;;  %v15945_v22 = vld [vmem:[#allocation2 + $0x3c] sm:$0x1] }
 0x5d5   :  { %v8211_v26 = vrot.slane %v8210_v31, 4  ;;  %v8581_v24 = vshll.u32 %v8490_v18, 16  ;;  %v8565_v25 = vrot.slane %v8564_v20, 4  ;;  %v8569_v51 = vrot.slane %v8567_v15, 5 }
 0x5d6   :  { %v8202_v57 = vsel %vm11876_vm2, %v8197_v0, %v8201_v19  ;;  %v8579_v23 = vrot.slane %v8578_v44, 4  ;;  %v8218_v10 = vshrl.u32 %v15935_v52, 16  ;;  %v8221_v12 = vshll.u32 %v15935_v52, 16  ;;  %v15959_v0 = vld [vmem:[#allocation2 + $0x50] sm:$0xf] }
 0x5d7   :  { %v8216_v30 = vsel %vm11876_vm2, %v8211_v26, %v8215_v47  ;;  %v8583_v8 = vrot.slane %v8581_v24, 5  ;;  %v8570_v60 = vsel %vm11876_vm2, %v8565_v25, %v8569_v51  ;;  %v8227_v16 = vshll.u32 %v15937_v4, 16  ;;  %v8492_v47 = vld [vmem:[#allocation2 + $0x44] sm:$0x1] }
 0x5d8   :  { %v10234_v42 = vcombine.low %v8202_v57, %v8216_v30  ;;  %v8232_v34 = vshrl.u32 %v15939_v37, 16  ;;  %v8220_v21 = vrot.slane %v8218_v10, 4  ;;  %v8223_v14 = vrot.slane %v8221_v12, 5  ;;  %v8480_v12 = vld [vmem:[#allocation2 + $0x68] sm:$0xf] }
 0x5d9   :  { %v8584_v59 = vsel %vm11876_vm2, %v8579_v23, %v8583_v8  ;;  %v8235_v45 = vshll.u32 %v15939_v37, 16  ;;  %v8591_v38 = vrot.slane %v8589_v62, 5  ;;  %v8241_v33 = vshll.u32 %v15945_v22, 16  ;;  %v15962_v62 = vld [vmem:[#allocation2 + $0x54] sm:$0x1] }
 0x5da   :  { %8793 = vrot.lane.b32.xlu1 %v10234_v42, %s11753_s15  ;;  %v10258_v11 = vcombine.low %v8570_v60, %v8584_v59  ;;  %v8234_v40 = vrot.slane %v8232_v34, 4  ;;  %v8224_v5 = vor.u32 %v8223_v14, %v8220_v21  ;;  %v8229_v58 = vrot.slane %v8227_v16, 5  ;;  %v8479_v34 = vld [vmem:[#allocation2 + $0x60] sm:$0xf] }
 0x5db   :  { %v8237_v3 = vrot.slane %v8235_v45, 5  ;;  %v8628_v27 = vshrl.u32 %v8478_v50, 16  ;;  %v8631_v29 = vshll.u32 %v8478_v50, 16  ;;  %v10252_v35 = vcombine.low %v8477_v46, %v8478_v50 }
 0x5dc   :  { %11272 = vmatprep.mubr.msk.bf16.mxu0 %vm5724_vm0, %v10258_v11  ;;  %v8614_v49 = vshrl.u32 %v8477_v46, 16  ;;  %v8617_v19 = vshll.u32 %v8477_v46, 16  ;;  %v8225_v56 = vrot.slane %v8224_v5, 4  ;;  %v8243_v31 = vrot.slane %v8241_v33, 5 }
 0x5dd   :  { %v8238_v18 = vor.u32 %v8237_v3, %v8234_v40  ;;  %v8630_v54 = vrot.slane %v8628_v27, 4  ;;  %8877 = vrot.lane.b32.xlu0 %v10252_v35, %s11753_s15  ;;  %v8592_v44 = vor.u32 %v8591_v38, %v8588_v48  ;;  %v8595_v26 = vshll.u32 %v8491_v41, 16  ;;  %v8493_v38 = vld [vmem:[#allocation2 + $0x54] sm:$0x1]  ;;  %v8481_v3 = vld [vmem:[#allocation2 + $0x70] sm:$0xf] }
 0x5de   :  { %v8616_v20 = vrot.slane %v8614_v49, 4  ;;  %v8619_v15 = vrot.slane %v8617_v19, 5  ;;  %v8230_v24 = vsel %vm11876_vm2, %v8225_v56, %v8229_v58  ;;  %v8606_v25 = vor.u32 %v15929_v9, %v15927_v39  ;;  %v8494_v58 = vld [vmem:[#allocation2 + $0x5c] sm:$0x1] }
 0x5df   :  { %v8239_v57 = vrot.slane %v8238_v18, 4  ;;  %v8609_v51 = vshll.u32 %v8492_v47, 16  ;;  %v8593_v23 = vrot.slane %v8592_v44, 4  ;;  %v8597_v30 = vrot.slane %v8595_v26, 5  ;;  %v8482_v18 = vld [vmem:[#allocation2 + $0x78] sm:$0xf] }
 0x5e0   :  { %v8260_v8 = vshrl.u32 %v15959_v0, 16  ;;  %v8263_v10 = vshll.u32 %v15959_v0, 16  ;;  %v8607_v42 = vrot.slane %v8606_v25, 4  ;;  %v8269_v16 = vshll.u32 %v15962_v62, 16 }
 0x5e1   :  { %v8244_v48 = vsel %vm11876_vm2, %v8239_v57, %v8243_v31  ;;  %v8611_v60 = vrot.slane %v8609_v51, 5  ;;  %v8633_v59 = vrot.slane %v8631_v29, 5  ;;  %v8598_v9 = vsel %vm11876_vm2, %v8593_v23, %v8597_v30  ;;  %v15986_v57 = vld [vmem:[#allocation2 + $0x58] sm:$0xf]  ;;  %v15990_v23 = vld [vmem:[#allocation2 + $0x5c] sm:$0x1] }
 0x5e2   :  { %v10235_v50 = vcombine.low %v8230_v24, %v8244_v48  ;;  %v8262_v21 = vrot.slane %v8260_v8, 4  ;;  %v8265_v39 = vrot.slane %v8263_v10, 5  ;;  %v8656_v45 = vshrl.u32 %v8480_v12, 16 }
 0x5e3   :  { %v8612_v14 = vsel %vm11876_vm2, %v8607_v42, %v8611_v60  ;;  %v8659_v46 = vshll.u32 %v8480_v12, 16  ;;  %v10253_v33 = vcombine.low %v8479_v34, %v8480_v12  ;;  %v8642_v5 = vshrl.u32 %v8479_v34, 16  ;;  %v15997_v12 = vld [vmem:[#allocation2 + $0x60] sm:$0xf] }
 0x5e4   :  { %8795 = vrot.lane.b32.xlu1 %v10235_v50, %s11753_s15  ;;  %v10259_v11 = vcombine.low %v8598_v9, %v8612_v14  ;;  %v8266_v40 = vor.u32 %v8265_v39, %v8262_v21  ;;  %v8271_v27 = vrot.slane %v8269_v16, 5  ;;  %v15978_v41 = vrot.slane %v8656_v45, 4  ;;  %v16011_v45 = vld [vmem:[#allocation2 + $0x88] sm:$0xf] }
 0x5e5   :  { %v8645_v29 = vshll.u32 %v8479_v34, 16  ;;  %v8620_v35 = vor.u32 %v8619_v15, %v8616_v20  ;;  %v15981_v19 = vrot.slane %v8659_v46, 5  ;;  %8879 = vrot.lane.b32.xlu0 %v10253_v33, %s11753_s15  ;;  %v8623_v47 = vshll.u32 %v8493_v38, 16  ;;  %v16001_v34 = vld [vmem:[#allocation2 + $0x64] sm:$0x1] }
 0x5e6   :  { %11273 = vmatmul.mubr.msk.bf16.gmra.mrb[204].mxu0 %vm5724_vm0, %v10259_v11  ;;  %v8267_v49 = vrot.slane %v8266_v40, 4  ;;  %v8634_v56 = vor.u32 %v8633_v59, %v8630_v54  ;;  %v15984_v31 = vrot.slane %v8642_v5, 4  ;;  %v8637_v26 = vshll.u32 %v8494_v58, 16  ;;  %v8483_v59 = vld [vmem:[#allocation2 + $0x80] sm:$0xf] }
 0x5e7   :  { %v8621_v44 = vrot.slane %v8620_v35, 4  ;;  %v8670_v24 = vshrl.u32 %v8481_v3, 16  ;;  %v8625_v15 = vrot.slane %v8623_v47, 5  ;;  %v8673_v51 = vshll.u32 %v8481_v3, 16 }
 0x5e8   :  { %v8272_v20 = vsel %vm11876_vm2, %v8267_v49, %v8271_v27  ;;  %v8635_v25 = vrot.slane %v8634_v56, 4  ;;  %v8647_v30 = vrot.slane %v8645_v29, 5  ;;  %v8639_v8 = vrot.slane %v8637_v26, 5  ;;  %v8495_v27 = vld [vmem:[#allocation2 + $0x64] sm:$0x1] }
 0x5e9   :  { %v10236_v54 = vcombine.low %v8258_v7, %v8272_v20  ;;  %v8684_v10 = vshrl.u32 %v8482_v18, 16  ;;  %v8626_v48 = vsel %vm11876_vm2, %v8621_v44, %v8625_v15  ;;  %v8672_v42 = vrot.slane %v8670_v24, 4  ;;  %v8496_v56 = vld [vmem:[#allocation2 + $0x6c] sm:$0x1] }
 0x5ea   :  { %v8687_v60 = vshll.u32 %v8482_v18, 16  ;;  %v10254_v16 = vcombine.low %v8481_v3, %v8482_v18  ;;  %v8640_v50 = vsel %vm11876_vm2, %v8635_v25, %v8639_v8  ;;  %v8675_v6 = vrot.slane %v8673_v51, 5 }
 0x5eb   :  { %8797 = vrot.lane.b32.xlu1 %v10236_v54, %s11753_s15  ;;  %v8274_v17 = vshrl.u32 %v15986_v57, 16  ;;  %v8277_v7 = vshll.u32 %v15986_v57, 16  ;;  %v10260_v21 = vcombine.low %v8626_v48, %v8640_v50  ;;  %v8686_v39 = vrot.slane %v8684_v10, 4  ;;  %v8497_v54 = vld [vmem:[#allocation2 + $0x74] sm:$0x1] }
 0x5ec   :  { %8881 = vrot.lane.b32.xlu0 %v10254_v16, %s11753_s15  ;;  %v8283_v9 = vshll.u32 %v15990_v23, 16  ;;  %v8288_v14 = vshrl.u32 %v15997_v12, 16  ;;  %v8291_v11 = vshll.u32 %v15997_v12, 16  ;;  %v8297_v40 = vshll.u32 %v16001_v34, 16  ;;  %v8498_v16 = vld [vmem:[#allocation2 + $0x7c] sm:$0x1] }
 0x5ed   :  { %v8276_v46 = vrot.slane %v8274_v17, 4  ;;  %v8279_v38 = vrot.slane %v8277_v7, 5  ;;  %11276 = vmatprep.mubr.msk.bf16.mxu0 %vm5724_vm0, %v10260_v21  ;;  %v8689_v33 = vrot.slane %v8687_v60, 5  ;;  %v8698_v58 = vshrl.u32 %v8483_v59, 16 }
 0x5ee   :  { %v8290_v5 = vrot.slane %v8288_v14, 4  ;;  %v8701_v3 = vshll.u32 %v8483_v59, 16  ;;  %v8285_v35 = vrot.slane %v8283_v9, 5  ;;  %v8293_v49 = vrot.slane %v8291_v11, 5  ;;  %v16031_v14 = vld [vmem:[#allocation2 + $0x68] sm:$0xf] }
 0x5ef   :  { %v8280_v29 = vor.u32 %v8279_v38, %v8276_v46  ;;  %v8712_v47 = vshrl.u32 %v16011_v45, 16  ;;  %v8299_v18 = vrot.slane %v8297_v40, 5  ;;  %v16017_v44 = vrot.slane %v8698_v58, 4  ;;  %v16037_v11 = vld [vmem:[#allocation2 + $0x6c] sm:$0x1] }
 0x5f0   :  { %v16019_v26 = vrot.slane %v8701_v3, 5  ;;  %v10255_v24 = vcombine.low %v8483_v59, %v16011_v45  ;;  %v8294_v15 = vor.u32 %v8293_v49, %v8290_v5  ;;  %v8715_v25 = vshll.u32 %v16011_v45, 16  ;;  %v16043_v58 = vld [vmem:[#allocation2 + $0x74] sm:$0x1] }
 0x5f1   :  { %v8281_v20 = vrot.slane %v8280_v29, 4  ;;  %v8648_v51 = vor.u32 %v8647_v30, %v15984_v31  ;;  %v16024_v8 = vrot.slane %v8712_v47, 4  ;;  %v8651_v10 = vshll.u32 %v8495_v27, 16 }
 0x5f2   :  { %8883 = vrot.lane.b32.xlu0 %v10255_v24, %s11753_s15  ;;  %v8662_v48 = vor.u32 %v15981_v19, %v15978_v41  ;;  %v8665_v60 = vshll.u32 %v8496_v56, 16  ;;  %v8295_v17 = vrot.slane %v8294_v15, 4  ;;  %v8676_v59 = vor.u32 %v8675_v6, %v8672_v42  ;;  %v16035_v19 = vld [vmem:[#allocation2 + $0x70] sm:$0xf] }
 0x5f3   :  { %v8286_v50 = vsel %vm11876_vm2, %v8281_v20, %v8285_v35  ;;  %v8649_v7 = vrot.slane %v8648_v51, 4  ;;  %v8653_v21 = vrot.slane %v8651_v10, 5  ;;  %v8679_v30 = vshll.u32 %v8497_v54, 16  ;;  %v16061_v54 = vld [vmem:[#allocation2 + $0x7c] sm:$0x1] }
 0x5f4   :  { %v8663_v9 = vrot.slane %v8662_v48, 4  ;;  %v8667_v31 = vrot.slane %v8665_v60, 5  ;;  %v8300_v45 = vsel %vm11876_vm2, %v8295_v17, %v8299_v18  ;;  %v8677_v46 = vrot.slane %v8676_v59, 4  ;;  %v16054_v18 = vld [vmem:[#allocation2 + $0x78] sm:$0xf] }
 0x5f5   :  { %v8690_v38 = vor.u32 %v8689_v33, %v8686_v39  ;;  %v8693_v41 = vshll.u32 %v8498_v16, 16  ;;  %v10237_v40 = vcombine.low %v8286_v50, %v8300_v45  ;;  %v8654_v42 = vsel %vm11876_vm2, %v8649_v7, %v8653_v21  ;;  %v16046_v33 = vld [vmem:[#allocation2 + $0x80] sm:$0xf]  ;;  %v16063_v7 = vld [vmem:[#allocation2 + $0x84] sm:$0x1] }
 0x5f6   :  { %v8668_v6 = vsel %vm11876_vm2, %v8663_v9, %v8667_v31  ;;  %v8681_v5 = vrot.slane %v8679_v30, 5  ;;  %v8302_v39 = vshrl.u32 %v16031_v14, 16  ;;  %v8305_v49 = vshll.u32 %v16031_v14, 16 }
 0x5f7   :  { %v10261_v3 = vcombine.low %v8654_v42, %v8668_v6  ;;  %v8691_v27 = vrot.slane %v8690_v38, 4  ;;  %v8695_v29 = vrot.slane %v8693_v41, 5  ;;  %8799 = vrot.lane.b32.xlu1 %v10237_v40, %s11753_s15  ;;  %v8311_v47 = vshll.u32 %v16037_v11, 16  ;;  %v8499_v40 = vld [vmem:[#allocation2 + $0x84] sm:$0x1] }
 0x5f8   :  { %v8682_v35 = vsel %vm11876_vm2, %v8677_v46, %v8681_v5  ;;  %v8316_v56 = vshrl.u32 %v16035_v19, 16  ;;  %v8304_v20 = vrot.slane %v8302_v39, 4  ;;  %v8319_v15 = vshll.u32 %v16035_v19, 16 }
 0x5f9   :  { %11277 = vmatmul.mubr.msk.bf16.gmra.mrb[208].mxu0 %vm5724_vm0, %v10261_v3  ;;  %v8696_v24 = vsel %vm11876_vm2, %v8691_v27, %v8695_v29  ;;  %v8325_v51 = vshll.u32 %v16043_v58, 16  ;;  %v8717_v10 = vrot.slane %v8715_v25, 5  ;;  %v8307_v60 = vrot.slane %v8305_v49, 5  ;;  %v8500_v27 = vld [vmem:[#allocation2 + $0x8c] sm:$0x1] }
 0x5fa   :  { %v10262_v48 = vcombine.low %v8682_v35, %v8696_v24  ;;  %v8318_v16 = vrot.slane %v8316_v56, 4  ;;  %v8313_v50 = vrot.slane %v8311_v47, 5  ;;  %v8321_v17 = vrot.slane %v8319_v15, 5 }
 0x5fb   :  { %v8330_v59 = vshrl.u32 %v16054_v18, 16  ;;  %v8333_v21 = vshll.u32 %v16054_v18, 16  ;;  %v8308_v9 = vor.u32 %v8307_v60, %v8304_v20  ;;  %v8339_v31 = vshll.u32 %v16061_v54, 16 }
 0x5fc   :  { %11280 = vmatprep.mubr.msk.bf16.mxu0 %vm5724_vm0, %v10262_v48  ;;  %v8344_v30 = vshrl.u32 %v16046_v33, 16  ;;  %v8347_v25 = vshll.u32 %v16046_v33, 16  ;;  %v8322_v45 = vor.u32 %v8321_v17, %v8318_v16  ;;  %v8327_v46 = vrot.slane %v8325_v51, 5 }
 0x5fd   :  { %v8332_v38 = vrot.slane %v8330_v59, 4  ;;  %v8335_v41 = vrot.slane %v8333_v21, 5  ;;  %v8309_v42 = vrot.slane %v8308_v9, 4  ;;  %v8353_v3 = vshll.u32 %v16063_v7, 16 }
 0x5fe   :  { %v8346_v6 = vrot.slane %v8344_v30, 4  ;;  %v8349_v5 = vrot.slane %v8347_v25, 5  ;;  %v8323_v29 = vrot.slane %v8322_v45, 4  ;;  %v8341_v35 = vrot.slane %v8339_v31, 5  ;;  %v8362_v30 = vld [vmem:[#allocation2 + $0x28] sm:$0xe] }
 0x5ff   :  { %v8336_v39 = vor.u32 %v8335_v41, %v8332_v38  ;;  %v8704_v49 = vor.u32 %v16019_v26, %v16017_v44  ;;  %v8314_v47 = vsel %vm11876_vm2, %v8309_v42, %v8313_v50  ;;  %v8707_v24 = vshll.u32 %v8499_v40, 16  ;;  %v8361_v50 = vld [vmem:[#allocation2 + $0x20] sm:$0xe]  ;;  %v8364_v40 = vld [vmem:[#allocation2 + $0x38] sm:$0xe] }
 0x600   :  { %v8350_v56 = vor.u32 %v8349_v5, %v8346_v6  ;;  %v8718_v20 = vor.u32 %v8717_v10, %v16024_v8  ;;  %v8328_v15 = vsel %vm11876_vm2, %v8323_v29, %v8327_v46  ;;  %v8721_v60 = vshll.u32 %v8500_v27, 16  ;;  %v8363_v46 = vld [vmem:[#allocation2 + $0x30] sm:$0xe] }
 0x601   :  { %v8337_v51 = vrot.slane %v8336_v39, 4  ;;  %v8705_v48 = vrot.slane %v8704_v49, 4  ;;  %v10238_v16 = vcombine.low %v8314_v47, %v8328_v15  ;;  %v8355_v44 = vrot.slane %v8353_v3, 5  ;;  %v8368_v47 = vld [vmem:[#allocation2 + $0x60] sm:$0xe] }
 0x602   :  { %v8351_v17 = vrot.slane %v8350_v56, 4  ;;  %v8719_v59 = vrot.slane %v8718_v20, 4  ;;  %v8709_v26 = vrot.slane %v8707_v24, 5  ;;  %v8723_v9 = vrot.slane %v8721_v60, 5  ;;  %v8369_v24 = vld [vmem:[#allocation2 + $0x68] sm:$0xe] }
 0x603   :  { %v8342_v21 = vsel %vm11876_vm2, %v8337_v51, %v8341_v35  ;;  %8801 = vrot.lane.b32.xlu1 %v10238_v16, %s11753_s15  ;;  %v10212_v38 = vrot.slane %v8361_v50, 9  ;;  %v8423_v41 = vrot.slane %v15895_v32, 5  ;;  %v10213_v42 = vrot.slane %v8362_v30, 9  ;;  %v8367_v35 = vld [vmem:[#allocation2 + $0x58] sm:$0xe] }
 0x604   :  { %v8356_v8 = vsel %vm11876_vm2, %v8351_v17, %v8355_v44  ;;  %v8710_v10 = vsel %vm11876_vm2, %v8705_v48, %v8709_v26  ;;  %v8724_v31 = vsel %vm11876_vm2, %v8719_v59, %v8723_v9  ;;  %v8427_v6 = vrot.slane %v15907_v61, 5  ;;  %v8370_v51 = vld [vmem:[#allocation2 + $0x70] sm:$0xe]  ;;  %v8371_v17 = vld [vmem:[#allocation2 + $0x78] sm:$0xe] }
 0x605   :  { %v10239_v25 = vcombine.low %v8342_v21, %v8356_v8  ;;  %v10263_v45 = vcombine.low %v8710_v10, %v8724_v31  ;;  %v10226_v5 = vcombine.low %v15893_v1, %v15897_v2  ;;  %v16096_v28 = vsel %vm12431_vm5, %v10212_v38, %v8423_v41  ;;  %v8372_v26 = vld [vmem:[#allocation2 + $0x80] sm:$0xe] }
 0x606   :  { %v10214_v3 = vrot.slane %v8363_v46, 9  ;;  %v8431_v27 = vrot.slane %v15937_v4, 5  ;;  %v16101_v32 = vsel %vm12431_vm5, %v10213_v42, %v8427_v6  ;;  %v10215_v29 = vrot.slane %v8364_v40, 9  ;;  %v8357_v41 = vld [vmem:[#allocation2] sm:$0xe] }
 0x607   :  { %8803 = vrot.lane.b32.xlu1 %v10239_v25, %s11753_s15  ;;  %11281 = vmatmul.mubr.msk.bf16.gmra.mrb[212].mxu0 %vm5724_vm0, %v10263_v45  ;;  %v8435_v39 = vrot.slane %v15945_v22, 5  ;;  %v10227_v61 = vcombine.low %v15935_v52, %v15939_v37  ;;  %v10242_v49 = vcombine.low %v16096_v28, %v16101_v32  ;;  %v10218_v20 = vrot.slane %v8367_v35, 9  ;;  %v8358_v40 = vld [vmem:[#allocation2 + $0x8] sm:$0xe]  ;;  %v11720_v6 = vld [vmem:[#allocation2 + $0x4] sm:$0x1] }
 0x608   :  { %v16110_v56 = vsel %vm12431_vm5, %v10214_v3, %v8431_v27  ;;  %v8447_v15 = vrot.slane %v15990_v23, 5  ;;  %v10219_v48 = vrot.slane %v8368_v47, 9  ;;  %v8451_v60 = vrot.slane %v16001_v34, 5  ;;  %v11723_v28 = vld [vmem:[#allocation2 + $0x4c] sm:$0x1] }
 0x609   :  { %v16114_v4 = vsel %vm12431_vm5, %v10215_v29, %v8435_v39  ;;  %v10229_v16 = vcombine.low %v15986_v57, %v15997_v12  ;;  %v10220_v21 = vrot.slane %v8369_v24, 9  ;;  %v8455_v44 = vrot.slane %v16037_v11, 5 }
 0x60a   :  { %v10243_v22 = vcombine.low %v16110_v56, %v16114_v4  ;;  %v16124_v59 = vsel %vm12431_vm5, %v10218_v20, %v8447_v15  ;;  %v16129_v9 = vsel %vm12431_vm5, %v10219_v48, %v8451_v60  ;;  %v10221_v23 = vrot.slane %v8370_v51, 9  ;;  %v8360_v15 = vld [vmem:[#allocation2 + $0x18] sm:$0xe]  ;;  %v8359_v51 = vld [vmem:[#allocation2 + $0x10] sm:$0xe] }
 0x60b   :  { %v8459_v50 = vrot.slane %v16043_v58, 5  ;;  %v10230_v34 = vcombine.low %v16031_v14, %v16035_v19  ;;  %v10245_v8 = vcombine.low %v16124_v59, %v16129_v9  ;;  %v16138_v10 = vsel %vm12431_vm5, %v10220_v21, %v8455_v44  ;;  %v11685_v14 = vld [vmem:[%s16331_s9] sm:$0xff]   ;;  %v11686_v19 = vld [vmem:[%s16331_s9 + $0x8] sm:$0xff]  }
 0x60c   :  { %v10222_v31 = vrot.slane %v8371_v17, 9  ;;  %v8463_v11 = vrot.slane %v16061_v54, 5  ;;  %v10223_v25 = vrot.slane %v8372_v26, 9  ;;  %v8467_v58 = vrot.slane %v16063_v7, 5  ;;  %11284 = vmatprep.subr.bf16.mxu0 %v11685_v14 }
 0x60d   :  { %v16143_v30 = vsel %vm12431_vm5, %v10221_v23, %v8459_v50  ;;  %v10231_v45 = vcombine.low %v16054_v18, %v16046_v33  ;;  %v10208_v7 = vrot.slane %v8357_v41, 9  ;;  %v8407_v3 = vrot.slane %v11720_v6, 5  ;;  %v11721_v50 = vld [vmem:[#allocation2] sm:$0xf]  ;;  %11285 = vmatpush3.bf16.msra.mxu0 %v11685_v14 }
 0x60e   :  { %v10246_v46 = vcombine.low %v16138_v10, %v16143_v30  ;;  %v16152_v38 = vsel %vm12431_vm5, %v10222_v31, %v8463_v11  ;;  %v16156_v54 = vsel %vm12431_vm5, %v10223_v25, %v8467_v58  ;;  %v10209_v27 = vrot.slane %v8358_v40, 9  ;;  %v11722_v31 = vld [vmem:[#allocation2 + $0x8] sm:$0xf]  ;;  %11286 = vmatprep.subr.bf16.mxu0 %v11686_v19  ;;  %v11688_v30 = vld [vmem:[%s16331_s9 + $0x18] sm:$0xff]  }
 0x60f   :  { %v10247_v42 = vcombine.low %v16152_v38, %v16156_v54  ;;  %v8411_v29 = vrot.slane %v15813_v36, 5  ;;  %v8408_v39 = vsel %vm12431_vm5, %v10208_v7, %v8407_v3  ;;  %v10211_v48 = vrot.slane %v8360_v15, 9 }
 0x610   :  { %v8419_v60 = vrot.slane %v15871_v13, 5  ;;  %v10210_v17 = vrot.slane %v8359_v51, 9  ;;  %v8415_v21 = vrot.slane %v15863_v43, 5  ;;  %v10224_v11 = vcombine.low %v11721_v50, %v11722_v31 }
 0x611   :  { %v8412_v35 = vsel %vm12431_vm5, %v10209_v27, %v8411_v29  ;;  %v10225_v43 = vcombine.low %v15853_v63, %v15861_v53  ;;  %v8365_v27 = vld [vmem:[#allocation2 + $0x48] sm:$0xe]  ;;  %v8366_v29 = vld [vmem:[#allocation2 + $0x50] sm:$0xe]  ;;  %v8439_v32 = vrot.slane %v11723_v28, 5  ;;  %11287 = vmatpush3.bf16.msra.mxu0 %v11686_v19 }
 0x612   :  { %v10240_v47 = vcombine.low %v8408_v39, %v8412_v35  ;;  %v8420_v36 = vsel %vm12431_vm5, %v10211_v48, %v8419_v60  ;;  %v8416_v26 = vsel %vm12431_vm5, %v10210_v17, %v8415_v21  ;;  %v10216_v63 = vrot.slane %v8365_v27, 9 }
 0x613   :  { %v10241_v23 = vcombine.low %v8416_v26, %v8420_v36 }
 0x61f   :  { %v8870_v24 = vpop.permute.xlu0 %8869 }
 0x620   :  { %v8943_v20 = vsel %vm5724_vm0, %v10240_v47, %v8870_v24  ;;  %v8443_v47 = vrot.slane %v15962_v62, 5  ;;  %v8440_v24 = vsel %vm12431_vm5, %v10216_v63, %v8439_v32 }
 0x621   :  { %9196 = vmatprep.mubr.bf16.mxu1 %v8943_v20 }
 0x628   :  { %v8872_v44 = vpop.permute.xlu0 %8871 }
 0x629   :  { %v8947_v58 = vsel %vm5724_vm0, %v10241_v23, %v8872_v44 }
 0x62e   :  { %v8790_v25 = vpop.permute.xlu1 %8789 }
 0x62f   :  { %v8911_v41 = vsel %vm5724_vm0, %v10224_v11, %v8790_v25  ;;  %v16256_v11 = vld [vmem:[%s16330_s8] ss:$0 sm:$0xff] }
 0x630   :  { %9197 = vmatmul.mubr.bf16.vlgmr.msra.gmra.mrb[200].mxu1 %v8911_v41 }
 0x631   :  { %9204 = vmatprep.mubr.bf16.mxu1 %v8947_v58 }
 0x63a   :  { %v8874_v13 = vpop.permute.xlu0 %8873 }
 0x63b   :  { %v8951_v7 = vsel %vm5724_vm0, %v10242_v49, %v8874_v13  ;;  %v10217_v49 = vrot.slane %v8366_v29, 9 }
 0x63d   :  { %v8444_v56 = vsel %vm12431_vm5, %v10217_v49, %v8443_v47 }
 0x640   :  { %v8792_v40 = vpop.permute.xlu1 %8791 }
 0x641   :  { %v8915_v6 = vsel %vm5724_vm0, %v10225_v43, %v8792_v40 }
 0x642   :  { %9205 = vmatmul.mubr.bf16.gmra.mrb[204].mxu1 %v8915_v6 }
 0x643   :  { %9212 = vmatprep.mubr.bf16.mxu1 %v8951_v7  ;;  %v8876_v3 = vpop.permute.xlu0 %8875 }
 0x644   :  { %v8955_v35 = vsel %vm5724_vm0, %v10243_v22, %v8876_v3  ;;  %v10244_v22 = vcombine.low %v8440_v24, %v8444_v56 }
 0x64c   :  { %v8794_v39 = vpop.permute.xlu1 %8793 }
 0x64d   :  { %v8919_v53 = vsel %vm5724_vm0, %v10226_v5, %v8794_v39  ;;  %v11724_v5 = vld [vmem:[#allocation2 + $0x48] sm:$0xf] }
 0x64e   :  { %9213 = vmatmul.mubr.bf16.gmra.mrb[208].mxu1 %v8919_v53  ;;  %v10228_v15 = vcombine.low %v11724_v5, %v15959_v0 }
 0x64f   :  { %9220 = vmatprep.mubr.bf16.mxu1 %v8955_v35  ;;  %v8878_v4 = vpop.permute.xlu0 %8877 }
 0x650   :  { %v8959_v1 = vsel %vm5724_vm0, %v10244_v22, %v8878_v4 }
 0x656   :  { %v8796_v20 = vpop.permute.xlu1 %8795 }
 0x657   :  { %v8923_v2 = vsel %vm5724_vm0, %v10227_v61, %v8796_v20  ;;  %v8880_v62 = vpop.permute.xlu0 %8879 }
 0x658   :  { %9221 = vmatmul.mubr.bf16.gmra.mrb[212].mxu1 %v8923_v2  ;;  %v8963_v48 = vsel %vm5724_vm0, %v10245_v8, %v8880_v62 }
 0x659   :  { %9228 = vmatprep.mubr.bf16.mxu1 %v8959_v1 }
 0x65d   :  { %v8798_v51 = vpop.permute.xlu1 %8797 }
 0x65e   :  { %v8927_v55 = vsel %vm5724_vm0, %v10228_v15, %v8798_v51  ;;  %v8882_v60 = vpop.permute.xlu0 %8881 }
 0x65f   :  { %v8967_v0 = vsel %vm5724_vm0, %v10246_v46, %v8882_v60 }
 0x660   :  { %9229 = vmatmul.mubr.bf16.gmra.mrb[216].mxu1 %v8927_v55 }
 0x661   :  { %9236 = vmatprep.mubr.bf16.mxu1 %v8963_v48 }
 0x664   :  { %v8884_v61 = vpop.permute.xlu0 %8883 }
 0x665   :  { %v8971_v57 = vsel %vm5724_vm0, %v10247_v42, %v8884_v61 }
 0x669   :  { %v8800_v52 = vpop.permute.xlu1 %8799 }
 0x66a   :  { %v8931_v37 = vsel %vm5724_vm0, %v10229_v16, %v8800_v52 }
 0x66b   :  { %9237 = vmatmul.mubr.bf16.gmra.mrb[220].mxu1 %v8931_v37 }
 0x66c   :  { %9244 = vmatprep.mubr.bf16.mxu1 %v8967_v0 }
 0x675   :  { %v8802_v59 = vpop.permute.xlu1 %8801 }
 0x676   :  { %v8935_v9 = vsel %vm5724_vm0, %v10230_v34, %v8802_v59  ;;  %v11687_v34 = vld [vmem:[%s16331_s9 + $0x10] sm:$0xff]  }
 0x677   :  { %9245 = vmatmul.mubr.bf16.gmra.mrb[224].mxu1 %v8935_v9  ;;  %11288 = vmatprep.subr.bf16.mxu0 %v11687_v34 }
 0x678   :  { %9252 = vmatprep.mubr.bf16.mxu1 %v8971_v57  ;;  %11289 = vmatpush3.bf16.msra.mxu0 %v11687_v34 }
 0x679   :  { %v8804_v12 = vpop.permute.xlu1 %8803  ;;  %11290 = vmatprep.subr.bf16.mxu0 %v11688_v30 }
 0x67a   :  { %v8939_v16 = vsel %vm5724_vm0, %v10231_v45, %v8804_v12 }
 0x67c   :  { %11291 = vmatpush3.bf16.msra.mxu0 %v11688_v30 }
 0x67f   :  { %9253 = vmatmul.mubr.bf16.gmra.mrb[228].mxu1 %v8939_v16 }
 0x6a4   :  { %v11270_v33 = vpop.f32.mrb[200].mxu0 }
 0x6a5   :  { %v9295_v18 = vpop.f32.mrb[201].mxu0 }
 0x6a6   :  { %v11271_v8 = vpop.f32.mrb[202].mxu0 }
 0x6a7   :  { %v9298_v10 = vpop.f32.mrb[203].mxu0 }
 0x6b9   :  { %v11274_v45 = vpop.f32.mrb[204].mxu0 }
 0x6ba   :  { %v9311_v46 = vpop.f32.mrb[205].mxu0 }
 0x6bb   :  { %v11275_v38 = vpop.f32.mrb[206].mxu0 }
 0x6bc   :  { %v9314_v54 = vpop.f32.mrb[207].mxu0 }
 0x6cc   :  { %v16237_v42 = vpop.f32.mrb[208].mxu0 }
 0x6cd   :  { %v16239_v17 = vpop.f32.mrb[209].mxu0 }
 0x6ce   :  { %v16241_v21 = vpop.f32.mrb[210].mxu0 }
 0x6cf   :  { %v16243_v36 = vpop.f32.mrb[211].mxu0 }
 0x6da   :  { %v16245_v44 = vpop.f32.mrb[212].mxu0 }
 0x6db   :  { %v16247_v26 = vpop.f32.mrb[213].mxu0 }
 0x6dc   :  { %v16249_v23 = vpop.f32.mrb[214].mxu0 }
 0x6dd   :  { %v16251_v50 = vpop.f32.mrb[215].mxu0 }
 0x703   :  { %v11112_v31 = vpop.f32.mrb[200].mxu1 }
 0x704   :  { %v11113_v25 = vpop.f32.mrb[201].mxu1 }
 0x705   :  { %v11114_v58 = vadd.f32 %v11113_v25, %v11112_v31  ;;  %v11115_v41 = vpop.f32.mrb[202].mxu1 }
 0x706   :  { %v11116_v13 = vpop.f32.mrb[203].mxu1 }
 0x707   :  { %v9199_v43 = vadd.f32 %v11114_v58, %v16256_v11  ;;  %v11117_v40 = vadd.f32 %v11116_v13, %v11115_v41 }
 0x709   :  { %v9296_v7 = vadd.f32 %v9295_v18, %v9199_v43  ;;  %v9202_v6 = vadd.f32 %v11117_v40, %v16256_v11 }
 0x70b   :  { %v9299_v3 = vadd.f32 %v9298_v10, %v9202_v6  ;;  %v9358_v27 = vmax.f32 %v9296_v7, 0.0 }
 0x70d   :  { %v9359_v29 = vmax.f32 %v9299_v3, 0.0 }
 0x70f   :  { %v9374_v39 = vpack.c.bf16 %v9359_v29, %v9358_v27 }
 0x711   :  { %11292 = vmatprep.mubr.msk.bf16.mxu0 %vm5724_vm0, %v9374_v39 }
 0x715   :  { %v11118_v35 = vpop.f32.mrb[204].mxu1 }
 0x716   :  { %v11119_v63 = vpop.f32.mrb[205].mxu1 }
 0x717   :  { %v11120_v53 = vadd.f32 %v11119_v63, %v11118_v35  ;;  %v11121_v28 = vpop.f32.mrb[206].mxu1 }
 0x718   :  { %v11122_v32 = vpop.f32.mrb[207].mxu1 }
 0x719   :  { %v9207_v49 = vadd.f32 %v11120_v53, %v16256_v11  ;;  %v11123_v47 = vadd.f32 %v11122_v32, %v11121_v28 }
 0x71b   :  { %v9304_v24 = vadd.f32 %v11270_v33, %v9207_v49  ;;  %v9210_v56 = vadd.f32 %v11123_v47, %v16256_v11 }
 0x71d   :  { %v9307_v4 = vadd.f32 %v11271_v8, %v9210_v56  ;;  %v9360_v22 = vmax.f32 %v9304_v24, 0.0 }
 0x71f   :  { %v9361_v20 = vmax.f32 %v9307_v4, 0.0 }
 0x721   :  { %v9375_v1 = vpack.c.bf16 %v9361_v20, %v9360_v22  ;;  %v11124_v2 = vpop.f32.mrb[208].mxu1 }
 0x722   :  { %v11125_v62 = vpop.f32.mrb[209].mxu1 }
 0x723   :  { %v11126_v5 = vadd.f32 %v11125_v62, %v11124_v2  ;;  %v11127_v15 = vpop.f32.mrb[210].mxu1  ;;  %11293 = vmatmul.mubr.msk.bf16.vlgmr.msra.gmra.mrb[216].mxu0 %vm5724_vm0, %v9375_v1 }
 0x724   :  { %v11128_v51 = vpop.f32.mrb[211].mxu1 }
 0x725   :  { %v9215_v55 = vadd.f32 %v11126_v5, %v16256_v11  ;;  %v11129_v48 = vadd.f32 %v11128_v51, %v11127_v15 }
 0x727   :  { %v9312_v60 = vadd.f32 %v9311_v46, %v9215_v55  ;;  %v9218_v52 = vadd.f32 %v11129_v48, %v16256_v11 }
 0x729   :  { %v9315_v37 = vadd.f32 %v9314_v54, %v9218_v52  ;;  %v9362_v0 = vmax.f32 %v9312_v60, 0.0 }
 0x72b   :  { %v9363_v61 = vmax.f32 %v9315_v37, 0.0  ;;  %v11130_v59 = vpop.f32.mrb[212].mxu1 }
 0x72c   :  { %v11131_v9 = vpop.f32.mrb[213].mxu1 }
 0x72d   :  { %v9376_v57 = vpack.c.bf16 %v9363_v61, %v9362_v0  ;;  %v11132_v12 = vadd.f32 %v11131_v9, %v11130_v59  ;;  %v11133_v16 = vpop.f32.mrb[214].mxu1 }
 0x72e   :  { %v11134_v14 = vpop.f32.mrb[215].mxu1 }
 0x72f   :  { %v9223_v19 = vadd.f32 %v11132_v12, %v16256_v11  ;;  %v11135_v34 = vadd.f32 %v11134_v14, %v11133_v16  ;;  %11296 = vmatprep.mubr.msk.bf16.mxu0 %vm5724_vm0, %v9376_v57  ;;  %v10293_v14 = vld [vmem:[%s16332_s10] ss:$0 sm:$0xff]  ;;  %s11754_s10 = smov [#allocation3]  }
 0x730   :  { %s9564_s24 = sshll.u32 %s11754_s10, 4  ;;  %s9565_s24 = int_to_ptr.vmem [resolvable:$true] %s9564_s24 }
 0x731   :  { %v9320_v33 = vadd.f32 %v11274_v45, %v9223_v19  ;;  %v9226_v18 = vadd.f32 %v11135_v34, %v16256_v11  ;;  %s11725_s3 = scalar_lea.vmem %s9565_s24, 2048  ;;  %p11730_p1 = scmp.lt.s32.totalorder %s9565_s24, %s9565_s24 }
 0x732   :  { %p11726_p0 = scmp.ne.s32.totalorder %s9565_s24, %s11725_s3  ;;  %p11731_p2 = scmp.lt.s32.totalorder %s11725_s3, %s11725_s3 }
 0x733   :  { %v9323_v8 = vadd.f32 %v11275_v38, %v9226_v18  ;;  %v11136_v10 = vpop.f32.mrb[216].mxu1  ;;  %v9364_v46 = vmax.f32 %v9320_v33, 0.0 }
 0x734   :  { %v11137_v30 = vpop.f32.mrb[217].mxu1  ;;  %p11732_p3 = por %p11731_p2, %p11730_p1 }
 0x735   :  { %v9365_v54 = vmax.f32 %v9323_v8, 0.0  ;;  %v11138_v31 = vadd.f32 %v11137_v30, %v11136_v10  ;;  %v11139_v25 = vpop.f32.mrb[218].mxu1 }
 0x736   :  { %v11140_v58 = vpop.f32.mrb[219].mxu1  ;;  %p11733_p4 = pnand %p11732_p3, %p11726_p0 }
 0x737   :  { %v9377_v41 = vpack.c.bf16 %v9365_v54, %v9364_v46  ;;  %v9231_v13 = vadd.f32 %v11138_v31, %v16256_v11  ;;  %v11141_v43 = vadd.f32 %v11140_v58, %v11139_v25 }
 0x739   :  { %v9328_v40 = vadd.f32 %v16239_v17, %v9231_v13  ;;  %v9234_v7 = vadd.f32 %v11141_v43, %v16256_v11  ;;  %11297 = vmatmul.mubr.msk.bf16.gmra.mrb[220].mxu0 %vm5724_vm0, %v9377_v41 }
 0x73b   :  { %v9331_v45 = vadd.f32 %v16243_v36, %v9234_v7  ;;  %v9366_v38 = vmax.f32 %v9328_v40, 0.0 }
 0x73d   :  { %v9367_v6 = vmax.f32 %v9331_v45, 0.0 }
 0x73e   :  { %v11142_v27 = vpop.f32.mrb[220].mxu1 }
 0x73f   :  { %v9378_v3 = vpack.c.bf16 %v9367_v6, %v9366_v38  ;;  %v11143_v29 = vpop.f32.mrb[221].mxu1 }
 0x740   :  { %v11144_v39 = vadd.f32 %v11143_v29, %v11142_v27  ;;  %v11145_v35 = vpop.f32.mrb[222].mxu1 }
 0x741   :  { %11300 = vmatprep.mubr.msk.bf16.mxu0 %vm5724_vm0, %v9378_v3  ;;  %v11146_v63 = vpop.f32.mrb[223].mxu1 }
 0x742   :  { %v9239_v53 = vadd.f32 %v11144_v39, %v16256_v11  ;;  %v11147_v28 = vadd.f32 %v11146_v63, %v11145_v35 }
 0x744   :  { %v9336_v17 = vadd.f32 %v16237_v42, %v9239_v53  ;;  %v9242_v32 = vadd.f32 %v11147_v28, %v16256_v11 }
 0x746   :  { %v9339_v49 = vadd.f32 %v16241_v21, %v9242_v32  ;;  %v9368_v36 = vmax.f32 %v9336_v17, 0.0 }
 0x748   :  { %v9369_v47 = vmax.f32 %v9339_v49, 0.0 }
 0x74a   :  { %v9379_v24 = vpack.c.bf16 %v9369_v47, %v9368_v36  ;;  %v11148_v56 = vpop.f32.mrb[224].mxu1 }
 0x74b   :  { %v11149_v4 = vpop.f32.mrb[225].mxu1 }
 0x74c   :  { %v11150_v22 = vadd.f32 %v11149_v4, %v11148_v56  ;;  %v11151_v20 = vpop.f32.mrb[226].mxu1  ;;  %11301 = vmatmul.mubr.msk.bf16.gmra.mrb[224].mxu0 %vm5724_vm0, %v9379_v24 }
 0x74d   :  { %v11152_v1 = vpop.f32.mrb[227].mxu1 }
 0x74e   :  { %v9247_v2 = vadd.f32 %v11150_v22, %v16256_v11  ;;  %v11153_v62 = vadd.f32 %v11152_v1, %v11151_v20 }
 0x750   :  { %v9344_v5 = vadd.f32 %v16247_v26, %v9247_v2  ;;  %v9250_v42 = vadd.f32 %v11153_v62, %v16256_v11 }
 0x752   :  { %v9347_v15 = vadd.f32 %v16251_v50, %v9250_v42  ;;  %v11154_v21 = vpop.f32.mrb[228].mxu1  ;;  %v9370_v55 = vmax.f32 %v9344_v5, 0.0 }
 0x753   :  { %v11155_v51 = vpop.f32.mrb[229].mxu1 }
 0x754   :  { %v9371_v48 = vmax.f32 %v9347_v15, 0.0  ;;  %v11156_v60 = vadd.f32 %v11155_v51, %v11154_v21  ;;  %v11157_v52 = vpop.f32.mrb[230].mxu1 }
 0x755   :  { %v11158_v37 = vpop.f32.mrb[231].mxu1 }
 0x756   :  { %v9380_v0 = vpack.c.bf16 %v9371_v48, %v9370_v55  ;;  %v9255_v61 = vadd.f32 %v11156_v60, %v16256_v11  ;;  %v11159_v59 = vadd.f32 %v11158_v37, %v11157_v52 }
 0x758   :  { %v9352_v9 = vadd.f32 %v16245_v44, %v9255_v61  ;;  %v9258_v57 = vadd.f32 %v11159_v59, %v16256_v11  ;;  %11304 = vmatprep.mubr.msk.bf16.mxu0 %vm5724_vm0, %v9380_v0 }
 0x75a   :  { %v9355_v26 = vadd.f32 %v16249_v23, %v9258_v57  ;;  %v9372_v50 = vmax.f32 %v9352_v9, 0.0 }
 0x75c   :  { %v9373_v12 = vmax.f32 %v9355_v26, 0.0 }
 0x75e   :  { %v9381_v16 = vpack.c.bf16 %v9373_v12, %v9372_v50 }
 0x760   :  { %11305 = vmatmul.mubr.msk.bf16.gmra.mrb[228].mxu0 %vm5724_vm0, %v9381_v16 }
 0x7f6   :  { %v11294_v19 = vpop.f32.mrb[216].mxu0 }
 0x7f7   :  { %v9488_v34 = vadd.f32 %v11294_v19, %v10293_v14  ;;  %v9479_v33 = vpop.f32.mrb[217].mxu0 }
 0x7f8   :  { %v9480_v44 = vadd.f32 %v10293_v14, %v9479_v33  ;;  %v11295_v18 = vpop.f32.mrb[218].mxu0 }
 0x7f9   :  { %9545 = vst.msk [vmem:[#allocation3 + $0x10] sm:$0xff] %vm9542_vm1, %v9488_v34  ;;  %v9491_v11 = vadd.f32 %v11295_v18, %v10293_v14  ;;  %v9482_v8 = vpop.f32.mrb[219].mxu0 }
 0x7fa   :  { %9543 = vst.msk [vmem:[#allocation3] sm:$0xff] %vm9542_vm1, %v9480_v44  ;;  %v9483_v23 = vadd.f32 %v10293_v14, %v9482_v8 }
 0x7fb   :  { %9546 = vst.msk [vmem:[#allocation3 + $0x18] sm:$0xff] %vm9542_vm1, %v9491_v11 }
 0x7fc   :  { %9544 = vst.msk [vmem:[#allocation3 + $0x8] sm:$0xff] %vm9542_vm1, %v9483_v23 }
 0x80c   :  { %v11298_v10 = vpop.f32.mrb[220].mxu0 }
 0x80d   :  { %v9504_v30 = vadd.f32 %v11298_v10, %v10293_v14  ;;  %v9495_v46 = vpop.f32.mrb[221].mxu0 }
 0x80e   :  { %v9496_v54 = vadd.f32 %v10293_v14, %v9495_v46  ;;  %v11299_v31 = vpop.f32.mrb[222].mxu0 }
 0x80f   :  { %9549 = vst.msk [vmem:[#allocation3 + $0x30] sm:$0xff] %vm9542_vm1, %v9504_v30  ;;  %v9507_v25 = vadd.f32 %v11299_v31, %v10293_v14  ;;  %v9498_v58 = vpop.f32.mrb[223].mxu0 }
 0x810   :  { %9547 = vst.msk [vmem:[#allocation3 + $0x20] sm:$0xff] %vm9542_vm1, %v9496_v54  ;;  %v9499_v41 = vadd.f32 %v10293_v14, %v9498_v58 }
 0x811   :  { %9550 = vst.msk [vmem:[#allocation3 + $0x38] sm:$0xff] %vm9542_vm1, %v9507_v25 }
 0x812   :  { %9548 = vst.msk [vmem:[#allocation3 + $0x28] sm:$0xff] %vm9542_vm1, %v9499_v41 }
 0x81f   :  { %v11302_v13 = vpop.f32.mrb[224].mxu0 }
 0x820   :  { %v9520_v43 = vadd.f32 %v11302_v13, %v10293_v14  ;;  %v9511_v40 = vpop.f32.mrb[225].mxu0 }
 0x821   :  { %v9512_v7 = vadd.f32 %v10293_v14, %v9511_v40  ;;  %v11303_v45 = vpop.f32.mrb[226].mxu0 }
 0x822   :  { %9553 = vst.msk [vmem:[#allocation3 + $0x50] sm:$0xff] %vm9542_vm1, %v9520_v43  ;;  %v9523_v38 = vadd.f32 %v11303_v45, %v10293_v14  ;;  %v9514_v6 = vpop.f32.mrb[227].mxu0 }
 0x823   :  { %9551 = vst.msk [vmem:[#allocation3 + $0x40] sm:$0xff] %vm9542_vm1, %v9512_v7  ;;  %v9515_v3 = vadd.f32 %v10293_v14, %v9514_v6 }
 0x824   :  { %9554 = vst.msk [vmem:[#allocation3 + $0x58] sm:$0xff] %vm9542_vm1, %v9523_v38 }
 0x825   :  { %9552 = vst.msk [vmem:[#allocation3 + $0x48] sm:$0xff] %vm9542_vm1, %v9515_v3 }
 0x833   :  { %v11306_v27 = vpop.f32.mrb[228].mxu0 }
 0x834   :  { %v9536_v29 = vadd.f32 %v11306_v27, %v10293_v14  ;;  %v9527_v39 = vpop.f32.mrb[229].mxu0 }
 0x835   :  { %v9528_v35 = vadd.f32 %v10293_v14, %v9527_v39  ;;  %v11307_v63 = vpop.f32.mrb[230].mxu0 }
 0x836   :  { %9557 = vst.msk [vmem:[#allocation3 + $0x70] sm:$0xff] %vm9542_vm1, %v9536_v29  ;;  %v9539_v53 = vadd.f32 %v11307_v63, %v10293_v14  ;;  %v9530_v28 = vpop.f32.mrb[231].mxu0 }
 0x837   :  { %9555 = vst.msk [vmem:[#allocation3 + $0x60] sm:$0xff] %vm9542_vm1, %v9528_v35  ;;  %v9531_v17 = vadd.f32 %v10293_v14, %v9530_v28 }
 0x838   :  { %9558 = vst.msk [vmem:[#allocation3 + $0x78] sm:$0xff] %vm9542_vm1, %v9539_v53 }
 0x839   :  { %9556 = vst.msk [vmem:[#allocation3 + $0x68] sm:$0xff] %vm9542_vm1, %v9531_v17 }
 0x83a   :  { %11736 = shalt.err (!%p11733_p4)
}
 0x83b   :  { %s11737_s1 = scalar_lea.hbm %s16333_s11, 2048 }
 0x83c   :  { %p11738_p5 = scmp.ne.s32.totalorder %s16333_s11, %s11737_s1  ;;  %p11741_p6 = scmp.lt.u32.totalorder %s11737_s1, %s16333_s11 }
 0x83e   :  { %p11743_p7 = pnand %p11741_p6, %p11738_p5 }
 0x840   :  { %11746 = shalt.err (!%p11743_p7)
}
 0x841   :  { %s11755_s27 = smov 128  }
 0x842   :  { %9570 = dma.vmem_to_hbm [thread:$0]  %s9565_s24, 2048, %s16333_s11, [#allocation4], %s11755_s27, %s11755_s27, %s11751_s20  }
 0x843   :  { %11747 = dma.done.wait [#allocation4], 2048  }
 0x844   :  { %11748 = vsyncadd [#allocation4], 4294965248 }
 0x845   :  { %9574 = vsyncpa [#allocation4], 1 }

</bundles_post_ra>
